<compile_context>
chip_gen: v5e
topology: v5e:2x2
jax: 0.10.0
libtpu: 0.0.40
codegen_flags: <defaults>
</compile_context>

<pallas_src>
import functools

import jax
import jax.numpy as jnp
from jax import lax
from jax.experimental import pallas as pl
from jax.experimental.pallas import tpu as pltpu

EPS_BN = 1e-5
LANE = 128                            # channel (lane) padding granularity
TM_MAX = 256                          # cap on the row tile
VMEM_BUDGET = 24 * 1024 * 1024        # per-call streaming budget (safe on v7x 64 MiB/TC)
FUSED_CONV_X_BYTES = 8 * 1024 * 1024  # max whole-activation residency for fused KxK


def _round_up(x, m):
    return (x + m - 1) // m * m


# ----------------------------------------------------------------------------
# Tile / VMEM budgeting
# ----------------------------------------------------------------------------

def _pick_tiles(M, N):
    """Adaptive (tm, tn, Mp): no M over-padding; >=2 parallel blocks when possible."""
    tm = min(TM_MAX, _round_up(M, 8))
    tn = 256 if N % 256 == 0 else 128      # MXU-native 256 on v6e/v7x; 128 native on v5e
    # v7x has 2 TensorCores: make sure at least one "parallel" axis has >=2 blocks.
    if (_round_up(M, tm) // tm) * (N // tn) == 1:
        if tm % 16 == 0:
            tm //= 2
        elif tn == 256:
            tn = 128
    Mp = _round_up(M, tm)
    return tm, tn, Mp


def _pick_tk(K, tm, tn, add_res):
    """Largest tk (multiple of 128, dividing K) whose streaming buffers fit the budget."""
    fixed = (2 * tm * tn * 2 * (2 if add_res else 1)   # out (+residual), double-buffered
             + tm * tn * 4                             # f32 accumulator
             + 2 * 2 * tn * 4)                         # scale/shift
    avail = max(VMEM_BUDGET - fixed, 1 << 20)
    cap = max((avail // (4 * (tm + tn))) // 128 * 128, 128)   # 2 bufs, bf16 x & w
    if K <= cap:
        return K
    best, t = 128, 256
    while t <= cap:
        if K % t == 0:
            best = t
        t += 128
    return best


def _mm_vmem_limit(tm, tn, tk, add_res):
    est = (2 * (tm * tk * 2 + tk * tn * 2 + 2 * tn * 4 + tm * tn * 2)
           + (2 * tm * tn * 2 if add_res else 0)
           + tm * tn * 4)
    return int(min(max(3 * est // 2 + (2 << 20), 4 << 20), 48 << 20))


# ----------------------------------------------------------------------------
# Pallas kernels
# ----------------------------------------------------------------------------

def _mm_bn_single_kernel(*refs, relu, add_res):
    # Single K step: dot -> folded BN -> (+residual) -> (ReLU) -> store; no accumulator.
    if add_res:
        x_ref, w_ref, s_ref, b_ref, r_ref, o_ref = refs
    else:
        x_ref, w_ref, s_ref, b_ref, o_ref = refs
        r_ref = None
    y = jnp.dot(x_ref[...], w_ref[...], preferred_element_type=jnp.float32)
    y = y * s_ref[...] + b_ref[...]
    if add_res:
        y = y + r_ref[...].astype(jnp.float32)
    if relu:
        y = jnp.maximum(y, 0.0)
    o_ref[...] = y.astype(o_ref.dtype)


def _mm_bn_multi_kernel(*refs, relu, add_res):
    # K-tiled: overwrite the f32 acc on k==0 (no zero-init store), += on k>0,
    # fused BN/residual/ReLU epilogue on the last K step.
    if add_res:
        x_ref, w_ref, s_ref, b_ref, r_ref, o_ref, acc_ref = refs
    else:
        x_ref, w_ref, s_ref, b_ref, o_ref, acc_ref = refs
        r_ref = None
    k = pl.program_id(2)
    prod = jnp.dot(x_ref[...], w_ref[...], preferred_element_type=jnp.float32)

    @pl.when(k == 0)
    def _first():
        acc_ref[...] = prod

    @pl.when(k > 0)
    def _rest():
        acc_ref[...] += prod

    @pl.when(k == pl.num_programs(2) - 1)
    def _epilogue():
        y = acc_ref[...] * s_ref[...] + b_ref[...]
        if add_res:
            y = y + r_ref[...].astype(jnp.float32)
        if relu:
            y = jnp.maximum(y, 0.0)
        o_ref[...] = y.astype(o_ref.dtype)


def matmul_bn_act(x2d, w2d, scale, shift, *, relu, residual=None,
                  out_dtype=jnp.bfloat16):
    """(M,K) @ (K,N) + per-channel scale/shift (+ residual) (+ ReLU), fused."""
    M, K = x2d.shape
    Kw, N = w2d.shape
    assert K == Kw and K % 128 == 0 and N % 128 == 0, (K, Kw, N)
    add_res = residual is not None
    tm, tn, Mp = _pick_tiles(M, N)
    tk = _pick_tk(K, tm, tn, add_res)
    kt = K // tk

    x2d = x2d.astype(jnp.bfloat16)
    if Mp != M:
        x2d = jnp.pad(x2d, ((0, Mp - M), (0, 0)))
    operands = [x2d, w2d.astype(jnp.bfloat16),
                scale.reshape(1, N), shift.reshape(1, N)]
    if add_res:
        r = residual.astype(jnp.bfloat16)
        if Mp != M:
            r = jnp.pad(r, ((0, Mp - M), (0, 0)))
        operands.append(r)

    cp = pltpu.CompilerParams(
        dimension_semantics=(("parallel", "parallel") if kt == 1
                             else ("parallel", "parallel", "arbitrary")),
        vmem_limit_bytes=_mm_vmem_limit(tm, tn, tk, add_res))

    if kt == 1:
        in_specs = [pl.BlockSpec((tm, K), lambda i, j: (i, 0)),
                    pl.BlockSpec((K, tn), lambda i, j: (0, j)),
                    pl.BlockSpec((1, tn), lambda i, j: (0, j)),
                    pl.BlockSpec((1, tn), lambda i, j: (0, j))]
        if add_res:
            in_specs.append(pl.BlockSpec((tm, tn), lambda i, j: (i, j)))
        out = pl.pallas_call(
            functools.partial(_mm_bn_single_kernel, relu=relu, add_res=add_res),
            out_shape=jax.ShapeDtypeStruct((Mp, N), out_dtype),
            grid=(Mp // tm, N // tn),
            in_specs=in_specs,
            out_specs=pl.BlockSpec((tm, tn), lambda i, j: (i, j)),
            compiler_params=cp,
        )(*operands)
    else:
        in_specs = [pl.BlockSpec((tm, tk), lambda i, j, k: (i, k)),
                    pl.BlockSpec((tk, tn), lambda i, j, k: (k, j)),
                    pl.BlockSpec((1, tn), lambda i, j, k: (0, j)),
                    pl.BlockSpec((1, tn), lambda i, j, k: (0, j))]
        if add_res:
            in_specs.append(pl.BlockSpec((tm, tn), lambda i, j, k: (i, j)))
        out = pl.pallas_call(
            functools.partial(_mm_bn_multi_kernel, relu=relu, add_res=add_res),
            out_shape=jax.ShapeDtypeStruct((Mp, N), out_dtype),
            grid=(Mp // tm, N // tn, kt),
            in_specs=in_specs,
            out_specs=pl.BlockSpec((tm, tn), lambda i, j, k: (i, j)),
            scratch_shapes=[pltpu.VMEM((tm, tn), jnp.float32)],
            compiler_params=cp,
        )(*operands)
    return out if Mp == M else out[:M]


def _conv_taps_kernel(x_ref, w_ref, s_ref, b_ref, o_ref, acc_ref, *,
                      offsets, mc, relu):
    # Shift-and-matmul conv: each tap is a contiguous mc-row window (static
    # offset ti*Wp+tj) of the flattened padded activation, which is resident in
    # VMEM once; accumulate in f32 scratch, fused folded-BN/ReLU epilogue.
    for t, off in enumerate(offsets):
        a = x_ref[pl.ds(off, mc), :]
        prod = jnp.dot(a, w_ref[t], preferred_element_type=jnp.float32)
        if t == 0:
            acc_ref[...] = prod
        else:
            acc_ref[...] += prod
    y = acc_ref[...] * s_ref[...] + b_ref[...]
    if relu:
        y = jnp.maximum(y, 0.0)
    o_ref[...] = y.astype(o_ref.dtype)


def conv_kxk_s1_fused(x, p, *, relu):
    """KxK stride-1 'same' conv + folded BN (+ReLU) with the im2col done in-kernel."""
    B, H, W, Cin = x.shape
    kh, kw, pad = p["kh"], p["kw"], p["pad"]
    Cout = p["cout_alloc"]
    Ho, Wo = H, W
    Hp, Wp = H + 2 * pad, W + 2 * pad
    Mc = Ho * Wp                                 # rows computed (valid + junk columns)
    Lx = Hp * Wp + (kw - 1)                      # flat rows incl. read-safety tail
    xp = jnp.pad(x.astype(jnp.bfloat16),
                 ((0, 0), (pad, pad), (pad, pad), (0, 0))).reshape(B, Hp * Wp, Cin)
    xp = jnp.pad(xp, ((0, 0), (0, Lx - Hp * Wp), (0, 0)))
    offsets = tuple(ti * Wp + tj for ti in range(kh) for tj in range(kw))

    tn = 256 if Cout % 256 == 0 else 128
    T = kh * kw
    est = (2 * (Lx * Cin * 2 + T * Cin * tn * 2 + 2 * tn * 4 + Mc * tn * 2)
           + Mc * tn * 4)
    cp = pltpu.CompilerParams(
        dimension_semantics=("parallel", "parallel"),
        vmem_limit_bytes=int(min(max(3 * est // 2 + (2 << 20), 4 << 20), 48 << 20)))

    out = pl.pallas_call(
        functools.partial(_conv_taps_kernel, offsets=offsets, mc=Mc, relu=relu),
        out_shape=jax.ShapeDtypeStruct((B, Mc, Cout), jnp.bfloat16),
        grid=(B, Cout // tn),
        in_specs=[
            pl.BlockSpec((None, Lx, Cin), lambda b, n: (b, 0, 0)),
            pl.BlockSpec((T, Cin, tn), lambda b, n: (0, 0, n)),
            pl.BlockSpec((1, tn), lambda b, n: (0, n)),
            pl.BlockSpec((1, tn), lambda b, n: (0, n)),
        ],
        out_specs=pl.BlockSpec((None, Mc, tn), lambda b, n: (b, 0, n)),
        scratch_shapes=[pltpu.VMEM((Mc, tn), jnp.float32)],
        compiler_params=cp,
    )(xp, p["w_taps"], p["scale"].reshape(1, Cout), p["shift"].reshape(1, Cout))
    # Drop the junk padded columns; keep NHWC bf16.
    return out.reshape(B, Ho, Wp, Cout)[:, :, :Wo, :]


def _global_pool_kernel(x_ref, o_ref, *, mode):
    x = x_ref[...].astype(jnp.float32)            # (B, H*W, 128)
    if mode == "avg":
        o_ref[...] = jnp.mean(x, axis=1)
    else:
        o_ref[...] = jnp.max(x, axis=1)


def global_pool(x_nhwc, mode):
    """Global avg/max pool, tiled over 128-lane channel blocks."""
    B, H, W, C = x_nhwc.shape
    assert C % LANE == 0
    x = x_nhwc.reshape(B, H * W, C)
    return pl.pallas_call(
        functools.partial(_global_pool_kernel, mode=mode),
        out_shape=jax.ShapeDtypeStruct((B, C), jnp.float32),
        grid=(C // LANE,),
        in_specs=[pl.BlockSpec((B, H * W, LANE), lambda c: (0, 0, c))],
        out_specs=pl.BlockSpec((B, LANE), lambda c: (0, c)),
        compiler_params=pltpu.CompilerParams(
            dimension_semantics=("parallel",)),
    )(x)


def _head_kernel(xg_ref, xm_ref, sg_ref, bg_ref, sm_ref, bm_ref, o_ref):
    # eval-mode BatchNorm1d on each branch, concat along features, L2-normalize
    # (F.normalize, p=2, dim=1, eps=1e-12) — one fused kernel.
    g = xg_ref[...] * sg_ref[...] + bg_ref[...]
    m = xm_ref[...] * sm_ref[...] + bm_ref[...]
    sq = (jnp.sum(g * g, axis=1, keepdims=True)
          + jnp.sum(m * m, axis=1, keepdims=True))
    inv = 1.0 / jnp.maximum(jnp.sqrt(sq), 1e-12)
    C = g.shape[1]
    o_ref[:, :C] = g * inv
    o_ref[:, C:] = m * inv


def head(xg, xm, bn_g, bn_m):
    B, C = xg.shape
    return pl.pallas_call(
        _head_kernel,
        out_shape=jax.ShapeDtypeStruct((B, 2 * C), jnp.float32),
    )(xg, xm, bn_g["scale"].reshape(1, C), bn_g["shift"].reshape(1, C),
      bn_m["scale"].reshape(1, C), bn_m["shift"].reshape(1, C))


# ----------------------------------------------------------------------------
# Conv / Bottleneck glue
# ----------------------------------------------------------------------------

def conv_bn(x, p, *, relu, residual=None):
    """Conv + folded eval-BN (+ fused residual add) (+ ReLU)."""
    B, H, W, Cin = x.shape
    kh, kw, s, pad = p["kh"], p["kw"], p["stride"], p["pad"]
    Cout = p["cout_alloc"]
    K_pad = p["w2d"].shape[0]

    if kh == 1 and kw == 1:
        if s != 1:
            # TODO(synk): fold the strided subsample into the BlockSpec index_map.
            x = x[:, ::s, ::s, :]
        _, Ho, Wo, _ = x.shape
        x2d = x.reshape(B * Ho * Wo, Cin)
    else:
        Ho = (H + 2 * pad - kh) // s + 1
        Wo = (W + 2 * pad - kw) // s + 1
        fused_ok = ("w_taps" in p and s == 1 and kh == kw and 2 * pad == kh - 1
                    and Cin == p["cin_alloc"] and Cin % LANE == 0
                    and residual is None
                    and (H + 2 * pad) * (W + 2 * pad) * Cin * 2 <= FUSED_CONV_X_BYTES)
        if fused_ok:
            return conv_kxk_s1_fused(x, p, relu=relu)
        # Fallback (strided KxK, 7x7 stem): bf16 im2col streamed through K.
        # TODO(synk): extend the in-kernel tap loop to strided KxK convs too.
        xp = jnp.pad(x, ((0, 0), (pad, pad), (pad, pad), (0, 0)))
        taps = [xp[:, i:i + s * Ho:s, j:j + s * Wo:s, :]
                for i in range(kh) for j in range(kw)]
        x2d = jnp.concatenate(taps, axis=-1).reshape(B * Ho * Wo, kh * kw * Cin)

    if x2d.shape[1] != K_pad:                    # K padded to a 128 multiple (stem)
        x2d = jnp.pad(x2d, ((0, 0), (0, K_pad - x2d.shape[1])))

    res2d = residual.reshape(B * Ho * Wo, Cout) if residual is not None else None
    out2d = matmul_bn_act(x2d, p["w2d"], p["scale"], p["shift"],
                          relu=relu, residual=res2d)
    return out2d.reshape(B, Ho, Wo, Cout)


def maxpool_3x3_s2(x):
    # TODO(synk): tiny op, kept as lax.reduce_window instead of a Pallas kernel.
    return lax.reduce_window(
        x, jnp.asarray(-jnp.inf, x.dtype), lax.max,
        window_dimensions=(1, 3, 3, 1),
        window_strides=(1, 2, 2, 1),
        padding=((0, 0), (1, 1), (1, 1), (0, 0)))


def bottleneck_fwd(x, p):
    # TODO(synk): fuse the whole bottleneck into one pallas_call (keep conv1/conv2
    #             intermediates in VMEM) — currently 3-4 fused conv calls.
    out = conv_bn(x, p["conv1"], relu=True)              # 1x1
    out = conv_bn(out, p["conv2"], relu=True)            # 3x3 (stride s)
    if p["down"] is not None:
        idt = conv_bn(x, p["down"], relu=False)          # 1x1 (stride s)
    else:
        idt = x
    # conv3 (1x1) with residual add + ReLU fused into the matmul epilogue.
    return conv_bn(out, p["conv3"], relu=True, residual=idt)


# ----------------------------------------------------------------------------
# Deterministic parameter construction (channels pre-padded, BN folded)
# ----------------------------------------------------------------------------

def make_conv_bn(key, kh, kw, cin_true, cout_true, cin_alloc, *, stride, pad):
    cout_alloc = _round_up(cout_true, LANE)
    k1, k2 = jax.random.split(key)
    fan_in = kh * kw * cin_true
    w = (jax.random.normal(k1, (kh, kw, cin_true, cout_true), jnp.float32)
         * jnp.sqrt(2.0 / fan_in))
    w_full = jnp.zeros((kh, kw, cin_alloc, cout_alloc), jnp.float32)
    w_full = w_full.at[:, :, :cin_true, :cout_true].set(w)
    K = kh * kw * cin_alloc
    K_pad = _round_up(K, LANE)
    w2d = w_full.reshape(K, cout_alloc)
    if K_pad != K:
        w2d = jnp.pad(w2d, ((0, K_pad - K), (0, 0)))
    # eval-mode BN (running mean=0, var=1) folded: scale=gamma/sqrt(1+eps), shift=0.
    gamma = 1.0 + 0.02 * jax.random.normal(k2, (cout_true,), jnp.float32)
    scale = jnp.ones((cout_alloc,), jnp.float32)
    scale = scale.at[:cout_true].set(gamma / jnp.sqrt(1.0 + EPS_BN))
    shift = jnp.zeros((cout_alloc,), jnp.float32)
    p = dict(w2d=w2d.astype(jnp.bfloat16), scale=scale, shift=shift,
             kh=kh, kw=kw, stride=stride, pad=pad,
             cin_alloc=cin_alloc, cout_alloc=cout_alloc)
    if kh > 1 and K_pad == K and cin_alloc % LANE == 0:
        # tap-major weights for the fused in-kernel im2col path
        p["w_taps"] = (w_full.reshape(kh * kw, cin_alloc, cout_alloc)
                       .astype(jnp.bfloat16))
    return p


def make_bottleneck(key, cin_true, cin_alloc, planes, stride, downsample):
    ks = jax.random.split(key, 4)
    planes_alloc = _round_up(planes, LANE)
    return dict(
        conv1=make_conv_bn(ks[0], 1, 1, cin_true, planes, cin_alloc,
                           stride=1, pad=0),
        conv2=make_conv_bn(ks[1], 3, 3, planes, planes, planes_alloc,
                           stride=stride, pad=1),
        conv3=make_conv_bn(ks[2], 1, 1, planes, planes * 4, planes_alloc,
                           stride=1, pad=0),
        down=(make_conv_bn(ks[3], 1, 1, cin_true, planes * 4, cin_alloc,
                           stride=stride, pad=0) if downsample else None),
        stride=stride)


def build_params(key, width=8, blocks=(1, 1, 1, 1)):
    keys = jax.random.split(key, 8)
    params = {"conv1": make_conv_bn(keys[0], 7, 7, 3, width, 3, stride=2, pad=3)}
    layer_planes = [width, width * 2, width * 4, width * 8]
    layer_strides = [1, 2, 2, 1]      # layer4 stride forced to (1,1) as in the module
    cin_true = width
    cin_alloc = _round_up(width, LANE)
    for li in range(4):
        planes, stride = layer_planes[li], layer_strides[li]
        lkeys = jax.random.split(keys[1 + li], blocks[li])
        blks = []
        for bi in range(blocks[li]):
            s = stride if bi == 0 else 1
            down = (bi == 0) and (s != 1 or cin_true != planes * 4)
            blks.append(make_bottleneck(lkeys[bi], cin_true, cin_alloc, planes, s, down))
            cin_true = planes * 4
            cin_alloc = _round_up(cin_true, LANE)
        params["layer%d" % (li + 1)] = blks

    out_planes = layer_planes[3] * 4
    params["out_planes"] = out_planes
    # max_branch = deepcopy(layer4) (identical initial weights -> share the params)
    #              + Bottleneck(out_planes, out_planes // 4) with identity skip.
    params["layer4_max"] = params["layer4"]
    params["max_extra"] = make_bottleneck(keys[5], out_planes,
                                          _round_up(out_planes, LANE),
                                          out_planes // 4, 1, False)
    # BatchNorm1d heads (weight=1, bias=0, running mean=0, var=1), folded.
    bn1d_scale = jnp.full((out_planes,), 1.0 / jnp.sqrt(1.0 + EPS_BN), jnp.float32)
    bn1d_shift = jnp.zeros((out_planes,), jnp.float32)
    params["feat_bn"] = {"scale": bn1d_scale, "shift": bn1d_shift}
    params["feat_bn_max"] = {"scale": bn1d_scale, "shift": bn1d_shift}
    return params


# ----------------------------------------------------------------------------
# Forward (eval-mode path of ResNet.forward)
# ----------------------------------------------------------------------------

def resnet_forward(x_nchw, params):
    x = jnp.transpose(x_nchw, (0, 2, 3, 1)).astype(jnp.bfloat16)  # NCHW -> NHWC

    # self.base: conv1 -> bn1 -> maxpool -> layer1 -> layer2 -> layer3
    # (no ReLU between bn1 and maxpool, exactly as in the module)
    x = conv_bn(x, params["conv1"], relu=False)
    x = maxpool_3x3_s2(x)
    for name in ("layer1", "layer2", "layer3"):
        for blk in params[name]:
            x = bottleneck_fwd(x, blk)

    # global branch: layer4 -> GAP
    x4 = x
    for blk in params["layer4"]:
        x4 = bottleneck_fwd(x4, blk)

    # max branch: deepcopy(layer4) -> extra Bottleneck -> GMP.
    # Weights are shared with layer4 in this synthetic build; reuse its output,
    # recompute only if the parameters ever diverge (e.g. loaded checkpoint).
    if params["layer4_max"] is params["layer4"]:
        x4m = x4
    else:
        x4m = x
        for blk in params["layer4_max"]:
            x4m = bottleneck_fwd(x4m, blk)
    xm = bottleneck_fwd(x4m, params["max_extra"])

    C = params["out_planes"]
    xg_pool = global_pool(x4, "avg")[:, :C]                       # (B, C)
    xm_pool = global_pool(xm, "max")[:, :C]                       # (B, C)

    # feat_bn / feat_bn_max (eval) + concat + F.normalize, fused in one kernel
    return head(xg_pool, xm_pool, params["feat_bn"], params["feat_bn_max"])


# ----------------------------------------------------------------------------

if __name__ == "__main__":
    key = jax.random.PRNGKey(0)
    pkey, xkey = jax.random.split(key)
    params = build_params(pkey, width=8, blocks=(1, 1, 1, 1))
    x = jax.random.normal(xkey, (2, 3, 32, 32), jnp.float32)      # NCHW like PyTorch

    fwd = jax.jit(lambda xx: resnet_forward(xx, params))
    out = jax.block_until_ready(fwd(x))

    assert out.shape == (2, 512), out.shape
    norms = jnp.linalg.norm(out, axis=1)
    assert bool(jnp.all(jnp.abs(norms - 1.0) < 1e-3)), norms
    assert bool(jnp.all(jnp.isfinite(out)))
    print("KERNEL_OK")
</pallas_src>

<mosaic_0001>
module attributes {stable_mosaic.version = 11 : i64} {
  func.func @_mm_bn_single_kernel(%arg0: i32, %arg1: i32, %arg2: memref<256x256xbf16, #tpu.memory_space<vmem>>, %arg3: memref<256x128xbf16, #tpu.memory_space<vmem>>, %arg4: memref<1x128xf32, #tpu.memory_space<vmem>>, %arg5: memref<1x128xf32, #tpu.memory_space<vmem>>, %arg6: memref<256x128xbf16, #tpu.memory_space<vmem>>) attributes {dimension_semantics = [#tpu.dimension_semantics<parallel>, #tpu.dimension_semantics<parallel>], iteration_bounds = array<i64: 2, 1>, scalar_prefetch = 0 : i64, scratch_operands = 0 : i64, tpu.core_type = #tpu.core_type<tc>, window_params = [{transform_indices = @transform_0, window_bounds = array<i64: 256, 256>}, {transform_indices = @transform_1, window_bounds = array<i64: 256, 128>}, {transform_indices = @transform_2, window_bounds = array<i64: 1, 128>}, {transform_indices = @transform_3, window_bounds = array<i64: 1, 128>}, {transform_indices = @transform_4, window_bounds = array<i64: 256, 128>}]} {
    %c0 = arith.constant 0 : index
    %c0_0 = arith.constant 0 : index
    %0 = vector.load %arg2[%c0, %c0_0] : memref<256x256xbf16, #tpu.memory_space<vmem>>, vector<256x256xbf16>
    %c0_1 = arith.constant 0 : index
    %c0_2 = arith.constant 0 : index
    %1 = vector.load %arg3[%c0_1, %c0_2] : memref<256x128xbf16, #tpu.memory_space<vmem>>, vector<256x128xbf16>
    %cst = arith.constant dense<0.000000e+00> : vector<256x128xf32>
    %2 = tpu.matmul %0, %1, %cst {dimension_numbers = #tpu.dot_dimension_numbers<[1], [0], [0], [1], [0, 0, 1, 1], [], []>} : vector<256x256xbf16>, vector<256x128xbf16>, vector<256x128xf32> -> vector<256x128xf32>
    %c0_3 = arith.constant 0 : index
    %c0_4 = arith.constant 0 : index
    %3 = vector.load %arg4[%c0_3, %c0_4] : memref<1x128xf32, #tpu.memory_space<vmem>>, vector<1x128xf32>
    %4 = vector.broadcast %3 : vector<1x128xf32> to vector<256x128xf32>
    %5 = arith.mulf %2, %4 : vector<256x128xf32>
    %c0_5 = arith.constant 0 : index
    %c0_6 = arith.constant 0 : index
    %6 = vector.load %arg5[%c0_5, %c0_6] : memref<1x128xf32, #tpu.memory_space<vmem>>, vector<1x128xf32>
    %7 = vector.broadcast %6 : vector<1x128xf32> to vector<256x128xf32>
    %8 = arith.addf %5, %7 : vector<256x128xf32>
    %9 = arith.truncf %8 : vector<256x128xf32> to vector<256x128xbf16>
    %c0_7 = arith.constant 0 : index
    %c0_8 = arith.constant 0 : index
    %10 = vector.load %arg6[%c0_7, %c0_8] : memref<256x128xbf16, #tpu.memory_space<vmem>>, vector<256x128xbf16>
    tpu.vector_store %arg6[%c0_7, %c0_8], %9 {strides = array<i32>} : memref<256x128xbf16, #tpu.memory_space<vmem>>, vector<256x128xbf16>,
    return
  }
  func.func @transform_0(%arg0: i32, %arg1: i32) -> (i32, i32) {
    %c0_i32 = arith.constant 0 : i32
    %c0_i32_0 = arith.constant 0 : i32
    return %arg0, %c0_i32 : i32, i32
  }
  func.func @transform_1(%arg0: i32, %arg1: i32) -> (i32, i32) {
    %c0_i32 = arith.constant 0 : i32
    %c0_i32_0 = arith.constant 0 : i32
    return %c0_i32, %arg1 : i32, i32
  }
  func.func @transform_2(%arg0: i32, %arg1: i32) -> (i32, i32) {
    %c0_i32 = arith.constant 0 : i32
    %c0_i32_0 = arith.constant 0 : i32
    return %c0_i32, %arg1 : i32, i32
  }
  func.func @transform_3(%arg0: i32, %arg1: i32) -> (i32, i32) {
    %c0_i32 = arith.constant 0 : i32
    %c0_i32_0 = arith.constant 0 : i32
    return %c0_i32, %arg1 : i32, i32
  }
  func.func @transform_4(%arg0: i32, %arg1: i32) -> (i32, i32) {
    %c0_i32 = arith.constant 0 : i32
    return %arg0, %arg1 : i32, i32
  }
}

module attributes {stable_mosaic.version = 11 : i64} {
  func.func @_mm_bn_single_kernel(%arg0: i32, %arg1: i32, %arg2: memref<64x128xbf16, #tpu.memory_space<vmem>>, %arg3: memref<128x128xbf16, #tpu.memory_space<vmem>>, %arg4: memref<1x128xf32, #tpu.memory_space<vmem>>, %arg5: memref<1x128xf32, #tpu.memory_space<vmem>>, %arg6: memref<64x128xbf16, #tpu.memory_space<vmem>>) attributes {dimension_semantics = [#tpu.dimension_semantics<parallel>, #tpu.dimension_semantics<parallel>], iteration_bounds = array<i64: 2, 1>, scalar_prefetch = 0 : i64, scratch_operands = 0 : i64, tpu.core_type = #tpu.core_type<tc>, window_params = [{transform_indices = @transform_0, window_bounds = array<i64: 64, 128>}, {transform_indices = @transform_1, window_bounds = array<i64: 128, 128>}, {transform_indices = @transform_2, window_bounds = array<i64: 1, 128>}, {transform_indices = @transform_3, window_bounds = array<i64: 1, 128>}, {transform_indices = @transform_4, window_bounds = array<i64: 64, 128>}]} {
    %c0 = arith.constant 0 : index
    %c0_0 = arith.constant 0 : index
    %0 = vector.load %arg2[%c0, %c0_0] : memref<64x128xbf16, #tpu.memory_space<vmem>>, vector<64x128xbf16>
    %c0_1 = arith.constant 0 : index
    %c0_2 = arith.constant 0 : index
    %1 = vector.load %arg3[%c0_1, %c0_2] : memref<128x128xbf16, #tpu.memory_space<vmem>>, vector<128x128xbf16>
    %cst = arith.constant dense<0.000000e+00> : vector<64x128xf32>
    %2 = tpu.matmul %0, %1, %cst {dimension_numbers = #tpu.dot_dimension_numbers<[1], [0], [0], [1], [0, 0, 1, 1], [], []>} : vector<64x128xbf16>, vector<128x128xbf16>, vector<64x128xf32> -> vector<64x128xf32>
    %c0_3 = arith.constant 0 : index
    %c0_4 = arith.constant 0 : index
    %3 = vector.load %arg4[%c0_3, %c0_4] : memref<1x128xf32, #tpu.memory_space<vmem>>, vector<1x128xf32>
    %4 = vector.broadcast %3 : vector<1x128xf32> to vector<64x128xf32>
    %5 = arith.mulf %2, %4 : vector<64x128xf32>
    %c0_5 = arith.constant 0 : index
    %c0_6 = arith.constant 0 : index
    %6 = vector.load %arg5[%c0_5, %c0_6] : memref<1x128xf32, #tpu.memory_space<vmem>>, vector<1x128xf32>
    %7 = vector.broadcast %6 : vector<1x128xf32> to vector<64x128xf32>
    %8 = arith.addf %5, %7 : vector<64x128xf32>
    %cst_7 = arith.constant 0.000000e+00 : f32
    %9 = vector.broadcast %cst_7 : f32 to vector<64x128xf32>
    %10 = arith.maximumf %8, %9 : vector<64x128xf32>
    %11 = arith.truncf %10 : vector<64x128xf32> to vector<64x128xbf16>
    %c0_8 = arith.constant 0 : index
    %c0_9 = arith.constant 0 : index
    %12 = vector.load %arg6[%c0_8, %c0_9] : memref<64x128xbf16, #tpu.memory_space<vmem>>, vector<64x128xbf16>
    tpu.vector_store %arg6[%c0_8, %c0_9], %11 {strides = array<i32>} : memref<64x128xbf16, #tpu.memory_space<vmem>>, vector<64x128xbf16>,
    return
  }
  func.func @transform_0(%arg0: i32, %arg1: i32) -> (i32, i32) {
    %c0_i32 = arith.constant 0 : i32
    %c0_i32_0 = arith.constant 0 : i32
    return %arg0, %c0_i32 : i32, i32
  }
  func.func @transform_1(%arg0: i32, %arg1: i32) -> (i32, i32) {
    %c0_i32 = arith.constant 0 : i32
    %c0_i32_0 = arith.constant 0 : i32
    return %c0_i32, %arg1 : i32, i32
  }
  func.func @transform_2(%arg0: i32, %arg1: i32) -> (i32, i32) {
    %c0_i32 = arith.constant 0 : i32
    %c0_i32_0 = arith.constant 0 : i32
    return %c0_i32, %arg1 : i32, i32
  }
  func.func @transform_3(%arg0: i32, %arg1: i32) -> (i32, i32) {
    %c0_i32 = arith.constant 0 : i32
    %c0_i32_0 = arith.constant 0 : i32
    return %c0_i32, %arg1 : i32, i32
  }
  func.func @transform_4(%arg0: i32, %arg1: i32) -> (i32, i32) {
    %c0_i32 = arith.constant 0 : i32
    return %arg0, %arg1 : i32, i32
  }
}

module attributes {stable_mosaic.version = 11 : i64} {
  func.func @_conv_taps_kernel(%arg0: i32, %arg1: i32, %arg2: memref<1x102x128xbf16, #tpu.memory_space<vmem>>, %arg3: memref<9x128x128xbf16, #tpu.memory_space<vmem>>, %arg4: memref<1x128xf32, #tpu.memory_space<vmem>>, %arg5: memref<1x128xf32, #tpu.memory_space<vmem>>, %arg6: memref<1x80x128xbf16, #tpu.memory_space<vmem>>, %arg7: memref<80x128xf32, #tpu.memory_space<vmem>>) attributes {dimension_semantics = [#tpu.dimension_semantics<parallel>, #tpu.dimension_semantics<parallel>], iteration_bounds = array<i64: 2, 1>, scalar_prefetch = 0 : i64, scratch_operands = 1 : i64, tpu.core_type = #tpu.core_type<tc>, window_params = [{transform_indices = @transform_0, window_bounds = array<i64: 1, 102, 128>}, {transform_indices = @transform_1, window_bounds = array<i64: 9, 128, 128>}, {transform_indices = @transform_2, window_bounds = array<i64: 1, 128>}, {transform_indices = @transform_3, window_bounds = array<i64: 1, 128>}, {transform_indices = @transform_4, window_bounds = array<i64: 1, 80, 128>}]} {
    %c0 = arith.constant 0 : index
    %c0_0 = arith.constant 0 : index
    %c0_1 = arith.constant 0 : index
    %0 = vector.load %arg2[%c0, %c0_0, %c0_1] : memref<1x102x128xbf16, #tpu.memory_space<vmem>>, vector<1x80x128xbf16>
    %1 = vector.shape_cast %0 : vector<1x80x128xbf16> to vector<80x128xbf16>
    %c0_2 = arith.constant 0 : index
    %c0_3 = arith.constant 0 : index
    %c0_4 = arith.constant 0 : index
    %2 = vector.load %arg3[%c0_2, %c0_3, %c0_4] : memref<9x128x128xbf16, #tpu.memory_space<vmem>>, vector<1x128x128xbf16>
    %3 = vector.shape_cast %2 : vector<1x128x128xbf16> to vector<128x128xbf16>
    %cst = arith.constant dense<0.000000e+00> : vector<80x128xf32>
    %4 = tpu.matmul %1, %3, %cst {dimension_numbers = #tpu.dot_dimension_numbers<[1], [0], [0], [1], [0, 0, 1, 1], [], []>} : vector<80x128xbf16>, vector<128x128xbf16>, vector<80x128xf32> -> vector<80x128xf32>
    %c0_5 = arith.constant 0 : index
    %c0_6 = arith.constant 0 : index
    %5 = vector.load %arg7[%c0_5, %c0_6] : memref<80x128xf32, #tpu.memory_space<vmem>>, vector<80x128xf32>
    tpu.vector_store %arg7[%c0_5, %c0_6], %4 {strides = array<i32>} : memref<80x128xf32, #tpu.memory_space<vmem>>, vector<80x128xf32>,
    %c0_7 = arith.constant 0 : index
    %c1 = arith.constant 1 : index
    %c0_8 = arith.constant 0 : index
    %6 = vector.load %arg2[%c0_7, %c1, %c0_8] : memref<1x102x128xbf16, #tpu.memory_space<vmem>>, vector<1x80x128xbf16>
    %7 = vector.shape_cast %6 : vector<1x80x128xbf16> to vector<80x128xbf16>
    %c1_9 = arith.constant 1 : index
    %c0_10 = arith.constant 0 : index
    %c0_11 = arith.constant 0 : index
    %8 = vector.load %arg3[%c1_9, %c0_10, %c0_11] : memref<9x128x128xbf16, #tpu.memory_space<vmem>>, vector<1x128x128xbf16>
    %9 = vector.shape_cast %8 : vector<1x128x128xbf16> to vector<128x128xbf16>
    %cst_12 = arith.constant dense<0.000000e+00> : vector<80x128xf32>
    %10 = tpu.matmul %7, %9, %cst_12 {dimension_numbers = #tpu.dot_dimension_numbers<[1], [0], [0], [1], [0, 0, 1, 1], [], []>} : vector<80x128xbf16>, vector<128x128xbf16>, vector<80x128xf32> -> vector<80x128xf32>
    %c0_13 = arith.constant 0 : index
    %c0_14 = arith.constant 0 : index
    %11 = vector.load %arg7[%c0_13, %c0_14] : memref<80x128xf32, #tpu.memory_space<vmem>>, vector<80x128xf32>
    %12 = arith.addf %11, %10 : vector<80x128xf32>
    %c0_15 = arith.constant 0 : index
    %c0_16 = arith.constant 0 : index
    %13 = vector.load %arg7[%c0_15, %c0_16] : memref<80x128xf32, #tpu.memory_space<vmem>>, vector<80x128xf32>
    tpu.vector_store %arg7[%c0_15, %c0_16], %12 {strides = array<i32>} : memref<80x128xf32, #tpu.memory_space<vmem>>, vector<80x128xf32>,
    %c0_17 = arith.constant 0 : index
    %c2 = arith.constant 2 : index
    %c0_18 = arith.constant 0 : index
    %14 = vector.load %arg2[%c0_17, %c2, %c0_18] : memref<1x102x128xbf16, #tpu.memory_space<vmem>>, vector<1x80x128xbf16>
    %15 = vector.shape_cast %14 : vector<1x80x128xbf16> to vector<80x128xbf16>
    %c2_19 = arith.constant 2 : index
    %c0_20 = arith.constant 0 : index
    %c0_21 = arith.constant 0 : index
    %16 = vector.load %arg3[%c2_19, %c0_20, %c0_21] : memref<9x128x128xbf16, #tpu.memory_space<vmem>>, vector<1x128x128xbf16>
    %17 = vector.shape_cast %16 : vector<1x128x128xbf16> to vector<128x128xbf16>
    %cst_22 = arith.constant dense<0.000000e+00> : vector<80x128xf32>
    %18 = tpu.matmul %15, %17, %cst_22 {dimension_numbers = #tpu.dot_dimension_numbers<[1], [0], [0], [1], [0, 0, 1, 1], [], []>} : vector<80x128xbf16>, vector<128x128xbf16>, vector<80x128xf32> -> vector<80x128xf32>
    %c0_23 = arith.constant 0 : index
    %c0_24 = arith.constant 0 : index
    %19 = vector.load %arg7[%c0_23, %c0_24] : memref<80x128xf32, #tpu.memory_space<vmem>>, vector<80x128xf32>
    %20 = arith.addf %19, %18 : vector<80x128xf32>
    %c0_25 = arith.constant 0 : index
    %c0_26 = arith.constant 0 : index
    %21 = vector.load %arg7[%c0_25, %c0_26] : memref<80x128xf32, #tpu.memory_space<vmem>>, vector<80x128xf32>
    tpu.vector_store %arg7[%c0_25, %c0_26], %20 {strides = array<i32>} : memref<80x128xf32, #tpu.memory_space<vmem>>, vector<80x128xf32>,
    %c0_27 = arith.constant 0 : index
    %c10 = arith.constant 10 : index
    %c0_28 = arith.constant 0 : index
    %22 = vector.load %arg2[%c0_27, %c10, %c0_28] : memref<1x102x128xbf16, #tpu.memory_space<vmem>>, vector<1x80x128xbf16>
    %23 = vector.shape_cast %22 : vector<1x80x128xbf16> to vector<80x128xbf16>
    %c3 = arith.constant 3 : index
    %c0_29 = arith.constant 0 : index
    %c0_30 = arith.constant 0 : index
    %24 = vector.load %arg3[%c3, %c0_29, %c0_30] : memref<9x128x128xbf16, #tpu.memory_space<vmem>>, vector<1x128x128xbf16>
    %25 = vector.shape_cast %24 : vector<1x128x128xbf16> to vector<128x128xbf16>
    %cst_31 = arith.constant dense<0.000000e+00> : vector<80x128xf32>
    %26 = tpu.matmul %23, %25, %cst_31 {dimension_numbers = #tpu.dot_dimension_numbers<[1], [0], [0], [1], [0, 0, 1, 1], [], []>} : vector<80x128xbf16>, vector<128x128xbf16>, vector<80x128xf32> -> vector<80x128xf32>
    %c0_32 = arith.constant 0 : index
    %c0_33 = arith.constant 0 : index
    %27 = vector.load %arg7[%c0_32, %c0_33] : memref<80x128xf32, #tpu.memory_space<vmem>>, vector<80x128xf32>
    %28 = arith.addf %27, %26 : vector<80x128xf32>
    %c0_34 = arith.constant 0 : index
    %c0_35 = arith.constant 0 : index
    %29 = vector.load %arg7[%c0_34, %c0_35] : memref<80x128xf32, #tpu.memory_space<vmem>>, vector<80x128xf32>
    tpu.vector_store %arg7[%c0_34, %c0_35], %28 {strides = array<i32>} : memref<80x128xf32, #tpu.memory_space<vmem>>, vector<80x128xf32>,
    %c0_36 = arith.constant 0 : index
    %c11 = arith.constant 11 : index
    %c0_37 = arith.constant 0 : index
    %30 = vector.load %arg2[%c0_36, %c11, %c0_37] : memref<1x102x128xbf16, #tpu.memory_space<vmem>>, vector<1x80x128xbf16>
    %31 = vector.shape_cast %30 : vector<1x80x128xbf16> to vector<80x128xbf16>
    %c4 = arith.constant 4 : index
    %c0_38 = arith.constant 0 : index
    %c0_39 = arith.constant 0 : index
    %32 = vector.load %arg3[%c4, %c0_38, %c0_39] : memref<9x128x128xbf16, #tpu.memory_space<vmem>>, vector<1x128x128xbf16>
    %33 = vector.shape_cast %32 : vector<1x128x128xbf16> to vector<128x128xbf16>
    %cst_40 = arith.constant dense<0.000000e+00> : vector<80x128xf32>
    %34 = tpu.matmul %31, %33, %cst_40 {dimension_numbers = #tpu.dot_dimension_numbers<[1], [0], [0], [1], [0, 0, 1, 1], [], []>} : vector<80x128xbf16>, vector<128x128xbf16>, vector<80x128xf32> -> vector<80x128xf32>
    %c0_41 = arith.constant 0 : index
    %c0_42 = arith.constant 0 : index
    %35 = vector.load %arg7[%c0_41, %c0_42] : memref<80x128xf32, #tpu.memory_space<vmem>>, vector<80x128xf32>
    %36 = arith.addf %35, %34 : vector<80x128xf32>
    %c0_43 = arith.constant 0 : index
    %c0_44 = arith.constant 0 : index
    %37 = vector.load %arg7[%c0_43, %c0_44] : memref<80x128xf32, #tpu.memory_space<vmem>>, vector<80x128xf32>
    tpu.vector_store %arg7[%c0_43, %c0_44], %36 {strides = array<i32>} : memref<80x128xf32, #tpu.memory_space<vmem>>, vector<80x128xf32>,
    %c0_45 = arith.constant 0 : index
    %c12 = arith.constant 12 : index
    %c0_46 = arith.constant 0 : index
    %38 = vector.load %arg2[%c0_45, %c12, %c0_46] : memref<1x102x128xbf16, #tpu.memory_space<vmem>>, vector<1x80x128xbf16>
    %39 = vector.shape_cast %38 : vector<1x80x128xbf16> to vector<80x128xbf16>
    %c5 = arith.constant 5 : index
    %c0_47 = arith.constant 0 : index
    %c0_48 = arith.constant 0 : index
    %40 = vector.load %arg3[%c5, %c0_47, %c0_48] : memref<9x128x128xbf16, #tpu.memory_space<vmem>>, vector<1x128x128xbf16>
    %41 = vector.shape_cast %40 : vector<1x128x128xbf16> to vector<128x128xbf16>
    %cst_49 = arith.constant dense<0.000000e+00> : vector<80x128xf32>
    %42 = tpu.matmul %39, %41, %cst_49 {dimension_numbers = #tpu.dot_dimension_numbers<[1], [0], [0], [1], [0, 0, 1, 1], [], []>} : vector<80x128xbf16>, vector<128x128xbf16>, vector<80x128xf32> -> vector<80x128xf32>
    %c0_50 = arith.constant 0 : index
    %c0_51 = arith.constant 0 : index
    %43 = vector.load %arg7[%c0_50, %c0_51] : memref<80x128xf32, #tpu.memory_space<vmem>>, vector<80x128xf32>
    %44 = arith.addf %43, %42 : vector<80x128xf32>
    %c0_52 = arith.constant 0 : index
    %c0_53 = arith.constant 0 : index
    %45 = vector.load %arg7[%c0_52, %c0_53] : memref<80x128xf32, #tpu.memory_space<vmem>>, vector<80x128xf32>
    tpu.vector_store %arg7[%c0_52, %c0_53], %44 {strides = array<i32>} : memref<80x128xf32, #tpu.memory_space<vmem>>, vector<80x128xf32>,
    %c0_54 = arith.constant 0 : index
    %c20 = arith.constant 20 : index
    %c0_55 = arith.constant 0 : index
    %46 = vector.load %arg2[%c0_54, %c20, %c0_55] : memref<1x102x128xbf16, #tpu.memory_space<vmem>>, vector<1x80x128xbf16>
    %47 = vector.shape_cast %46 : vector<1x80x128xbf16> to vector<80x128xbf16>
    %c6 = arith.constant 6 : index
    %c0_56 = arith.constant 0 : index
    %c0_57 = arith.constant 0 : index
    %48 = vector.load %arg3[%c6, %c0_56, %c0_57] : memref<9x128x128xbf16, #tpu.memory_space<vmem>>, vector<1x128x128xbf16>
    %49 = vector.shape_cast %48 : vector<1x128x128xbf16> to vector<128x128xbf16>
    %cst_58 = arith.constant dense<0.000000e+00> : vector<80x128xf32>
    %50 = tpu.matmul %47, %49, %cst_58 {dimension_numbers = #tpu.dot_dimension_numbers<[1], [0], [0], [1], [0, 0, 1, 1], [], []>} : vector<80x128xbf16>, vector<128x128xbf16>, vector<80x128xf32> -> vector<80x128xf32>
    %c0_59 = arith.constant 0 : index
    %c0_60 = arith.constant 0 : index
    %51 = vector.load %arg7[%c0_59, %c0_60] : memref<80x128xf32, #tpu.memory_space<vmem>>, vector<80x128xf32>
    %52 = arith.addf %51, %50 : vector<80x128xf32>
    %c0_61 = arith.constant 0 : index
    %c0_62 = arith.constant 0 : index
    %53 = vector.load %arg7[%c0_61, %c0_62] : memref<80x128xf32, #tpu.memory_space<vmem>>, vector<80x128xf32>
    tpu.vector_store %arg7[%c0_61, %c0_62], %52 {strides = array<i32>} : memref<80x128xf32, #tpu.memory_space<vmem>>, vector<80x128xf32>,
    %c0_63 = arith.constant 0 : index
    %c21 = arith.constant 21 : index
    %c0_64 = arith.constant 0 : index
    %54 = vector.load %arg2[%c0_63, %c21, %c0_64] : memref<1x102x128xbf16, #tpu.memory_space<vmem>>, vector<1x80x128xbf16>
    %55 = vector.shape_cast %54 : vector<1x80x128xbf16> to vector<80x128xbf16>
    %c7 = arith.constant 7 : index
    %c0_65 = arith.constant 0 : index
    %c0_66 = arith.constant 0 : index
    %56 = vector.load %arg3[%c7, %c0_65, %c0_66] : memref<9x128x128xbf16, #tpu.memory_space<vmem>>, vector<1x128x128xbf16>
    %57 = vector.shape_cast %56 : vector<1x128x128xbf16> to vector<128x128xbf16>
    %cst_67 = arith.constant dense<0.000000e+00> : vector<80x128xf32>
    %58 = tpu.matmul %55, %57, %cst_67 {dimension_numbers = #tpu.dot_dimension_numbers<[1], [0], [0], [1], [0, 0, 1, 1], [], []>} : vector<80x128xbf16>, vector<128x128xbf16>, vector<80x128xf32> -> vector<80x128xf32>
    %c0_68 = arith.constant 0 : index
    %c0_69 = arith.constant 0 : index
    %59 = vector.load %arg7[%c0_68, %c0_69] : memref<80x128xf32, #tpu.memory_space<vmem>>, vector<80x128xf32>
    %60 = arith.addf %59, %58 : vector<80x128xf32>
    %c0_70 = arith.constant 0 : index
    %c0_71 = arith.constant 0 : index
    %61 = vector.load %arg7[%c0_70, %c0_71] : memref<80x128xf32, #tpu.memory_space<vmem>>, vector<80x128xf32>
    tpu.vector_store %arg7[%c0_70, %c0_71], %60 {strides = array<i32>} : memref<80x128xf32, #tpu.memory_space<vmem>>, vector<80x128xf32>,
    %c0_72 = arith.constant 0 : index
    %c22 = arith.constant 22 : index
    %c0_73 = arith.constant 0 : index
    %62 = vector.load %arg2[%c0_72, %c22, %c0_73] : memref<1x102x128xbf16, #tpu.memory_space<vmem>>, vector<1x80x128xbf16>
    %63 = vector.shape_cast %62 : vector<1x80x128xbf16> to vector<80x128xbf16>
    %c8 = arith.constant 8 : index
    %c0_74 = arith.constant 0 : index
    %c0_75 = arith.constant 0 : index
    %64 = vector.load %arg3[%c8, %c0_74, %c0_75] : memref<9x128x128xbf16, #tpu.memory_space<vmem>>, vector<1x128x128xbf16>
    %65 = vector.shape_cast %64 : vector<1x128x128xbf16> to vector<128x128xbf16>
    %cst_76 = arith.constant dense<0.000000e+00> : vector<80x128xf32>
    %66 = tpu.matmul %63, %65, %cst_76 {dimension_numbers = #tpu.dot_dimension_numbers<[1], [0], [0], [1], [0, 0, 1, 1], [], []>} : vector<80x128xbf16>, vector<128x128xbf16>, vector<80x128xf32> -> vector<80x128xf32>
    %c0_77 = arith.constant 0 : index
    %c0_78 = arith.constant 0 : index
    %67 = vector.load %arg7[%c0_77, %c0_78] : memref<80x128xf32, #tpu.memory_space<vmem>>, vector<80x128xf32>
    %68 = arith.addf %67, %66 : vector<80x128xf32>
    %c0_79 = arith.constant 0 : index
    %c0_80 = arith.constant 0 : index
    %69 = vector.load %arg7[%c0_79, %c0_80] : memref<80x128xf32, #tpu.memory_space<vmem>>, vector<80x128xf32>
    tpu.vector_store %arg7[%c0_79, %c0_80], %68 {strides = array<i32>} : memref<80x128xf32, #tpu.memory_space<vmem>>, vector<80x128xf32>,
    %c0_81 = arith.constant 0 : index
    %c0_82 = arith.constant 0 : index
    %70 = vector.load %arg7[%c0_81, %c0_82] : memref<80x128xf32, #tpu.memory_space<vmem>>, vector<80x128xf32>
    %c0_83 = arith.constant 0 : index
    %c0_84 = arith.constant 0 : index
    %71 = vector.load %arg4[%c0_83, %c0_84] : memref<1x128xf32, #tpu.memory_space<vmem>>, vector<1x128xf32>
    %72 = vector.broadcast %71 : vector<1x128xf32> to vector<80x128xf32>
    %73 = arith.mulf %70, %72 : vector<80x128xf32>
    %c0_85 = arith.constant 0 : index
    %c0_86 = arith.constant 0 : index
    %74 = vector.load %arg5[%c0_85, %c0_86] : memref<1x128xf32, #tpu.memory_space<vmem>>, vector<1x128xf32>
    %75 = vector.broadcast %74 : vector<1x128xf32> to vector<80x128xf32>
    %76 = arith.addf %73, %75 : vector<80x128xf32>
    %cst_87 = arith.constant 0.000000e+00 : f32
    %77 = vector.broadcast %cst_87 : f32 to vector<80x128xf32>
    %78 = arith.maximumf %76, %77 : vector<80x128xf32>
    %79 = arith.truncf %78 : vector<80x128xf32> to vector<80x128xbf16>
    %c0_88 = arith.constant 0 : index
    %c0_89 = arith.constant 0 : index
    %c0_90 = arith.constant 0 : index
    %80 = vector.load %arg6[%c0_88, %c0_89, %c0_90] : memref<1x80x128xbf16, #tpu.memory_space<vmem>>, vector<1x80x128xbf16>
    %81 = vector.shape_cast %80 : vector<1x80x128xbf16> to vector<80x128xbf16>
    %82 = vector.shape_cast %79 : vector<80x128xbf16> to vector<1x80x128xbf16>
    tpu.vector_store %arg6[%c0_88, %c0_89, %c0_90], %82 {strides = array<i32>} : memref<1x80x128xbf16, #tpu.memory_space<vmem>>, vector<1x80x128xbf16>,
    return
  }
  func.func @transform_0(%arg0: i32, %arg1: i32) -> (i32, i32, i32) {
    %c0_i32 = arith.constant 0 : i32
    %c0_i32_0 = arith.constant 0 : i32
    %c0_i32_1 = arith.constant 0 : i32
    return %arg0, %c0_i32, %c0_i32_0 : i32, i32, i32
  }
  func.func @transform_1(%arg0: i32, %arg1: i32) -> (i32, i32, i32) {
    %c0_i32 = arith.constant 0 : i32
    %c0_i32_0 = arith.constant 0 : i32
    %c0_i32_1 = arith.constant 0 : i32
    return %c0_i32, %c0_i32_0, %arg1 : i32, i32, i32
  }
  func.func @transform_2(%arg0: i32, %arg1: i32) -> (i32, i32) {
    %c0_i32 = arith.constant 0 : i32
    %c0_i32_0 = arith.constant 0 : i32
    return %c0_i32, %arg1 : i32, i32
  }
  func.func @transform_3(%arg0: i32, %arg1: i32) -> (i32, i32) {
    %c0_i32 = arith.constant 0 : i32
    %c0_i32_0 = arith.constant 0 : i32
    return %c0_i32, %arg1 : i32, i32
  }
  func.func @transform_4(%arg0: i32, %arg1: i32) -> (i32, i32, i32) {
    %c0_i32 = arith.constant 0 : i32
    %c0_i32_0 = arith.constant 0 : i32
    return %arg0, %c0_i32, %arg1 : i32, i32, i32
  }
}

module attributes {stable_mosaic.version = 11 : i64} {
  func.func @_mm_bn_single_kernel(%arg0: i32, %arg1: i32, %arg2: memref<64x128xbf16, #tpu.memory_space<vmem>>, %arg3: memref<128x128xbf16, #tpu.memory_space<vmem>>, %arg4: memref<1x128xf32, #tpu.memory_space<vmem>>, %arg5: memref<1x128xf32, #tpu.memory_space<vmem>>, %arg6: memref<64x128xbf16, #tpu.memory_space<vmem>>, %arg7: memref<64x128xbf16, #tpu.memory_space<vmem>>) attributes {dimension_semantics = [#tpu.dimension_semantics<parallel>, #tpu.dimension_semantics<parallel>], iteration_bounds = array<i64: 2, 1>, scalar_prefetch = 0 : i64, scratch_operands = 0 : i64, tpu.core_type = #tpu.core_type<tc>, window_params = [{transform_indices = @transform_0, window_bounds = array<i64: 64, 128>}, {transform_indices = @transform_1, window_bounds = array<i64: 128, 128>}, {transform_indices = @transform_2, window_bounds = array<i64: 1, 128>}, {transform_indices = @transform_3, window_bounds = array<i64: 1, 128>}, {transform_indices = @transform_4, window_bounds = array<i64: 64, 128>}, {transform_indices = @transform_5, window_bounds = array<i64: 64, 128>}]} {
    %c0 = arith.constant 0 : index
    %c0_0 = arith.constant 0 : index
    %0 = vector.load %arg2[%c0, %c0_0] : memref<64x128xbf16, #tpu.memory_space<vmem>>, vector<64x128xbf16>
    %c0_1 = arith.constant 0 : index
    %c0_2 = arith.constant 0 : index
    %1 = vector.load %arg3[%c0_1, %c0_2] : memref<128x128xbf16, #tpu.memory_space<vmem>>, vector<128x128xbf16>
    %cst = arith.constant dense<0.000000e+00> : vector<64x128xf32>
    %2 = tpu.matmul %0, %1, %cst {dimension_numbers = #tpu.dot_dimension_numbers<[1], [0], [0], [1], [0, 0, 1, 1], [], []>} : vector<64x128xbf16>, vector<128x128xbf16>, vector<64x128xf32> -> vector<64x128xf32>
    %c0_3 = arith.constant 0 : index
    %c0_4 = arith.constant 0 : index
    %3 = vector.load %arg4[%c0_3, %c0_4] : memref<1x128xf32, #tpu.memory_space<vmem>>, vector<1x128xf32>
    %4 = vector.broadcast %3 : vector<1x128xf32> to vector<64x128xf32>
    %5 = arith.mulf %2, %4 : vector<64x128xf32>
    %c0_5 = arith.constant 0 : index
    %c0_6 = arith.constant 0 : index
    %6 = vector.load %arg5[%c0_5, %c0_6] : memref<1x128xf32, #tpu.memory_space<vmem>>, vector<1x128xf32>
    %7 = vector.broadcast %6 : vector<1x128xf32> to vector<64x128xf32>
    %8 = arith.addf %5, %7 : vector<64x128xf32>
    %c0_7 = arith.constant 0 : index
    %c0_8 = arith.constant 0 : index
    %9 = vector.load %arg6[%c0_7, %c0_8] : memref<64x128xbf16, #tpu.memory_space<vmem>>, vector<64x128xbf16>
    %10 = arith.extf %9 : vector<64x128xbf16> to vector<64x128xf32>
    %11 = arith.addf %8, %10 : vector<64x128xf32>
    %cst_9 = arith.constant 0.000000e+00 : f32
    %12 = vector.broadcast %cst_9 : f32 to vector<64x128xf32>
    %13 = arith.maximumf %11, %12 : vector<64x128xf32>
    %14 = arith.truncf %13 : vector<64x128xf32> to vector<64x128xbf16>
    %c0_10 = arith.constant 0 : index
    %c0_11 = arith.constant 0 : index
    %15 = vector.load %arg7[%c0_10, %c0_11] : memref<64x128xbf16, #tpu.memory_space<vmem>>, vector<64x128xbf16>
    tpu.vector_store %arg7[%c0_10, %c0_11], %14 {strides = array<i32>} : memref<64x128xbf16, #tpu.memory_space<vmem>>, vector<64x128xbf16>,
    return
  }
  func.func @transform_0(%arg0: i32, %arg1: i32) -> (i32, i32) {
    %c0_i32 = arith.constant 0 : i32
    %c0_i32_0 = arith.constant 0 : i32
    return %arg0, %c0_i32 : i32, i32
  }
  func.func @transform_1(%arg0: i32, %arg1: i32) -> (i32, i32) {
    %c0_i32 = arith.constant 0 : i32
    %c0_i32_0 = arith.constant 0 : i32
    return %c0_i32, %arg1 : i32, i32
  }
  func.func @transform_2(%arg0: i32, %arg1: i32) -> (i32, i32) {
    %c0_i32 = arith.constant 0 : i32
    %c0_i32_0 = arith.constant 0 : i32
    return %c0_i32, %arg1 : i32, i32
  }
  func.func @transform_3(%arg0: i32, %arg1: i32) -> (i32, i32) {
    %c0_i32 = arith.constant 0 : i32
    %c0_i32_0 = arith.constant 0 : i32
    return %c0_i32, %arg1 : i32, i32
  }
  func.func @transform_4(%arg0: i32, %arg1: i32) -> (i32, i32) {
    %c0_i32 = arith.constant 0 : i32
    return %arg0, %arg1 : i32, i32
  }
  func.func @transform_5(%arg0: i32, %arg1: i32) -> (i32, i32) {
    %c0_i32 = arith.constant 0 : i32
    return %arg0, %arg1 : i32, i32
  }
}

module attributes {stable_mosaic.version = 11 : i64} {
  func.func @_mm_bn_single_kernel(%arg0: i32, %arg1: i32, %arg2: memref<64x128xbf16, #tpu.memory_space<vmem>>, %arg3: memref<128x128xbf16, #tpu.memory_space<vmem>>, %arg4: memref<1x128xf32, #tpu.memory_space<vmem>>, %arg5: memref<1x128xf32, #tpu.memory_space<vmem>>, %arg6: memref<64x128xbf16, #tpu.memory_space<vmem>>) attributes {dimension_semantics = [#tpu.dimension_semantics<parallel>, #tpu.dimension_semantics<parallel>], iteration_bounds = array<i64: 2, 1>, scalar_prefetch = 0 : i64, scratch_operands = 0 : i64, tpu.core_type = #tpu.core_type<tc>, window_params = [{transform_indices = @transform_0, window_bounds = array<i64: 64, 128>}, {transform_indices = @transform_1, window_bounds = array<i64: 128, 128>}, {transform_indices = @transform_2, window_bounds = array<i64: 1, 128>}, {transform_indices = @transform_3, window_bounds = array<i64: 1, 128>}, {transform_indices = @transform_4, window_bounds = array<i64: 64, 128>}]} {
    %c0 = arith.constant 0 : index
    %c0_0 = arith.constant 0 : index
    %0 = vector.load %arg2[%c0, %c0_0] : memref<64x128xbf16, #tpu.memory_space<vmem>>, vector<64x128xbf16>
    %c0_1 = arith.constant 0 : index
    %c0_2 = arith.constant 0 : index
    %1 = vector.load %arg3[%c0_1, %c0_2] : memref<128x128xbf16, #tpu.memory_space<vmem>>, vector<128x128xbf16>
    %cst = arith.constant dense<0.000000e+00> : vector<64x128xf32>
    %2 = tpu.matmul %0, %1, %cst {dimension_numbers = #tpu.dot_dimension_numbers<[1], [0], [0], [1], [0, 0, 1, 1], [], []>} : vector<64x128xbf16>, vector<128x128xbf16>, vector<64x128xf32> -> vector<64x128xf32>
    %c0_3 = arith.constant 0 : index
    %c0_4 = arith.constant 0 : index
    %3 = vector.load %arg4[%c0_3, %c0_4] : memref<1x128xf32, #tpu.memory_space<vmem>>, vector<1x128xf32>
    %4 = vector.broadcast %3 : vector<1x128xf32> to vector<64x128xf32>
    %5 = arith.mulf %2, %4 : vector<64x128xf32>
    %c0_5 = arith.constant 0 : index
    %c0_6 = arith.constant 0 : index
    %6 = vector.load %arg5[%c0_5, %c0_6] : memref<1x128xf32, #tpu.memory_space<vmem>>, vector<1x128xf32>
    %7 = vector.broadcast %6 : vector<1x128xf32> to vector<64x128xf32>
    %8 = arith.addf %5, %7 : vector<64x128xf32>
    %9 = arith.truncf %8 : vector<64x128xf32> to vector<64x128xbf16>
    %c0_7 = arith.constant 0 : index
    %c0_8 = arith.constant 0 : index
    %10 = vector.load %arg6[%c0_7, %c0_8] : memref<64x128xbf16, #tpu.memory_space<vmem>>, vector<64x128xbf16>
    tpu.vector_store %arg6[%c0_7, %c0_8], %9 {strides = array<i32>} : memref<64x128xbf16, #tpu.memory_space<vmem>>, vector<64x128xbf16>,
    return
  }
  func.func @transform_0(%arg0: i32, %arg1: i32) -> (i32, i32) {
    %c0_i32 = arith.constant 0 : i32
    %c0_i32_0 = arith.constant 0 : i32
    return %arg0, %c0_i32 : i32, i32
  }
  func.func @transform_1(%arg0: i32, %arg1: i32) -> (i32, i32) {
    %c0_i32 = arith.constant 0 : i32
    %c0_i32_0 = arith.constant 0 : i32
    return %c0_i32, %arg1 : i32, i32
  }
  func.func @transform_2(%arg0: i32, %arg1: i32) -> (i32, i32) {
    %c0_i32 = arith.constant 0 : i32
    %c0_i32_0 = arith.constant 0 : i32
    return %c0_i32, %arg1 : i32, i32
  }
  func.func @transform_3(%arg0: i32, %arg1: i32) -> (i32, i32) {
    %c0_i32 = arith.constant 0 : i32
    %c0_i32_0 = arith.constant 0 : i32
    return %c0_i32, %arg1 : i32, i32
  }
  func.func @transform_4(%arg0: i32, %arg1: i32) -> (i32, i32) {
    %c0_i32 = arith.constant 0 : i32
    return %arg0, %arg1 : i32, i32
  }
}

module attributes {stable_mosaic.version = 11 : i64} {
  func.func @_mm_bn_single_kernel(%arg0: i32, %arg1: i32, %arg2: memref<16x1152xbf16, #tpu.memory_space<vmem>>, %arg3: memref<1152x128xbf16, #tpu.memory_space<vmem>>, %arg4: memref<1x128xf32, #tpu.memory_space<vmem>>, %arg5: memref<1x128xf32, #tpu.memory_space<vmem>>, %arg6: memref<16x128xbf16, #tpu.memory_space<vmem>>) attributes {dimension_semantics = [#tpu.dimension_semantics<parallel>, #tpu.dimension_semantics<parallel>], iteration_bounds = array<i64: 2, 1>, scalar_prefetch = 0 : i64, scratch_operands = 0 : i64, tpu.core_type = #tpu.core_type<tc>, window_params = [{transform_indices = @transform_0, window_bounds = array<i64: 16, 1152>}, {transform_indices = @transform_1, window_bounds = array<i64: 1152, 128>}, {transform_indices = @transform_2, window_bounds = array<i64: 1, 128>}, {transform_indices = @transform_3, window_bounds = array<i64: 1, 128>}, {transform_indices = @transform_4, window_bounds = array<i64: 16, 128>}]} {
    %c0 = arith.constant 0 : index
    %c0_0 = arith.constant 0 : index
    %0 = vector.load %arg2[%c0, %c0_0] : memref<16x1152xbf16, #tpu.memory_space<vmem>>, vector<16x1152xbf16>
    %c0_1 = arith.constant 0 : index
    %c0_2 = arith.constant 0 : index
    %1 = vector.load %arg3[%c0_1, %c0_2] : memref<1152x128xbf16, #tpu.memory_space<vmem>>, vector<1152x128xbf16>
    %cst = arith.constant dense<0.000000e+00> : vector<16x128xf32>
    %2 = tpu.matmul %0, %1, %cst {dimension_numbers = #tpu.dot_dimension_numbers<[1], [0], [0], [1], [0, 0, 1, 1], [], []>} : vector<16x1152xbf16>, vector<1152x128xbf16>, vector<16x128xf32> -> vector<16x128xf32>
    %c0_3 = arith.constant 0 : index
    %c0_4 = arith.constant 0 : index
    %3 = vector.load %arg4[%c0_3, %c0_4] : memref<1x128xf32, #tpu.memory_space<vmem>>, vector<1x128xf32>
    %4 = vector.broadcast %3 : vector<1x128xf32> to vector<16x128xf32>
    %5 = arith.mulf %2, %4 : vector<16x128xf32>
    %c0_5 = arith.constant 0 : index
    %c0_6 = arith.constant 0 : index
    %6 = vector.load %arg5[%c0_5, %c0_6] : memref<1x128xf32, #tpu.memory_space<vmem>>, vector<1x128xf32>
    %7 = vector.broadcast %6 : vector<1x128xf32> to vector<16x128xf32>
    %8 = arith.addf %5, %7 : vector<16x128xf32>
    %cst_7 = arith.constant 0.000000e+00 : f32
    %9 = vector.broadcast %cst_7 : f32 to vector<16x128xf32>
    %10 = arith.maximumf %8, %9 : vector<16x128xf32>
    %11 = arith.truncf %10 : vector<16x128xf32> to vector<16x128xbf16>
    %c0_8 = arith.constant 0 : index
    %c0_9 = arith.constant 0 : index
    %12 = vector.load %arg6[%c0_8, %c0_9] : memref<16x128xbf16, #tpu.memory_space<vmem>>, vector<16x128xbf16>
    tpu.vector_store %arg6[%c0_8, %c0_9], %11 {strides = array<i32>} : memref<16x128xbf16, #tpu.memory_space<vmem>>, vector<16x128xbf16>,
    return
  }
  func.func @transform_0(%arg0: i32, %arg1: i32) -> (i32, i32) {
    %c0_i32 = arith.constant 0 : i32
    %c0_i32_0 = arith.constant 0 : i32
    return %arg0, %c0_i32 : i32, i32
  }
  func.func @transform_1(%arg0: i32, %arg1: i32) -> (i32, i32) {
    %c0_i32 = arith.constant 0 : i32
    %c0_i32_0 = arith.constant 0 : i32
    return %c0_i32, %arg1 : i32, i32
  }
  func.func @transform_2(%arg0: i32, %arg1: i32) -> (i32, i32) {
    %c0_i32 = arith.constant 0 : i32
    %c0_i32_0 = arith.constant 0 : i32
    return %c0_i32, %arg1 : i32, i32
  }
  func.func @transform_3(%arg0: i32, %arg1: i32) -> (i32, i32) {
    %c0_i32 = arith.constant 0 : i32
    %c0_i32_0 = arith.constant 0 : i32
    return %c0_i32, %arg1 : i32, i32
  }
  func.func @transform_4(%arg0: i32, %arg1: i32) -> (i32, i32) {
    %c0_i32 = arith.constant 0 : i32
    return %arg0, %arg1 : i32, i32
  }
}

module attributes {stable_mosaic.version = 11 : i64} {
  func.func @_mm_bn_single_kernel(%arg0: i32, %arg1: i32, %arg2: memref<16x128xbf16, #tpu.memory_space<vmem>>, %arg3: memref<128x128xbf16, #tpu.memory_space<vmem>>, %arg4: memref<1x128xf32, #tpu.memory_space<vmem>>, %arg5: memref<1x128xf32, #tpu.memory_space<vmem>>, %arg6: memref<16x128xbf16, #tpu.memory_space<vmem>>) attributes {dimension_semantics = [#tpu.dimension_semantics<parallel>, #tpu.dimension_semantics<parallel>], iteration_bounds = array<i64: 2, 1>, scalar_prefetch = 0 : i64, scratch_operands = 0 : i64, tpu.core_type = #tpu.core_type<tc>, window_params = [{transform_indices = @transform_0, window_bounds = array<i64: 16, 128>}, {transform_indices = @transform_1, window_bounds = array<i64: 128, 128>}, {transform_indices = @transform_2, window_bounds = array<i64: 1, 128>}, {transform_indices = @transform_3, window_bounds = array<i64: 1, 128>}, {transform_indices = @transform_4, window_bounds = array<i64: 16, 128>}]} {
    %c0 = arith.constant 0 : index
    %c0_0 = arith.constant 0 : index
    %0 = vector.load %arg2[%c0, %c0_0] : memref<16x128xbf16, #tpu.memory_space<vmem>>, vector<16x128xbf16>
    %c0_1 = arith.constant 0 : index
    %c0_2 = arith.constant 0 : index
    %1 = vector.load %arg3[%c0_1, %c0_2] : memref<128x128xbf16, #tpu.memory_space<vmem>>, vector<128x128xbf16>
    %cst = arith.constant dense<0.000000e+00> : vector<16x128xf32>
    %2 = tpu.matmul %0, %1, %cst {dimension_numbers = #tpu.dot_dimension_numbers<[1], [0], [0], [1], [0, 0, 1, 1], [], []>} : vector<16x128xbf16>, vector<128x128xbf16>, vector<16x128xf32> -> vector<16x128xf32>
    %c0_3 = arith.constant 0 : index
    %c0_4 = arith.constant 0 : index
    %3 = vector.load %arg4[%c0_3, %c0_4] : memref<1x128xf32, #tpu.memory_space<vmem>>, vector<1x128xf32>
    %4 = vector.broadcast %3 : vector<1x128xf32> to vector<16x128xf32>
    %5 = arith.mulf %2, %4 : vector<16x128xf32>
    %c0_5 = arith.constant 0 : index
    %c0_6 = arith.constant 0 : index
    %6 = vector.load %arg5[%c0_5, %c0_6] : memref<1x128xf32, #tpu.memory_space<vmem>>, vector<1x128xf32>
    %7 = vector.broadcast %6 : vector<1x128xf32> to vector<16x128xf32>
    %8 = arith.addf %5, %7 : vector<16x128xf32>
    %9 = arith.truncf %8 : vector<16x128xf32> to vector<16x128xbf16>
    %c0_7 = arith.constant 0 : index
    %c0_8 = arith.constant 0 : index
    %10 = vector.load %arg6[%c0_7, %c0_8] : memref<16x128xbf16, #tpu.memory_space<vmem>>, vector<16x128xbf16>
    tpu.vector_store %arg6[%c0_7, %c0_8], %9 {strides = array<i32>} : memref<16x128xbf16, #tpu.memory_space<vmem>>, vector<16x128xbf16>,
    return
  }
  func.func @transform_0(%arg0: i32, %arg1: i32) -> (i32, i32) {
    %c0_i32 = arith.constant 0 : i32
    %c0_i32_0 = arith.constant 0 : i32
    return %arg0, %c0_i32 : i32, i32
  }
  func.func @transform_1(%arg0: i32, %arg1: i32) -> (i32, i32) {
    %c0_i32 = arith.constant 0 : i32
    %c0_i32_0 = arith.constant 0 : i32
    return %c0_i32, %arg1 : i32, i32
  }
  func.func @transform_2(%arg0: i32, %arg1: i32) -> (i32, i32) {
    %c0_i32 = arith.constant 0 : i32
    %c0_i32_0 = arith.constant 0 : i32
    return %c0_i32, %arg1 : i32, i32
  }
  func.func @transform_3(%arg0: i32, %arg1: i32) -> (i32, i32) {
    %c0_i32 = arith.constant 0 : i32
    %c0_i32_0 = arith.constant 0 : i32
    return %c0_i32, %arg1 : i32, i32
  }
  func.func @transform_4(%arg0: i32, %arg1: i32) -> (i32, i32) {
    %c0_i32 = arith.constant 0 : i32
    return %arg0, %arg1 : i32, i32
  }
}

module attributes {stable_mosaic.version = 11 : i64} {
  func.func @_mm_bn_single_kernel(%arg0: i32, %arg1: i32, %arg2: memref<16x128xbf16, #tpu.memory_space<vmem>>, %arg3: memref<128x128xbf16, #tpu.memory_space<vmem>>, %arg4: memref<1x128xf32, #tpu.memory_space<vmem>>, %arg5: memref<1x128xf32, #tpu.memory_space<vmem>>, %arg6: memref<16x128xbf16, #tpu.memory_space<vmem>>, %arg7: memref<16x128xbf16, #tpu.memory_space<vmem>>) attributes {dimension_semantics = [#tpu.dimension_semantics<parallel>, #tpu.dimension_semantics<parallel>], iteration_bounds = array<i64: 2, 1>, scalar_prefetch = 0 : i64, scratch_operands = 0 : i64, tpu.core_type = #tpu.core_type<tc>, window_params = [{transform_indices = @transform_0, window_bounds = array<i64: 16, 128>}, {transform_indices = @transform_1, window_bounds = array<i64: 128, 128>}, {transform_indices = @transform_2, window_bounds = array<i64: 1, 128>}, {transform_indices = @transform_3, window_bounds = array<i64: 1, 128>}, {transform_indices = @transform_4, window_bounds = array<i64: 16, 128>}, {transform_indices = @transform_5, window_bounds = array<i64: 16, 128>}]} {
    %c0 = arith.constant 0 : index
    %c0_0 = arith.constant 0 : index
    %0 = vector.load %arg2[%c0, %c0_0] : memref<16x128xbf16, #tpu.memory_space<vmem>>, vector<16x128xbf16>
    %c0_1 = arith.constant 0 : index
    %c0_2 = arith.constant 0 : index
    %1 = vector.load %arg3[%c0_1, %c0_2] : memref<128x128xbf16, #tpu.memory_space<vmem>>, vector<128x128xbf16>
    %cst = arith.constant dense<0.000000e+00> : vector<16x128xf32>
    %2 = tpu.matmul %0, %1, %cst {dimension_numbers = #tpu.dot_dimension_numbers<[1], [0], [0], [1], [0, 0, 1, 1], [], []>} : vector<16x128xbf16>, vector<128x128xbf16>, vector<16x128xf32> -> vector<16x128xf32>
    %c0_3 = arith.constant 0 : index
    %c0_4 = arith.constant 0 : index
    %3 = vector.load %arg4[%c0_3, %c0_4] : memref<1x128xf32, #tpu.memory_space<vmem>>, vector<1x128xf32>
    %4 = vector.broadcast %3 : vector<1x128xf32> to vector<16x128xf32>
    %5 = arith.mulf %2, %4 : vector<16x128xf32>
    %c0_5 = arith.constant 0 : index
    %c0_6 = arith.constant 0 : index
    %6 = vector.load %arg5[%c0_5, %c0_6] : memref<1x128xf32, #tpu.memory_space<vmem>>, vector<1x128xf32>
    %7 = vector.broadcast %6 : vector<1x128xf32> to vector<16x128xf32>
    %8 = arith.addf %5, %7 : vector<16x128xf32>
    %c0_7 = arith.constant 0 : index
    %c0_8 = arith.constant 0 : index
    %9 = vector.load %arg6[%c0_7, %c0_8] : memref<16x128xbf16, #tpu.memory_space<vmem>>, vector<16x128xbf16>
    %10 = arith.extf %9 : vector<16x128xbf16> to vector<16x128xf32>
    %11 = arith.addf %8, %10 : vector<16x128xf32>
    %cst_9 = arith.constant 0.000000e+00 : f32
    %12 = vector.broadcast %cst_9 : f32 to vector<16x128xf32>
    %13 = arith.maximumf %11, %12 : vector<16x128xf32>
    %14 = arith.truncf %13 : vector<16x128xf32> to vector<16x128xbf16>
    %c0_10 = arith.constant 0 : index
    %c0_11 = arith.constant 0 : index
    %15 = vector.load %arg7[%c0_10, %c0_11] : memref<16x128xbf16, #tpu.memory_space<vmem>>, vector<16x128xbf16>
    tpu.vector_store %arg7[%c0_10, %c0_11], %14 {strides = array<i32>} : memref<16x128xbf16, #tpu.memory_space<vmem>>, vector<16x128xbf16>,
    return
  }
  func.func @transform_0(%arg0: i32, %arg1: i32) -> (i32, i32) {
    %c0_i32 = arith.constant 0 : i32
    %c0_i32_0 = arith.constant 0 : i32
    return %arg0, %c0_i32 : i32, i32
  }
  func.func @transform_1(%arg0: i32, %arg1: i32) -> (i32, i32) {
    %c0_i32 = arith.constant 0 : i32
    %c0_i32_0 = arith.constant 0 : i32
    return %c0_i32, %arg1 : i32, i32
  }
  func.func @transform_2(%arg0: i32, %arg1: i32) -> (i32, i32) {
    %c0_i32 = arith.constant 0 : i32
    %c0_i32_0 = arith.constant 0 : i32
    return %c0_i32, %arg1 : i32, i32
  }
  func.func @transform_3(%arg0: i32, %arg1: i32) -> (i32, i32) {
    %c0_i32 = arith.constant 0 : i32
    %c0_i32_0 = arith.constant 0 : i32
    return %c0_i32, %arg1 : i32, i32
  }
  func.func @transform_4(%arg0: i32, %arg1: i32) -> (i32, i32) {
    %c0_i32 = arith.constant 0 : i32
    return %arg0, %arg1 : i32, i32
  }
  func.func @transform_5(%arg0: i32, %arg1: i32) -> (i32, i32) {
    %c0_i32 = arith.constant 0 : i32
    return %arg0, %arg1 : i32, i32
  }
}

module attributes {stable_mosaic.version = 11 : i64} {
  func.func @_mm_bn_single_kernel(%arg0: i32, %arg1: i32, %arg2: memref<16x128xbf16, #tpu.memory_space<vmem>>, %arg3: memref<128x128xbf16, #tpu.memory_space<vmem>>, %arg4: memref<1x128xf32, #tpu.memory_space<vmem>>, %arg5: memref<1x128xf32, #tpu.memory_space<vmem>>, %arg6: memref<16x128xbf16, #tpu.memory_space<vmem>>) attributes {dimension_semantics = [#tpu.dimension_semantics<parallel>, #tpu.dimension_semantics<parallel>], iteration_bounds = array<i64: 2, 1>, scalar_prefetch = 0 : i64, scratch_operands = 0 : i64, tpu.core_type = #tpu.core_type<tc>, window_params = [{transform_indices = @transform_0, window_bounds = array<i64: 16, 128>}, {transform_indices = @transform_1, window_bounds = array<i64: 128, 128>}, {transform_indices = @transform_2, window_bounds = array<i64: 1, 128>}, {transform_indices = @transform_3, window_bounds = array<i64: 1, 128>}, {transform_indices = @transform_4, window_bounds = array<i64: 16, 128>}]} {
    %c0 = arith.constant 0 : index
    %c0_0 = arith.constant 0 : index
    %0 = vector.load %arg2[%c0, %c0_0] : memref<16x128xbf16, #tpu.memory_space<vmem>>, vector<16x128xbf16>
    %c0_1 = arith.constant 0 : index
    %c0_2 = arith.constant 0 : index
    %1 = vector.load %arg3[%c0_1, %c0_2] : memref<128x128xbf16, #tpu.memory_space<vmem>>, vector<128x128xbf16>
    %cst = arith.constant dense<0.000000e+00> : vector<16x128xf32>
    %2 = tpu.matmul %0, %1, %cst {dimension_numbers = #tpu.dot_dimension_numbers<[1], [0], [0], [1], [0, 0, 1, 1], [], []>} : vector<16x128xbf16>, vector<128x128xbf16>, vector<16x128xf32> -> vector<16x128xf32>
    %c0_3 = arith.constant 0 : index
    %c0_4 = arith.constant 0 : index
    %3 = vector.load %arg4[%c0_3, %c0_4] : memref<1x128xf32, #tpu.memory_space<vmem>>, vector<1x128xf32>
    %4 = vector.broadcast %3 : vector<1x128xf32> to vector<16x128xf32>
    %5 = arith.mulf %2, %4 : vector<16x128xf32>
    %c0_5 = arith.constant 0 : index
    %c0_6 = arith.constant 0 : index
    %6 = vector.load %arg5[%c0_5, %c0_6] : memref<1x128xf32, #tpu.memory_space<vmem>>, vector<1x128xf32>
    %7 = vector.broadcast %6 : vector<1x128xf32> to vector<16x128xf32>
    %8 = arith.addf %5, %7 : vector<16x128xf32>
    %cst_7 = arith.constant 0.000000e+00 : f32
    %9 = vector.broadcast %cst_7 : f32 to vector<16x128xf32>
    %10 = arith.maximumf %8, %9 : vector<16x128xf32>
    %11 = arith.truncf %10 : vector<16x128xf32> to vector<16x128xbf16>
    %c0_8 = arith.constant 0 : index
    %c0_9 = arith.constant 0 : index
    %12 = vector.load %arg6[%c0_8, %c0_9] : memref<16x128xbf16, #tpu.memory_space<vmem>>, vector<16x128xbf16>
    tpu.vector_store %arg6[%c0_8, %c0_9], %11 {strides = array<i32>} : memref<16x128xbf16, #tpu.memory_space<vmem>>, vector<16x128xbf16>,
    return
  }
  func.func @transform_0(%arg0: i32, %arg1: i32) -> (i32, i32) {
    %c0_i32 = arith.constant 0 : i32
    %c0_i32_0 = arith.constant 0 : i32
    return %arg0, %c0_i32 : i32, i32
  }
  func.func @transform_1(%arg0: i32, %arg1: i32) -> (i32, i32) {
    %c0_i32 = arith.constant 0 : i32
    %c0_i32_0 = arith.constant 0 : i32
    return %c0_i32, %arg1 : i32, i32
  }
  func.func @transform_2(%arg0: i32, %arg1: i32) -> (i32, i32) {
    %c0_i32 = arith.constant 0 : i32
    %c0_i32_0 = arith.constant 0 : i32
    return %c0_i32, %arg1 : i32, i32
  }
  func.func @transform_3(%arg0: i32, %arg1: i32) -> (i32, i32) {
    %c0_i32 = arith.constant 0 : i32
    %c0_i32_0 = arith.constant 0 : i32
    return %c0_i32, %arg1 : i32, i32
  }
  func.func @transform_4(%arg0: i32, %arg1: i32) -> (i32, i32) {
    %c0_i32 = arith.constant 0 : i32
    return %arg0, %arg1 : i32, i32
  }
}

module attributes {stable_mosaic.version = 11 : i64} {
  func.func @_mm_bn_single_kernel(%arg0: i32, %arg1: i32, %arg2: memref<8x128xbf16, #tpu.memory_space<vmem>>, %arg3: memref<128x128xbf16, #tpu.memory_space<vmem>>, %arg4: memref<1x128xf32, #tpu.memory_space<vmem>>, %arg5: memref<1x128xf32, #tpu.memory_space<vmem>>, %arg6: memref<8x128xbf16, #tpu.memory_space<vmem>>) attributes {dimension_semantics = [#tpu.dimension_semantics<parallel>, #tpu.dimension_semantics<parallel>], iteration_bounds = array<i64: 1, 1>, scalar_prefetch = 0 : i64, scratch_operands = 0 : i64, tpu.core_type = #tpu.core_type<tc>, window_params = [{transform_indices = @transform_0, window_bounds = array<i64: 8, 128>}, {transform_indices = @transform_1, window_bounds = array<i64: 128, 128>}, {transform_indices = @transform_2, window_bounds = array<i64: 1, 128>}, {transform_indices = @transform_3, window_bounds = array<i64: 1, 128>}, {transform_indices = @transform_4, window_bounds = array<i64: 8, 128>}]} {
    %c0 = arith.constant 0 : index
    %c0_0 = arith.constant 0 : index
    %0 = vector.load %arg2[%c0, %c0_0] : memref<8x128xbf16, #tpu.memory_space<vmem>>, vector<8x128xbf16>
    %c0_1 = arith.constant 0 : index
    %c0_2 = arith.constant 0 : index
    %1 = vector.load %arg3[%c0_1, %c0_2] : memref<128x128xbf16, #tpu.memory_space<vmem>>, vector<128x128xbf16>
    %cst = arith.constant dense<0.000000e+00> : vector<8x128xf32>
    %2 = tpu.matmul %0, %1, %cst {dimension_numbers = #tpu.dot_dimension_numbers<[1], [0], [0], [1], [0, 0, 1, 1], [], []>} : vector<8x128xbf16>, vector<128x128xbf16>, vector<8x128xf32> -> vector<8x128xf32>
    %c0_3 = arith.constant 0 : index
    %c0_4 = arith.constant 0 : index
    %3 = vector.load %arg4[%c0_3, %c0_4] : memref<1x128xf32, #tpu.memory_space<vmem>>, vector<1x128xf32>
    %4 = vector.broadcast %3 : vector<1x128xf32> to vector<8x128xf32>
    %5 = arith.mulf %2, %4 : vector<8x128xf32>
    %c0_5 = arith.constant 0 : index
    %c0_6 = arith.constant 0 : index
    %6 = vector.load %arg5[%c0_5, %c0_6] : memref<1x128xf32, #tpu.memory_space<vmem>>, vector<1x128xf32>
    %7 = vector.broadcast %6 : vector<1x128xf32> to vector<8x128xf32>
    %8 = arith.addf %5, %7 : vector<8x128xf32>
    %9 = arith.truncf %8 : vector<8x128xf32> to vector<8x128xbf16>
    %c0_7 = arith.constant 0 : index
    %c0_8 = arith.constant 0 : index
    %10 = vector.load %arg6[%c0_7, %c0_8] : memref<8x128xbf16, #tpu.memory_space<vmem>>, vector<8x128xbf16>
    tpu.vector_store %arg6[%c0_7, %c0_8], %9 {strides = array<i32>} : memref<8x128xbf16, #tpu.memory_space<vmem>>, vector<8x128xbf16>,
    return
  }
  func.func @transform_0(%arg0: i32, %arg1: i32) -> (i32, i32) {
    %c0_i32 = arith.constant 0 : i32
    %c0_i32_0 = arith.constant 0 : i32
    return %arg0, %c0_i32 : i32, i32
  }
  func.func @transform_1(%arg0: i32, %arg1: i32) -> (i32, i32) {
    %c0_i32 = arith.constant 0 : i32
    %c0_i32_0 = arith.constant 0 : i32
    return %c0_i32, %arg1 : i32, i32
  }
  func.func @transform_2(%arg0: i32, %arg1: i32) -> (i32, i32) {
    %c0_i32 = arith.constant 0 : i32
    %c0_i32_0 = arith.constant 0 : i32
    return %c0_i32, %arg1 : i32, i32
  }
  func.func @transform_3(%arg0: i32, %arg1: i32) -> (i32, i32) {
    %c0_i32 = arith.constant 0 : i32
    %c0_i32_0 = arith.constant 0 : i32
    return %c0_i32, %arg1 : i32, i32
  }
  func.func @transform_4(%arg0: i32, %arg1: i32) -> (i32, i32) {
    %c0_i32 = arith.constant 0 : i32
    return %arg0, %arg1 : i32, i32
  }
}

module attributes {stable_mosaic.version = 11 : i64} {
  func.func @_mm_bn_single_kernel(%arg0: i32, %arg1: i32, %arg2: memref<8x1152xbf16, #tpu.memory_space<vmem>>, %arg3: memref<1152x128xbf16, #tpu.memory_space<vmem>>, %arg4: memref<1x128xf32, #tpu.memory_space<vmem>>, %arg5: memref<1x128xf32, #tpu.memory_space<vmem>>, %arg6: memref<8x128xbf16, #tpu.memory_space<vmem>>) attributes {dimension_semantics = [#tpu.dimension_semantics<parallel>, #tpu.dimension_semantics<parallel>], iteration_bounds = array<i64: 1, 1>, scalar_prefetch = 0 : i64, scratch_operands = 0 : i64, tpu.core_type = #tpu.core_type<tc>, window_params = [{transform_indices = @transform_0, window_bounds = array<i64: 8, 1152>}, {transform_indices = @transform_1, window_bounds = array<i64: 1152, 128>}, {transform_indices = @transform_2, window_bounds = array<i64: 1, 128>}, {transform_indices = @transform_3, window_bounds = array<i64: 1, 128>}, {transform_indices = @transform_4, window_bounds = array<i64: 8, 128>}]} {
    %c0 = arith.constant 0 : index
    %c0_0 = arith.constant 0 : index
    %0 = vector.load %arg2[%c0, %c0_0] : memref<8x1152xbf16, #tpu.memory_space<vmem>>, vector<8x1152xbf16>
    %c0_1 = arith.constant 0 : index
    %c0_2 = arith.constant 0 : index
    %1 = vector.load %arg3[%c0_1, %c0_2] : memref<1152x128xbf16, #tpu.memory_space<vmem>>, vector<1152x128xbf16>
    %cst = arith.constant dense<0.000000e+00> : vector<8x128xf32>
    %2 = tpu.matmul %0, %1, %cst {dimension_numbers = #tpu.dot_dimension_numbers<[1], [0], [0], [1], [0, 0, 1, 1], [], []>} : vector<8x1152xbf16>, vector<1152x128xbf16>, vector<8x128xf32> -> vector<8x128xf32>
    %c0_3 = arith.constant 0 : index
    %c0_4 = arith.constant 0 : index
    %3 = vector.load %arg4[%c0_3, %c0_4] : memref<1x128xf32, #tpu.memory_space<vmem>>, vector<1x128xf32>
    %4 = vector.broadcast %3 : vector<1x128xf32> to vector<8x128xf32>
    %5 = arith.mulf %2, %4 : vector<8x128xf32>
    %c0_5 = arith.constant 0 : index
    %c0_6 = arith.constant 0 : index
    %6 = vector.load %arg5[%c0_5, %c0_6] : memref<1x128xf32, #tpu.memory_space<vmem>>, vector<1x128xf32>
    %7 = vector.broadcast %6 : vector<1x128xf32> to vector<8x128xf32>
    %8 = arith.addf %5, %7 : vector<8x128xf32>
    %cst_7 = arith.constant 0.000000e+00 : f32
    %9 = vector.broadcast %cst_7 : f32 to vector<8x128xf32>
    %10 = arith.maximumf %8, %9 : vector<8x128xf32>
    %11 = arith.truncf %10 : vector<8x128xf32> to vector<8x128xbf16>
    %c0_8 = arith.constant 0 : index
    %c0_9 = arith.constant 0 : index
    %12 = vector.load %arg6[%c0_8, %c0_9] : memref<8x128xbf16, #tpu.memory_space<vmem>>, vector<8x128xbf16>
    tpu.vector_store %arg6[%c0_8, %c0_9], %11 {strides = array<i32>} : memref<8x128xbf16, #tpu.memory_space<vmem>>, vector<8x128xbf16>,
    return
  }
  func.func @transform_0(%arg0: i32, %arg1: i32) -> (i32, i32) {
    %c0_i32 = arith.constant 0 : i32
    %c0_i32_0 = arith.constant 0 : i32
    return %arg0, %c0_i32 : i32, i32
  }
  func.func @transform_1(%arg0: i32, %arg1: i32) -> (i32, i32) {
    %c0_i32 = arith.constant 0 : i32
    %c0_i32_0 = arith.constant 0 : i32
    return %c0_i32, %arg1 : i32, i32
  }
  func.func @transform_2(%arg0: i32, %arg1: i32) -> (i32, i32) {
    %c0_i32 = arith.constant 0 : i32
    %c0_i32_0 = arith.constant 0 : i32
    return %c0_i32, %arg1 : i32, i32
  }
  func.func @transform_3(%arg0: i32, %arg1: i32) -> (i32, i32) {
    %c0_i32 = arith.constant 0 : i32
    %c0_i32_0 = arith.constant 0 : i32
    return %c0_i32, %arg1 : i32, i32
  }
  func.func @transform_4(%arg0: i32, %arg1: i32) -> (i32, i32) {
    %c0_i32 = arith.constant 0 : i32
    return %arg0, %arg1 : i32, i32
  }
}

module attributes {stable_mosaic.version = 11 : i64} {
  func.func @_mm_bn_single_kernel(%arg0: i32, %arg1: i32, %arg2: memref<8x128xbf16, #tpu.memory_space<vmem>>, %arg3: memref<128x128xbf16, #tpu.memory_space<vmem>>, %arg4: memref<1x128xf32, #tpu.memory_space<vmem>>, %arg5: memref<1x128xf32, #tpu.memory_space<vmem>>, %arg6: memref<8x128xbf16, #tpu.memory_space<vmem>>, %arg7: memref<8x128xbf16, #tpu.memory_space<vmem>>) attributes {dimension_semantics = [#tpu.dimension_semantics<parallel>, #tpu.dimension_semantics<parallel>], iteration_bounds = array<i64: 1, 1>, scalar_prefetch = 0 : i64, scratch_operands = 0 : i64, tpu.core_type = #tpu.core_type<tc>, window_params = [{transform_indices = @transform_0, window_bounds = array<i64: 8, 128>}, {transform_indices = @transform_1, window_bounds = array<i64: 128, 128>}, {transform_indices = @transform_2, window_bounds = array<i64: 1, 128>}, {transform_indices = @transform_3, window_bounds = array<i64: 1, 128>}, {transform_indices = @transform_4, window_bounds = array<i64: 8, 128>}, {transform_indices = @transform_5, window_bounds = array<i64: 8, 128>}]} {
    %c0 = arith.constant 0 : index
    %c0_0 = arith.constant 0 : index
    %0 = vector.load %arg2[%c0, %c0_0] : memref<8x128xbf16, #tpu.memory_space<vmem>>, vector<8x128xbf16>
    %c0_1 = arith.constant 0 : index
    %c0_2 = arith.constant 0 : index
    %1 = vector.load %arg3[%c0_1, %c0_2] : memref<128x128xbf16, #tpu.memory_space<vmem>>, vector<128x128xbf16>
    %cst = arith.constant dense<0.000000e+00> : vector<8x128xf32>
    %2 = tpu.matmul %0, %1, %cst {dimension_numbers = #tpu.dot_dimension_numbers<[1], [0], [0], [1], [0, 0, 1, 1], [], []>} : vector<8x128xbf16>, vector<128x128xbf16>, vector<8x128xf32> -> vector<8x128xf32>
    %c0_3 = arith.constant 0 : index
    %c0_4 = arith.constant 0 : index
    %3 = vector.load %arg4[%c0_3, %c0_4] : memref<1x128xf32, #tpu.memory_space<vmem>>, vector<1x128xf32>
    %4 = vector.broadcast %3 : vector<1x128xf32> to vector<8x128xf32>
    %5 = arith.mulf %2, %4 : vector<8x128xf32>
    %c0_5 = arith.constant 0 : index
    %c0_6 = arith.constant 0 : index
    %6 = vector.load %arg5[%c0_5, %c0_6] : memref<1x128xf32, #tpu.memory_space<vmem>>, vector<1x128xf32>
    %7 = vector.broadcast %6 : vector<1x128xf32> to vector<8x128xf32>
    %8 = arith.addf %5, %7 : vector<8x128xf32>
    %c0_7 = arith.constant 0 : index
    %c0_8 = arith.constant 0 : index
    %9 = vector.load %arg6[%c0_7, %c0_8] : memref<8x128xbf16, #tpu.memory_space<vmem>>, vector<8x128xbf16>
    %10 = arith.extf %9 : vector<8x128xbf16> to vector<8x128xf32>
    %11 = arith.addf %8, %10 : vector<8x128xf32>
    %cst_9 = arith.constant 0.000000e+00 : f32
    %12 = vector.broadcast %cst_9 : f32 to vector<8x128xf32>
    %13 = arith.maximumf %11, %12 : vector<8x128xf32>
    %14 = arith.truncf %13 : vector<8x128xf32> to vector<8x128xbf16>
    %c0_10 = arith.constant 0 : index
    %c0_11 = arith.constant 0 : index
    %15 = vector.load %arg7[%c0_10, %c0_11] : memref<8x128xbf16, #tpu.memory_space<vmem>>, vector<8x128xbf16>
    tpu.vector_store %arg7[%c0_10, %c0_11], %14 {strides = array<i32>} : memref<8x128xbf16, #tpu.memory_space<vmem>>, vector<8x128xbf16>,
    return
  }
  func.func @transform_0(%arg0: i32, %arg1: i32) -> (i32, i32) {
    %c0_i32 = arith.constant 0 : i32
    %c0_i32_0 = arith.constant 0 : i32
    return %arg0, %c0_i32 : i32, i32
  }
  func.func @transform_1(%arg0: i32, %arg1: i32) -> (i32, i32) {
    %c0_i32 = arith.constant 0 : i32
    %c0_i32_0 = arith.constant 0 : i32
    return %c0_i32, %arg1 : i32, i32
  }
  func.func @transform_2(%arg0: i32, %arg1: i32) -> (i32, i32) {
    %c0_i32 = arith.constant 0 : i32
    %c0_i32_0 = arith.constant 0 : i32
    return %c0_i32, %arg1 : i32, i32
  }
  func.func @transform_3(%arg0: i32, %arg1: i32) -> (i32, i32) {
    %c0_i32 = arith.constant 0 : i32
    %c0_i32_0 = arith.constant 0 : i32
    return %c0_i32, %arg1 : i32, i32
  }
  func.func @transform_4(%arg0: i32, %arg1: i32) -> (i32, i32) {
    %c0_i32 = arith.constant 0 : i32
    return %arg0, %arg1 : i32, i32
  }
  func.func @transform_5(%arg0: i32, %arg1: i32) -> (i32, i32) {
    %c0_i32 = arith.constant 0 : i32
    return %arg0, %arg1 : i32, i32
  }
}

module attributes {stable_mosaic.version = 11 : i64} {
  func.func @_mm_bn_single_kernel(%arg0: i32, %arg1: i32, %arg2: memref<8x128xbf16, #tpu.memory_space<vmem>>, %arg3: memref<128x128xbf16, #tpu.memory_space<vmem>>, %arg4: memref<1x128xf32, #tpu.memory_space<vmem>>, %arg5: memref<1x128xf32, #tpu.memory_space<vmem>>, %arg6: memref<8x128xbf16, #tpu.memory_space<vmem>>) attributes {dimension_semantics = [#tpu.dimension_semantics<parallel>, #tpu.dimension_semantics<parallel>], iteration_bounds = array<i64: 1, 1>, scalar_prefetch = 0 : i64, scratch_operands = 0 : i64, tpu.core_type = #tpu.core_type<tc>, window_params = [{transform_indices = @transform_0, window_bounds = array<i64: 8, 128>}, {transform_indices = @transform_1, window_bounds = array<i64: 128, 128>}, {transform_indices = @transform_2, window_bounds = array<i64: 1, 128>}, {transform_indices = @transform_3, window_bounds = array<i64: 1, 128>}, {transform_indices = @transform_4, window_bounds = array<i64: 8, 128>}]} {
    %c0 = arith.constant 0 : index
    %c0_0 = arith.constant 0 : index
    %0 = vector.load %arg2[%c0, %c0_0] : memref<8x128xbf16, #tpu.memory_space<vmem>>, vector<8x128xbf16>
    %c0_1 = arith.constant 0 : index
    %c0_2 = arith.constant 0 : index
    %1 = vector.load %arg3[%c0_1, %c0_2] : memref<128x128xbf16, #tpu.memory_space<vmem>>, vector<128x128xbf16>
    %cst = arith.constant dense<0.000000e+00> : vector<8x128xf32>
    %2 = tpu.matmul %0, %1, %cst {dimension_numbers = #tpu.dot_dimension_numbers<[1], [0], [0], [1], [0, 0, 1, 1], [], []>} : vector<8x128xbf16>, vector<128x128xbf16>, vector<8x128xf32> -> vector<8x128xf32>
    %c0_3 = arith.constant 0 : index
    %c0_4 = arith.constant 0 : index
    %3 = vector.load %arg4[%c0_3, %c0_4] : memref<1x128xf32, #tpu.memory_space<vmem>>, vector<1x128xf32>
    %4 = vector.broadcast %3 : vector<1x128xf32> to vector<8x128xf32>
    %5 = arith.mulf %2, %4 : vector<8x128xf32>
    %c0_5 = arith.constant 0 : index
    %c0_6 = arith.constant 0 : index
    %6 = vector.load %arg5[%c0_5, %c0_6] : memref<1x128xf32, #tpu.memory_space<vmem>>, vector<1x128xf32>
    %7 = vector.broadcast %6 : vector<1x128xf32> to vector<8x128xf32>
    %8 = arith.addf %5, %7 : vector<8x128xf32>
    %cst_7 = arith.constant 0.000000e+00 : f32
    %9 = vector.broadcast %cst_7 : f32 to vector<8x128xf32>
    %10 = arith.maximumf %8, %9 : vector<8x128xf32>
    %11 = arith.truncf %10 : vector<8x128xf32> to vector<8x128xbf16>
    %c0_8 = arith.constant 0 : index
    %c0_9 = arith.constant 0 : index
    %12 = vector.load %arg6[%c0_8, %c0_9] : memref<8x128xbf16, #tpu.memory_space<vmem>>, vector<8x128xbf16>
    tpu.vector_store %arg6[%c0_8, %c0_9], %11 {strides = array<i32>} : memref<8x128xbf16, #tpu.memory_space<vmem>>, vector<8x128xbf16>,
    return
  }
  func.func @transform_0(%arg0: i32, %arg1: i32) -> (i32, i32) {
    %c0_i32 = arith.constant 0 : i32
    %c0_i32_0 = arith.constant 0 : i32
    return %arg0, %c0_i32 : i32, i32
  }
  func.func @transform_1(%arg0: i32, %arg1: i32) -> (i32, i32) {
    %c0_i32 = arith.constant 0 : i32
    %c0_i32_0 = arith.constant 0 : i32
    return %c0_i32, %arg1 : i32, i32
  }
  func.func @transform_2(%arg0: i32, %arg1: i32) -> (i32, i32) {
    %c0_i32 = arith.constant 0 : i32
    %c0_i32_0 = arith.constant 0 : i32
    return %c0_i32, %arg1 : i32, i32
  }
  func.func @transform_3(%arg0: i32, %arg1: i32) -> (i32, i32) {
    %c0_i32 = arith.constant 0 : i32
    %c0_i32_0 = arith.constant 0 : i32
    return %c0_i32, %arg1 : i32, i32
  }
  func.func @transform_4(%arg0: i32, %arg1: i32) -> (i32, i32) {
    %c0_i32 = arith.constant 0 : i32
    return %arg0, %arg1 : i32, i32
  }
}

module attributes {stable_mosaic.version = 11 : i64} {
  func.func @_conv_taps_kernel(%arg0: i32, %arg1: i32, %arg2: memref<1x18x128xbf16, #tpu.memory_space<vmem>>, %arg3: memref<9x128x128xbf16, #tpu.memory_space<vmem>>, %arg4: memref<1x128xf32, #tpu.memory_space<vmem>>, %arg5: memref<1x128xf32, #tpu.memory_space<vmem>>, %arg6: memref<1x8x128xbf16, #tpu.memory_space<vmem>>, %arg7: memref<8x128xf32, #tpu.memory_space<vmem>>) attributes {dimension_semantics = [#tpu.dimension_semantics<parallel>, #tpu.dimension_semantics<parallel>], iteration_bounds = array<i64: 2, 1>, scalar_prefetch = 0 : i64, scratch_operands = 1 : i64, tpu.core_type = #tpu.core_type<tc>, window_params = [{transform_indices = @transform_0, window_bounds = array<i64: 1, 18, 128>}, {transform_indices = @transform_1, window_bounds = array<i64: 9, 128, 128>}, {transform_indices = @transform_2, window_bounds = array<i64: 1, 128>}, {transform_indices = @transform_3, window_bounds = array<i64: 1, 128>}, {transform_indices = @transform_4, window_bounds = array<i64: 1, 8, 128>}]} {
    %c0 = arith.constant 0 : index
    %c0_0 = arith.constant 0 : index
    %c0_1 = arith.constant 0 : index
    %0 = vector.load %arg2[%c0, %c0_0, %c0_1] : memref<1x18x128xbf16, #tpu.memory_space<vmem>>, vector<1x8x128xbf16>
    %1 = vector.shape_cast %0 : vector<1x8x128xbf16> to vector<8x128xbf16>
    %c0_2 = arith.constant 0 : index
    %c0_3 = arith.constant 0 : index
    %c0_4 = arith.constant 0 : index
    %2 = vector.load %arg3[%c0_2, %c0_3, %c0_4] : memref<9x128x128xbf16, #tpu.memory_space<vmem>>, vector<1x128x128xbf16>
    %3 = vector.shape_cast %2 : vector<1x128x128xbf16> to vector<128x128xbf16>
    %cst = arith.constant dense<0.000000e+00> : vector<8x128xf32>
    %4 = tpu.matmul %1, %3, %cst {dimension_numbers = #tpu.dot_dimension_numbers<[1], [0], [0], [1], [0, 0, 1, 1], [], []>} : vector<8x128xbf16>, vector<128x128xbf16>, vector<8x128xf32> -> vector<8x128xf32>
    %c0_5 = arith.constant 0 : index
    %c0_6 = arith.constant 0 : index
    %5 = vector.load %arg7[%c0_5, %c0_6] : memref<8x128xf32, #tpu.memory_space<vmem>>, vector<8x128xf32>
    tpu.vector_store %arg7[%c0_5, %c0_6], %4 {strides = array<i32>} : memref<8x128xf32, #tpu.memory_space<vmem>>, vector<8x128xf32>,
    %c0_7 = arith.constant 0 : index
    %c1 = arith.constant 1 : index
    %c0_8 = arith.constant 0 : index
    %6 = vector.load %arg2[%c0_7, %c1, %c0_8] : memref<1x18x128xbf16, #tpu.memory_space<vmem>>, vector<1x8x128xbf16>
    %7 = vector.shape_cast %6 : vector<1x8x128xbf16> to vector<8x128xbf16>
    %c1_9 = arith.constant 1 : index
    %c0_10 = arith.constant 0 : index
    %c0_11 = arith.constant 0 : index
    %8 = vector.load %arg3[%c1_9, %c0_10, %c0_11] : memref<9x128x128xbf16, #tpu.memory_space<vmem>>, vector<1x128x128xbf16>
    %9 = vector.shape_cast %8 : vector<1x128x128xbf16> to vector<128x128xbf16>
    %cst_12 = arith.constant dense<0.000000e+00> : vector<8x128xf32>
    %10 = tpu.matmul %7, %9, %cst_12 {dimension_numbers = #tpu.dot_dimension_numbers<[1], [0], [0], [1], [0, 0, 1, 1], [], []>} : vector<8x128xbf16>, vector<128x128xbf16>, vector<8x128xf32> -> vector<8x128xf32>
    %c0_13 = arith.constant 0 : index
    %c0_14 = arith.constant 0 : index
    %11 = vector.load %arg7[%c0_13, %c0_14] : memref<8x128xf32, #tpu.memory_space<vmem>>, vector<8x128xf32>
    %12 = arith.addf %11, %10 : vector<8x128xf32>
    %c0_15 = arith.constant 0 : index
    %c0_16 = arith.constant 0 : index
    %13 = vector.load %arg7[%c0_15, %c0_16] : memref<8x128xf32, #tpu.memory_space<vmem>>, vector<8x128xf32>
    tpu.vector_store %arg7[%c0_15, %c0_16], %12 {strides = array<i32>} : memref<8x128xf32, #tpu.memory_space<vmem>>, vector<8x128xf32>,
    %c0_17 = arith.constant 0 : index
    %c2 = arith.constant 2 : index
    %c0_18 = arith.constant 0 : index
    %14 = vector.load %arg2[%c0_17, %c2, %c0_18] : memref<1x18x128xbf16, #tpu.memory_space<vmem>>, vector<1x8x128xbf16>
    %15 = vector.shape_cast %14 : vector<1x8x128xbf16> to vector<8x128xbf16>
    %c2_19 = arith.constant 2 : index
    %c0_20 = arith.constant 0 : index
    %c0_21 = arith.constant 0 : index
    %16 = vector.load %arg3[%c2_19, %c0_20, %c0_21] : memref<9x128x128xbf16, #tpu.memory_space<vmem>>, vector<1x128x128xbf16>
    %17 = vector.shape_cast %16 : vector<1x128x128xbf16> to vector<128x128xbf16>
    %cst_22 = arith.constant dense<0.000000e+00> : vector<8x128xf32>
    %18 = tpu.matmul %15, %17, %cst_22 {dimension_numbers = #tpu.dot_dimension_numbers<[1], [0], [0], [1], [0, 0, 1, 1], [], []>} : vector<8x128xbf16>, vector<128x128xbf16>, vector<8x128xf32> -> vector<8x128xf32>
    %c0_23 = arith.constant 0 : index
    %c0_24 = arith.constant 0 : index
    %19 = vector.load %arg7[%c0_23, %c0_24] : memref<8x128xf32, #tpu.memory_space<vmem>>, vector<8x128xf32>
    %20 = arith.addf %19, %18 : vector<8x128xf32>
    %c0_25 = arith.constant 0 : index
    %c0_26 = arith.constant 0 : index
    %21 = vector.load %arg7[%c0_25, %c0_26] : memref<8x128xf32, #tpu.memory_space<vmem>>, vector<8x128xf32>
    tpu.vector_store %arg7[%c0_25, %c0_26], %20 {strides = array<i32>} : memref<8x128xf32, #tpu.memory_space<vmem>>, vector<8x128xf32>,
    %c0_27 = arith.constant 0 : index
    %c4 = arith.constant 4 : index
    %c0_28 = arith.constant 0 : index
    %22 = vector.load %arg2[%c0_27, %c4, %c0_28] : memref<1x18x128xbf16, #tpu.memory_space<vmem>>, vector<1x8x128xbf16>
    %23 = vector.shape_cast %22 : vector<1x8x128xbf16> to vector<8x128xbf16>
    %c3 = arith.constant 3 : index
    %c0_29 = arith.constant 0 : index
    %c0_30 = arith.constant 0 : index
    %24 = vector.load %arg3[%c3, %c0_29, %c0_30] : memref<9x128x128xbf16, #tpu.memory_space<vmem>>, vector<1x128x128xbf16>
    %25 = vector.shape_cast %24 : vector<1x128x128xbf16> to vector<128x128xbf16>
    %cst_31 = arith.constant dense<0.000000e+00> : vector<8x128xf32>
    %26 = tpu.matmul %23, %25, %cst_31 {dimension_numbers = #tpu.dot_dimension_numbers<[1], [0], [0], [1], [0, 0, 1, 1], [], []>} : vector<8x128xbf16>, vector<128x128xbf16>, vector<8x128xf32> -> vector<8x128xf32>
    %c0_32 = arith.constant 0 : index
    %c0_33 = arith.constant 0 : index
    %27 = vector.load %arg7[%c0_32, %c0_33] : memref<8x128xf32, #tpu.memory_space<vmem>>, vector<8x128xf32>
    %28 = arith.addf %27, %26 : vector<8x128xf32>
    %c0_34 = arith.constant 0 : index
    %c0_35 = arith.constant 0 : index
    %29 = vector.load %arg7[%c0_34, %c0_35] : memref<8x128xf32, #tpu.memory_space<vmem>>, vector<8x128xf32>
    tpu.vector_store %arg7[%c0_34, %c0_35], %28 {strides = array<i32>} : memref<8x128xf32, #tpu.memory_space<vmem>>, vector<8x128xf32>,
    %c0_36 = arith.constant 0 : index
    %c5 = arith.constant 5 : index
    %c0_37 = arith.constant 0 : index
    %30 = vector.load %arg2[%c0_36, %c5, %c0_37] : memref<1x18x128xbf16, #tpu.memory_space<vmem>>, vector<1x8x128xbf16>
    %31 = vector.shape_cast %30 : vector<1x8x128xbf16> to vector<8x128xbf16>
    %c4_38 = arith.constant 4 : index
    %c0_39 = arith.constant 0 : index
    %c0_40 = arith.constant 0 : index
    %32 = vector.load %arg3[%c4_38, %c0_39, %c0_40] : memref<9x128x128xbf16, #tpu.memory_space<vmem>>, vector<1x128x128xbf16>
    %33 = vector.shape_cast %32 : vector<1x128x128xbf16> to vector<128x128xbf16>
    %cst_41 = arith.constant dense<0.000000e+00> : vector<8x128xf32>
    %34 = tpu.matmul %31, %33, %cst_41 {dimension_numbers = #tpu.dot_dimension_numbers<[1], [0], [0], [1], [0, 0, 1, 1], [], []>} : vector<8x128xbf16>, vector<128x128xbf16>, vector<8x128xf32> -> vector<8x128xf32>
    %c0_42 = arith.constant 0 : index
    %c0_43 = arith.constant 0 : index
    %35 = vector.load %arg7[%c0_42, %c0_43] : memref<8x128xf32, #tpu.memory_space<vmem>>, vector<8x128xf32>
    %36 = arith.addf %35, %34 : vector<8x128xf32>
    %c0_44 = arith.constant 0 : index
    %c0_45 = arith.constant 0 : index
    %37 = vector.load %arg7[%c0_44, %c0_45] : memref<8x128xf32, #tpu.memory_space<vmem>>, vector<8x128xf32>
    tpu.vector_store %arg7[%c0_44, %c0_45], %36 {strides = array<i32>} : memref<8x128xf32, #tpu.memory_space<vmem>>, vector<8x128xf32>,
    %c0_46 = arith.constant 0 : index
    %c6 = arith.constant 6 : index
    %c0_47 = arith.constant 0 : index
    %38 = vector.load %arg2[%c0_46, %c6, %c0_47] : memref<1x18x128xbf16, #tpu.memory_space<vmem>>, vector<1x8x128xbf16>
    %39 = vector.shape_cast %38 : vector<1x8x128xbf16> to vector<8x128xbf16>
    %c5_48 = arith.constant 5 : index
    %c0_49 = arith.constant 0 : index
    %c0_50 = arith.constant 0 : index
    %40 = vector.load %arg3[%c5_48, %c0_49, %c0_50] : memref<9x128x128xbf16, #tpu.memory_space<vmem>>, vector<1x128x128xbf16>
    %41 = vector.shape_cast %40 : vector<1x128x128xbf16> to vector<128x128xbf16>
    %cst_51 = arith.constant dense<0.000000e+00> : vector<8x128xf32>
    %42 = tpu.matmul %39, %41, %cst_51 {dimension_numbers = #tpu.dot_dimension_numbers<[1], [0], [0], [1], [0, 0, 1, 1], [], []>} : vector<8x128xbf16>, vector<128x128xbf16>, vector<8x128xf32> -> vector<8x128xf32>
    %c0_52 = arith.constant 0 : index
    %c0_53 = arith.constant 0 : index
    %43 = vector.load %arg7[%c0_52, %c0_53] : memref<8x128xf32, #tpu.memory_space<vmem>>, vector<8x128xf32>
    %44 = arith.addf %43, %42 : vector<8x128xf32>
    %c0_54 = arith.constant 0 : index
    %c0_55 = arith.constant 0 : index
    %45 = vector.load %arg7[%c0_54, %c0_55] : memref<8x128xf32, #tpu.memory_space<vmem>>, vector<8x128xf32>
    tpu.vector_store %arg7[%c0_54, %c0_55], %44 {strides = array<i32>} : memref<8x128xf32, #tpu.memory_space<vmem>>, vector<8x128xf32>,
    %c0_56 = arith.constant 0 : index
    %c8 = arith.constant 8 : index
    %c0_57 = arith.constant 0 : index
    %46 = vector.load %arg2[%c0_56, %c8, %c0_57] : memref<1x18x128xbf16, #tpu.memory_space<vmem>>, vector<1x8x128xbf16>
    %47 = vector.shape_cast %46 : vector<1x8x128xbf16> to vector<8x128xbf16>
    %c6_58 = arith.constant 6 : index
    %c0_59 = arith.constant 0 : index
    %c0_60 = arith.constant 0 : index
    %48 = vector.load %arg3[%c6_58, %c0_59, %c0_60] : memref<9x128x128xbf16, #tpu.memory_space<vmem>>, vector<1x128x128xbf16>
    %49 = vector.shape_cast %48 : vector<1x128x128xbf16> to vector<128x128xbf16>
    %cst_61 = arith.constant dense<0.000000e+00> : vector<8x128xf32>
    %50 = tpu.matmul %47, %49, %cst_61 {dimension_numbers = #tpu.dot_dimension_numbers<[1], [0], [0], [1], [0, 0, 1, 1], [], []>} : vector<8x128xbf16>, vector<128x128xbf16>, vector<8x128xf32> -> vector<8x128xf32>
    %c0_62 = arith.constant 0 : index
    %c0_63 = arith.constant 0 : index
    %51 = vector.load %arg7[%c0_62, %c0_63] : memref<8x128xf32, #tpu.memory_space<vmem>>, vector<8x128xf32>
    %52 = arith.addf %51, %50 : vector<8x128xf32>
    %c0_64 = arith.constant 0 : index
    %c0_65 = arith.constant 0 : index
    %53 = vector.load %arg7[%c0_64, %c0_65] : memref<8x128xf32, #tpu.memory_space<vmem>>, vector<8x128xf32>
    tpu.vector_store %arg7[%c0_64, %c0_65], %52 {strides = array<i32>} : memref<8x128xf32, #tpu.memory_space<vmem>>, vector<8x128xf32>,
    %c0_66 = arith.constant 0 : index
    %c9 = arith.constant 9 : index
    %c0_67 = arith.constant 0 : index
    %54 = vector.load %arg2[%c0_66, %c9, %c0_67] : memref<1x18x128xbf16, #tpu.memory_space<vmem>>, vector<1x8x128xbf16>
    %55 = vector.shape_cast %54 : vector<1x8x128xbf16> to vector<8x128xbf16>
    %c7 = arith.constant 7 : index
    %c0_68 = arith.constant 0 : index
    %c0_69 = arith.constant 0 : index
    %56 = vector.load %arg3[%c7, %c0_68, %c0_69] : memref<9x128x128xbf16, #tpu.memory_space<vmem>>, vector<1x128x128xbf16>
    %57 = vector.shape_cast %56 : vector<1x128x128xbf16> to vector<128x128xbf16>
    %cst_70 = arith.constant dense<0.000000e+00> : vector<8x128xf32>
    %58 = tpu.matmul %55, %57, %cst_70 {dimension_numbers = #tpu.dot_dimension_numbers<[1], [0], [0], [1], [0, 0, 1, 1], [], []>} : vector<8x128xbf16>, vector<128x128xbf16>, vector<8x128xf32> -> vector<8x128xf32>
    %c0_71 = arith.constant 0 : index
    %c0_72 = arith.constant 0 : index
    %59 = vector.load %arg7[%c0_71, %c0_72] : memref<8x128xf32, #tpu.memory_space<vmem>>, vector<8x128xf32>
    %60 = arith.addf %59, %58 : vector<8x128xf32>
    %c0_73 = arith.constant 0 : index
    %c0_74 = arith.constant 0 : index
    %61 = vector.load %arg7[%c0_73, %c0_74] : memref<8x128xf32, #tpu.memory_space<vmem>>, vector<8x128xf32>
    tpu.vector_store %arg7[%c0_73, %c0_74], %60 {strides = array<i32>} : memref<8x128xf32, #tpu.memory_space<vmem>>, vector<8x128xf32>,
    %c0_75 = arith.constant 0 : index
    %c10 = arith.constant 10 : index
    %c0_76 = arith.constant 0 : index
    %62 = vector.load %arg2[%c0_75, %c10, %c0_76] : memref<1x18x128xbf16, #tpu.memory_space<vmem>>, vector<1x8x128xbf16>
    %63 = vector.shape_cast %62 : vector<1x8x128xbf16> to vector<8x128xbf16>
    %c8_77 = arith.constant 8 : index
    %c0_78 = arith.constant 0 : index
    %c0_79 = arith.constant 0 : index
    %64 = vector.load %arg3[%c8_77, %c0_78, %c0_79] : memref<9x128x128xbf16, #tpu.memory_space<vmem>>, vector<1x128x128xbf16>
    %65 = vector.shape_cast %64 : vector<1x128x128xbf16> to vector<128x128xbf16>
    %cst_80 = arith.constant dense<0.000000e+00> : vector<8x128xf32>
    %66 = tpu.matmul %63, %65, %cst_80 {dimension_numbers = #tpu.dot_dimension_numbers<[1], [0], [0], [1], [0, 0, 1, 1], [], []>} : vector<8x128xbf16>, vector<128x128xbf16>, vector<8x128xf32> -> vector<8x128xf32>
    %c0_81 = arith.constant 0 : index
    %c0_82 = arith.constant 0 : index
    %67 = vector.load %arg7[%c0_81, %c0_82] : memref<8x128xf32, #tpu.memory_space<vmem>>, vector<8x128xf32>
    %68 = arith.addf %67, %66 : vector<8x128xf32>
    %c0_83 = arith.constant 0 : index
    %c0_84 = arith.constant 0 : index
    %69 = vector.load %arg7[%c0_83, %c0_84] : memref<8x128xf32, #tpu.memory_space<vmem>>, vector<8x128xf32>
    tpu.vector_store %arg7[%c0_83, %c0_84], %68 {strides = array<i32>} : memref<8x128xf32, #tpu.memory_space<vmem>>, vector<8x128xf32>,
    %c0_85 = arith.constant 0 : index
    %c0_86 = arith.constant 0 : index
    %70 = vector.load %arg7[%c0_85, %c0_86] : memref<8x128xf32, #tpu.memory_space<vmem>>, vector<8x128xf32>
    %c0_87 = arith.constant 0 : index
    %c0_88 = arith.constant 0 : index
    %71 = vector.load %arg4[%c0_87, %c0_88] : memref<1x128xf32, #tpu.memory_space<vmem>>, vector<1x128xf32>
    %72 = vector.broadcast %71 : vector<1x128xf32> to vector<8x128xf32>
    %73 = arith.mulf %70, %72 : vector<8x128xf32>
    %c0_89 = arith.constant 0 : index
    %c0_90 = arith.constant 0 : index
    %74 = vector.load %arg5[%c0_89, %c0_90] : memref<1x128xf32, #tpu.memory_space<vmem>>, vector<1x128xf32>
    %75 = vector.broadcast %74 : vector<1x128xf32> to vector<8x128xf32>
    %76 = arith.addf %73, %75 : vector<8x128xf32>
    %cst_91 = arith.constant 0.000000e+00 : f32
    %77 = vector.broadcast %cst_91 : f32 to vector<8x128xf32>
    %78 = arith.maximumf %76, %77 : vector<8x128xf32>
    %79 = arith.truncf %78 : vector<8x128xf32> to vector<8x128xbf16>
    %c0_92 = arith.constant 0 : index
    %c0_93 = arith.constant 0 : index
    %c0_94 = arith.constant 0 : index
    %80 = vector.load %arg6[%c0_92, %c0_93, %c0_94] : memref<1x8x128xbf16, #tpu.memory_space<vmem>>, vector<1x8x128xbf16>
    %81 = vector.shape_cast %80 : vector<1x8x128xbf16> to vector<8x128xbf16>
    %82 = vector.shape_cast %79 : vector<8x128xbf16> to vector<1x8x128xbf16>
    tpu.vector_store %arg6[%c0_92, %c0_93, %c0_94], %82 {strides = array<i32>} : memref<1x8x128xbf16, #tpu.memory_space<vmem>>, vector<1x8x128xbf16>,
    return
  }
  func.func @transform_0(%arg0: i32, %arg1: i32) -> (i32, i32, i32) {
    %c0_i32 = arith.constant 0 : i32
    %c0_i32_0 = arith.constant 0 : i32
    %c0_i32_1 = arith.constant 0 : i32
    return %arg0, %c0_i32, %c0_i32_0 : i32, i32, i32
  }
  func.func @transform_1(%arg0: i32, %arg1: i32) -> (i32, i32, i32) {
    %c0_i32 = arith.constant 0 : i32
    %c0_i32_0 = arith.constant 0 : i32
    %c0_i32_1 = arith.constant 0 : i32
    return %c0_i32, %c0_i32_0, %arg1 : i32, i32, i32
  }
  func.func @transform_2(%arg0: i32, %arg1: i32) -> (i32, i32) {
    %c0_i32 = arith.constant 0 : i32
    %c0_i32_0 = arith.constant 0 : i32
    return %c0_i32, %arg1 : i32, i32
  }
  func.func @transform_3(%arg0: i32, %arg1: i32) -> (i32, i32) {
    %c0_i32 = arith.constant 0 : i32
    %c0_i32_0 = arith.constant 0 : i32
    return %c0_i32, %arg1 : i32, i32
  }
  func.func @transform_4(%arg0: i32, %arg1: i32) -> (i32, i32, i32) {
    %c0_i32 = arith.constant 0 : i32
    %c0_i32_0 = arith.constant 0 : i32
    return %arg0, %c0_i32, %arg1 : i32, i32, i32
  }
}

module attributes {stable_mosaic.version = 11 : i64} {
  func.func @_mm_bn_single_kernel(%arg0: i32, %arg1: i32, %arg2: memref<8x128xbf16, #tpu.memory_space<vmem>>, %arg3: memref<128x128xbf16, #tpu.memory_space<vmem>>, %arg4: memref<1x128xf32, #tpu.memory_space<vmem>>, %arg5: memref<1x128xf32, #tpu.memory_space<vmem>>, %arg6: memref<8x128xbf16, #tpu.memory_space<vmem>>) attributes {dimension_semantics = [#tpu.dimension_semantics<parallel>, #tpu.dimension_semantics<parallel>], iteration_bounds = array<i64: 1, 2>, scalar_prefetch = 0 : i64, scratch_operands = 0 : i64, tpu.core_type = #tpu.core_type<tc>, window_params = [{transform_indices = @transform_0, window_bounds = array<i64: 8, 128>}, {transform_indices = @transform_1, window_bounds = array<i64: 128, 128>}, {transform_indices = @transform_2, window_bounds = array<i64: 1, 128>}, {transform_indices = @transform_3, window_bounds = array<i64: 1, 128>}, {transform_indices = @transform_4, window_bounds = array<i64: 8, 128>}]} {
    %c0 = arith.constant 0 : index
    %c0_0 = arith.constant 0 : index
    %0 = vector.load %arg2[%c0, %c0_0] : memref<8x128xbf16, #tpu.memory_space<vmem>>, vector<8x128xbf16>
    %c0_1 = arith.constant 0 : index
    %c0_2 = arith.constant 0 : index
    %1 = vector.load %arg3[%c0_1, %c0_2] : memref<128x128xbf16, #tpu.memory_space<vmem>>, vector<128x128xbf16>
    %cst = arith.constant dense<0.000000e+00> : vector<8x128xf32>
    %2 = tpu.matmul %0, %1, %cst {dimension_numbers = #tpu.dot_dimension_numbers<[1], [0], [0], [1], [0, 0, 1, 1], [], []>} : vector<8x128xbf16>, vector<128x128xbf16>, vector<8x128xf32> -> vector<8x128xf32>
    %c0_3 = arith.constant 0 : index
    %c0_4 = arith.constant 0 : index
    %3 = vector.load %arg4[%c0_3, %c0_4] : memref<1x128xf32, #tpu.memory_space<vmem>>, vector<1x128xf32>
    %4 = vector.broadcast %3 : vector<1x128xf32> to vector<8x128xf32>
    %5 = arith.mulf %2, %4 : vector<8x128xf32>
    %c0_5 = arith.constant 0 : index
    %c0_6 = arith.constant 0 : index
    %6 = vector.load %arg5[%c0_5, %c0_6] : memref<1x128xf32, #tpu.memory_space<vmem>>, vector<1x128xf32>
    %7 = vector.broadcast %6 : vector<1x128xf32> to vector<8x128xf32>
    %8 = arith.addf %5, %7 : vector<8x128xf32>
    %9 = arith.truncf %8 : vector<8x128xf32> to vector<8x128xbf16>
    %c0_7 = arith.constant 0 : index
    %c0_8 = arith.constant 0 : index
    %10 = vector.load %arg6[%c0_7, %c0_8] : memref<8x128xbf16, #tpu.memory_space<vmem>>, vector<8x128xbf16>
    tpu.vector_store %arg6[%c0_7, %c0_8], %9 {strides = array<i32>} : memref<8x128xbf16, #tpu.memory_space<vmem>>, vector<8x128xbf16>,
    return
  }
  func.func @transform_0(%arg0: i32, %arg1: i32) -> (i32, i32) {
    %c0_i32 = arith.constant 0 : i32
    %c0_i32_0 = arith.constant 0 : i32
    return %arg0, %c0_i32 : i32, i32
  }
  func.func @transform_1(%arg0: i32, %arg1: i32) -> (i32, i32) {
    %c0_i32 = arith.constant 0 : i32
    %c0_i32_0 = arith.constant 0 : i32
    return %c0_i32, %arg1 : i32, i32
  }
  func.func @transform_2(%arg0: i32, %arg1: i32) -> (i32, i32) {
    %c0_i32 = arith.constant 0 : i32
    %c0_i32_0 = arith.constant 0 : i32
    return %c0_i32, %arg1 : i32, i32
  }
  func.func @transform_3(%arg0: i32, %arg1: i32) -> (i32, i32) {
    %c0_i32 = arith.constant 0 : i32
    %c0_i32_0 = arith.constant 0 : i32
    return %c0_i32, %arg1 : i32, i32
  }
  func.func @transform_4(%arg0: i32, %arg1: i32) -> (i32, i32) {
    %c0_i32 = arith.constant 0 : i32
    return %arg0, %arg1 : i32, i32
  }
}

module attributes {stable_mosaic.version = 11 : i64} {
  func.func @_mm_bn_single_kernel(%arg0: i32, %arg1: i32, %arg2: memref<8x128xbf16, #tpu.memory_space<vmem>>, %arg3: memref<128x128xbf16, #tpu.memory_space<vmem>>, %arg4: memref<1x128xf32, #tpu.memory_space<vmem>>, %arg5: memref<1x128xf32, #tpu.memory_space<vmem>>, %arg6: memref<8x128xbf16, #tpu.memory_space<vmem>>, %arg7: memref<8x128xbf16, #tpu.memory_space<vmem>>) attributes {dimension_semantics = [#tpu.dimension_semantics<parallel>, #tpu.dimension_semantics<parallel>], iteration_bounds = array<i64: 1, 2>, scalar_prefetch = 0 : i64, scratch_operands = 0 : i64, tpu.core_type = #tpu.core_type<tc>, window_params = [{transform_indices = @transform_0, window_bounds = array<i64: 8, 128>}, {transform_indices = @transform_1, window_bounds = array<i64: 128, 128>}, {transform_indices = @transform_2, window_bounds = array<i64: 1, 128>}, {transform_indices = @transform_3, window_bounds = array<i64: 1, 128>}, {transform_indices = @transform_4, window_bounds = array<i64: 8, 128>}, {transform_indices = @transform_5, window_bounds = array<i64: 8, 128>}]} {
    %c0 = arith.constant 0 : index
    %c0_0 = arith.constant 0 : index
    %0 = vector.load %arg2[%c0, %c0_0] : memref<8x128xbf16, #tpu.memory_space<vmem>>, vector<8x128xbf16>
    %c0_1 = arith.constant 0 : index
    %c0_2 = arith.constant 0 : index
    %1 = vector.load %arg3[%c0_1, %c0_2] : memref<128x128xbf16, #tpu.memory_space<vmem>>, vector<128x128xbf16>
    %cst = arith.constant dense<0.000000e+00> : vector<8x128xf32>
    %2 = tpu.matmul %0, %1, %cst {dimension_numbers = #tpu.dot_dimension_numbers<[1], [0], [0], [1], [0, 0, 1, 1], [], []>} : vector<8x128xbf16>, vector<128x128xbf16>, vector<8x128xf32> -> vector<8x128xf32>
    %c0_3 = arith.constant 0 : index
    %c0_4 = arith.constant 0 : index
    %3 = vector.load %arg4[%c0_3, %c0_4] : memref<1x128xf32, #tpu.memory_space<vmem>>, vector<1x128xf32>
    %4 = vector.broadcast %3 : vector<1x128xf32> to vector<8x128xf32>
    %5 = arith.mulf %2, %4 : vector<8x128xf32>
    %c0_5 = arith.constant 0 : index
    %c0_6 = arith.constant 0 : index
    %6 = vector.load %arg5[%c0_5, %c0_6] : memref<1x128xf32, #tpu.memory_space<vmem>>, vector<1x128xf32>
    %7 = vector.broadcast %6 : vector<1x128xf32> to vector<8x128xf32>
    %8 = arith.addf %5, %7 : vector<8x128xf32>
    %c0_7 = arith.constant 0 : index
    %c0_8 = arith.constant 0 : index
    %9 = vector.load %arg6[%c0_7, %c0_8] : memref<8x128xbf16, #tpu.memory_space<vmem>>, vector<8x128xbf16>
    %10 = arith.extf %9 : vector<8x128xbf16> to vector<8x128xf32>
    %11 = arith.addf %8, %10 : vector<8x128xf32>
    %cst_9 = arith.constant 0.000000e+00 : f32
    %12 = vector.broadcast %cst_9 : f32 to vector<8x128xf32>
    %13 = arith.maximumf %11, %12 : vector<8x128xf32>
    %14 = arith.truncf %13 : vector<8x128xf32> to vector<8x128xbf16>
    %c0_10 = arith.constant 0 : index
    %c0_11 = arith.constant 0 : index
    %15 = vector.load %arg7[%c0_10, %c0_11] : memref<8x128xbf16, #tpu.memory_space<vmem>>, vector<8x128xbf16>
    tpu.vector_store %arg7[%c0_10, %c0_11], %14 {strides = array<i32>} : memref<8x128xbf16, #tpu.memory_space<vmem>>, vector<8x128xbf16>,
    return
  }
  func.func @transform_0(%arg0: i32, %arg1: i32) -> (i32, i32) {
    %c0_i32 = arith.constant 0 : i32
    %c0_i32_0 = arith.constant 0 : i32
    return %arg0, %c0_i32 : i32, i32
  }
  func.func @transform_1(%arg0: i32, %arg1: i32) -> (i32, i32) {
    %c0_i32 = arith.constant 0 : i32
    %c0_i32_0 = arith.constant 0 : i32
    return %c0_i32, %arg1 : i32, i32
  }
  func.func @transform_2(%arg0: i32, %arg1: i32) -> (i32, i32) {
    %c0_i32 = arith.constant 0 : i32
    %c0_i32_0 = arith.constant 0 : i32
    return %c0_i32, %arg1 : i32, i32
  }
  func.func @transform_3(%arg0: i32, %arg1: i32) -> (i32, i32) {
    %c0_i32 = arith.constant 0 : i32
    %c0_i32_0 = arith.constant 0 : i32
    return %c0_i32, %arg1 : i32, i32
  }
  func.func @transform_4(%arg0: i32, %arg1: i32) -> (i32, i32) {
    %c0_i32 = arith.constant 0 : i32
    return %arg0, %arg1 : i32, i32
  }
  func.func @transform_5(%arg0: i32, %arg1: i32) -> (i32, i32) {
    %c0_i32 = arith.constant 0 : i32
    return %arg0, %arg1 : i32, i32
  }
}

module attributes {stable_mosaic.version = 11 : i64} {
  func.func @_mm_bn_single_kernel(%arg0: i32, %arg1: i32, %arg2: memref<8x256xbf16, #tpu.memory_space<vmem>>, %arg3: memref<256x128xbf16, #tpu.memory_space<vmem>>, %arg4: memref<1x128xf32, #tpu.memory_space<vmem>>, %arg5: memref<1x128xf32, #tpu.memory_space<vmem>>, %arg6: memref<8x128xbf16, #tpu.memory_space<vmem>>) attributes {dimension_semantics = [#tpu.dimension_semantics<parallel>, #tpu.dimension_semantics<parallel>], iteration_bounds = array<i64: 1, 1>, scalar_prefetch = 0 : i64, scratch_operands = 0 : i64, tpu.core_type = #tpu.core_type<tc>, window_params = [{transform_indices = @transform_0, window_bounds = array<i64: 8, 256>}, {transform_indices = @transform_1, window_bounds = array<i64: 256, 128>}, {transform_indices = @transform_2, window_bounds = array<i64: 1, 128>}, {transform_indices = @transform_3, window_bounds = array<i64: 1, 128>}, {transform_indices = @transform_4, window_bounds = array<i64: 8, 128>}]} {
    %c0 = arith.constant 0 : index
    %c0_0 = arith.constant 0 : index
    %0 = vector.load %arg2[%c0, %c0_0] : memref<8x256xbf16, #tpu.memory_space<vmem>>, vector<8x256xbf16>
    %c0_1 = arith.constant 0 : index
    %c0_2 = arith.constant 0 : index
    %1 = vector.load %arg3[%c0_1, %c0_2] : memref<256x128xbf16, #tpu.memory_space<vmem>>, vector<256x128xbf16>
    %cst = arith.constant dense<0.000000e+00> : vector<8x128xf32>
    %2 = tpu.matmul %0, %1, %cst {dimension_numbers = #tpu.dot_dimension_numbers<[1], [0], [0], [1], [0, 0, 1, 1], [], []>} : vector<8x256xbf16>, vector<256x128xbf16>, vector<8x128xf32> -> vector<8x128xf32>
    %c0_3 = arith.constant 0 : index
    %c0_4 = arith.constant 0 : index
    %3 = vector.load %arg4[%c0_3, %c0_4] : memref<1x128xf32, #tpu.memory_space<vmem>>, vector<1x128xf32>
    %4 = vector.broadcast %3 : vector<1x128xf32> to vector<8x128xf32>
    %5 = arith.mulf %2, %4 : vector<8x128xf32>
    %c0_5 = arith.constant 0 : index
    %c0_6 = arith.constant 0 : index
    %6 = vector.load %arg5[%c0_5, %c0_6] : memref<1x128xf32, #tpu.memory_space<vmem>>, vector<1x128xf32>
    %7 = vector.broadcast %6 : vector<1x128xf32> to vector<8x128xf32>
    %8 = arith.addf %5, %7 : vector<8x128xf32>
    %cst_7 = arith.constant 0.000000e+00 : f32
    %9 = vector.broadcast %cst_7 : f32 to vector<8x128xf32>
    %10 = arith.maximumf %8, %9 : vector<8x128xf32>
    %11 = arith.truncf %10 : vector<8x128xf32> to vector<8x128xbf16>
    %c0_8 = arith.constant 0 : index
    %c0_9 = arith.constant 0 : index
    %12 = vector.load %arg6[%c0_8, %c0_9] : memref<8x128xbf16, #tpu.memory_space<vmem>>, vector<8x128xbf16>
    tpu.vector_store %arg6[%c0_8, %c0_9], %11 {strides = array<i32>} : memref<8x128xbf16, #tpu.memory_space<vmem>>, vector<8x128xbf16>,
    return
  }
  func.func @transform_0(%arg0: i32, %arg1: i32) -> (i32, i32) {
    %c0_i32 = arith.constant 0 : i32
    %c0_i32_0 = arith.constant 0 : i32
    return %arg0, %c0_i32 : i32, i32
  }
  func.func @transform_1(%arg0: i32, %arg1: i32) -> (i32, i32) {
    %c0_i32 = arith.constant 0 : i32
    %c0_i32_0 = arith.constant 0 : i32
    return %c0_i32, %arg1 : i32, i32
  }
  func.func @transform_2(%arg0: i32, %arg1: i32) -> (i32, i32) {
    %c0_i32 = arith.constant 0 : i32
    %c0_i32_0 = arith.constant 0 : i32
    return %c0_i32, %arg1 : i32, i32
  }
  func.func @transform_3(%arg0: i32, %arg1: i32) -> (i32, i32) {
    %c0_i32 = arith.constant 0 : i32
    %c0_i32_0 = arith.constant 0 : i32
    return %c0_i32, %arg1 : i32, i32
  }
  func.func @transform_4(%arg0: i32, %arg1: i32) -> (i32, i32) {
    %c0_i32 = arith.constant 0 : i32
    return %arg0, %arg1 : i32, i32
  }
}

module attributes {stable_mosaic.version = 11 : i64} {
  func.func @_global_pool_kernel(%arg0: i32, %arg1: memref<2x4x128xbf16, #tpu.memory_space<vmem>>, %arg2: memref<2x128xf32, #tpu.memory_space<vmem>>) attributes {dimension_semantics = [#tpu.dimension_semantics<parallel>], iteration_bounds = array<i64: 2>, scalar_prefetch = 0 : i64, scratch_operands = 0 : i64, tpu.core_type = #tpu.core_type<tc>, window_params = [{transform_indices = @transform_0, window_bounds = array<i64: 2, 4, 128>}, {transform_indices = @transform_1, window_bounds = array<i64: 2, 128>}]} {
    %c0 = arith.constant 0 : index
    %c0_0 = arith.constant 0 : index
    %c0_1 = arith.constant 0 : index
    %0 = vector.load %arg1[%c0, %c0_0, %c0_1] : memref<2x4x128xbf16, #tpu.memory_space<vmem>>, vector<2x4x128xbf16>
    %1 = arith.extf %0 : vector<2x4x128xbf16> to vector<2x4x128xf32>
    %cst = arith.constant dense<0xFF800000> : vector<2x128xf32>
    %2 = vector.multi_reduction <maximumf>, %1, %cst [1] : vector<2x4x128xf32> to vector<2x128xf32>
    %c0_2 = arith.constant 0 : index
    %c0_3 = arith.constant 0 : index
    %3 = vector.load %arg2[%c0_2, %c0_3] : memref<2x128xf32, #tpu.memory_space<vmem>>, vector<2x128xf32>
    tpu.vector_store %arg2[%c0_2, %c0_3], %2 {strides = array<i32>} : memref<2x128xf32, #tpu.memory_space<vmem>>, vector<2x128xf32>,
    return
  }
  func.func @transform_0(%arg0: i32) -> (i32, i32, i32) {
    %c0_i32 = arith.constant 0 : i32
    %c0_i32_0 = arith.constant 0 : i32
    %c0_i32_1 = arith.constant 0 : i32
    return %c0_i32, %c0_i32_0, %arg0 : i32, i32, i32
  }
  func.func @transform_1(%arg0: i32) -> (i32, i32) {
    %c0_i32 = arith.constant 0 : i32
    %c0_i32_0 = arith.constant 0 : i32
    return %c0_i32, %arg0 : i32, i32
  }
}

module attributes {stable_mosaic.version = 11 : i64} {
  func.func @_global_pool_kernel(%arg0: i32, %arg1: memref<2x4x128xbf16, #tpu.memory_space<vmem>>, %arg2: memref<2x128xf32, #tpu.memory_space<vmem>>) attributes {dimension_semantics = [#tpu.dimension_semantics<parallel>], iteration_bounds = array<i64: 2>, scalar_prefetch = 0 : i64, scratch_operands = 0 : i64, tpu.core_type = #tpu.core_type<tc>, window_params = [{transform_indices = @transform_0, window_bounds = array<i64: 2, 4, 128>}, {transform_indices = @transform_1, window_bounds = array<i64: 2, 128>}]} {
    %c0 = arith.constant 0 : index
    %c0_0 = arith.constant 0 : index
    %c0_1 = arith.constant 0 : index
    %0 = vector.load %arg1[%c0, %c0_0, %c0_1] : memref<2x4x128xbf16, #tpu.memory_space<vmem>>, vector<2x4x128xbf16>
    %1 = arith.extf %0 : vector<2x4x128xbf16> to vector<2x4x128xf32>
    %cst = arith.constant dense<0.000000e+00> : vector<2x128xf32>
    %2 = vector.multi_reduction <add>, %1, %cst [1] : vector<2x4x128xf32> to vector<2x128xf32>
    %cst_2 = arith.constant 4.000000e+00 : f32
    %3 = vector.broadcast %cst_2 : f32 to vector<2x128xf32>
    %4 = arith.divf %2, %3 : vector<2x128xf32>
    %c0_3 = arith.constant 0 : index
    %c0_4 = arith.constant 0 : index
    %5 = vector.load %arg2[%c0_3, %c0_4] : memref<2x128xf32, #tpu.memory_space<vmem>>, vector<2x128xf32>
    tpu.vector_store %arg2[%c0_3, %c0_4], %4 {strides = array<i32>} : memref<2x128xf32, #tpu.memory_space<vmem>>, vector<2x128xf32>,
    return
  }
  func.func @transform_0(%arg0: i32) -> (i32, i32, i32) {
    %c0_i32 = arith.constant 0 : i32
    %c0_i32_0 = arith.constant 0 : i32
    %c0_i32_1 = arith.constant 0 : i32
    return %c0_i32, %c0_i32_0, %arg0 : i32, i32, i32
  }
  func.func @transform_1(%arg0: i32) -> (i32, i32) {
    %c0_i32 = arith.constant 0 : i32
    %c0_i32_0 = arith.constant 0 : i32
    return %c0_i32, %arg0 : i32, i32
  }
}

module attributes {stable_mosaic.version = 11 : i64} {
  func.func @_head_kernel(%arg0: memref<2x256xf32, #tpu.memory_space<vmem>>, %arg1: memref<2x256xf32, #tpu.memory_space<vmem>>, %arg2: memref<1x256xf32, #tpu.memory_space<vmem>>, %arg3: memref<1x256xf32, #tpu.memory_space<vmem>>, %arg4: memref<1x256xf32, #tpu.memory_space<vmem>>, %arg5: memref<1x256xf32, #tpu.memory_space<vmem>>, %arg6: memref<2x512xf32, #tpu.memory_space<vmem>>) attributes {dimension_semantics = [], scalar_prefetch = 0 : i64, scratch_operands = 0 : i64, tpu.core_type = #tpu.core_type<tc>} {
    %c0 = arith.constant 0 : index
    %c0_0 = arith.constant 0 : index
    %0 = vector.load %arg0[%c0, %c0_0] : memref<2x256xf32, #tpu.memory_space<vmem>>, vector<2x256xf32>
    %c0_1 = arith.constant 0 : index
    %c0_2 = arith.constant 0 : index
    %1 = vector.load %arg2[%c0_1, %c0_2] : memref<1x256xf32, #tpu.memory_space<vmem>>, vector<1x256xf32>
    %2 = vector.broadcast %1 : vector<1x256xf32> to vector<2x256xf32>
    %3 = arith.mulf %0, %2 : vector<2x256xf32>
    %c0_3 = arith.constant 0 : index
    %c0_4 = arith.constant 0 : index
    %4 = vector.load %arg3[%c0_3, %c0_4] : memref<1x256xf32, #tpu.memory_space<vmem>>, vector<1x256xf32>
    %5 = vector.broadcast %4 : vector<1x256xf32> to vector<2x256xf32>
    %6 = arith.addf %3, %5 : vector<2x256xf32>
    %c0_5 = arith.constant 0 : index
    %c0_6 = arith.constant 0 : index
    %7 = vector.load %arg1[%c0_5, %c0_6] : memref<2x256xf32, #tpu.memory_space<vmem>>, vector<2x256xf32>
    %c0_7 = arith.constant 0 : index
    %c0_8 = arith.constant 0 : index
    %8 = vector.load %arg4[%c0_7, %c0_8] : memref<1x256xf32, #tpu.memory_space<vmem>>, vector<1x256xf32>
    %9 = vector.broadcast %8 : vector<1x256xf32> to vector<2x256xf32>
    %10 = arith.mulf %7, %9 : vector<2x256xf32>
    %c0_9 = arith.constant 0 : index
    %c0_10 = arith.constant 0 : index
    %11 = vector.load %arg5[%c0_9, %c0_10] : memref<1x256xf32, #tpu.memory_space<vmem>>, vector<1x256xf32>
    %12 = vector.broadcast %11 : vector<1x256xf32> to vector<2x256xf32>
    %13 = arith.addf %10, %12 : vector<2x256xf32>
    %14 = arith.mulf %6, %6 : vector<2x256xf32>
    %cst = arith.constant dense<0.000000e+00> : vector<2xf32>
    %15 = vector.multi_reduction <add>, %14, %cst [1] : vector<2x256xf32> to vector<2xf32>
    %16 = vector.shape_cast %15 : vector<2xf32> to vector<2x1xf32>
    %17 = arith.mulf %13, %13 : vector<2x256xf32>
    %cst_11 = arith.constant dense<0.000000e+00> : vector<2xf32>
    %18 = vector.multi_reduction <add>, %17, %cst_11 [1] : vector<2x256xf32> to vector<2xf32>
    %19 = vector.shape_cast %18 : vector<2xf32> to vector<2x1xf32>
    %20 = arith.addf %16, %19 : vector<2x1xf32>
    %21 = math.sqrt %20 : vector<2x1xf32>
    %cst_12 = arith.constant 9.99999996E-13 : f32
    %22 = vector.broadcast %cst_12 : f32 to vector<2x1xf32>
    %23 = arith.maximumf %21, %22 : vector<2x1xf32>
    %cst_13 = arith.constant 1.000000e+00 : f32
    %24 = vector.broadcast %cst_13 : f32 to vector<2x1xf32>
    %25 = arith.divf %24, %23 : vector<2x1xf32>
    %26 = vector.broadcast %25 : vector<2x1xf32> to vector<2x256xf32>
    %27 = arith.mulf %6, %26 : vector<2x256xf32>
    %c0_14 = arith.constant 0 : index
    %c0_15 = arith.constant 0 : index
    %28 = vector.load %arg6[%c0_14, %c0_15] : memref<2x512xf32, #tpu.memory_space<vmem>>, vector<2x256xf32>
    tpu.vector_store %arg6[%c0_14, %c0_15], %27 {strides = array<i32>} : memref<2x512xf32, #tpu.memory_space<vmem>>, vector<2x256xf32>,
    %29 = vector.broadcast %25 : vector<2x1xf32> to vector<2x256xf32>
    %30 = arith.mulf %13, %29 : vector<2x256xf32>
    %c0_16 = arith.constant 0 : index
    %c256 = arith.constant 256 : index
    %31 = vector.load %arg6[%c0_16, %c256] : memref<2x512xf32, #tpu.memory_space<vmem>>, vector<2x256xf32>
    tpu.vector_store %arg6[%c0_16, %c256], %30 {strides = array<i32>} : memref<2x512xf32, #tpu.memory_space<vmem>>, vector<2x256xf32>,
    return
  }
}

</mosaic_0001>

<bundles_post_ra>
// kernel: _lambda_.24
= control target key start
LH: loop header
LB: loop body
LE: loop exit
PB: predicated region body
PF: predicated region fallthrough
CT: control target
= control target key end

     0   :  { %s749_s15 = smov 0   ;;  %s751_s16 = smov 0   ;;  %s822_s0 = inlined_call_operand.vmem [shape: bf16[128,128], index: 0, kind: input, shape index: {}]   ;;  %s823_s1 = inlined_call_operand.vmem [shape: bf16[128,128], index: 1, kind: input, shape index: {}]   ;;  %s824_s2 = inlined_call_operand.vmem [shape: f32[1,128], index: 2, kind: input, shape index: {}]   ;;  %s825_s3 = inlined_call_operand.vmem [shape: f32[1,128], index: 3, kind: input, shape index: {}]   ;;  %s826_s4 = inlined_call_operand.vmem [shape: bf16[128,128], index: 4, kind: output, shape index: {}]  }
   0x1   :  { %s753_s17 = smov 0  }
   0x2 LB: > { %s26_s18 = sadd.s32 1, %s718_s16  ;;  %p560_p0 = scmp.ge.s32.totalorder %s722_s17, 1  ;;  %s722_s17 = sphi %s753_s17, %s14_s17   ;;  %s718_s16 = sphi %s751_s16, %s828_s16   ;;  %s714_s15 = sphi %s749_s15, %s827_s15  }
   0x3   : > { %p28_p1 = scmp.ge.s32.totalorder %s26_s18, 2  ;;  %p202_p2 = scmp.lt.s32.totalorder %s722_s17, 3 }
   0x5   : > { %s830_s18 = smov (%p28_p1, %s26_s18), 0  ;;  %p203_p3 = pnand %p560_p0, %p202_p2 }
   0x6   : > { %s561_s27 = sshll.u32 (!%p203_p3), %s714_s15, 3 }
   0x7   : > { %206 = sbr.rel (%p203_p3) target bundleno = 195 (0xc3), region = 36  ;;  %p242_p4 = scmp.lt.s32.totalorder (!%p203_p3), %s561_s27, 15 }
   0xc   : > { %v626_v0 = vld [vmem:[%s823_s1 + $0x38] sm:$0xff]  ;;  %v625_v1 = vld [vmem:[%s823_s1 + $0x30] sm:$0xff]  ;;  %v624_v2 = vld [vmem:[%s823_s1 + $0x28] sm:$0xff]  ;;  %s832_s27 = smov (!%p242_p4, %s561_s27), 15 }
   0xd   : > { %362 = vmatpush.bf16.msra.mxu0 %v626_v0  ;;  %650 = vmatpush.bf16.msra.mxu1 %v626_v0  ;;  %v623_v3 = vld [vmem:[%s823_s1 + $0x20] sm:$0xff]  ;;  %v622_v4 = vld [vmem:[%s823_s1 + $0x18] sm:$0xff]  ;;  %v621_v5 = vld [vmem:[%s823_s1 + $0x10] sm:$0xff]  ;;  %s562_s8 = sshll.u32 %s832_s27, 2 }
   0xe   : > { %651 = vmatpush.bf16.msra.mxu2 %v626_v0  ;;  %652 = vmatpush.bf16.msra.mxu3 %v626_v0  ;;  %v620_v6 = vld [vmem:[%s823_s1 + $0x8] sm:$0xff]  ;;  %v619_v7 = vld [vmem:[%s823_s1] sm:$0xff]  ;;  %s245_s13 = scalar_lea.vmem %s822_s0, %s562_s8  ;;  %s264_s23 = scalar_lea.vmem %s826_s4, %s562_s8 }
   0xf   : > { %v615_v8 = vld [vmem:[%s245_s13] sm:$0xff]  ;;  %v616_v9 = vld [vmem:[%s245_s13 + $0x8] sm:$0xff]  ;;  %v617_v10 = vld [vmem:[%s245_s13 + $0x10] sm:$0xff] }
  0x10   : > { %v618_v11 = vld [vmem:[%s245_s13 + $0x18] sm:$0xff]  ;;  %v698_v14 = vld [vmem:[%s824_s2] ss:$0 sm:$0xff] }
  0x11   : > { %363 = vmatpush.bf16.msra.mxu0 %v625_v1  ;;  %653 = vmatpush.bf16.msra.mxu1 %v625_v1  ;;  %v699_v16 = vld [vmem:[%s825_s3] ss:$0 sm:$0xff] }
  0x12   : > { %654 = vmatpush.bf16.msra.mxu2 %v625_v1  ;;  %655 = vmatpush.bf16.msra.mxu3 %v625_v1 }
  0x15   : > { %364 = vmatpush.bf16.msra.mxu0 %v624_v2  ;;  %656 = vmatpush.bf16.msra.mxu1 %v624_v2 }
  0x16   : > { %657 = vmatpush.bf16.msra.mxu2 %v624_v2  ;;  %658 = vmatpush.bf16.msra.mxu3 %v624_v2 }
  0x19   : > { %365 = vmatpush.bf16.msra.mxu0 %v623_v3  ;;  %659 = vmatpush.bf16.msra.mxu1 %v623_v3 }
  0x1a   : > { %660 = vmatpush.bf16.msra.mxu2 %v623_v3  ;;  %661 = vmatpush.bf16.msra.mxu3 %v623_v3 }
  0x1d   : > { %366 = vmatpush.bf16.msra.mxu0 %v622_v4  ;;  %662 = vmatpush.bf16.msra.mxu1 %v622_v4 }
  0x1e   : > { %663 = vmatpush.bf16.msra.mxu2 %v622_v4  ;;  %664 = vmatpush.bf16.msra.mxu3 %v622_v4 }
  0x21   : > { %367 = vmatpush.bf16.msra.mxu0 %v621_v5  ;;  %665 = vmatpush.bf16.msra.mxu1 %v621_v5 }
  0x22   : > { %666 = vmatpush.bf16.msra.mxu2 %v621_v5  ;;  %667 = vmatpush.bf16.msra.mxu3 %v621_v5 }
  0x25   : > { %368 = vmatpush.bf16.msra.mxu0 %v620_v6  ;;  %668 = vmatpush.bf16.msra.mxu1 %v620_v6 }
  0x26   : > { %669 = vmatpush.bf16.msra.mxu2 %v620_v6  ;;  %670 = vmatpush.bf16.msra.mxu3 %v620_v6 }
  0x29   : > { %369 = vmatpush.bf16.msra.mxu0 %v619_v7  ;;  %671 = vmatpush.bf16.msra.mxu1 %v619_v7 }
  0x2a   : > { %672 = vmatpush.bf16.msra.mxu2 %v619_v7  ;;  %673 = vmatpush.bf16.msra.mxu3 %v619_v7 }
  0x2c   : > { %370 = vmatmul.bf16.vlgmr.msra.gmra.mxu0 %v615_v8  ;;  %375 = vmatmul.bf16.vlgmr.msra.gmra.mxu1 %v616_v9 }
  0x2d   : > { %380 = vmatmul.bf16.vlgmr.msra.gmra.mxu2 %v617_v10  ;;  %385 = vmatmul.bf16.vlgmr.msra.gmra.mxu3 %v618_v11 }
  0xa9   : > { %v371_v12 = vpop.f32.mrf.mxu0  ;;  %v376_v13 = vpop.f32.mrf.mxu1 }
  0xaa   : > { %v395_v15 = vmul.f32 %v698_v14, %v371_v12  ;;  %v397_v17 = vmul.f32 %v698_v14, %v376_v13 }
  0xac   : > { %v407_v22 = vadd.f32 %v699_v16, %v395_v15  ;;  %v409_v23 = vadd.f32 %v699_v16, %v397_v17 }
  0xae   : > { %v415_v30 = vmax.f32 %v407_v22, 0.0  ;;  %v417_v31 = vmax.f32 %v409_v23, 0.0 }
  0xb0   : > { %v381_v18 = vpop.f32.mrf.mxu2  ;;  %v386_v19 = vpop.f32.mrf.mxu3 }
  0xb1   : > { %v373_v20 = vpop.f32.mrf.mxu0  ;;  %v378_v21 = vpop.f32.mrf.mxu1  ;;  %v399_v28 = vmul.f32 %v698_v14, %v381_v18  ;;  %v401_v29 = vmul.f32 %v698_v14, %v386_v19 }
  0xb2   : > { %v396_v24 = vmul.f32 %v698_v14, %v373_v20  ;;  %v398_v25 = vmul.f32 %v698_v14, %v378_v21 }
  0xb3   : > { %v411_v38 = vadd.f32 %v699_v16, %v399_v28  ;;  %v413_v39 = vadd.f32 %v699_v16, %v401_v29 }
  0xb4   : > { %v408_v26 = vadd.f32 %v699_v16, %v396_v24  ;;  %v410_v27 = vadd.f32 %v699_v16, %v398_v25 }
  0xb5   : > { %v419_v44 = vmax.f32 %v411_v38, 0.0  ;;  %v421_v45 = vmax.f32 %v413_v39, 0.0 }
  0xb6   : > { %v416_v32 = vmax.f32 %v408_v26, 0.0  ;;  %v418_v33 = vmax.f32 %v410_v27, 0.0 }
  0xb8   : > { %v630_v34 = vpack.c.bf16 %v416_v32, %v415_v30  ;;  %v635_v35 = vpack.c.bf16 %v418_v33, %v417_v31  ;;  %v383_v36 = vpop.f32.mrf.mxu2  ;;  %v388_v37 = vpop.f32.mrf.mxu3 }
  0xb9   : > { %v400_v40 = vmul.f32 %v698_v14, %v383_v36  ;;  %v402_v41 = vmul.f32 %v698_v14, %v388_v37 }
  0xba   : > { %631 = vst [vmem:[%s264_s23] sm:$0xff] %v630_v34  }
  0xbb   : > { %647 = vst [vmem:[%s264_s23 + $0x8] sm:$0xff] %v635_v35   ;;  %v412_v42 = vadd.f32 %v699_v16, %v400_v40  ;;  %v414_v43 = vadd.f32 %v699_v16, %v402_v41 }
  0xbd   : > { %v420_v46 = vmax.f32 %v412_v42, 0.0  ;;  %v422_v47 = vmax.f32 %v414_v43, 0.0 }
  0xbf   : > { %v640_v48 = vpack.c.bf16 %v420_v46, %v419_v44  ;;  %v645_v49 = vpack.c.bf16 %v422_v47, %v421_v45 }
  0xc1   : > { %648 = vst [vmem:[%s264_s23 + $0x10] sm:$0xff] %v640_v48  }
  0xc2   : > { %649 = vst [vmem:[%s264_s23 + $0x18] sm:$0xff] %v645_v49  }
  0xc3 PF: > { %s14_s17 = sadd.s32 1, %s722_s17   ;;  %s827_s15 = smov %s718_s16 }
  0xc4   : > { %p11_p5 = scmp.ge.s32.totalorder %s14_s17, 4   ;;  %s828_s16 = smov %s830_s18 }
  0xc6   :  { %13 = sbr.rel (!%p11_p5) target bundleno = 2 (0x2), region = 75 }

// kernel: _lambda_.23
= control target key start
LH: loop header
LB: loop body
LE: loop exit
PB: predicated region body
PF: predicated region fallthrough
CT: control target
= control target key end

     0   :  { %s1459_s15 = smov 0   ;;  %s1461_s16 = smov 0   ;;  %s1705_s0 = inlined_call_operand.vmem [shape: bf16[512,256], index: 0, kind: input, shape index: {}]   ;;  %s1706_s1 = inlined_call_operand.vmem [shape: bf16[256,128], index: 1, kind: input, shape index: {}]   ;;  %s1707_s2 = inlined_call_operand.vmem [shape: f32[1,128], index: 2, kind: input, shape index: {}]   ;;  %s1708_s3 = inlined_call_operand.vmem [shape: f32[1,128], index: 3, kind: input, shape index: {}]   ;;  %s1709_s4 = inlined_call_operand.vmem [shape: bf16[512,128], index: 4, kind: output, shape index: {}]  }
   0x1   :  { %s1463_s17 = smov 0  }
   0x2 LB: > { %s26_s18 = sadd.s32 1, %s1428_s16  ;;  %p1024_p0 = scmp.ge.s32.totalorder %s1432_s17, 1  ;;  %s1432_s17 = sphi %s1463_s17, %s14_s17   ;;  %s1428_s16 = sphi %s1461_s16, %s1711_s16   ;;  %s1424_s15 = sphi %s1459_s15, %s1710_s15  }
   0x3   : > { %p28_p1 = scmp.ge.s32.totalorder %s26_s18, 2  ;;  %p203_p2 = scmp.lt.s32.totalorder %s1432_s17, 3 }
   0x5   : > { %s1713_s18 = smov (%p28_p1, %s26_s18), 0  ;;  %p204_p3 = pnand %p1024_p0, %p203_p2 }
   0x6   : > { %s1025_s5 = sshll.u32 (!%p204_p3), %s1424_s15, 5 }
   0x7   : > { %207 = sbr.rel (%p204_p3) target bundleno = 306 (0x132), region = 36  ;;  %p244_p4 = scmp.lt.s32.totalorder (!%p204_p3), %s1025_s5, 63 }
   0xc   : > { %v1264_v0 = vld [vmem:[%s1706_s1 + $0x38] sm:$0xff]  ;;  %v1263_v2 = vld [vmem:[%s1706_s1 + $0x30] sm:$0xff]  ;;  %v1262_v4 = vld [vmem:[%s1706_s1 + $0x28] sm:$0xff]  ;;  %s1715_s5 = smov (!%p244_p4, %s1025_s5), 63 }
   0xd   : > { %v1272_v1 = vld [vmem:[%s1706_s1 + $0x78] sm:$0xff]  ;;  %589 = vmatpush.bf16.msra.mxu0 %v1264_v0  ;;  %1368 = vmatpush.bf16.msra.mxu2 %v1264_v0  ;;  %v1271_v3 = vld [vmem:[%s1706_s1 + $0x70] sm:$0xff]  ;;  %v1270_v5 = vld [vmem:[%s1706_s1 + $0x68] sm:$0xff]  ;;  %s1224_s21 = sshll.u32 %s1715_s5, 3  ;;  %s1029_s12 = sshll.u32 %s1715_s5, 2 }
   0xe   : > { %678 = vmatpush.bf16.msra.mxu1 %v1272_v1  ;;  %1376 = vmatpush.bf16.msra.mxu3 %v1272_v1  ;;  %v1261_v6 = vld [vmem:[%s1706_s1 + $0x20] sm:$0xff]  ;;  %v1260_v8 = vld [vmem:[%s1706_s1 + $0x18] sm:$0xff]  ;;  %v1259_v10 = vld [vmem:[%s1706_s1 + $0x10] sm:$0xff]  ;;  %s1525_s26 = scalar_lea.vmem %s1705_s0, %s1224_s21  ;;  %s1618_s15 = scalar_lea.vmem %s1709_s4, %s1029_s12 }
   0xf   : > { %v1269_v7 = vld [vmem:[%s1706_s1 + $0x60] sm:$0xff]  ;;  %v1268_v9 = vld [vmem:[%s1706_s1 + $0x58] sm:$0xff]  ;;  %v1267_v11 = vld [vmem:[%s1706_s1 + $0x50] sm:$0xff] }
  0x10   : > { %v1258_v12 = vld [vmem:[%s1706_s1 + $0x8] sm:$0xff]  ;;  %v1257_v14 = vld [vmem:[%s1706_s1] sm:$0xff]  ;;  %v1040_v28 = vld [vmem:[%s1525_s26 + $0x10] sm:$0xf] }
  0x11   : > { %590 = vmatpush.bf16.msra.mxu0 %v1263_v2  ;;  %1369 = vmatpush.bf16.msra.mxu2 %v1263_v2  ;;  %v1266_v13 = vld [vmem:[%s1706_s1 + $0x48] sm:$0xff]  ;;  %v1265_v15 = vld [vmem:[%s1706_s1 + $0x40] sm:$0xff]  ;;  %v1228_v29 = vld [vmem:[%s1525_s26 + $0x14] sm:$0xf0] }
  0x12   : > { %679 = vmatpush.bf16.msra.mxu1 %v1271_v3  ;;  %1377 = vmatpush.bf16.msra.mxu3 %v1271_v3  ;;  %v1032_v16 = vld [vmem:[%s1525_s26] sm:$0xf]  ;;  %v1226_v17 = vld [vmem:[%s1525_s26 + $0x4] sm:$0xf0]  ;;  %v1225_v20 = vld [vmem:[%s1525_s26 + $0x4] sm:$0xf]  ;;  %v1041_v36 = vor.u32 %v1228_v29, %v1040_v28 }
  0x13   : > { %v1096_v18 = vld [vmem:[%s1525_s26 + $0x80] sm:$0xf]  ;;  %v1242_v19 = vld [vmem:[%s1525_s26 + $0x84] sm:$0xf0]  ;;  %v1034_v21 = vld [vmem:[%s1525_s26 + $0x8] sm:$0xf0]  ;;  %v1033_v24 = vor.u32 %v1226_v17, %v1032_v16 }
  0x14   : > { %v1241_v22 = vld [vmem:[%s1525_s26 + $0x84] sm:$0xf]  ;;  %v1098_v23 = vld [vmem:[%s1525_s26 + $0x88] sm:$0xf0]  ;;  %v1097_v25 = vor.u32 %v1242_v19, %v1096_v18  ;;  %v1037_v26 = vor.u32 %v1225_v20, %v1034_v21  ;;  %v1104_v30 = vld [vmem:[%s1525_s26 + $0x90] sm:$0xf] }
  0x15   : > { %591 = vmatpush.bf16.msra.mxu0 %v1262_v4  ;;  %1370 = vmatpush.bf16.msra.mxu2 %v1262_v4  ;;  %v1101_v27 = vor.u32 %v1241_v22, %v1098_v23  ;;  %v1244_v31 = vld [vmem:[%s1525_s26 + $0x94] sm:$0xf0]  ;;  %v1227_v32 = vld [vmem:[%s1525_s26 + $0x14] sm:$0xf]  ;;  %v1042_v33 = vld [vmem:[%s1525_s26 + $0x18] sm:$0xf0] }
  0x16   : > { %680 = vmatpush.bf16.msra.mxu1 %v1270_v5  ;;  %1378 = vmatpush.bf16.msra.mxu3 %v1270_v5  ;;  %v1243_v34 = vld [vmem:[%s1525_s26 + $0x94] sm:$0xf]  ;;  %v1106_v35 = vld [vmem:[%s1525_s26 + $0x98] sm:$0xf0]  ;;  %v1105_v37 = vor.u32 %v1244_v31, %v1104_v30  ;;  %v1045_v38 = vor.u32 %v1227_v32, %v1042_v33  ;;  %v1048_v40 = vld [vmem:[%s1525_s26 + $0x20] sm:$0xf] }
  0x17   : > { %v1109_v39 = vor.u32 %v1243_v34, %v1106_v35  ;;  %v1230_v41 = vld [vmem:[%s1525_s26 + $0x24] sm:$0xf0]  ;;  %v1112_v42 = vld [vmem:[%s1525_s26 + $0xa0] sm:$0xf]  ;;  %v1229_v44 = vld [vmem:[%s1525_s26 + $0x24] sm:$0xf] }
  0x18   : > { %v1246_v43 = vld [vmem:[%s1525_s26 + $0xa4] sm:$0xf0]  ;;  %v1050_v45 = vld [vmem:[%s1525_s26 + $0x28] sm:$0xf0]  ;;  %v1245_v46 = vld [vmem:[%s1525_s26 + $0xa4] sm:$0xf]  ;;  %v1049_v48 = vor.u32 %v1230_v41, %v1048_v40 }
  0x19   : > { %592 = vmatpush.bf16.msra.mxu0 %v1261_v6  ;;  %1371 = vmatpush.bf16.msra.mxu2 %v1261_v6  ;;  %v1114_v47 = vld [vmem:[%s1525_s26 + $0xa8] sm:$0xf0]  ;;  %v1113_v49 = vor.u32 %v1246_v43, %v1112_v42  ;;  %v1053_v50 = vor.u32 %v1229_v44, %v1050_v45  ;;  %v1056_v52 = vld [vmem:[%s1525_s26 + $0x30] sm:$0xf]  ;;  %v1232_v53 = vld [vmem:[%s1525_s26 + $0x34] sm:$0xf0] }
  0x1a   : > { %681 = vmatpush.bf16.msra.mxu1 %v1269_v7  ;;  %1379 = vmatpush.bf16.msra.mxu3 %v1269_v7  ;;  %v1117_v51 = vor.u32 %v1245_v46, %v1114_v47  ;;  %v1120_v54 = vld [vmem:[%s1525_s26 + $0xb0] sm:$0xf]  ;;  %v1248_v55 = vld [vmem:[%s1525_s26 + $0xb4] sm:$0xf0]  ;;  %v1231_v56 = vld [vmem:[%s1525_s26 + $0x34] sm:$0xf]  ;;  %v1057_v60 = vor.u32 %v1232_v53, %v1056_v52 }
  0x1b   : > { %v1058_v57 = vld [vmem:[%s1525_s26 + $0x38] sm:$0xf0]  ;;  %v1247_v58 = vld [vmem:[%s1525_s26 + $0xb4] sm:$0xf]  ;;  %v1121_v61 = vor.u32 %v1248_v55, %v1120_v54  ;;  %v1064_v0 = vld [vmem:[%s1525_s26 + $0x40] sm:$0xf] }
  0x1c   : > { %v1122_v59 = vld [vmem:[%s1525_s26 + $0xb8] sm:$0xf0]  ;;  %v1061_v62 = vor.u32 %v1231_v56, %v1058_v57  ;;  %v1234_v1 = vld [vmem:[%s1525_s26 + $0x44] sm:$0xf0]  ;;  %v1128_v2 = vld [vmem:[%s1525_s26 + $0xc0] sm:$0xf] }
  0x1d   : > { %593 = vmatpush.bf16.msra.mxu0 %v1260_v8  ;;  %1372 = vmatpush.bf16.msra.mxu2 %v1260_v8  ;;  %v1125_v63 = vor.u32 %v1247_v58, %v1122_v59  ;;  %v1250_v3 = vld [vmem:[%s1525_s26 + $0xc4] sm:$0xf0]  ;;  %v1233_v4 = vld [vmem:[%s1525_s26 + $0x44] sm:$0xf]  ;;  %v1066_v5 = vld [vmem:[%s1525_s26 + $0x48] sm:$0xf0]  ;;  %v1065_v8 = vor.u32 %v1234_v1, %v1064_v0 }
  0x1e   : > { %682 = vmatpush.bf16.msra.mxu1 %v1268_v9  ;;  %1380 = vmatpush.bf16.msra.mxu3 %v1268_v9  ;;  %v1249_v6 = vld [vmem:[%s1525_s26 + $0xc4] sm:$0xf]  ;;  %v1130_v7 = vld [vmem:[%s1525_s26 + $0xc8] sm:$0xf0]  ;;  %v1129_v9 = vor.u32 %v1250_v3, %v1128_v2  ;;  %v1235_v16 = vld [vmem:[%s1525_s26 + $0x54] sm:$0xf] }
  0x1f   : > { %v1074_v17 = vld [vmem:[%s1525_s26 + $0x58] sm:$0xf0]  ;;  %v1251_v18 = vld [vmem:[%s1525_s26 + $0xd4] sm:$0xf]  ;;  %v1237_v28 = vld [vmem:[%s1525_s26 + $0x64] sm:$0xf] }
  0x20   : > { %v1138_v19 = vld [vmem:[%s1525_s26 + $0xd8] sm:$0xf0]  ;;  %v1077_v22 = vor.u32 %v1235_v16, %v1074_v17  ;;  %v1082_v29 = vld [vmem:[%s1525_s26 + $0x68] sm:$0xf0]  ;;  %v1253_v30 = vld [vmem:[%s1525_s26 + $0xe4] sm:$0xf] }
  0x21   : > { %594 = vmatpush.bf16.msra.mxu0 %v1259_v10  ;;  %1373 = vmatpush.bf16.msra.mxu2 %v1259_v10  ;;  %v1069_v10 = vor.u32 %v1233_v4, %v1066_v5  ;;  %v1141_v23 = vor.u32 %v1251_v18, %v1138_v19  ;;  %v1146_v31 = vld [vmem:[%s1525_s26 + $0xe8] sm:$0xf0]  ;;  %v1085_v34 = vor.u32 %v1237_v28, %v1082_v29  ;;  %v1239_v40 = vld [vmem:[%s1525_s26 + $0x74] sm:$0xf]  ;;  %v1090_v41 = vld [vmem:[%s1525_s26 + $0x78] sm:$0xf0] }
  0x22   : > { %683 = vmatpush.bf16.msra.mxu1 %v1267_v11  ;;  %1381 = vmatpush.bf16.msra.mxu3 %v1267_v11  ;;  %v1133_v11 = vor.u32 %v1249_v6, %v1130_v7  ;;  %v1149_v35 = vor.u32 %v1253_v30, %v1146_v31  ;;  %v1255_v42 = vld [vmem:[%s1525_s26 + $0xf4] sm:$0xf]  ;;  %v1154_v43 = vld [vmem:[%s1525_s26 + $0xf8] sm:$0xf0]  ;;  %v1093_v46 = vor.u32 %v1239_v40, %v1090_v41  ;;  %v1609_v57 = vld [vmem:[%s1708_s3] ss:$0 sm:$0xff] }
  0x23   : > { %v1157_v47 = vor.u32 %v1255_v42, %v1154_v43 }
  0x25   : > { %595 = vmatpush.bf16.msra.mxu0 %v1258_v12  ;;  %1374 = vmatpush.bf16.msra.mxu2 %v1258_v12  ;;  %v1072_v12 = vld [vmem:[%s1525_s26 + $0x50] sm:$0xf] }
  0x26   : > { %684 = vmatpush.bf16.msra.mxu1 %v1266_v13  ;;  %1382 = vmatpush.bf16.msra.mxu3 %v1266_v13  ;;  %v1236_v13 = vld [vmem:[%s1525_s26 + $0x54] sm:$0xf0] }
  0x27   : > { %v1073_v20 = vor.u32 %v1236_v13, %v1072_v12 }
  0x29   : > { %596 = vmatpush.bf16.msra.mxu0 %v1257_v14  ;;  %1375 = vmatpush.bf16.msra.mxu2 %v1257_v14  ;;  %v1136_v14 = vld [vmem:[%s1525_s26 + $0xd0] sm:$0xf] }
  0x2a   : > { %685 = vmatpush.bf16.msra.mxu1 %v1265_v15  ;;  %1383 = vmatpush.bf16.msra.mxu3 %v1265_v15  ;;  %v1252_v15 = vld [vmem:[%s1525_s26 + $0xd4] sm:$0xf0] }
  0x2b   : > { %v1137_v21 = vor.u32 %v1252_v15, %v1136_v14 }
  0x2c   : > { %597 = vmatmul.bf16.vlgmr.msra.gmra.mxu0 %v1033_v24  ;;  %637 = vmatmul.bf16.vlgmr.msra.gmra.mxu2 %v1097_v25  ;;  %v1080_v24 = vld [vmem:[%s1525_s26 + $0x60] sm:$0xf]  ;;  %v1238_v25 = vld [vmem:[%s1525_s26 + $0x64] sm:$0xf0] }
  0x2d   : > { %686 = vmatmul.bf16.vlgmr.msra.gmra.mxu1 %v1037_v26  ;;  %726 = vmatmul.bf16.vlgmr.msra.gmra.mxu3 %v1101_v27  ;;  %v1144_v26 = vld [vmem:[%s1525_s26 + $0xe0] sm:$0xf]  ;;  %v1254_v27 = vld [vmem:[%s1525_s26 + $0xe4] sm:$0xf0]  ;;  %v1081_v32 = vor.u32 %v1238_v25, %v1080_v24 }
  0x2e   : > { %v1145_v33 = vor.u32 %v1254_v27, %v1144_v26 }
  0x3c   : > { %602 = vmatmul.bf16.gmra.mxu0 %v1041_v36  ;;  %642 = vmatmul.bf16.gmra.mxu2 %v1105_v37  ;;  %v1088_v36 = vld [vmem:[%s1525_s26 + $0x70] sm:$0xf]  ;;  %v1240_v37 = vld [vmem:[%s1525_s26 + $0x74] sm:$0xf0] }
  0x3d   : > { %691 = vmatmul.bf16.gmra.mxu1 %v1045_v38  ;;  %731 = vmatmul.bf16.gmra.mxu3 %v1109_v39  ;;  %v1152_v38 = vld [vmem:[%s1525_s26 + $0xf0] sm:$0xf]  ;;  %v1256_v39 = vld [vmem:[%s1525_s26 + $0xf4] sm:$0xf0]  ;;  %v1089_v44 = vor.u32 %v1240_v37, %v1088_v36 }
  0x3e   : > { %v1153_v45 = vor.u32 %v1256_v39, %v1152_v38 }
  0x4c   : > { %607 = vmatmul.bf16.gmra.mxu0 %v1049_v48  ;;  %647 = vmatmul.bf16.gmra.mxu2 %v1113_v49 }
  0x4d   : > { %696 = vmatmul.bf16.gmra.mxu1 %v1053_v50  ;;  %736 = vmatmul.bf16.gmra.mxu3 %v1117_v51  ;;  %v1603_v51 = vld [vmem:[%s1707_s2] ss:$0 sm:$0xff] }
  0x5c   : > { %612 = vmatmul.bf16.gmra.mxu0 %v1057_v60  ;;  %652 = vmatmul.bf16.gmra.mxu2 %v1121_v61 }
  0x5d   : > { %701 = vmatmul.bf16.gmra.mxu1 %v1061_v62  ;;  %741 = vmatmul.bf16.gmra.mxu3 %v1125_v63 }
  0x6c   : > { %617 = vmatmul.bf16.gmra.mxu0 %v1065_v8  ;;  %657 = vmatmul.bf16.gmra.mxu2 %v1129_v9 }
  0x6d   : > { %706 = vmatmul.bf16.gmra.mxu1 %v1069_v10  ;;  %746 = vmatmul.bf16.gmra.mxu3 %v1133_v11 }
  0x7c   : > { %622 = vmatmul.bf16.gmra.mxu0 %v1073_v20  ;;  %662 = vmatmul.bf16.gmra.mxu2 %v1137_v21 }
  0x7d   : > { %711 = vmatmul.bf16.gmra.mxu1 %v1077_v22  ;;  %751 = vmatmul.bf16.gmra.mxu3 %v1141_v23 }
  0x8c   : > { %627 = vmatmul.bf16.gmra.mxu0 %v1081_v32  ;;  %667 = vmatmul.bf16.gmra.mxu2 %v1145_v33 }
  0x8d   : > { %716 = vmatmul.bf16.gmra.mxu1 %v1085_v34  ;;  %756 = vmatmul.bf16.gmra.mxu3 %v1149_v35 }
  0x9c   : > { %632 = vmatmul.bf16.gmra.mxu0 %v1089_v44  ;;  %672 = vmatmul.bf16.gmra.mxu2 %v1153_v45 }
  0x9d   : > { %721 = vmatmul.bf16.gmra.mxu1 %v1093_v46  ;;  %761 = vmatmul.bf16.gmra.mxu3 %v1157_v47 }
  0xa9   : > { %v598_v48 = vpop.f32.mrf.mxu0 }
  0xaa   : > { %v687_v49 = vpop.f32.mrf.mxu1 }
  0xab   : > { %v688_v50 = vadd.f32 %v687_v49, %v598_v48 }
  0xad   : > { %v771_v56 = vmul.f32 %v1603_v51, %v688_v50 }
  0xaf   : > { %v638_v52 = vpop.f32.mrf.mxu2  ;;  %v807_v61 = vadd.f32 %v1609_v57, %v771_v56 }
  0xb0   : > { %v727_v53 = vpop.f32.mrf.mxu3 }
  0xb1   : > { %v600_v54 = vpop.f32.mrf.mxu0  ;;  %v728_v59 = vadd.f32 %v727_v53, %v638_v52 }
  0xb2   : > { %v689_v55 = vpop.f32.mrf.mxu1 }
  0xb3   : > { %v690_v58 = vadd.f32 %v689_v55, %v600_v54  ;;  %v787_v1 = vmul.f32 %v1603_v51, %v728_v59 }
  0xb5   : > { %v772_v60 = vmul.f32 %v1603_v51, %v690_v58  ;;  %v823_v7 = vadd.f32 %v1609_v57, %v787_v1 }
  0xb7   : > { %v808_v62 = vadd.f32 %v1609_v57, %v772_v60  ;;  %v640_v63 = vpop.f32.mrf.mxu2 }
  0xb8   : > { %v729_v0 = vpop.f32.mrf.mxu3 }
  0xb9   : > { %v1276_v2 = vpack.c.bf16 %v808_v62, %v807_v61  ;;  %v730_v3 = vadd.f32 %v729_v0, %v640_v63  ;;  %v603_v4 = vpop.f32.mrf.mxu0 }
  0xba   : > { %v692_v5 = vpop.f32.mrf.mxu1 }
  0xbb   : > { %1277 = vst [vmem:[%s1618_s15] sm:$0xff] %v1276_v2   ;;  %v788_v6 = vmul.f32 %v1603_v51, %v730_v3  ;;  %v693_v10 = vadd.f32 %v692_v5, %v603_v4 }
  0xbd   : > { %v824_v8 = vadd.f32 %v1609_v57, %v788_v6  ;;  %v773_v15 = vmul.f32 %v1603_v51, %v693_v10 }
  0xbf   : > { %v1316_v9 = vpack.c.bf16 %v824_v8, %v823_v7  ;;  %v643_v11 = vpop.f32.mrf.mxu2  ;;  %v809_v19 = vadd.f32 %v1609_v57, %v773_v15 }
  0xc0   : > { %v732_v12 = vpop.f32.mrf.mxu3 }
  0xc1   : > { %1360 = vst [vmem:[%s1618_s15 + $0x40] sm:$0xff] %v1316_v9   ;;  %v605_v13 = vpop.f32.mrf.mxu0  ;;  %v733_v17 = vadd.f32 %v732_v12, %v643_v11 }
  0xc2   : > { %v694_v14 = vpop.f32.mrf.mxu1 }
  0xc3   : > { %v695_v16 = vadd.f32 %v694_v14, %v605_v13  ;;  %v789_v23 = vmul.f32 %v1603_v51, %v733_v17 }
  0xc5   : > { %v774_v18 = vmul.f32 %v1603_v51, %v695_v16  ;;  %v825_v29 = vadd.f32 %v1609_v57, %v789_v23 }
  0xc7   : > { %v810_v20 = vadd.f32 %v1609_v57, %v774_v18  ;;  %v645_v21 = vpop.f32.mrf.mxu2 }
  0xc8   : > { %v734_v22 = vpop.f32.mrf.mxu3 }
  0xc9   : > { %v1281_v24 = vpack.c.bf16 %v810_v20, %v809_v19  ;;  %v735_v25 = vadd.f32 %v734_v22, %v645_v21  ;;  %v608_v26 = vpop.f32.mrf.mxu0 }
  0xca   : > { %v697_v27 = vpop.f32.mrf.mxu1 }
  0xcb   : > { %1353 = vst [vmem:[%s1618_s15 + $0x8] sm:$0xff] %v1281_v24   ;;  %v790_v28 = vmul.f32 %v1603_v51, %v735_v25  ;;  %v698_v32 = vadd.f32 %v697_v27, %v608_v26 }
  0xcd   : > { %v826_v30 = vadd.f32 %v1609_v57, %v790_v28  ;;  %v775_v37 = vmul.f32 %v1603_v51, %v698_v32 }
  0xcf   : > { %v1321_v31 = vpack.c.bf16 %v826_v30, %v825_v29  ;;  %v648_v33 = vpop.f32.mrf.mxu2  ;;  %v811_v41 = vadd.f32 %v1609_v57, %v775_v37 }
  0xd0   : > { %v737_v34 = vpop.f32.mrf.mxu3 }
  0xd1   : > { %1361 = vst [vmem:[%s1618_s15 + $0x48] sm:$0xff] %v1321_v31   ;;  %v610_v35 = vpop.f32.mrf.mxu0  ;;  %v738_v39 = vadd.f32 %v737_v34, %v648_v33 }
  0xd2   : > { %v699_v36 = vpop.f32.mrf.mxu1 }
  0xd3   : > { %v700_v38 = vadd.f32 %v699_v36, %v610_v35  ;;  %v791_v45 = vmul.f32 %v1603_v51, %v738_v39 }
  0xd5   : > { %v776_v40 = vmul.f32 %v1603_v51, %v700_v38  ;;  %v827_v52 = vadd.f32 %v1609_v57, %v791_v45 }
  0xd7   : > { %v812_v42 = vadd.f32 %v1609_v57, %v776_v40  ;;  %v650_v43 = vpop.f32.mrf.mxu2 }
  0xd8   : > { %v739_v44 = vpop.f32.mrf.mxu3 }
  0xd9   : > { %v1286_v46 = vpack.c.bf16 %v812_v42, %v811_v41  ;;  %v740_v47 = vadd.f32 %v739_v44, %v650_v43  ;;  %v613_v48 = vpop.f32.mrf.mxu0 }
  0xda   : > { %v702_v49 = vpop.f32.mrf.mxu1 }
  0xdb   : > { %1354 = vst [vmem:[%s1618_s15 + $0x10] sm:$0xff] %v1286_v46   ;;  %v792_v50 = vmul.f32 %v1603_v51, %v740_v47  ;;  %v703_v55 = vadd.f32 %v702_v49, %v613_v48 }
  0xdd   : > { %v828_v53 = vadd.f32 %v1609_v57, %v792_v50  ;;  %v777_v61 = vmul.f32 %v1603_v51, %v703_v55 }
  0xdf   : > { %v1326_v54 = vpack.c.bf16 %v828_v53, %v827_v52  ;;  %v653_v56 = vpop.f32.mrf.mxu2  ;;  %v813_v1 = vadd.f32 %v1609_v57, %v777_v61 }
  0xe0   : > { %v742_v58 = vpop.f32.mrf.mxu3 }
  0xe1   : > { %1362 = vst [vmem:[%s1618_s15 + $0x50] sm:$0xff] %v1326_v54   ;;  %v615_v59 = vpop.f32.mrf.mxu0  ;;  %v743_v63 = vadd.f32 %v742_v58, %v653_v56 }
  0xe2   : > { %v704_v60 = vpop.f32.mrf.mxu1 }
  0xe3   : > { %v705_v62 = vadd.f32 %v704_v60, %v615_v59  ;;  %v793_v5 = vmul.f32 %v1603_v51, %v743_v63 }
  0xe5   : > { %v778_v0 = vmul.f32 %v1603_v51, %v705_v62  ;;  %v829_v11 = vadd.f32 %v1609_v57, %v793_v5 }
  0xe7   : > { %v814_v2 = vadd.f32 %v1609_v57, %v778_v0  ;;  %v655_v3 = vpop.f32.mrf.mxu2 }
  0xe8   : > { %v744_v4 = vpop.f32.mrf.mxu3 }
  0xe9   : > { %v1291_v6 = vpack.c.bf16 %v814_v2, %v813_v1  ;;  %v745_v7 = vadd.f32 %v744_v4, %v655_v3  ;;  %v618_v8 = vpop.f32.mrf.mxu0 }
  0xea   : > { %v707_v9 = vpop.f32.mrf.mxu1 }
  0xeb   : > { %1355 = vst [vmem:[%s1618_s15 + $0x18] sm:$0xff] %v1291_v6   ;;  %v794_v10 = vmul.f32 %v1603_v51, %v745_v7  ;;  %v708_v14 = vadd.f32 %v707_v9, %v618_v8 }
  0xed   : > { %v830_v12 = vadd.f32 %v1609_v57, %v794_v10  ;;  %v779_v19 = vmul.f32 %v1603_v51, %v708_v14 }
  0xef   : > { %v1331_v13 = vpack.c.bf16 %v830_v12, %v829_v11  ;;  %v658_v15 = vpop.f32.mrf.mxu2  ;;  %v815_v23 = vadd.f32 %v1609_v57, %v779_v19 }
  0xf0   : > { %v747_v16 = vpop.f32.mrf.mxu3 }
  0xf1   : > { %1363 = vst [vmem:[%s1618_s15 + $0x58] sm:$0xff] %v1331_v13   ;;  %v620_v17 = vpop.f32.mrf.mxu0  ;;  %v748_v21 = vadd.f32 %v747_v16, %v658_v15 }
  0xf2   : > { %v709_v18 = vpop.f32.mrf.mxu1 }
  0xf3   : > { %v710_v20 = vadd.f32 %v709_v18, %v620_v17  ;;  %v795_v27 = vmul.f32 %v1603_v51, %v748_v21 }
  0xf5   : > { %v780_v22 = vmul.f32 %v1603_v51, %v710_v20  ;;  %v831_v33 = vadd.f32 %v1609_v57, %v795_v27 }
  0xf7   : > { %v816_v24 = vadd.f32 %v1609_v57, %v780_v22  ;;  %v660_v25 = vpop.f32.mrf.mxu2 }
  0xf8   : > { %v749_v26 = vpop.f32.mrf.mxu3 }
  0xf9   : > { %v1296_v28 = vpack.c.bf16 %v816_v24, %v815_v23  ;;  %v750_v29 = vadd.f32 %v749_v26, %v660_v25  ;;  %v623_v30 = vpop.f32.mrf.mxu0 }
  0xfa   : > { %v712_v31 = vpop.f32.mrf.mxu1 }
  0xfb   : > { %1356 = vst [vmem:[%s1618_s15 + $0x20] sm:$0xff] %v1296_v28   ;;  %v796_v32 = vmul.f32 %v1603_v51, %v750_v29  ;;  %v713_v36 = vadd.f32 %v712_v31, %v623_v30 }
  0xfd   : > { %v832_v34 = vadd.f32 %v1609_v57, %v796_v32  ;;  %v781_v41 = vmul.f32 %v1603_v51, %v713_v36 }
  0xff   : > { %v1336_v35 = vpack.c.bf16 %v832_v34, %v831_v33  ;;  %v663_v37 = vpop.f32.mrf.mxu2  ;;  %v817_v45 = vadd.f32 %v1609_v57, %v781_v41 }
 0x100   : > { %v752_v38 = vpop.f32.mrf.mxu3 }
 0x101   : > { %1364 = vst [vmem:[%s1618_s15 + $0x60] sm:$0xff] %v1336_v35   ;;  %v625_v39 = vpop.f32.mrf.mxu0  ;;  %v753_v43 = vadd.f32 %v752_v38, %v663_v37 }
 0x102   : > { %v714_v40 = vpop.f32.mrf.mxu1 }
 0x103   : > { %v715_v42 = vadd.f32 %v714_v40, %v625_v39  ;;  %v797_v49 = vmul.f32 %v1603_v51, %v753_v43 }
 0x105   : > { %v782_v44 = vmul.f32 %v1603_v51, %v715_v42  ;;  %v833_v56 = vadd.f32 %v1609_v57, %v797_v49 }
 0x107   : > { %v818_v46 = vadd.f32 %v1609_v57, %v782_v44  ;;  %v665_v47 = vpop.f32.mrf.mxu2 }
 0x108   : > { %v754_v48 = vpop.f32.mrf.mxu3 }
 0x109   : > { %v1301_v50 = vpack.c.bf16 %v818_v46, %v817_v45  ;;  %v755_v52 = vadd.f32 %v754_v48, %v665_v47  ;;  %v628_v53 = vpop.f32.mrf.mxu0 }
 0x10a   : > { %v717_v54 = vpop.f32.mrf.mxu1 }
 0x10b   : > { %1357 = vst [vmem:[%s1618_s15 + $0x28] sm:$0xff] %v1301_v50   ;;  %v798_v55 = vmul.f32 %v1603_v51, %v755_v52  ;;  %v718_v60 = vadd.f32 %v717_v54, %v628_v53 }
 0x10d   : > { %v834_v58 = vadd.f32 %v1609_v57, %v798_v55  ;;  %v783_v1 = vmul.f32 %v1603_v51, %v718_v60 }
 0x10f   : > { %v1341_v59 = vpack.c.bf16 %v834_v58, %v833_v56  ;;  %v668_v61 = vpop.f32.mrf.mxu2  ;;  %v819_v5 = vadd.f32 %v1609_v57, %v783_v1 }
 0x110   : > { %v757_v62 = vpop.f32.mrf.mxu3 }
 0x111   : > { %1365 = vst [vmem:[%s1618_s15 + $0x68] sm:$0xff] %v1341_v59   ;;  %v630_v63 = vpop.f32.mrf.mxu0  ;;  %v758_v3 = vadd.f32 %v757_v62, %v668_v61 }
 0x112   : > { %v719_v0 = vpop.f32.mrf.mxu1 }
 0x113   : > { %v720_v2 = vadd.f32 %v719_v0, %v630_v63  ;;  %v799_v9 = vmul.f32 %v1603_v51, %v758_v3 }
 0x115   : > { %v784_v4 = vmul.f32 %v1603_v51, %v720_v2  ;;  %v835_v15 = vadd.f32 %v1609_v57, %v799_v9 }
 0x117   : > { %v820_v6 = vadd.f32 %v1609_v57, %v784_v4  ;;  %v670_v7 = vpop.f32.mrf.mxu2 }
 0x118   : > { %v759_v8 = vpop.f32.mrf.mxu3 }
 0x119   : > { %v1306_v10 = vpack.c.bf16 %v820_v6, %v819_v5  ;;  %v760_v11 = vadd.f32 %v759_v8, %v670_v7  ;;  %v633_v12 = vpop.f32.mrf.mxu0 }
 0x11a   : > { %v722_v13 = vpop.f32.mrf.mxu1 }
 0x11b   : > { %1358 = vst [vmem:[%s1618_s15 + $0x30] sm:$0xff] %v1306_v10   ;;  %v800_v14 = vmul.f32 %v1603_v51, %v760_v11  ;;  %v723_v18 = vadd.f32 %v722_v13, %v633_v12 }
 0x11d   : > { %v836_v16 = vadd.f32 %v1609_v57, %v800_v14  ;;  %v785_v23 = vmul.f32 %v1603_v51, %v723_v18 }
 0x11f   : > { %v1346_v17 = vpack.c.bf16 %v836_v16, %v835_v15  ;;  %v673_v19 = vpop.f32.mrf.mxu2  ;;  %v821_v27 = vadd.f32 %v1609_v57, %v785_v23 }
 0x120   : > { %v762_v20 = vpop.f32.mrf.mxu3 }
 0x121   : > { %1366 = vst [vmem:[%s1618_s15 + $0x70] sm:$0xff] %v1346_v17   ;;  %v635_v21 = vpop.f32.mrf.mxu0  ;;  %v763_v25 = vadd.f32 %v762_v20, %v673_v19 }
 0x122   : > { %v724_v22 = vpop.f32.mrf.mxu1 }
 0x123   : > { %v725_v24 = vadd.f32 %v724_v22, %v635_v21  ;;  %v801_v31 = vmul.f32 %v1603_v51, %v763_v25 }
 0x125   : > { %v786_v26 = vmul.f32 %v1603_v51, %v725_v24  ;;  %v837_v35 = vadd.f32 %v1609_v57, %v801_v31 }
 0x127   : > { %v822_v28 = vadd.f32 %v1609_v57, %v786_v26  ;;  %v675_v29 = vpop.f32.mrf.mxu2 }
 0x128   : > { %v764_v30 = vpop.f32.mrf.mxu3 }
 0x129   : > { %v1311_v32 = vpack.c.bf16 %v822_v28, %v821_v27  ;;  %v765_v33 = vadd.f32 %v764_v30, %v675_v29 }
 0x12b   : > { %1359 = vst [vmem:[%s1618_s15 + $0x38] sm:$0xff] %v1311_v32   ;;  %v802_v34 = vmul.f32 %v1603_v51, %v765_v33 }
 0x12d   : > { %v838_v36 = vadd.f32 %v1609_v57, %v802_v34 }
 0x12f   : > { %v1351_v37 = vpack.c.bf16 %v838_v36, %v837_v35 }
 0x131   : > { %1367 = vst [vmem:[%s1618_s15 + $0x78] sm:$0xff] %v1351_v37  }
 0x132 PF: > { %s14_s17 = sadd.s32 1, %s1432_s17   ;;  %s1710_s15 = smov %s1428_s16 }
 0x133   : > { %p11_p5 = scmp.ge.s32.totalorder %s14_s17, 4   ;;  %s1711_s16 = smov %s1713_s18 }
 0x135   :  { %13 = sbr.rel (!%p11_p5) target bundleno = 2 (0x2), region = 75 }

// kernel: _lambda_.27
= control target key start
LH: loop header
LB: loop body
LE: loop exit
PB: predicated region body
PF: predicated region fallthrough
CT: control target
= control target key end

     0   :  { %s874_s18 = smov 0   ;;  %s876_s19 = smov 0   ;;  %s948_s0 = inlined_call_operand.vmem [shape: bf16[128,128], index: 0, kind: input, shape index: {}]   ;;  %s949_s1 = inlined_call_operand.vmem [shape: bf16[128,128], index: 1, kind: input, shape index: {}]   ;;  %s950_s2 = inlined_call_operand.vmem [shape: f32[1,128], index: 2, kind: input, shape index: {}]   ;;  %s951_s3 = inlined_call_operand.vmem [shape: f32[1,128], index: 3, kind: input, shape index: {}]   ;;  %s952_s4 = inlined_call_operand.vmem [shape: bf16[128,128], index: 4, kind: input, shape index: {}]   ;;  %s953_s5 = inlined_call_operand.vmem [shape: bf16[128,128], index: 5, kind: output, shape index: {}]  }
   0x1   :  { %s878_s20 = smov 0  }
   0x2 LB: > { %s27_s21 = sadd.s32 1, %s838_s19  ;;  %p659_p0 = scmp.ge.s32.totalorder %s842_s20, 1  ;;  %s842_s20 = sphi %s878_s20, %s15_s20   ;;  %s838_s19 = sphi %s876_s19, %s955_s19   ;;  %s834_s18 = sphi %s874_s18, %s954_s18  }
   0x3   : > { %p29_p1 = scmp.ge.s32.totalorder %s27_s21, 2  ;;  %p243_p2 = scmp.lt.s32.totalorder %s842_s20, 3 }
   0x5   : > { %s957_s21 = smov (%p29_p1, %s27_s21), 0  ;;  %p244_p3 = pnand %p659_p0, %p243_p2 }
   0x6   : > { %s660_s30 = sshll.u32 (!%p244_p3), %s834_s18, 3 }
   0x7   : > { %247 = sbr.rel (%p244_p3) target bundleno = 197 (0xc5), region = 40  ;;  %p293_p4 = scmp.lt.s32.totalorder (!%p244_p3), %s660_s30, 15 }
   0xc   : > { %v727_v0 = vld [vmem:[%s949_s1 + $0x38] sm:$0xff]  ;;  %v726_v1 = vld [vmem:[%s949_s1 + $0x30] sm:$0xff]  ;;  %v725_v2 = vld [vmem:[%s949_s1 + $0x28] sm:$0xff]  ;;  %s959_s30 = smov (!%p293_p4, %s660_s30), 15 }
   0xd   : > { %422 = vmatpush.bf16.msra.mxu0 %v727_v0  ;;  %770 = vmatpush.bf16.msra.mxu1 %v727_v0  ;;  %v724_v3 = vld [vmem:[%s949_s1 + $0x20] sm:$0xff]  ;;  %v723_v4 = vld [vmem:[%s949_s1 + $0x18] sm:$0xff]  ;;  %v722_v5 = vld [vmem:[%s949_s1 + $0x10] sm:$0xff]  ;;  %s916_s12 = sshll.u32 %s959_s30, 2 }
   0xe   : > { %771 = vmatpush.bf16.msra.mxu2 %v727_v0  ;;  %772 = vmatpush.bf16.msra.mxu3 %v727_v0  ;;  %v721_v6 = vld [vmem:[%s949_s1 + $0x8] sm:$0xff]  ;;  %v720_v7 = vld [vmem:[%s949_s1] sm:$0xff]  ;;  %s296_s17 = scalar_lea.vmem %s948_s0, %s916_s12  ;;  %s315_s25 = scalar_lea.vmem %s952_s4, %s916_s12 }
   0xf   : > { %v716_v8 = vld [vmem:[%s296_s17] sm:$0xff]  ;;  %v717_v9 = vld [vmem:[%s296_s17 + $0x8] sm:$0xff]  ;;  %v718_v10 = vld [vmem:[%s296_s17 + $0x10] sm:$0xff]  ;;  %s324_s30 = scalar_lea.vmem %s953_s5, %s916_s12 }
  0x10   : > { %v719_v11 = vld [vmem:[%s296_s17 + $0x18] sm:$0xff]  ;;  %v818_v12 = vld [vmem:[%s950_s2] ss:$0 sm:$0xff]  ;;  %v764_v19 = vld [vmem:[%s315_s25 + $0x8] sm:$0xff]  }
  0x11   : > { %423 = vmatpush.bf16.msra.mxu0 %v726_v1  ;;  %773 = vmatpush.bf16.msra.mxu1 %v726_v1  ;;  %v819_v16 = vld [vmem:[%s951_s3] ss:$0 sm:$0xff]  ;;  %v734_v23 = vunpack.c.l.bf16 %v764_v19  ;;  %v735_v31 = vunpack.c.h.bf16 %v764_v19  ;;  %v765_v36 = vld [vmem:[%s315_s25 + $0x10] sm:$0xff]   ;;  %v766_v37 = vld [vmem:[%s315_s25 + $0x18] sm:$0xff]  }
  0x12   : > { %774 = vmatpush.bf16.msra.mxu2 %v726_v1  ;;  %775 = vmatpush.bf16.msra.mxu3 %v726_v1  ;;  %v729_v18 = vld [vmem:[%s315_s25] sm:$0xff]   ;;  %v738_v43 = vunpack.c.l.bf16 %v765_v36  ;;  %v742_v45 = vunpack.c.l.bf16 %v766_v37  ;;  %v739_v53 = vunpack.c.h.bf16 %v765_v36  ;;  %v743_v55 = vunpack.c.h.bf16 %v766_v37 }
  0x13   : > { %v730_v21 = vunpack.c.l.bf16 %v729_v18  ;;  %v731_v29 = vunpack.c.h.bf16 %v729_v18 }
  0x15   : > { %424 = vmatpush.bf16.msra.mxu0 %v725_v2  ;;  %776 = vmatpush.bf16.msra.mxu1 %v725_v2 }
  0x16   : > { %777 = vmatpush.bf16.msra.mxu2 %v725_v2  ;;  %778 = vmatpush.bf16.msra.mxu3 %v725_v2 }
  0x19   : > { %425 = vmatpush.bf16.msra.mxu0 %v724_v3  ;;  %779 = vmatpush.bf16.msra.mxu1 %v724_v3 }
  0x1a   : > { %780 = vmatpush.bf16.msra.mxu2 %v724_v3  ;;  %781 = vmatpush.bf16.msra.mxu3 %v724_v3 }
  0x1d   : > { %426 = vmatpush.bf16.msra.mxu0 %v723_v4  ;;  %782 = vmatpush.bf16.msra.mxu1 %v723_v4 }
  0x1e   : > { %783 = vmatpush.bf16.msra.mxu2 %v723_v4  ;;  %784 = vmatpush.bf16.msra.mxu3 %v723_v4 }
  0x21   : > { %427 = vmatpush.bf16.msra.mxu0 %v722_v5  ;;  %785 = vmatpush.bf16.msra.mxu1 %v722_v5 }
  0x22   : > { %786 = vmatpush.bf16.msra.mxu2 %v722_v5  ;;  %787 = vmatpush.bf16.msra.mxu3 %v722_v5 }
  0x25   : > { %428 = vmatpush.bf16.msra.mxu0 %v721_v6  ;;  %788 = vmatpush.bf16.msra.mxu1 %v721_v6 }
  0x26   : > { %789 = vmatpush.bf16.msra.mxu2 %v721_v6  ;;  %790 = vmatpush.bf16.msra.mxu3 %v721_v6 }
  0x29   : > { %429 = vmatpush.bf16.msra.mxu0 %v720_v7  ;;  %791 = vmatpush.bf16.msra.mxu1 %v720_v7 }
  0x2a   : > { %792 = vmatpush.bf16.msra.mxu2 %v720_v7  ;;  %793 = vmatpush.bf16.msra.mxu3 %v720_v7 }
  0x2c   : > { %430 = vmatmul.bf16.vlgmr.msra.gmra.mxu0 %v716_v8  ;;  %435 = vmatmul.bf16.vlgmr.msra.gmra.mxu1 %v717_v9 }
  0x2d   : > { %440 = vmatmul.bf16.vlgmr.msra.gmra.mxu2 %v718_v10  ;;  %445 = vmatmul.bf16.vlgmr.msra.gmra.mxu3 %v719_v11 }
  0xa9   : > { %v431_v13 = vpop.f32.mrf.mxu0  ;;  %v436_v14 = vpop.f32.mrf.mxu1 }
  0xaa   : > { %v455_v15 = vmul.f32 %v818_v12, %v431_v13  ;;  %v457_v17 = vmul.f32 %v818_v12, %v436_v14 }
  0xac   : > { %v467_v20 = vadd.f32 %v819_v16, %v455_v15  ;;  %v469_v22 = vadd.f32 %v819_v16, %v457_v17 }
  0xae   : > { %v491_v34 = vadd.f32 %v730_v21, %v467_v20  ;;  %v493_v35 = vadd.f32 %v734_v23, %v469_v22 }
  0xb0   : > { %v441_v24 = vpop.f32.mrf.mxu2  ;;  %v446_v25 = vpop.f32.mrf.mxu3  ;;  %v499_v46 = vmax.f32 %v491_v34, 0.0  ;;  %v501_v47 = vmax.f32 %v493_v35, 0.0 }
  0xb1   : > { %v433_v26 = vpop.f32.mrf.mxu0  ;;  %v438_v27 = vpop.f32.mrf.mxu1  ;;  %v459_v32 = vmul.f32 %v818_v12, %v441_v24  ;;  %v461_v33 = vmul.f32 %v818_v12, %v446_v25 }
  0xb2   : > { %v456_v28 = vmul.f32 %v818_v12, %v433_v26  ;;  %v458_v30 = vmul.f32 %v818_v12, %v438_v27 }
  0xb3   : > { %v471_v42 = vadd.f32 %v819_v16, %v459_v32  ;;  %v473_v44 = vadd.f32 %v819_v16, %v461_v33 }
  0xb4   : > { %v468_v38 = vadd.f32 %v819_v16, %v456_v28  ;;  %v470_v39 = vadd.f32 %v819_v16, %v458_v30 }
  0xb5   : > { %v495_v58 = vadd.f32 %v738_v43, %v471_v42  ;;  %v497_v59 = vadd.f32 %v742_v45, %v473_v44 }
  0xb6   : > { %v492_v40 = vadd.f32 %v731_v29, %v468_v38  ;;  %v494_v41 = vadd.f32 %v735_v31, %v470_v39 }
  0xb7   : > { %v503_v0 = vmax.f32 %v495_v58, 0.0  ;;  %v505_v1 = vmax.f32 %v497_v59, 0.0 }
  0xb8   : > { %v500_v48 = vmax.f32 %v492_v40, 0.0  ;;  %v502_v49 = vmax.f32 %v494_v41, 0.0  ;;  %v443_v50 = vpop.f32.mrf.mxu2  ;;  %v448_v51 = vpop.f32.mrf.mxu3 }
  0xb9   : > { %v460_v52 = vmul.f32 %v818_v12, %v443_v50  ;;  %v462_v54 = vmul.f32 %v818_v12, %v448_v51 }
  0xba   : > { %v747_v56 = vpack.c.bf16 %v500_v48, %v499_v46  ;;  %v752_v57 = vpack.c.bf16 %v502_v49, %v501_v47 }
  0xbb   : > { %v472_v60 = vadd.f32 %v819_v16, %v460_v52  ;;  %v474_v61 = vadd.f32 %v819_v16, %v462_v54 }
  0xbc   : > { %748 = vst [vmem:[%s324_s30] sm:$0xff] %v747_v56  }
  0xbd   : > { %767 = vst [vmem:[%s324_s30 + $0x8] sm:$0xff] %v752_v57   ;;  %v496_v62 = vadd.f32 %v739_v53, %v472_v60  ;;  %v498_v63 = vadd.f32 %v743_v55, %v474_v61 }
  0xbf   : > { %v504_v2 = vmax.f32 %v496_v62, 0.0  ;;  %v506_v3 = vmax.f32 %v498_v63, 0.0 }
  0xc1   : > { %v757_v4 = vpack.c.bf16 %v504_v2, %v503_v0  ;;  %v762_v5 = vpack.c.bf16 %v506_v3, %v505_v1 }
  0xc3   : > { %768 = vst [vmem:[%s324_s30 + $0x10] sm:$0xff] %v757_v4  }
  0xc4   : > { %769 = vst [vmem:[%s324_s30 + $0x18] sm:$0xff] %v762_v5  }
  0xc5 PF: > { %s15_s20 = sadd.s32 1, %s842_s20   ;;  %s954_s18 = smov %s838_s19 }
  0xc6   : > { %p12_p5 = scmp.ge.s32.totalorder %s15_s20, 4   ;;  %s955_s19 = smov %s957_s21 }
  0xc8   :  { %14 = sbr.rel (!%p12_p5) target bundleno = 2 (0x2), region = 82 }

// kernel: _lambda_.26
= control target key start
LH: loop header
LB: loop body
LE: loop exit
PB: predicated region body
PF: predicated region fallthrough
CT: control target
= control target key end

     0   :  { %s741_s15 = smov 0   ;;  %s743_s16 = smov 0   ;;  %s814_s0 = inlined_call_operand.vmem [shape: bf16[128,128], index: 0, kind: input, shape index: {}]   ;;  %s815_s1 = inlined_call_operand.vmem [shape: bf16[128,128], index: 1, kind: input, shape index: {}]   ;;  %s816_s2 = inlined_call_operand.vmem [shape: f32[1,128], index: 2, kind: input, shape index: {}]   ;;  %s817_s3 = inlined_call_operand.vmem [shape: f32[1,128], index: 3, kind: input, shape index: {}]   ;;  %s818_s4 = inlined_call_operand.vmem [shape: bf16[128,128], index: 4, kind: output, shape index: {}]  }
   0x1   :  { %s745_s17 = smov 0  }
   0x2 LB: > { %s26_s18 = sadd.s32 1, %s710_s16  ;;  %p552_p0 = scmp.ge.s32.totalorder %s714_s17, 1  ;;  %s714_s17 = sphi %s745_s17, %s14_s17   ;;  %s710_s16 = sphi %s743_s16, %s820_s16   ;;  %s706_s15 = sphi %s741_s15, %s819_s15  }
   0x3   : > { %p28_p1 = scmp.ge.s32.totalorder %s26_s18, 2  ;;  %p202_p2 = scmp.lt.s32.totalorder %s714_s17, 3 }
   0x5   : > { %s822_s18 = smov (%p28_p1, %s26_s18), 0  ;;  %p203_p3 = pnand %p552_p0, %p202_p2 }
   0x6   : > { %s553_s27 = sshll.u32 (!%p203_p3), %s706_s15, 3 }
   0x7   : > { %206 = sbr.rel (%p203_p3) target bundleno = 193 (0xc1), region = 36  ;;  %p242_p4 = scmp.lt.s32.totalorder (!%p203_p3), %s553_s27, 15 }
   0xc   : > { %v618_v0 = vld [vmem:[%s815_s1 + $0x38] sm:$0xff]  ;;  %v617_v1 = vld [vmem:[%s815_s1 + $0x30] sm:$0xff]  ;;  %v616_v2 = vld [vmem:[%s815_s1 + $0x28] sm:$0xff]  ;;  %s824_s27 = smov (!%p242_p4, %s553_s27), 15 }
   0xd   : > { %362 = vmatpush.bf16.msra.mxu0 %v618_v0  ;;  %642 = vmatpush.bf16.msra.mxu1 %v618_v0  ;;  %v615_v3 = vld [vmem:[%s815_s1 + $0x20] sm:$0xff]  ;;  %v614_v4 = vld [vmem:[%s815_s1 + $0x18] sm:$0xff]  ;;  %v613_v5 = vld [vmem:[%s815_s1 + $0x10] sm:$0xff]  ;;  %s554_s8 = sshll.u32 %s824_s27, 2 }
   0xe   : > { %643 = vmatpush.bf16.msra.mxu2 %v618_v0  ;;  %644 = vmatpush.bf16.msra.mxu3 %v618_v0  ;;  %v612_v6 = vld [vmem:[%s815_s1 + $0x8] sm:$0xff]  ;;  %v611_v7 = vld [vmem:[%s815_s1] sm:$0xff]  ;;  %s245_s13 = scalar_lea.vmem %s814_s0, %s554_s8  ;;  %s264_s23 = scalar_lea.vmem %s818_s4, %s554_s8 }
   0xf   : > { %v607_v8 = vld [vmem:[%s245_s13] sm:$0xff]  ;;  %v608_v9 = vld [vmem:[%s245_s13 + $0x8] sm:$0xff]  ;;  %v609_v10 = vld [vmem:[%s245_s13 + $0x10] sm:$0xff] }
  0x10   : > { %v610_v11 = vld [vmem:[%s245_s13 + $0x18] sm:$0xff]  ;;  %v690_v14 = vld [vmem:[%s816_s2] ss:$0 sm:$0xff] }
  0x11   : > { %363 = vmatpush.bf16.msra.mxu0 %v617_v1  ;;  %645 = vmatpush.bf16.msra.mxu1 %v617_v1  ;;  %v691_v16 = vld [vmem:[%s817_s3] ss:$0 sm:$0xff] }
  0x12   : > { %646 = vmatpush.bf16.msra.mxu2 %v617_v1  ;;  %647 = vmatpush.bf16.msra.mxu3 %v617_v1 }
  0x15   : > { %364 = vmatpush.bf16.msra.mxu0 %v616_v2  ;;  %648 = vmatpush.bf16.msra.mxu1 %v616_v2 }
  0x16   : > { %649 = vmatpush.bf16.msra.mxu2 %v616_v2  ;;  %650 = vmatpush.bf16.msra.mxu3 %v616_v2 }
  0x19   : > { %365 = vmatpush.bf16.msra.mxu0 %v615_v3  ;;  %651 = vmatpush.bf16.msra.mxu1 %v615_v3 }
  0x1a   : > { %652 = vmatpush.bf16.msra.mxu2 %v615_v3  ;;  %653 = vmatpush.bf16.msra.mxu3 %v615_v3 }
  0x1d   : > { %366 = vmatpush.bf16.msra.mxu0 %v614_v4  ;;  %654 = vmatpush.bf16.msra.mxu1 %v614_v4 }
  0x1e   : > { %655 = vmatpush.bf16.msra.mxu2 %v614_v4  ;;  %656 = vmatpush.bf16.msra.mxu3 %v614_v4 }
  0x21   : > { %367 = vmatpush.bf16.msra.mxu0 %v613_v5  ;;  %657 = vmatpush.bf16.msra.mxu1 %v613_v5 }
  0x22   : > { %658 = vmatpush.bf16.msra.mxu2 %v613_v5  ;;  %659 = vmatpush.bf16.msra.mxu3 %v613_v5 }
  0x25   : > { %368 = vmatpush.bf16.msra.mxu0 %v612_v6  ;;  %660 = vmatpush.bf16.msra.mxu1 %v612_v6 }
  0x26   : > { %661 = vmatpush.bf16.msra.mxu2 %v612_v6  ;;  %662 = vmatpush.bf16.msra.mxu3 %v612_v6 }
  0x29   : > { %369 = vmatpush.bf16.msra.mxu0 %v611_v7  ;;  %663 = vmatpush.bf16.msra.mxu1 %v611_v7 }
  0x2a   : > { %664 = vmatpush.bf16.msra.mxu2 %v611_v7  ;;  %665 = vmatpush.bf16.msra.mxu3 %v611_v7 }
  0x2c   : > { %370 = vmatmul.bf16.vlgmr.msra.gmra.mxu0 %v607_v8  ;;  %375 = vmatmul.bf16.vlgmr.msra.gmra.mxu1 %v608_v9 }
  0x2d   : > { %380 = vmatmul.bf16.vlgmr.msra.gmra.mxu2 %v609_v10  ;;  %385 = vmatmul.bf16.vlgmr.msra.gmra.mxu3 %v610_v11 }
  0xa9   : > { %v371_v12 = vpop.f32.mrf.mxu0  ;;  %v376_v13 = vpop.f32.mrf.mxu1 }
  0xaa   : > { %v395_v15 = vmul.f32 %v690_v14, %v371_v12  ;;  %v397_v17 = vmul.f32 %v690_v14, %v376_v13 }
  0xac   : > { %v407_v24 = vadd.f32 %v691_v16, %v395_v15  ;;  %v409_v25 = vadd.f32 %v691_v16, %v397_v17 }
  0xb0   : > { %v381_v18 = vpop.f32.mrf.mxu2  ;;  %v386_v19 = vpop.f32.mrf.mxu3 }
  0xb1   : > { %v373_v20 = vpop.f32.mrf.mxu0  ;;  %v378_v21 = vpop.f32.mrf.mxu1  ;;  %v399_v30 = vmul.f32 %v690_v14, %v381_v18  ;;  %v401_v31 = vmul.f32 %v690_v14, %v386_v19 }
  0xb2   : > { %v396_v22 = vmul.f32 %v690_v14, %v373_v20  ;;  %v398_v23 = vmul.f32 %v690_v14, %v378_v21 }
  0xb3   : > { %v411_v36 = vadd.f32 %v691_v16, %v399_v30  ;;  %v413_v37 = vadd.f32 %v691_v16, %v401_v31 }
  0xb4   : > { %v408_v26 = vadd.f32 %v691_v16, %v396_v22  ;;  %v410_v27 = vadd.f32 %v691_v16, %v398_v23 }
  0xb6   : > { %v622_v28 = vpack.c.bf16 %v408_v26, %v407_v24  ;;  %v627_v29 = vpack.c.bf16 %v410_v27, %v409_v25 }
  0xb8   : > { %623 = vst [vmem:[%s264_s23] sm:$0xff] %v622_v28   ;;  %v383_v32 = vpop.f32.mrf.mxu2  ;;  %v388_v33 = vpop.f32.mrf.mxu3 }
  0xb9   : > { %639 = vst [vmem:[%s264_s23 + $0x8] sm:$0xff] %v627_v29   ;;  %v400_v34 = vmul.f32 %v690_v14, %v383_v32  ;;  %v402_v35 = vmul.f32 %v690_v14, %v388_v33 }
  0xbb   : > { %v412_v38 = vadd.f32 %v691_v16, %v400_v34  ;;  %v414_v39 = vadd.f32 %v691_v16, %v402_v35 }
  0xbd   : > { %v632_v40 = vpack.c.bf16 %v412_v38, %v411_v36  ;;  %v637_v41 = vpack.c.bf16 %v414_v39, %v413_v37 }
  0xbf   : > { %640 = vst [vmem:[%s264_s23 + $0x10] sm:$0xff] %v632_v40  }
  0xc0   : > { %641 = vst [vmem:[%s264_s23 + $0x18] sm:$0xff] %v637_v41  }
  0xc1 PF: > { %s14_s17 = sadd.s32 1, %s714_s17   ;;  %s819_s15 = smov %s710_s16 }
  0xc2   : > { %p11_p5 = scmp.ge.s32.totalorder %s14_s17, 4   ;;  %s820_s16 = smov %s822_s18 }
  0xc4   :  { %13 = sbr.rel (!%p11_p5) target bundleno = 2 (0x2), region = 75 }

// kernel: _lambda_.25
= control target key start
LH: loop header
LB: loop body
LE: loop exit
PB: predicated region body
PF: predicated region fallthrough
CT: control target
= control target key end

     0   :  { %s3038_s15 = smov 0   ;;  %s3040_s16 = smov 0   ;;  %s3531_s0 = inlined_call_operand.vmem [shape: bf16[2,102,128], index: 0, kind: input, shape index: {}]   ;;  %s3532_s1 = inlined_call_operand.vmem [shape: bf16[9,128,128], index: 1, kind: input, shape index: {}]   ;;  %s3533_s2 = inlined_call_operand.vmem [shape: f32[1,128], index: 2, kind: input, shape index: {}]   ;;  %s3534_s3 = inlined_call_operand.vmem [shape: f32[1,128], index: 3, kind: input, shape index: {}]   ;;  %s3535_s4 = inlined_call_operand.vmem [shape: bf16[2,80,128], index: 4, kind: output, shape index: {}]  }
   0x1   :  { %s3042_s17 = smov 0  }
   0x2 LB: > { %s26_s18 = sadd.s32 1, %s3007_s16  ;;  %p2198_p0 = scmp.ge.s32.totalorder %s3011_s17, 1  ;;  %s3011_s17 = sphi %s3042_s17, %s14_s17   ;;  %s3007_s16 = sphi %s3040_s16, %s3537_s16   ;;  %s3003_s15 = sphi %s3038_s15, %s3536_s15  }
   0x3   : > { %p28_p1 = scmp.ge.s32.totalorder %s26_s18, 2  ;;  %p201_p2 = scmp.lt.s32.totalorder %s3011_s17, 3 }
   0x5   : > { %s3539_s18 = smov (%p28_p1, %s26_s18), 0  ;;  %p202_p3 = pnand %p2198_p0, %p201_p2 }
   0x6   : > { %p240_p4 = scmp.lt.s32.totalorder (!%p202_p3), %s3003_s15, 1 }
   0x7   : > { %205 = sbr.rel (%p202_p3) target bundleno = 378 (0x17a), region = 36 }
   0xc   : > { %v2811_v0 = vld [vmem:[%s3532_s1 + $0x38] sm:$0xff]  ;;  %v2810_v1 = vld [vmem:[%s3532_s1 + $0x30] sm:$0xff]  ;;  %v2809_v4 = vld [vmem:[%s3532_s1 + $0x28] sm:$0xff]  ;;  %s3541_s15 = smov (!%p240_p4, %s3003_s15), 1  ;;  %vm685_vm0 = vcmask 1046528   ;;  %vm1281_vm4 = vcmask 1045504  }
   0xd   : > { %367 = vmatpush.bf16.msra.mxu0 %v2811_v0  ;;  %2945 = vmatpush.bf16.msra.mxu1 %v2811_v0  ;;  %v2850_v2 = vld [vmem:[%s3532_s1 + $0xf8] sm:$0xff]  ;;  %v2849_v3 = vld [vmem:[%s3532_s1 + $0xf0] sm:$0xff]  ;;  %v2848_v5 = vld [vmem:[%s3532_s1 + $0xe8] sm:$0xff]  ;;  %s2961_s19 = smul.u32 52, %s3541_s15  ;;  %vm467_vm1 = vsmask.f32 7424 }
   0xe   : > { %2946 = vmatpush.bf16.msra.mxu2 %v2811_v0  ;;  %934 = vmatpush.bf16.msra.mxu3 %v2850_v2  ;;  %v2808_v6 = vld [vmem:[%s3532_s1 + $0x20] sm:$0xff]  ;;  %v2807_v8 = vld [vmem:[%s3532_s1 + $0x18] sm:$0xff]  ;;  %v2806_v10 = vld [vmem:[%s3532_s1 + $0x10] sm:$0xff]  ;;  %vm1054_vm2 = vsmask.f32 6400  ;;  %vm1877_vm5 = vcmask 1044480  }
   0xf   : > { %v2847_v7 = vld [vmem:[%s3532_s1 + $0xe0] sm:$0xff]  ;;  %v2846_v9 = vld [vmem:[%s3532_s1 + $0xd8] sm:$0xff]  ;;  %v2845_v11 = vld [vmem:[%s3532_s1 + $0xd0] sm:$0xff]  ;;  %s3105_s26 = scalar_lea.vmem %s3531_s0, %s2961_s19  ;;  %vm1650_vm3 = vsmask.f32 5376  ;;  %s2962_s21 = smul.u32 40, %s3541_s15 }
  0x10   : > { %v2805_v12 = vld [vmem:[%s3532_s1 + $0x8] sm:$0xff]  ;;  %v2407_v13 = vld [vmem:[%s3105_s26 + $0x4] sm:$0xe]  ;;  %v2824_v19 = vld [vmem:[%s3532_s1 + $0x78] sm:$0xff] }
  0x11   : > { %368 = vmatpush.bf16.msra.mxu0 %v2810_v1  ;;  %2947 = vmatpush.bf16.msra.mxu1 %v2810_v1  ;;  %v2838_v14 = vld [vmem:[%s3105_s26 + $0x4] sm:$0xf0]  ;;  %v2804_v16 = vld [vmem:[%s3532_s1] sm:$0xff]  ;;  %v3116_v17 = vld [vmem:[%s3105_s26 + $0xc] sm:$0xff]  ;;  %s3492_s24 = scalar_lea.vmem %s3535_s4, %s2962_s21 }
  0x12   : > { %2948 = vmatpush.bf16.msra.mxu2 %v2810_v1  ;;  %935 = vmatpush.bf16.msra.mxu3 %v2849_v3  ;;  %v2844_v15 = vld [vmem:[%s3532_s1 + $0xc8] sm:$0xff]  ;;  %v2408_v18 = vor.u32 %v2838_v14, %v2407_v13  ;;  %v2837_v20 = vld [vmem:[%s3532_s1 + $0xb8] sm:$0xff]  ;;  %v2799_v22 = vld [vmem:[%s3105_s26] sm:$0xff]  ;;  %v871_v27 = vrot.slane %v3116_v17, 1 }
  0x13   : > { %v2863_v21 = vld [vmem:[%s3532_s1 + $0x138] sm:$0xff]  ;;  %v2801_v23 = vld [vmem:[%s3105_s26 + $0x10] sm:$0xff]  ;;  %v2803_v24 = vld [vmem:[%s3105_s26 + $0x20] sm:$0xff] }
  0x14   : > { %v2843_v25 = vld [vmem:[%s3532_s1 + $0xc0] sm:$0xff]  ;;  %v870_v26 = vrot.slane %v2408_v18, 1  ;;  %v2823_v28 = vld [vmem:[%s3532_s1 + $0x70] sm:$0xff]  ;;  %v2902_v29 = vld [vmem:[%s3532_s1 + $0x1f8] sm:$0xff] }
  0x15   : > { %369 = vmatpush.bf16.msra.mxu0 %v2809_v4  ;;  %2949 = vmatpush.bf16.msra.mxu1 %v2809_v4  ;;  %v2836_v30 = vld [vmem:[%s3532_s1 + $0xb0] sm:$0xff]  ;;  %v2822_v33 = vld [vmem:[%s3532_s1 + $0x68] sm:$0xff]  ;;  %v2821_v37 = vld [vmem:[%s3532_s1 + $0x60] sm:$0xff] }
  0x16   : > { %2950 = vmatpush.bf16.msra.mxu2 %v2809_v4  ;;  %936 = vmatpush.bf16.msra.mxu3 %v2848_v5  ;;  %v2862_v31 = vld [vmem:[%s3532_s1 + $0x130] sm:$0xff]  ;;  %v872_v32 = vsel %vm685_vm0, %v870_v26, %v871_v27  ;;  %v2835_v35 = vld [vmem:[%s3532_s1 + $0xa8] sm:$0xff]  ;;  %v2834_v38 = vld [vmem:[%s3532_s1 + $0xa0] sm:$0xff] }
  0x17   : > { %v2901_v34 = vld [vmem:[%s3532_s1 + $0x1f0] sm:$0xff]  ;;  %v2861_v36 = vld [vmem:[%s3532_s1 + $0x128] sm:$0xff]  ;;  %v2860_v39 = vld [vmem:[%s3532_s1 + $0x120] sm:$0xff] }
  0x18   : > { %v2475_v40 = vld [vmem:[%s3105_s26 + $0x4] sm:$0xe]  ;;  %v2851_v41 = vld [vmem:[%s3105_s26 + $0x4] sm:$0xf0]  ;;  %v3173_v42 = vld [vmem:[%s3105_s26 + $0x14] sm:$0xff] }
  0x19   : > { %370 = vmatpush.bf16.msra.mxu0 %v2808_v6  ;;  %2951 = vmatpush.bf16.msra.mxu1 %v2808_v6  ;;  %v2820_v43 = vld [vmem:[%s3532_s1 + $0x58] sm:$0xff]  ;;  %v2800_v46 = vld [vmem:[%s3105_s26 + $0x8] sm:$0xff]  ;;  %v2812_v48 = vld [vmem:[%s3105_s26] sm:$0xff]  ;;  %v2476_v49 = vor.u32 %v2851_v41, %v2475_v40  ;;  %v873_v51 = vrot.slane %v3173_v42, 1 }
  0x1a   : > { %2952 = vmatpush.bf16.msra.mxu2 %v2808_v6  ;;  %937 = vmatpush.bf16.msra.mxu3 %v2847_v7  ;;  %v2833_v44 = vld [vmem:[%s3532_s1 + $0x98] sm:$0xff]  ;;  %v2852_v50 = vld [vmem:[%s3105_s26 + $0xc] sm:$0xff]  ;;  %v2339_v55 = vld [vmem:[%s3105_s26] sm:$0xe]  ;;  %v471_v58 = vshll.u32 %v2812_v48, 16  ;;  %v469_v6 = vshrl.u32 %v2812_v48, 16 }
  0x1b   : > { %v2859_v45 = vld [vmem:[%s3532_s1 + $0x118] sm:$0xff]  ;;  %v2819_v52 = vld [vmem:[%s3532_s1 + $0x50] sm:$0xff]  ;;  %v2825_v56 = vld [vmem:[%s3105_s26] sm:$0xf0]  ;;  %v1056_v59 = vshrl.u32 %v2476_v49, 16  ;;  %v1059_v61 = vshll.u32 %v2476_v49, 16  ;;  %v874_v0 = vsel %vm685_vm0, %v871_v27, %v873_v51 }
  0x1c   : > { %v2802_v47 = vld [vmem:[%s3105_s26 + $0x18] sm:$0xff]  ;;  %v2832_v53 = vld [vmem:[%s3532_s1 + $0x90] sm:$0xff]  ;;  %v3201_v57 = vld [vmem:[%s3105_s26 + $0x8] sm:$0xff]  ;;  %v1064_v62 = vshrl.u32 %v2852_v50, 16  ;;  %v1067_v63 = vshll.u32 %v2852_v50, 16  ;;  %v2340_v5 = vor.u32 %v2825_v56, %v2339_v55  ;;  %v473_v7 = vrot.slane %v471_v58, 1 }
  0x1d   : > { %371 = vmatpush.bf16.msra.mxu0 %v2807_v8  ;;  %2953 = vmatpush.bf16.msra.mxu1 %v2807_v8  ;;  %v2858_v54 = vld [vmem:[%s3532_s1 + $0x110] sm:$0xff]  ;;  %v2900_v60 = vld [vmem:[%s3532_s1 + $0x1e8] sm:$0xff]  ;;  %v2817_v13 = vld [vmem:[%s3532_s1 + $0x40] sm:$0xff] }
  0x1e   : > { %2954 = vmatpush.bf16.msra.mxu2 %v2807_v8  ;;  %938 = vmatpush.bf16.msra.mxu3 %v2846_v9  ;;  %v2818_v1 = vld [vmem:[%s3532_s1 + $0x48] sm:$0xff]  ;;  %v476_v8 = vshll.u32 %v3201_v57, 16  ;;  %v1058_v9 = vrot.slane %v1056_v59, 1  ;;  %v2830_v14 = vld [vmem:[%s3532_s1 + $0x80] sm:$0xff]  ;;  %v2889_v18 = vld [vmem:[%s3532_s1 + $0x1b8] sm:$0xff] }
  0x1f   : > { %v2831_v2 = vld [vmem:[%s3532_s1 + $0x88] sm:$0xff]  ;;  %v2856_v17 = vld [vmem:[%s3532_s1 + $0x100] sm:$0xff]  ;;  %v2885_v55 = vld [vmem:[%s3532_s1 + $0x198] sm:$0xff] }
  0x20   : > { %v2857_v3 = vld [vmem:[%s3532_s1 + $0x108] sm:$0xff]  ;;  %v2886_v48 = vld [vmem:[%s3532_s1 + $0x1a0] sm:$0xff] }
  0x21   : > { %372 = vmatpush.bf16.msra.mxu0 %v2806_v10  ;;  %2955 = vmatpush.bf16.msra.mxu1 %v2806_v10  ;;  %v3221_v4 = vld [vmem:[%s3105_s26 + $0x8] sm:$0xff]  ;;  %v2873_v49 = vld [vmem:[%s3532_s1 + $0x160] sm:$0xff] }
  0x22   : > { %2956 = vmatpush.bf16.msra.mxu2 %v2806_v10  ;;  %939 = vmatpush.bf16.msra.mxu3 %v2845_v11  ;;  %v1061_v10 = vrot.slane %v1059_v61, 2  ;;  %v1066_v11 = vrot.slane %v1064_v62, 1  ;;  %v2913_v41 = vld [vmem:[%s3532_s1 + $0x228] sm:$0xff]  ;;  %v2912_v50 = vld [vmem:[%s3532_s1 + $0x220] sm:$0xff] }
  0x23   : > { %v3302_v56 = vld [vmem:[%s3105_s26 + $0x24] sm:$0xff]  ;;  %v2854_v61 = vld [vmem:[%s3105_s26 + $0x1c] sm:$0xff] }
  0x24   : > { %v877_v62 = vrot.slane %v3302_v56, 1 }
  0x25   : > { %373 = vmatpush.bf16.msra.mxu0 %v2805_v12  ;;  %2957 = vmatpush.bf16.msra.mxu1 %v2805_v12 }
  0x26   : > { %2958 = vmatpush.bf16.msra.mxu2 %v2805_v12  ;;  %940 = vmatpush.bf16.msra.mxu3 %v2844_v15  ;;  %v1069_v12 = vrot.slane %v1067_v63, 2  ;;  %v686_v15 = vrot.slane %v2340_v5, 1  ;;  %v2884_v63 = vld [vmem:[%s3532_s1 + $0x190] sm:$0xff]  ;;  %v1085_v5 = vshll.u32 %v2854_v61, 16 }
  0x29   : > { %374 = vmatpush.bf16.msra.mxu0 %v2804_v16  ;;  %2959 = vmatpush.bf16.msra.mxu1 %v2804_v16 }
  0x2a   : > { %2960 = vmatpush.bf16.msra.mxu2 %v2804_v16  ;;  %941 = vmatpush.bf16.msra.mxu3 %v2843_v25  ;;  %v687_v16 = vrot.slane %v3221_v4, 1  ;;  %v3244_v25 = vld [vmem:[%s3105_s26 + $0x1c] sm:$0xff]  ;;  %v1082_v4 = vshrl.u32 %v2854_v61, 16 }
  0x2c   : > { %375 = vmatmul.bf16.vlgmr.msra.gmra.mxu0 %v2799_v22  ;;  %385 = vmatmul.bf16.vlgmr.msra.gmra.mxu1 %v2801_v23  ;;  %v1062_v22 = vor.u32 %v1061_v10, %v1058_v9  ;;  %v1070_v23 = vor.u32 %v1069_v12, %v1066_v11  ;;  %v688_v26 = vsel %vm685_vm0, %v686_v15, %v687_v16  ;;  %v824_v9 = vld [vmem:[%s3105_s26 + $0x2c] sm:$0x1]  ;;  %v3341_v11 = vld [vmem:[%s3105_s26 + $0x18] sm:$0xff]  ;;  %v1087_v15 = vrot.slane %v1085_v5, 2 }
  0x2d   : > { %565 = vmatpush.bf16.msrb.mxu1 %v2824_v19  ;;  %1161 = vmatpush.bf16.msrb.mxu0 %v2863_v21  ;;  %v2876_v19 = vld [vmem:[%s3532_s1 + $0x178] sm:$0xff]  ;;  %v478_v21 = vrot.slane %v476_v8, 1  ;;  %v2910_v8 = vld [vmem:[%s3532_s1 + $0x210] sm:$0xff]  ;;  %v2896_v10 = vld [vmem:[%s3532_s1 + $0x1c8] sm:$0xff] }
  0x2e   : > { %750 = vmatpush.bf16.msrb.mxu2 %v2837_v20  ;;  %1757 = vmatpush.bf16.msrb.mxu3 %v2902_v29  ;;  %v474_v20 = vor.u32 %v473_v7, %v469_v6  ;;  %v2888_v29 = vld [vmem:[%s3532_s1 + $0x1b0] sm:$0xff]  ;;  %v2883_v7 = vld [vmem:[%s3532_s1 + $0x188] sm:$0xff] }
  0x2f   : > { %395 = vmatmul.bf16.vlgmr.msra.gmra.mxu2 %v2803_v24  ;;  %942 = vmatmul.bf16.vlgmr.msra.gmra.mxu3 %v872_v32  ;;  %v2915_v24 = vld [vmem:[%s3532_s1 + $0x238] sm:$0xff]  ;;  %v875_v32 = vrot.slane %v3244_v25, 1 }
  0x30   : > { %v479_v27 = vsel %vm467_vm1, %v474_v20, %v478_v21 }
  0x31   : > { %566 = vmatpush.bf16.msrb.mxu1 %v2823_v28  ;;  %1162 = vmatpush.bf16.msrb.mxu0 %v2862_v31  ;;  %v1071_v28 = vsel %vm1054_vm2, %v1062_v22, %v1070_v23  ;;  %v2853_v31 = vld [vmem:[%s3105_s26 + $0x14] sm:$0xff]  ;;  %v876_v40 = vsel %vm685_vm0, %v873_v51, %v875_v32  ;;  %v878_v6 = vsel %vm685_vm0, %v875_v32, %v877_v62 }
  0x32   : > { %751 = vmatpush.bf16.msrb.mxu2 %v2836_v30  ;;  %1758 = vmatpush.bf16.msrb.mxu3 %v2901_v34  ;;  %v2875_v30 = vld [vmem:[%s3532_s1 + $0x170] sm:$0xff]  ;;  %v2899_v34 = vld [vmem:[%s3532_s1 + $0x1e0] sm:$0xff] }
  0x35   : > { %567 = vmatpush.bf16.msrb.mxu1 %v2822_v33  ;;  %1163 = vmatpush.bf16.msrb.mxu0 %v2861_v36  ;;  %v2914_v33 = vld [vmem:[%s3532_s1 + $0x230] sm:$0xff]  ;;  %v1073_v36 = vshrl.u32 %v2853_v31, 16 }
  0x36   : > { %752 = vmatpush.bf16.msrb.mxu2 %v2835_v35  ;;  %1759 = vmatpush.bf16.msrb.mxu3 %v2900_v60  ;;  %v3266_v35 = vld [vmem:[%s3105_s26 + $0x10] sm:$0xff] }
  0x37   : > { %v1075_v42 = vrot.slane %v1073_v36, 1  ;;  %v488_v12 = vshrl.u32 %v3266_v35, 16 }
  0x39   : > { %568 = vmatpush.bf16.msrb.mxu1 %v2821_v37  ;;  %1164 = vmatpush.bf16.msrb.mxu0 %v2860_v39  ;;  %v1076_v37 = vshll.u32 %v2853_v31, 16  ;;  %v2874_v39 = vld [vmem:[%s3532_s1 + $0x168] sm:$0xff] }
  0x3a   : > { %753 = vmatpush.bf16.msrb.mxu2 %v2834_v38  ;;  %v2887_v38 = vld [vmem:[%s3532_s1 + $0x1a8] sm:$0xff]  ;;  %1760 = vmatpush.bf16.msrb.mxu3 %v2899_v34 }
  0x3b   : > { %v2909_v34 = vld [vmem:[%s3532_s1 + $0x208] sm:$0xff] }
  0x3c   : > { %380 = vmatmul.bf16.gmra.mxu0 %v2800_v46  ;;  %390 = vmatmul.bf16.gmra.mxu1 %v2802_v47  ;;  %v484_v46 = vshll.u32 %v3266_v35, 16  ;;  %v1078_v47 = vrot.slane %v1076_v37, 2  ;;  %v2895_v35 = vld [vmem:[%s3532_s1 + $0x1c0] sm:$0xff] }
  0x3d   : > { %569 = vmatpush.bf16.msrb.mxu1 %v2820_v43  ;;  %1165 = vmatpush.bf16.msrb.mxu0 %v2859_v45  ;;  %v2898_v43 = vld [vmem:[%s3532_s1 + $0x1d8] sm:$0xff]  ;;  %v480_v45 = vshrl.u32 %v3201_v57, 16  ;;  %v2869_v37 = vld [vmem:[%s3532_s1 + $0x140] sm:$0xff] }
  0x3e   : > { %754 = vmatpush.bf16.msrb.mxu2 %v2833_v44  ;;  %v3284_v44 = vld [vmem:[%s3105_s26 + $0x10] sm:$0xff]  ;;  %1761 = vmatpush.bf16.msrb.mxu3 %v2898_v43  ;;  %v2872_v57 = vld [vmem:[%s3532_s1 + $0x158] sm:$0xff] }
  0x3f   : > { %947 = vmatmul.bf16.gmra.mxu3 %v874_v0  ;;  %v689_v51 = vrot.slane %v3284_v44, 1  ;;  %v2911_v0 = vld [vmem:[%s3532_s1 + $0x218] sm:$0xff] }
  0x41   : > { %570 = vmatpush.bf16.msrb.mxu1 %v2819_v52  ;;  %1166 = vmatpush.bf16.msrb.mxu0 %v2858_v54  ;;  %v482_v52 = vor.u32 %v480_v45, %v478_v21  ;;  %v1079_v54 = vor.u32 %v1078_v47, %v1075_v42  ;;  %v690_v58 = vsel %vm685_vm0, %v687_v16, %v689_v51  ;;  %v863_v16 = vunpack.c.l.b16 %v824_v9 }
  0x42   : > { %755 = vmatpush.bf16.msrb.mxu2 %v2832_v53  ;;  %v486_v53 = vrot.slane %v484_v46, 1  ;;  %v1008_v46 = vld [vmem:[%s3105_s26 + $0x2c] sm:$0x3] }
  0x43   : > { %v1080_v60 = vsel %vm1054_vm2, %v1070_v23, %v1079_v54  ;;  %v869_v21 = vpack.c.b16 %v863_v16, %v863_v16  ;;  %v2855_v23 = vld [vmem:[%s3105_s26 + $0x24] sm:$0xff] }
  0x44   : > { %v487_v59 = vsel %vm467_vm1, %v482_v52, %v486_v53  ;;  %v1091_v31 = vshrl.u32 %v2855_v23, 16  ;;  %v1094_v32 = vshll.u32 %v2855_v23, 16 }
  0x45   : > { %571 = vmatpush.bf16.msrb.mxu1 %v2818_v1  ;;  %1167 = vmatpush.bf16.msrb.mxu0 %v2857_v3  ;;  %v2897_v1 = vld [vmem:[%s3532_s1 + $0x1d0] sm:$0xff]  ;;  %v3327_v3 = vld [vmem:[%s3105_s26 + $0x18] sm:$0xff] }
  0x46   : > { %756 = vmatpush.bf16.msrb.mxu2 %v2831_v2  ;;  %v2871_v2 = vld [vmem:[%s3532_s1 + $0x150] sm:$0xff]  ;;  %1762 = vmatpush.bf16.msrb.mxu3 %v2897_v1  ;;  %v1093_v44 = vrot.slane %v1091_v31, 1  ;;  %v1096_v45 = vrot.slane %v1094_v32, 2  ;;  %v2864_v31 = vld [vmem:[%s3105_s26 + $0x4] sm:$0xf0] }
  0x49   : > { %572 = vmatpush.bf16.msrb.mxu1 %v2817_v13  ;;  %1168 = vmatpush.bf16.msrb.mxu0 %v2856_v17  ;;  %v492_v13 = vshll.u32 %v3327_v3, 16  ;;  %v691_v17 = vrot.slane %v3341_v11, 1 }
  0x4a   : > { %757 = vmatpush.bf16.msrb.mxu2 %v2830_v14  ;;  %v1084_v14 = vrot.slane %v1082_v4, 1  ;;  %1763 = vmatpush.bf16.msrb.mxu3 %v2896_v10  ;;  %v2892_v10 = vld [vmem:[%s3105_s26 + $0x18] sm:$0xff] }
  0x4b   : > { %v692_v22 = vsel %vm685_vm0, %v689_v51, %v691_v17  ;;  %v1669_v16 = vshrl.u32 %v2892_v10, 16 }
  0x4c   : > { %573 = vmatmul.bf16.vlgmr.msrb.gmra.mxu1 %v479_v27  ;;  %1169 = vmatmul.bf16.vlgmr.msrb.gmra.mxu0 %v1071_v28  ;;  %v1088_v20 = vor.u32 %v1087_v15, %v1084_v14  ;;  %v2870_v27 = vld [vmem:[%s3532_s1 + $0x148] sm:$0xff] }
  0x4d   : > { %1346 = vmatpush.bf16.msra.mxu1 %v2876_v19  ;;  %1942 = vmatpush.bf16.msra.mxu0 %v2915_v24  ;;  %v494_v19 = vrot.slane %v492_v13, 1  ;;  %v2679_v28 = vld [vmem:[%s3105_s26 + $0x8] sm:$0xc] }
  0x4e   : > { %1530 = vmatpush.bf16.msra.mxu2 %v2889_v18  ;;  %v490_v18 = vor.u32 %v488_v12, %v486_v53  ;;  %v1089_v25 = vsel %vm1054_vm2, %v1079_v54, %v1088_v20  ;;  %1764 = vmatpush.bf16.msrb.mxu3 %v2895_v35  ;;  %v1097_v53 = vor.u32 %v1096_v45, %v1093_v44  ;;  %v1047_v54 = vunpack.c.l.b16 %v1008_v46  ;;  %v2903_v35 = vld [vmem:[%s3105_s26 + $0x8] sm:$0xf0] }
  0x4f   : > { %758 = vmatmul.bf16.vlgmr.msrb.gmra.mxu2 %v688_v26  ;;  %952 = vmatmul.bf16.gmra.mxu3 %v876_v40  ;;  %v879_v26 = vrot.slane %v869_v21, 1  ;;  %v2829_v40 = vld [vmem:[%s3105_s26 + $0x20] sm:$0xff] }
  0x50   : > { %v495_v24 = vsel %vm467_vm1, %v490_v18, %v494_v19  ;;  %v1098_v1 = vsel %vm1054_vm2, %v1088_v20, %v1097_v53 }
  0x51   : > { %1347 = vmatpush.bf16.msra.mxu1 %v2875_v30  ;;  %1943 = vmatpush.bf16.msra.mxu0 %v2914_v33  ;;  %v3356_v30 = vld [vmem:[%s3105_s26 + $0x20] sm:$0xff]  ;;  %v880_v36 = vsel %vm685_vm0, %v877_v62, %v879_v26  ;;  %v639_v62 = vld [vmem:[%s3105_s26 + $0x28] sm:$0x1] }
  0x52   : > { %1531 = vmatpush.bf16.msra.mxu2 %v2888_v29  ;;  %v2890_v29 = vld [vmem:[%s3105_s26 + $0x8] sm:$0xf0]  ;;  %v2882_v33 = vld [vmem:[%s3532_s1 + $0x180] sm:$0xff]  ;;  %v500_v43 = vshll.u32 %v3356_v30, 16  ;;  %v678_v5 = vunpack.c.l.b16 %v639_v62  ;;  %v504_v12 = vshrl.u32 %v3356_v30, 16 }
  0x53   : > { %v2543_v30 = vld [vmem:[%s3105_s26 + $0x4] sm:$0xc] }
  0x54   : > { %v502_v52 = vrot.slane %v500_v43, 1  ;;  %v684_v11 = vpack.c.b16 %v678_v5, %v678_v5  ;;  %v1604_v5 = vld [vmem:[%s3105_s26 + $0x30] sm:$0x7] }
  0x55   : > { %1348 = vmatpush.bf16.msra.mxu1 %v2874_v39  ;;  %1944 = vmatpush.bf16.msra.mxu0 %v2913_v41  ;;  %v2680_v39 = vor.u32 %v2890_v29, %v2679_v28  ;;  %v496_v41 = vshrl.u32 %v3327_v3, 16  ;;  %v2611_v28 = vld [vmem:[%s3105_s26 + $0x8] sm:$0xc]  ;;  %v2877_v29 = vld [vmem:[%s3105_s26 + $0x8] sm:$0xf0] }
  0x56   : > { %1532 = vmatpush.bf16.msra.mxu2 %v2887_v38  ;;  %v2891_v38 = vld [vmem:[%s3105_s26 + $0x10] sm:$0xff]  ;;  %v695_v18 = vrot.slane %v684_v11, 1  ;;  %v1643_v11 = vunpack.c.l.b16 %v1604_v5 }
  0x57   : > { %v1652_v42 = vshrl.u32 %v2680_v39, 16  ;;  %v1655_v47 = vshll.u32 %v2680_v39, 16  ;;  %v498_v51 = vor.u32 %v496_v41, %v494_v19  ;;  %v506_v19 = vor.u32 %v504_v12, %v502_v52 }
  0x58   : > { %v2544_v39 = vor.u32 %v2864_v31, %v2543_v30 }
  0x59   : > { %1349 = vmatpush.bf16.msra.mxu1 %v2873_v49  ;;  %1945 = vmatpush.bf16.msra.mxu0 %v2912_v50  ;;  %v1663_v49 = vshll.u32 %v2891_v38, 16  ;;  %v693_v50 = vrot.slane %v2829_v40, 1  ;;  %v1654_v56 = vrot.slane %v1652_v42, 2  ;;  %v503_v61 = vsel %vm467_vm1, %v498_v51, %v502_v52  ;;  %v2904_v40 = vld [vmem:[%s3105_s26 + $0x10] sm:$0xff] }
  0x5a   : > { %1533 = vmatpush.bf16.msra.mxu2 %v2886_v48  ;;  %v1660_v48 = vshrl.u32 %v2891_v38, 16  ;;  %v2865_v38 = vld [vmem:[%s3105_s26 + $0xc] sm:$0xff]  ;;  %v1282_v42 = vrot.slane %v2544_v39, 2  ;;  %v2868_v39 = vld [vmem:[%s3105_s26 + $0x24] sm:$0xff] }
  0x5c   : > { %578 = vmatmul.bf16.gmra.mxu1 %v487_v59  ;;  %1174 = vmatmul.bf16.gmra.mxu0 %v1080_v60  ;;  %v1665_v59 = vrot.slane %v1663_v49, 3  ;;  %v694_v60 = vsel %vm685_vm0, %v691_v17, %v693_v50  ;;  %v1672_v17 = vshll.u32 %v2892_v10, 16  ;;  %v1879_v49 = vrot.slane %v2904_v40, 3  ;;  %v2907_v40 = vld [vmem:[%s3105_s26 + $0x28] sm:$0xff] }
  0x5d   : > { %1350 = vmatpush.bf16.msra.mxu1 %v2872_v57  ;;  %1946 = vmatpush.bf16.msra.mxu0 %v2911_v0  ;;  %v1657_v57 = vrot.slane %v1655_v47, 3  ;;  %v2908_v0 = vld [vmem:[%s3532_s1 + $0x200] sm:$0xff]  ;;  %v1283_v47 = vrot.slane %v2865_v38, 2 }
  0x5e   : > { %1534 = vmatpush.bf16.msra.mxu2 %v2885_v55  ;;  %v421_v55 = vld [vmem:[%s3105_s26 + $0x28] sm:$0x1]  ;;  %v1674_v23 = vrot.slane %v1672_v17, 3  ;;  %v2867_v17 = vld [vmem:[%s3105_s26 + $0x1c] sm:$0xff] }
  0x5f   : > { %763 = vmatmul.bf16.gmra.mxu2 %v690_v58  ;;  %957 = vmatmul.bf16.gmra.mxu3 %v878_v6  ;;  %v1662_v58 = vrot.slane %v1660_v48, 2  ;;  %v1658_v3 = vor.u32 %v1657_v57, %v1654_v56  ;;  %v2894_v57 = vld [vmem:[%s3105_s26 + $0x28] sm:$0xff] }
  0x60   : > { %v1690_v62 = vshll.u32 %v2894_v57, 16 }
  0x61   : > { %1351 = vmatpush.bf16.msra.mxu1 %v2871_v2  ;;  %1947 = vmatpush.bf16.msra.mxu0 %v2910_v8  ;;  %v1053_v2 = vpack.c.b16 %v1047_v54, %v1047_v54  ;;  %v1666_v4 = vor.u32 %v1665_v59, %v1662_v58  ;;  %v2879_v58 = vld [vmem:[%s3105_s26 + $0x18] sm:$0xff] }
  0x62   : > { %1535 = vmatpush.bf16.msra.mxu2 %v2884_v63  ;;  %v460_v63 = vunpack.c.l.b16 %v421_v55  ;;  %v2866_v59 = vld [vmem:[%s3105_s26 + $0x14] sm:$0xff] }
  0x63   : > { %v1103_v8 = vshll.u32 %v1053_v2, 16  ;;  %v1667_v9 = vsel %vm1650_vm3, %v1658_v3, %v1666_v4  ;;  %v1692_v3 = vrot.slane %v1690_v62, 3 }
  0x64   : > { %v466_v6 = vpack.c.b16 %v460_v63, %v460_v63  ;;  %v1469_v63 = vrot.slane %v2879_v58, 2 }
  0x65   : > { %1352 = vmatpush.bf16.msra.mxu1 %v2870_v27  ;;  %1948 = vmatpush.bf16.msra.mxu0 %v2909_v34  ;;  %v1105_v15 = vrot.slane %v1103_v8, 2  ;;  %v2747_v34 = vld [vmem:[%s3105_s26 + $0x8] sm:$0x8] }
  0x66   : > { %1536 = vmatpush.bf16.msra.mxu2 %v2883_v7  ;;  %v1100_v7 = vshrl.u32 %v1053_v2, 16  ;;  %v508_v13 = vshll.u32 %v466_v6, 16  ;;  %v2748_v41 = vor.u32 %v2903_v35, %v2747_v34 }
  0x68   : > { %v1102_v14 = vrot.slane %v1100_v7, 1  ;;  %v510_v20 = vrot.slane %v508_v13, 1  ;;  %v1878_v48 = vrot.slane %v2748_v41, 3  ;;  %v1649_v13 = vpack.c.b16 %v1643_v11, %v1643_v11 }
  0x69   : > { %1353 = vmatpush.bf16.msra.mxu1 %v2869_v37  ;;  %1949 = vmatpush.bf16.msra.mxu0 %v2908_v0  ;;  %v2612_v37 = vor.u32 %v2877_v29, %v2611_v28  ;;  %v1285_v0 = vrot.slane %v2866_v59, 2 }
  0x6a   : > { %1537 = vmatpush.bf16.msra.mxu2 %v2882_v33  ;;  %v1106_v21 = vor.u32 %v1105_v15, %v1102_v14  ;;  %v2893_v33 = vld [vmem:[%s3105_s26 + $0x20] sm:$0xff]  ;;  %v1880_v54 = vsel %vm1877_vm5, %v1878_v48, %v1879_v49 }
  0x6b   : > { %v1678_v43 = vshrl.u32 %v2893_v33, 16  ;;  %v1681_v44 = vshll.u32 %v2893_v33, 16  ;;  %v1466_v45 = vrot.slane %v2612_v37, 2  ;;  %v1286_v8 = vsel %vm1281_vm4, %v1283_v47, %v1285_v0  ;;  %v2880_v14 = vld [vmem:[%s3105_s26 + $0x20] sm:$0xff] }
  0x6c   : > { %583 = vmatmul.bf16.gmra.mxu1 %v495_v24  ;;  %1179 = vmatmul.bf16.gmra.mxu0 %v1089_v25  ;;  %v696_v24 = vsel %vm685_vm0, %v693_v50, %v695_v18  ;;  %v511_v25 = vsel %vm467_vm1, %v506_v19, %v510_v20  ;;  %v1107_v26 = vsel %vm1054_vm2, %v1097_v53, %v1106_v21  ;;  %v2906_v18 = vld [vmem:[%s3105_s26 + $0x20] sm:$0xff]  ;;  %v1696_v19 = vshrl.u32 %v1649_v13, 16 }
  0x6d   : > { %v1680_v50 = vrot.slane %v1678_v43, 2  ;;  %v1683_v51 = vrot.slane %v1681_v44, 3  ;;  %v1284_v53 = vsel %vm1281_vm4, %v1282_v42, %v1283_v47  ;;  %v1699_v20 = vshll.u32 %v1649_v13, 16  ;;  %v1420_v47 = vld [vmem:[%s3105_s26 + $0x30] sm:$0x3] }
  0x6e   : > { %v1471_v21 = vrot.slane %v2880_v14, 2 }
  0x6f   : > { %768 = vmatmul.bf16.gmra.mxu2 %v692_v22  ;;  %962 = vmatmul.bf16.gmra.mxu3 %v880_v36  ;;  %v1671_v22 = vrot.slane %v1669_v16, 2  ;;  %v2878_v36 = vld [vmem:[%s3105_s26 + $0x10] sm:$0xff]  ;;  %v1684_v55 = vor.u32 %v1683_v51, %v1680_v50 }
  0x70   : > { %v1467_v46 = vrot.slane %v2878_v36, 2  ;;  %v2881_v36 = vld [vmem:[%s3105_s26 + $0x28] sm:$0xff] }
  0x71   : > { %v1675_v27 = vor.u32 %v1674_v23, %v1671_v22  ;;  %v1287_v23 = vrot.slane %v2867_v17, 2  ;;  %v1473_v41 = vrot.slane %v2881_v36, 2 }
  0x72   : > { %v1468_v52 = vsel %vm1281_vm4, %v1466_v45, %v1467_v46  ;;  %v1289_v45 = vrot.slane %v2868_v39, 2 }
  0x73   : > { %v1676_v32 = vsel %vm1650_vm3, %v1666_v4, %v1675_v27  ;;  %v1685_v56 = vsel %vm1650_vm3, %v1675_v27, %v1684_v55  ;;  %v1470_v4 = vsel %vm1281_vm4, %v1467_v46, %v1469_v63  ;;  %v1472_v27 = vsel %vm1281_vm4, %v1469_v63, %v1471_v21 }
  0x74   : > { %v1288_v30 = vsel %vm1281_vm4, %v1285_v0, %v1287_v23  ;;  %v1885_v46 = vrot.slane %v2907_v40, 3  ;;  %v1474_v42 = vsel %vm1281_vm4, %v1471_v21, %v1473_v41  ;;  %v1290_v50 = vsel %vm1281_vm4, %v1287_v23, %v1289_v45 }
  0x7c   : > { %588 = vmatmul.bf16.gmra.mxu1 %v503_v61  ;;  %1184 = vmatmul.bf16.gmra.mxu0 %v1098_v1  ;;  %v1687_v61 = vshrl.u32 %v2894_v57, 16 }
  0x7e   : > { %v1689_v2 = vrot.slane %v1687_v61, 2 }
  0x7f   : > { %773 = vmatmul.bf16.gmra.mxu2 %v694_v60  ;;  %1765 = vmatmul.bf16.vlgmr.msrb.gmra.mxu3 %v1667_v9  ;;  %v2905_v60 = vld [vmem:[%s3105_s26 + $0x18] sm:$0xff] }
  0x80   : > { %v1881_v1 = vrot.slane %v2905_v60, 3  ;;  %v1693_v10 = vor.u32 %v1692_v3, %v1689_v2 }
  0x82   : > { %v1882_v9 = vsel %vm1877_vm5, %v1879_v49, %v1881_v1  ;;  %v1694_v12 = vsel %vm1650_vm3, %v1684_v55, %v1693_v10  ;;  %v1459_v55 = vunpack.c.l.b16 %v1420_v47 }
  0x84   : > { %v1465_v61 = vpack.c.b16 %v1459_v55, %v1459_v55 }
  0x86   : > { %v1475_v5 = vrot.slane %v1465_v61, 2 }
  0x8c   : > { %593 = vmatmul.bf16.gmra.mxu1 %v511_v25  ;;  %1189 = vmatmul.bf16.gmra.mxu0 %v1107_v26  ;;  %v1698_v25 = vrot.slane %v1696_v19, 2  ;;  %v1701_v26 = vrot.slane %v1699_v20, 3 }
  0x8f   : > { %778 = vmatmul.bf16.gmra.mxu2 %v696_v24  ;;  %1770 = vmatmul.bf16.gmra.mxu3 %v1676_v32  ;;  %v1883_v24 = vrot.slane %v2906_v18, 3  ;;  %v1702_v32 = vor.u32 %v1701_v26, %v1698_v25 }
  0x91   : > { %v1884_v31 = vsel %vm1877_vm5, %v1881_v1, %v1883_v24  ;;  %v1703_v35 = vsel %vm1650_vm3, %v1693_v10, %v1702_v32  ;;  %v1886_v51 = vsel %vm1877_vm5, %v1883_v24, %v1885_v46 }
  0x9c   : > { %1354 = vmatmul.bf16.vlgmr.msra.gmra.mxu1 %v1284_v53  ;;  %1950 = vmatmul.bf16.vlgmr.msra.gmra.mxu0 %v1880_v54  ;;  %v1235_v53 = vld [vmem:[%s3105_s26 + $0x2c] sm:$0x3]  ;;  %v1831_v54 = vld [vmem:[%s3105_s26 + $0x30] sm:$0x7] }
  0x9d   : > { %v1274_v58 = vunpack.c.l.b16 %v1235_v53  ;;  %v1870_v59 = vunpack.c.l.b16 %v1831_v54 }
  0x9f   : > { %1538 = vmatmul.bf16.vlgmr.msra.gmra.mxu2 %v1468_v52  ;;  %1775 = vmatmul.bf16.gmra.mxu3 %v1685_v56  ;;  %v1280_v1 = vpack.c.b16 %v1274_v58, %v1274_v58  ;;  %v1876_v2 = vpack.c.b16 %v1870_v59, %v1870_v59 }
  0xa1   : > { %v1887_v10 = vrot.slane %v1876_v2, 3 }
  0xa3   : > { %v1888_v19 = vsel %vm1877_vm5, %v1885_v46, %v1887_v10 }
  0xa9   : > { %v376_v6 = vpop.f32.mrf.mxu0  ;;  %v3411_v7 = vpop.f32.mrf.mxu1 }
  0xac   : > { %1359 = vmatmul.bf16.gmra.mxu1 %v1286_v8  ;;  %1955 = vmatmul.bf16.gmra.mxu0 %v1882_v9  ;;  %v1291_v9 = vrot.slane %v1280_v1, 2 }
  0xae   : > { %v1292_v18 = vsel %vm1281_vm4, %v1289_v45, %v1291_v9 }
  0xaf   : > { %1543 = vmatmul.bf16.gmra.mxu2 %v1470_v4  ;;  %1780 = vmatmul.bf16.gmra.mxu3 %v1694_v12  ;;  %v1476_v12 = vsel %vm1281_vm4, %v1473_v41, %v1475_v5 }
  0xb1   : > { %v378_v15 = vpop.f32.mrf.mxu0  ;;  %v3417_v16 = vpop.f32.mrf.mxu1 }
  0xb2   : > { %v943_v22 = vpop.f32.mrf.mxu3  ;;  %v3426_v33 = vpop.f32.mrf.mxu2 }
  0xb9   : > { %v381_v28 = vpop.f32.mrf.mxu0  ;;  %v3422_v29 = vpop.f32.mrf.mxu1 }
  0xba   : > { %v945_v34 = vpop.f32.mrf.mxu3  ;;  %v3434_v44 = vpop.f32.mrf.mxu2 }
  0xbc   : > { %1364 = vmatmul.bf16.gmra.mxu1 %v1288_v30  ;;  %1960 = vmatmul.bf16.gmra.mxu0 %v1884_v31 }
  0xbf   : > { %1548 = vmatmul.bf16.gmra.mxu2 %v1472_v27  ;;  %1785 = vmatmul.bf16.gmra.mxu3 %v1703_v35 }
  0xc1   : > { %v383_v37 = vpop.f32.mrf.mxu0  ;;  %v3430_v38 = vpop.f32.mrf.mxu1 }
  0xc2   : > { %v948_v43 = vpop.f32.mrf.mxu3 }
  0xc9   : > { %v574_v48 = vpop.f32.mrf.mxu1  ;;  %v1170_v49 = vpop.f32.mrf.mxu0 }
  0xca   : > { %v609_v52 = vadd.f32 %v574_v48, %v376_v6  ;;  %v950_v56 = vpop.f32.mrf.mxu3 }
  0xcc   : > { %1369 = vmatmul.bf16.gmra.mxu1 %v1290_v50  ;;  %1965 = vmatmul.bf16.gmra.mxu0 %v1886_v51 }
  0xcf   : > { %1553 = vmatmul.bf16.gmra.mxu2 %v1474_v42 }
  0xd1   : > { %v576_v63 = vpop.f32.mrf.mxu1  ;;  %v1172_v0 = vpop.f32.mrf.mxu0 }
  0xd2   : > { %v759_v57 = vpop.f32.mrf.mxu2  ;;  %v610_v3 = vadd.f32 %v576_v63, %v378_v15  ;;  %v953_v6 = vpop.f32.mrf.mxu3 }
  0xd3   : > { %v794_v60 = vadd.f32 %v759_v57, %v609_v52 }
  0xd5   : > { %v978_v62 = vadd.f32 %v943_v22, %v794_v60 }
  0xd7   : > { %v3442_v4 = vadd.f32 %v1170_v49, %v978_v62 }
  0xd9   : > { %v579_v14 = vpop.f32.mrf.mxu1  ;;  %v1175_v17 = vpop.f32.mrf.mxu0 }
  0xda   : > { %v761_v8 = vpop.f32.mrf.mxu2  ;;  %v611_v20 = vadd.f32 %v579_v14, %v381_v28  ;;  %v955_v21 = vpop.f32.mrf.mxu3 }
  0xdb   : > { %v795_v11 = vadd.f32 %v761_v8, %v610_v3 }
  0xdc   : > { %1374 = vmatmul.bf16.gmra.mxu1 %v1292_v18  ;;  %1970 = vmatmul.bf16.gmra.mxu0 %v1888_v19 }
  0xdd   : > { %v979_v13 = vadd.f32 %v945_v34, %v795_v11 }
  0xdf   : > { %1558 = vmatmul.bf16.gmra.mxu2 %v1476_v12  ;;  %v3447_v15 = vadd.f32 %v1172_v0, %v979_v13 }
  0xe1   : > { %v581_v25 = vpop.f32.mrf.mxu1  ;;  %v1177_v26 = vpop.f32.mrf.mxu0 }
  0xe2   : > { %v764_v22 = vpop.f32.mrf.mxu2  ;;  %v612_v27 = vadd.f32 %v581_v25, %v383_v37  ;;  %v958_v31 = vpop.f32.mrf.mxu3 }
  0xe3   : > { %v796_v23 = vadd.f32 %v764_v22, %v611_v20 }
  0xe5   : > { %v980_v24 = vadd.f32 %v948_v43, %v796_v23 }
  0xe7   : > { %v3449_v30 = vadd.f32 %v1175_v17, %v980_v24 }
  0xe9   : > { %v584_v36 = vpop.f32.mrf.mxu1  ;;  %v1180_v28 = vpop.f32.mrf.mxu0 }
  0xea   : > { %v766_v32 = vpop.f32.mrf.mxu2  ;;  %v613_v39 = vadd.f32 %v584_v36, %v3411_v7  ;;  %v960_v46 = vpop.f32.mrf.mxu3 }
  0xeb   : > { %v797_v34 = vadd.f32 %v766_v32, %v612_v27 }
  0xed   : > { %v981_v35 = vadd.f32 %v950_v56, %v797_v34  ;;  %v3476_v34 = vld [vmem:[%s3533_s2] ss:$0 sm:$0xff] }
  0xef   : > { %v3452_v40 = vadd.f32 %v1177_v26, %v981_v35 }
  0xf1   : > { %v586_v43 = vpop.f32.mrf.mxu1  ;;  %v1182_v47 = vpop.f32.mrf.mxu0 }
  0xf2   : > { %v769_v41 = vpop.f32.mrf.mxu2  ;;  %v614_v37 = vadd.f32 %v586_v43, %v3417_v16  ;;  %v963_v52 = vpop.f32.mrf.mxu3 }
  0xf3   : > { %v798_v45 = vadd.f32 %v769_v41, %v613_v39 }
  0xf5   : > { %v982_v42 = vadd.f32 %v953_v6, %v798_v45 }
  0xf7   : > { %v3455_v48 = vadd.f32 %v1180_v28, %v982_v42  ;;  %v3482_v28 = vld [vmem:[%s3534_s3] ss:$0 sm:$0xff] }
  0xf9   : > { %v589_v53 = vpop.f32.mrf.mxu1  ;;  %v1185_v54 = vpop.f32.mrf.mxu0 }
  0xfa   : > { %v771_v49 = vpop.f32.mrf.mxu2  ;;  %v615_v7 = vadd.f32 %v589_v53, %v3422_v29  ;;  %v965_v16 = vpop.f32.mrf.mxu3 }
  0xfb   : > { %v799_v50 = vadd.f32 %v771_v49, %v614_v37 }
  0xfd   : > { %v983_v51 = vadd.f32 %v955_v21, %v799_v50 }
  0xff   : > { %v3458_v55 = vadd.f32 %v1182_v47, %v983_v51 }
 0x101   : > { %v591_v59 = vpop.f32.mrf.mxu1  ;;  %v1187_v60 = vpop.f32.mrf.mxu0 }
 0x102   : > { %v774_v56 = vpop.f32.mrf.mxu2  ;;  %v616_v61 = vadd.f32 %v591_v59, %v3430_v38  ;;  %v1766_v6 = vpop.f32.mrf.mxu3 }
 0x103   : > { %v800_v57 = vadd.f32 %v774_v56, %v615_v7 }
 0x105   : > { %v984_v58 = vadd.f32 %v958_v31, %v800_v57 }
 0x107   : > { %v3461_v62 = vadd.f32 %v1185_v54, %v984_v58 }
 0x109   : > { %v594_v2 = vpop.f32.mrf.mxu1  ;;  %v1190_v3 = vpop.f32.mrf.mxu0 }
 0x10a   : > { %v776_v63 = vpop.f32.mrf.mxu2  ;;  %v617_v5 = vadd.f32 %v594_v2, %v3426_v33  ;;  %v1768_v18 = vpop.f32.mrf.mxu3 }
 0x10b   : > { %v801_v0 = vadd.f32 %v776_v63, %v616_v61 }
 0x10d   : > { %v985_v1 = vadd.f32 %v960_v46, %v801_v0 }
 0x10f   : > { %v3464_v29 = vadd.f32 %v1187_v60, %v985_v1 }
 0x111   : > { %v596_v11 = vpop.f32.mrf.mxu1  ;;  %v1192_v12 = vpop.f32.mrf.mxu0 }
 0x112   : > { %v779_v8 = vpop.f32.mrf.mxu2  ;;  %v618_v38 = vadd.f32 %v596_v11, %v3434_v44  ;;  %v1771_v26 = vpop.f32.mrf.mxu3 }
 0x113   : > { %v802_v9 = vadd.f32 %v779_v8, %v617_v5 }
 0x115   : > { %v986_v10 = vadd.f32 %v963_v52, %v802_v9 }
 0x117   : > { %v3467_v13 = vadd.f32 %v1190_v3, %v986_v10 }
 0x119   : > { %v1355_v20 = vpop.f32.mrf.mxu1  ;;  %v1951_v21 = vpop.f32.mrf.mxu0 }
 0x11a   : > { %v781_v14 = vpop.f32.mrf.mxu2  ;;  %v1390_v33 = vadd.f32 %v1355_v20, %v3442_v4  ;;  %v1773_v42 = vpop.f32.mrf.mxu3 }
 0x11b   : > { %v803_v17 = vadd.f32 %v781_v14, %v618_v38 }
 0x11d   : > { %v987_v19 = vadd.f32 %v965_v16, %v803_v17 }
 0x11f   : > { %v3470_v22 = vadd.f32 %v1192_v12, %v987_v19 }
 0x121   : > { %v1357_v27 = vpop.f32.mrf.mxu1  ;;  %v1953_v31 = vpop.f32.mrf.mxu0 }
 0x122   : > { %v1539_v23 = vpop.f32.mrf.mxu2  ;;  %v1391_v44 = vadd.f32 %v1357_v27, %v3447_v15  ;;  %v1776_v59 = vpop.f32.mrf.mxu3 }
 0x123   : > { %v1574_v24 = vadd.f32 %v1539_v23, %v1390_v33 }
 0x125   : > { %v1801_v25 = vadd.f32 %v1766_v6, %v1574_v24 }
 0x127   : > { %v1986_v32 = vadd.f32 %v1951_v21, %v1801_v25 }
 0x129   : > { %v2020_v4 = vmul.f32 %v3476_v34, %v1986_v32  ;;  %v1360_v41 = vpop.f32.mrf.mxu1  ;;  %v1956_v45 = vpop.f32.mrf.mxu0 }
 0x12a   : > { %v1541_v35 = vpop.f32.mrf.mxu2  ;;  %v1392_v15 = vadd.f32 %v1360_v41, %v3449_v30  ;;  %v1778_v9 = vpop.f32.mrf.mxu3 }
 0x12b   : > { %v1575_v36 = vadd.f32 %v1541_v35, %v1391_v44  ;;  %v2034_v43 = vadd.f32 %v3482_v28, %v2020_v4 }
 0x12d   : > { %v1802_v39 = vadd.f32 %v1768_v18, %v1575_v36  ;;  %v2044_v51 = vmax.f32 %v2034_v43, 0.0 }
 0x12f   : > { %v1987_v46 = vadd.f32 %v1953_v31, %v1802_v39 }
 0x131   : > { %v2021_v47 = vmul.f32 %v3476_v34, %v1987_v46  ;;  %v1362_v30 = vpop.f32.mrf.mxu1  ;;  %v1958_v54 = vpop.f32.mrf.mxu0 }
 0x132   : > { %v1544_v37 = vpop.f32.mrf.mxu2  ;;  %v1393_v56 = vadd.f32 %v1362_v30, %v3452_v40  ;;  %v1781_v23 = vpop.f32.mrf.mxu3 }
 0x133   : > { %v2035_v49 = vadd.f32 %v3482_v28, %v2021_v47  ;;  %v1576_v50 = vadd.f32 %v1544_v37, %v1392_v15 }
 0x135   : > { %v2045_v52 = vmax.f32 %v2035_v49, 0.0  ;;  %v1803_v53 = vadd.f32 %v1771_v26, %v1576_v50 }
 0x137   : > { %v2919_v7 = vpack.c.bf16 %v2045_v52, %v2044_v51  ;;  %v1988_v57 = vadd.f32 %v1956_v45, %v1803_v53 }
 0x139   : > { %2920 = vst [vmem:[%s3492_s24] sm:$0xff] %v2919_v7   ;;  %v2022_v61 = vmul.f32 %v3476_v34, %v1988_v57  ;;  %v1365_v63 = vpop.f32.mrf.mxu1  ;;  %v1961_v0 = vpop.f32.mrf.mxu0 }
 0x13a   : > { %v1546_v58 = vpop.f32.mrf.mxu2  ;;  %v1394_v2 = vadd.f32 %v1365_v63, %v3455_v48  ;;  %v1783_v15 = vpop.f32.mrf.mxu3 }
 0x13b   : > { %v1577_v60 = vadd.f32 %v1546_v58, %v1393_v56  ;;  %v2036_v3 = vadd.f32 %v3482_v28, %v2022_v61 }
 0x13d   : > { %v1804_v16 = vadd.f32 %v1773_v42, %v1577_v60  ;;  %v2046_v10 = vmax.f32 %v2036_v3, 0.0 }
 0x13f   : > { %v1989_v1 = vadd.f32 %v1958_v54, %v1804_v16 }
 0x141   : > { %v2023_v5 = vmul.f32 %v3476_v34, %v1989_v1  ;;  %v1367_v38 = vpop.f32.mrf.mxu1  ;;  %v1963_v14 = vpop.f32.mrf.mxu0 }
 0x142   : > { %v1549_v6 = vpop.f32.mrf.mxu2  ;;  %v1395_v18 = vadd.f32 %v1367_v38, %v3458_v55  ;;  %v1786_v54 = vpop.f32.mrf.mxu3 }
 0x143   : > { %v2037_v40 = vadd.f32 %v3482_v28, %v2023_v5  ;;  %v1578_v8 = vadd.f32 %v1549_v6, %v1394_v2 }
 0x145   : > { %v2047_v11 = vmax.f32 %v2037_v40, 0.0  ;;  %v1805_v12 = vadd.f32 %v1776_v59, %v1578_v8 }
 0x147   : > { %v2924_v17 = vpack.c.bf16 %v2047_v11, %v2046_v10  ;;  %v1990_v19 = vadd.f32 %v1961_v0, %v1805_v12 }
 0x149   : > { %2941 = vst [vmem:[%s3492_s24 + $0x8] sm:$0xff] %v2924_v17   ;;  %v2024_v21 = vmul.f32 %v3476_v34, %v1990_v19  ;;  %v1370_v24 = vpop.f32.mrf.mxu1  ;;  %v1966_v27 = vpop.f32.mrf.mxu0 }
 0x14a   : > { %v1551_v48 = vpop.f32.mrf.mxu2  ;;  %v1396_v26 = vadd.f32 %v1370_v24, %v3461_v62  ;;  %v1788_v5 = vpop.f32.mrf.mxu3 }
 0x14b   : > { %v1579_v20 = vadd.f32 %v1551_v48, %v1395_v18  ;;  %v2038_v31 = vadd.f32 %v3482_v28, %v2024_v21 }
 0x14d   : > { %v1806_v33 = vadd.f32 %v1778_v9, %v1579_v20  ;;  %v2048_v36 = vmax.f32 %v2038_v31, 0.0 }
 0x14f   : > { %v1991_v25 = vadd.f32 %v1963_v14, %v1806_v33 }
 0x151   : > { %v2025_v44 = vmul.f32 %v3476_v34, %v1991_v25  ;;  %v1372_v41 = vpop.f32.mrf.mxu1  ;;  %v1968_v62 = vpop.f32.mrf.mxu0 }
 0x152   : > { %v1554_v32 = vpop.f32.mrf.mxu2  ;;  %v1397_v46 = vadd.f32 %v1372_v41, %v3464_v29 }
 0x153   : > { %v2039_v55 = vadd.f32 %v3482_v28, %v2025_v44  ;;  %v1580_v35 = vadd.f32 %v1554_v32, %v1396_v26 }
 0x155   : > { %v2049_v4 = vmax.f32 %v2039_v55, 0.0  ;;  %v1807_v39 = vadd.f32 %v1781_v23, %v1580_v35 }
 0x157   : > { %v2929_v45 = vpack.c.bf16 %v2049_v4, %v2048_v36  ;;  %v1992_v42 = vadd.f32 %v1966_v27, %v1807_v39 }
 0x159   : > { %2942 = vst [vmem:[%s3492_s24 + $0x10] sm:$0xff] %v2929_v45   ;;  %v2026_v37 = vmul.f32 %v3476_v34, %v1992_v42  ;;  %v1375_v50 = vpop.f32.mrf.mxu1  ;;  %v1971_v57 = vpop.f32.mrf.mxu0 }
 0x15a   : > { %v1556_v43 = vpop.f32.mrf.mxu2  ;;  %v1398_v52 = vadd.f32 %v1375_v50, %v3467_v13 }
 0x15b   : > { %v1581_v47 = vadd.f32 %v1556_v43, %v1397_v46  ;;  %v2040_v53 = vadd.f32 %v3482_v28, %v2026_v37 }
 0x15d   : > { %v1808_v49 = vadd.f32 %v1783_v15, %v1581_v47  ;;  %v2050_v58 = vmax.f32 %v2040_v53, 0.0 }
 0x15f   : > { %v1993_v51 = vadd.f32 %v1968_v62, %v1808_v49 }
 0x161   : > { %v2027_v30 = vmul.f32 %v3476_v34, %v1993_v51  ;;  %v1377_v61 = vpop.f32.mrf.mxu1  ;;  %v1973_v40 = vpop.f32.mrf.mxu0 }
 0x162   : > { %v1559_v29 = vpop.f32.mrf.mxu2  ;;  %v1399_v0 = vadd.f32 %v1377_v61, %v3470_v22 }
 0x163   : > { %v2041_v7 = vadd.f32 %v3482_v28, %v2027_v30  ;;  %v1582_v56 = vadd.f32 %v1559_v29, %v1398_v52 }
 0x165   : > { %v2051_v59 = vmax.f32 %v2041_v7, 0.0  ;;  %v1809_v60 = vadd.f32 %v1786_v54, %v1582_v56 }
 0x167   : > { %v2934_v16 = vpack.c.bf16 %v2051_v59, %v2050_v58  ;;  %v1994_v63 = vadd.f32 %v1971_v57, %v1809_v60 }
 0x169   : > { %2943 = vst [vmem:[%s3492_s24 + $0x18] sm:$0xff] %v2934_v16   ;;  %v2028_v13 = vmul.f32 %v3476_v34, %v1994_v63 }
 0x16a   : > { %v1561_v1 = vpop.f32.mrf.mxu2 }
 0x16b   : > { %v2042_v2 = vadd.f32 %v3482_v28, %v2028_v13  ;;  %v1583_v3 = vadd.f32 %v1561_v1, %v1399_v0 }
 0x16d   : > { %v1810_v6 = vadd.f32 %v1788_v5, %v1583_v3  ;;  %v2052_v11 = vmax.f32 %v2042_v2, 0.0 }
 0x16f   : > { %v1995_v8 = vadd.f32 %v1973_v40, %v1810_v6 }
 0x171   : > { %v2029_v9 = vmul.f32 %v3476_v34, %v1995_v8 }
 0x173   : > { %v2043_v10 = vadd.f32 %v3482_v28, %v2029_v9 }
 0x175   : > { %v2053_v12 = vmax.f32 %v2043_v10, 0.0 }
 0x177   : > { %v2939_v38 = vpack.c.bf16 %v2053_v12, %v2052_v11 }
 0x179   : > { %2944 = vst [vmem:[%s3492_s24 + $0x20] sm:$0xff] %v2939_v38  }
 0x17a PF: > { %s14_s17 = sadd.s32 1, %s3011_s17   ;;  %s3536_s15 = smov %s3007_s16 }
 0x17b   : > { %p11_p5 = scmp.ge.s32.totalorder %s14_s17, 4   ;;  %s3537_s16 = smov %s3539_s18 }
 0x17d   :  { %13 = sbr.rel (!%p11_p5) target bundleno = 2 (0x2), region = 83 }

// kernel: _lambda_.30
= control target key start
LH: loop header
LB: loop body
LE: loop exit
PB: predicated region body
PF: predicated region fallthrough
CT: control target
= control target key end

     0   :  { %s621_s15 = smov 0   ;;  %s623_s16 = smov 0   ;;  %s684_s0 = inlined_call_operand.vmem [shape: bf16[32,128], index: 0, kind: input, shape index: {}]   ;;  %s685_s1 = inlined_call_operand.vmem [shape: bf16[128,128], index: 1, kind: input, shape index: {}]   ;;  %s686_s2 = inlined_call_operand.vmem [shape: f32[1,128], index: 2, kind: input, shape index: {}]   ;;  %s687_s3 = inlined_call_operand.vmem [shape: f32[1,128], index: 3, kind: input, shape index: {}]   ;;  %s688_s4 = inlined_call_operand.vmem [shape: bf16[32,128], index: 4, kind: output, shape index: {}]  }
   0x1   :  { %s625_s17 = smov 0  }
   0x2 LB: > { %s26_s18 = sadd.s32 1, %s590_s16  ;;  %p489_p0 = scmp.ge.s32.totalorder %s594_s17, 1  ;;  %s594_s17 = sphi %s625_s17, %s14_s17   ;;  %s590_s16 = sphi %s623_s16, %s690_s16   ;;  %s586_s15 = sphi %s621_s15, %s689_s15  }
   0x3   : > { %p28_p1 = scmp.ge.s32.totalorder %s26_s18, 2  ;;  %p202_p2 = scmp.lt.s32.totalorder %s594_s17, 3 }
   0x5   : > { %s692_s18 = smov (%p28_p1, %s26_s18), 0  ;;  %p203_p3 = pnand %p489_p0, %p202_p2 }
   0x6   : > { %s490_s27 = sshll.u32 (!%p203_p3), %s586_s15, 1 }
   0x7   : > { %206 = sbr.rel (%p203_p3) target bundleno = 185 (0xb9), region = 36  ;;  %p242_p4 = scmp.lt.s32.totalorder (!%p203_p3), %s490_s27, 3 }
   0xc   : > { %v540_v0 = vld [vmem:[%s685_s1 + $0x38] sm:$0xff]  ;;  %v539_v1 = vld [vmem:[%s685_s1 + $0x30] sm:$0xff]  ;;  %v538_v2 = vld [vmem:[%s685_s1 + $0x28] sm:$0xff]  ;;  %s694_s27 = smov (!%p242_p4, %s490_s27), 3 }
   0xd   : > { %338 = vmatpush.bf16.msra.mxu0 %v540_v0  ;;  %v537_v3 = vld [vmem:[%s685_s1 + $0x20] sm:$0xff]  ;;  %v536_v4 = vld [vmem:[%s685_s1 + $0x18] sm:$0xff]  ;;  %v535_v5 = vld [vmem:[%s685_s1 + $0x10] sm:$0xff]  ;;  %s491_s8 = sshll.u32 %s694_s27, 2 }
   0xe   : > { %v534_v6 = vld [vmem:[%s685_s1 + $0x8] sm:$0xff]  ;;  %v533_v7 = vld [vmem:[%s685_s1] sm:$0xff]  ;;  %s245_s13 = scalar_lea.vmem %s684_s0, %s491_s8  ;;  %s264_s23 = scalar_lea.vmem %s688_s4, %s491_s8 }
   0xf   : > { %v532_v8 = vld [vmem:[%s245_s13] sm:$0xff] }
  0x10   : > { %v570_v10 = vld [vmem:[%s686_s2] ss:$0 sm:$0xff] }
  0x11   : > { %339 = vmatpush.bf16.msra.mxu0 %v539_v1  ;;  %v571_v12 = vld [vmem:[%s687_s3] ss:$0 sm:$0xff] }
  0x15   : > { %340 = vmatpush.bf16.msra.mxu0 %v538_v2 }
  0x19   : > { %341 = vmatpush.bf16.msra.mxu0 %v537_v3 }
  0x1d   : > { %342 = vmatpush.bf16.msra.mxu0 %v536_v4 }
  0x21   : > { %343 = vmatpush.bf16.msra.mxu0 %v535_v5 }
  0x25   : > { %344 = vmatpush.bf16.msra.mxu0 %v534_v6 }
  0x29   : > { %345 = vmatpush.bf16.msra.mxu0 %v533_v7 }
  0x2c   : > { %346 = vmatmul.bf16.vlgmr.msra.gmra.mxu0 %v532_v8 }
  0xa9   : > { %v347_v9 = vpop.f32.mrf.mxu0 }
  0xaa   : > { %v356_v11 = vmul.f32 %v570_v10, %v347_v9 }
  0xac   : > { %v362_v15 = vadd.f32 %v571_v12, %v356_v11 }
  0xb1   : > { %v349_v13 = vpop.f32.mrf.mxu0 }
  0xb2   : > { %v357_v14 = vmul.f32 %v570_v10, %v349_v13 }
  0xb4   : > { %v363_v16 = vadd.f32 %v571_v12, %v357_v14 }
  0xb6   : > { %v544_v17 = vpack.c.bf16 %v363_v16, %v362_v15 }
  0xb8   : > { %545 = vst [vmem:[%s264_s23] sm:$0xff] %v544_v17  }
  0xb9 PF: > { %s14_s17 = sadd.s32 1, %s594_s17   ;;  %s689_s15 = smov %s590_s16 }
  0xba   : > { %p11_p5 = scmp.ge.s32.totalorder %s14_s17, 4   ;;  %s690_s16 = smov %s692_s18 }
  0xbc   :  { %13 = sbr.rel (!%p11_p5) target bundleno = 2 (0x2), region = 75 }

// kernel: _lambda_.31
= control target key start
LH: loop header
LB: loop body
LE: loop exit
PB: predicated region body
PF: predicated region fallthrough
CT: control target
= control target key end

     0   :  { %s715_s18 = smov 0   ;;  %s717_s19 = smov 0   ;;  %s781_s0 = inlined_call_operand.vmem [shape: bf16[32,128], index: 0, kind: input, shape index: {}]   ;;  %s782_s1 = inlined_call_operand.vmem [shape: bf16[128,128], index: 1, kind: input, shape index: {}]   ;;  %s783_s2 = inlined_call_operand.vmem [shape: f32[1,128], index: 2, kind: input, shape index: {}]   ;;  %s784_s3 = inlined_call_operand.vmem [shape: f32[1,128], index: 3, kind: input, shape index: {}]   ;;  %s785_s4 = inlined_call_operand.vmem [shape: bf16[32,128], index: 4, kind: input, shape index: {}]   ;;  %s786_s5 = inlined_call_operand.vmem [shape: bf16[32,128], index: 5, kind: output, shape index: {}]  }
   0x1   :  { %s719_s20 = smov 0  }
   0x2 LB: > { %s27_s21 = sadd.s32 1, %s679_s19  ;;  %p572_p0 = scmp.ge.s32.totalorder %s683_s20, 1  ;;  %s683_s20 = sphi %s719_s20, %s15_s20   ;;  %s679_s19 = sphi %s717_s19, %s788_s19   ;;  %s675_s18 = sphi %s715_s18, %s787_s18  }
   0x3   : > { %p29_p1 = scmp.ge.s32.totalorder %s27_s21, 2  ;;  %p243_p2 = scmp.lt.s32.totalorder %s683_s20, 3 }
   0x5   : > { %s790_s21 = smov (%p29_p1, %s27_s21), 0  ;;  %p244_p3 = pnand %p572_p0, %p243_p2 }
   0x6   : > { %s573_s30 = sshll.u32 (!%p244_p3), %s675_s18, 1 }
   0x7   : > { %247 = sbr.rel (%p244_p3) target bundleno = 189 (0xbd), region = 40  ;;  %p293_p4 = scmp.lt.s32.totalorder (!%p244_p3), %s573_s30, 3 }
   0xc   : > { %v625_v0 = vld [vmem:[%s782_s1 + $0x38] sm:$0xff]  ;;  %v624_v1 = vld [vmem:[%s782_s1 + $0x30] sm:$0xff]  ;;  %v623_v2 = vld [vmem:[%s782_s1 + $0x28] sm:$0xff]  ;;  %s792_s30 = smov (!%p293_p4, %s573_s30), 3 }
   0xd   : > { %398 = vmatpush.bf16.msra.mxu0 %v625_v0  ;;  %v622_v3 = vld [vmem:[%s782_s1 + $0x20] sm:$0xff]  ;;  %v621_v4 = vld [vmem:[%s782_s1 + $0x18] sm:$0xff]  ;;  %v620_v5 = vld [vmem:[%s782_s1 + $0x10] sm:$0xff]  ;;  %s574_s12 = sshll.u32 %s792_s30, 2 }
   0xe   : > { %v619_v6 = vld [vmem:[%s782_s1 + $0x8] sm:$0xff]  ;;  %v618_v7 = vld [vmem:[%s782_s1] sm:$0xff]  ;;  %s296_s17 = scalar_lea.vmem %s781_s0, %s574_s12  ;;  %s315_s25 = scalar_lea.vmem %s785_s4, %s574_s12 }
   0xf   : > { %v617_v8 = vld [vmem:[%s296_s17] sm:$0xff]  ;;  %s324_s30 = scalar_lea.vmem %s786_s5, %s574_s12 }
  0x10   : > { %v659_v9 = vld [vmem:[%s783_s2] ss:$0 sm:$0xff] }
  0x11   : > { %399 = vmatpush.bf16.msra.mxu0 %v624_v1  ;;  %v660_v12 = vld [vmem:[%s784_s3] ss:$0 sm:$0xff] }
  0x12   : > { %v627_v13 = vld [vmem:[%s315_s25] sm:$0xff]  }
  0x13   : > { %v628_v15 = vunpack.c.l.bf16 %v627_v13  ;;  %v629_v18 = vunpack.c.h.bf16 %v627_v13 }
  0x15   : > { %400 = vmatpush.bf16.msra.mxu0 %v623_v2 }
  0x19   : > { %401 = vmatpush.bf16.msra.mxu0 %v622_v3 }
  0x1d   : > { %402 = vmatpush.bf16.msra.mxu0 %v621_v4 }
  0x21   : > { %403 = vmatpush.bf16.msra.mxu0 %v620_v5 }
  0x25   : > { %404 = vmatpush.bf16.msra.mxu0 %v619_v6 }
  0x29   : > { %405 = vmatpush.bf16.msra.mxu0 %v618_v7 }
  0x2c   : > { %406 = vmatmul.bf16.vlgmr.msra.gmra.mxu0 %v617_v8 }
  0xa9   : > { %v407_v10 = vpop.f32.mrf.mxu0 }
  0xaa   : > { %v416_v11 = vmul.f32 %v659_v9, %v407_v10 }
  0xac   : > { %v422_v14 = vadd.f32 %v660_v12, %v416_v11 }
  0xae   : > { %v428_v19 = vadd.f32 %v628_v15, %v422_v14 }
  0xb0   : > { %v430_v22 = vmax.f32 %v428_v19, 0.0 }
  0xb1   : > { %v409_v16 = vpop.f32.mrf.mxu0 }
  0xb2   : > { %v417_v17 = vmul.f32 %v659_v9, %v409_v16 }
  0xb4   : > { %v423_v20 = vadd.f32 %v660_v12, %v417_v17 }
  0xb6   : > { %v429_v21 = vadd.f32 %v629_v18, %v423_v20 }
  0xb8   : > { %v431_v23 = vmax.f32 %v429_v21, 0.0 }
  0xba   : > { %v633_v24 = vpack.c.bf16 %v431_v23, %v430_v22 }
  0xbc   : > { %634 = vst [vmem:[%s324_s30] sm:$0xff] %v633_v24  }
  0xbd PF: > { %s15_s20 = sadd.s32 1, %s683_s20   ;;  %s787_s18 = smov %s679_s19 }
  0xbe   : > { %p12_p5 = scmp.ge.s32.totalorder %s15_s20, 4   ;;  %s788_s19 = smov %s790_s21 }
  0xc0   :  { %14 = sbr.rel (!%p12_p5) target bundleno = 2 (0x2), region = 82 }

// kernel: _lambda_.29
= control target key start
LH: loop header
LB: loop body
LE: loop exit
PB: predicated region body
PF: predicated region fallthrough
CT: control target
= control target key end

     0   :  { %s1659_s15 = smov 0   ;;  %s1661_s16 = smov 0   ;;  %s1941_s0 = inlined_call_operand.vmem [shape: bf16[32,1152], index: 0, kind: input, shape index: {}]   ;;  %s1942_s1 = inlined_call_operand.vmem [shape: bf16[1152,128], index: 1, kind: input, shape index: {}]   ;;  %s1943_s2 = inlined_call_operand.vmem [shape: f32[1,128], index: 2, kind: input, shape index: {}]   ;;  %s1944_s3 = inlined_call_operand.vmem [shape: f32[1,128], index: 3, kind: input, shape index: {}]   ;;  %s1945_s4 = inlined_call_operand.vmem [shape: bf16[32,128], index: 4, kind: output, shape index: {}]  }
   0x1   :  { %s1663_s17 = smov 0  }
   0x2 LB: > { %s26_s18 = sadd.s32 1, %s1628_s16  ;;  %p1166_p0 = scmp.ge.s32.totalorder %s1632_s17, 1  ;;  %s1632_s17 = sphi %s1663_s17, %s14_s17   ;;  %s1628_s16 = sphi %s1661_s16, %s1947_s16   ;;  %s1624_s15 = sphi %s1659_s15, %s1946_s15  }
   0x3   : > { %p28_p1 = scmp.ge.s32.totalorder %s26_s18, 2  ;;  %p203_p2 = scmp.lt.s32.totalorder %s1632_s17, 3 }
   0x5   : > { %s1949_s18 = smov (%p28_p1, %s26_s18), 0  ;;  %p204_p3 = pnand %p1166_p0, %p203_p2 }
   0x6   : > { %s1167_s21 = sshll.u32 (!%p204_p3), %s1624_s15, 1 }
   0x7   : > { %207 = sbr.rel (%p204_p3) target bundleno = 253 (0xfd), region = 36  ;;  %p244_p4 = scmp.lt.s32.totalorder (!%p204_p3), %s1167_s21, 3 }
   0xc   : > { %v1513_v0 = vld [vmem:[%s1942_s1 + $0x38] sm:$0xff]  ;;  %v1512_v4 = vld [vmem:[%s1942_s1 + $0x30] sm:$0xff]  ;;  %v1511_v8 = vld [vmem:[%s1942_s1 + $0x28] sm:$0xff]  ;;  %s1951_s21 = smov (!%p244_p4, %s1167_s21), 3 }
   0xd   : > { %v1529_v1 = vld [vmem:[%s1942_s1 + $0xb8] sm:$0xff]  ;;  %901 = vmatpush.bf16.msra.mxu0 %v1513_v0  ;;  %v1528_v5 = vld [vmem:[%s1942_s1 + $0xb0] sm:$0xff]  ;;  %v1527_v9 = vld [vmem:[%s1942_s1 + $0xa8] sm:$0xff]  ;;  %s1583_s24 = smul.u32 36, %s1951_s21  ;;  %s1170_s20 = sshll.u32 %s1951_s21, 2 }
   0xe   : > { %v1521_v2 = vld [vmem:[%s1942_s1 + $0x78] sm:$0xff]  ;;  %929 = vmatpush.bf16.msra.mxu2 %v1529_v1  ;;  %v1520_v6 = vld [vmem:[%s1942_s1 + $0x70] sm:$0xff]  ;;  %v1519_v10 = vld [vmem:[%s1942_s1 + $0x68] sm:$0xff] }
   0xf   : > { %v1537_v3 = vld [vmem:[%s1942_s1 + $0xf8] sm:$0xff]  ;;  %915 = vmatpush.bf16.msra.mxu1 %v1521_v2  ;;  %v1536_v7 = vld [vmem:[%s1942_s1 + $0xf0] sm:$0xff]  ;;  %v1535_v11 = vld [vmem:[%s1942_s1 + $0xe8] sm:$0xff]  ;;  %s1770_s8 = scalar_lea.vmem %s1941_s0, %s1583_s24  ;;  %s267_s24 = scalar_lea.vmem %s1945_s4, %s1170_s20 }
  0x10   : > { %943 = vmatpush.bf16.msra.mxu3 %v1537_v3  ;;  %v1510_v12 = vld [vmem:[%s1942_s1 + $0x20] sm:$0xff]  ;;  %v1509_v16 = vld [vmem:[%s1942_s1 + $0x18] sm:$0xff]  ;;  %v1508_v20 = vld [vmem:[%s1942_s1 + $0x10] sm:$0xff] }
  0x11   : > { %902 = vmatpush.bf16.msra.mxu0 %v1512_v4  ;;  %v1526_v13 = vld [vmem:[%s1942_s1 + $0xa0] sm:$0xff]  ;;  %v1525_v17 = vld [vmem:[%s1942_s1 + $0x98] sm:$0xff]  ;;  %v1524_v21 = vld [vmem:[%s1942_s1 + $0x90] sm:$0xff] }
  0x12   : > { %930 = vmatpush.bf16.msra.mxu2 %v1528_v5  ;;  %v1518_v14 = vld [vmem:[%s1942_s1 + $0x60] sm:$0xff]  ;;  %v1517_v18 = vld [vmem:[%s1942_s1 + $0x58] sm:$0xff]  ;;  %v1516_v22 = vld [vmem:[%s1942_s1 + $0x50] sm:$0xff] }
  0x13   : > { %916 = vmatpush.bf16.msra.mxu1 %v1520_v6  ;;  %v1534_v15 = vld [vmem:[%s1942_s1 + $0xe0] sm:$0xff]  ;;  %v1533_v19 = vld [vmem:[%s1942_s1 + $0xd8] sm:$0xff]  ;;  %v1532_v23 = vld [vmem:[%s1942_s1 + $0xd0] sm:$0xff] }
  0x14   : > { %944 = vmatpush.bf16.msra.mxu3 %v1536_v7  ;;  %v1507_v24 = vld [vmem:[%s1942_s1 + $0x8] sm:$0xff]  ;;  %v1506_v28 = vld [vmem:[%s1942_s1] sm:$0xff]  ;;  %v1545_v30 = vld [vmem:[%s1942_s1 + $0x138] sm:$0xff] }
  0x15   : > { %903 = vmatpush.bf16.msra.mxu0 %v1511_v8  ;;  %v1523_v25 = vld [vmem:[%s1942_s1 + $0x88] sm:$0xff]  ;;  %v1522_v29 = vld [vmem:[%s1942_s1 + $0x80] sm:$0xff]  ;;  %v1561_v31 = vld [vmem:[%s1942_s1 + $0x1b8] sm:$0xff] }
  0x16   : > { %931 = vmatpush.bf16.msra.mxu2 %v1527_v9  ;;  %v1515_v26 = vld [vmem:[%s1942_s1 + $0x48] sm:$0xff]  ;;  %v1514_v32 = vld [vmem:[%s1942_s1 + $0x40] sm:$0xff]  ;;  %v1553_v38 = vld [vmem:[%s1942_s1 + $0x178] sm:$0xff] }
  0x17   : > { %917 = vmatpush.bf16.msra.mxu1 %v1519_v10  ;;  %v1531_v27 = vld [vmem:[%s1942_s1 + $0xc8] sm:$0xff]  ;;  %v1530_v33 = vld [vmem:[%s1942_s1 + $0xc0] sm:$0xff]  ;;  %v1569_v39 = vld [vmem:[%s1942_s1 + $0x1f8] sm:$0xff] }
  0x18   : > { %945 = vmatpush.bf16.msra.mxu3 %v1535_v11  ;;  %v1173_v34 = vld [vmem:[%s1770_s8] sm:$0xf]  ;;  %v1501_v35 = vld [vmem:[%s1770_s8 + $0x20] sm:$0xf0]  ;;  %v1181_v36 = vld [vmem:[%s1770_s8 + $0x8] sm:$0xf] }
  0x19   : > { %904 = vmatpush.bf16.msra.mxu0 %v1510_v12  ;;  %v1502_v37 = vld [vmem:[%s1770_s8 + $0x28] sm:$0xf0]  ;;  %v1497_v40 = vld [vmem:[%s1770_s8 + $0x4] sm:$0xf]  ;;  %v1175_v41 = vld [vmem:[%s1770_s8 + $0x24] sm:$0xf0]  ;;  %v1174_v44 = vor.u32 %v1501_v35, %v1173_v34 }
  0x1a   : > { %932 = vmatpush.bf16.msra.mxu2 %v1526_v13  ;;  %v1498_v42 = vld [vmem:[%s1770_s8 + $0xc] sm:$0xf]  ;;  %v1183_v43 = vld [vmem:[%s1770_s8 + $0x2c] sm:$0xf0]  ;;  %v1182_v45 = vor.u32 %v1502_v37, %v1181_v36  ;;  %v1178_v48 = vor.u32 %v1497_v40, %v1175_v41  ;;  %v1542_v56 = vld [vmem:[%s1942_s1 + $0x120] sm:$0xff] }
  0x1b   : > { %918 = vmatpush.bf16.msra.mxu1 %v1518_v14  ;;  %v1544_v46 = vld [vmem:[%s1942_s1 + $0x130] sm:$0xff]  ;;  %v1186_v49 = vor.u32 %v1498_v42, %v1183_v43  ;;  %v1543_v52 = vld [vmem:[%s1942_s1 + $0x128] sm:$0xff]  ;;  %v1558_v57 = vld [vmem:[%s1942_s1 + $0x1a0] sm:$0xff] }
  0x1c   : > { %946 = vmatpush.bf16.msra.mxu3 %v1534_v15  ;;  %v1560_v47 = vld [vmem:[%s1942_s1 + $0x1b0] sm:$0xff]  ;;  %v1559_v53 = vld [vmem:[%s1942_s1 + $0x1a8] sm:$0xff]  ;;  %v1550_v58 = vld [vmem:[%s1942_s1 + $0x160] sm:$0xff] }
  0x1d   : > { %905 = vmatpush.bf16.msra.mxu0 %v1509_v16  ;;  %v1552_v50 = vld [vmem:[%s1942_s1 + $0x170] sm:$0xff]  ;;  %v1551_v54 = vld [vmem:[%s1942_s1 + $0x168] sm:$0xff]  ;;  %v1566_v59 = vld [vmem:[%s1942_s1 + $0x1e0] sm:$0xff] }
  0x1e   : > { %933 = vmatpush.bf16.msra.mxu2 %v1525_v17  ;;  %v1568_v51 = vld [vmem:[%s1942_s1 + $0x1f0] sm:$0xff]  ;;  %v1567_v55 = vld [vmem:[%s1942_s1 + $0x1e8] sm:$0xff]  ;;  %v1541_v60 = vld [vmem:[%s1942_s1 + $0x118] sm:$0xff] }
  0x1f   : > { %919 = vmatpush.bf16.msra.mxu1 %v1517_v18  ;;  %v1557_v61 = vld [vmem:[%s1942_s1 + $0x198] sm:$0xff]  ;;  %v1540_v0 = vld [vmem:[%s1942_s1 + $0x110] sm:$0xff]  ;;  %v1539_v4 = vld [vmem:[%s1942_s1 + $0x108] sm:$0xff] }
  0x20   : > { %947 = vmatpush.bf16.msra.mxu3 %v1533_v19  ;;  %v1549_v62 = vld [vmem:[%s1942_s1 + $0x158] sm:$0xff]  ;;  %v1556_v1 = vld [vmem:[%s1942_s1 + $0x190] sm:$0xff]  ;;  %v1555_v5 = vld [vmem:[%s1942_s1 + $0x188] sm:$0xff] }
  0x21   : > { %906 = vmatpush.bf16.msra.mxu0 %v1508_v20  ;;  %v1565_v63 = vld [vmem:[%s1942_s1 + $0x1d8] sm:$0xff]  ;;  %v1548_v2 = vld [vmem:[%s1942_s1 + $0x150] sm:$0xff]  ;;  %v1547_v6 = vld [vmem:[%s1942_s1 + $0x148] sm:$0xff] }
  0x22   : > { %934 = vmatpush.bf16.msra.mxu2 %v1524_v21  ;;  %v1564_v3 = vld [vmem:[%s1942_s1 + $0x1d0] sm:$0xff]  ;;  %v1563_v7 = vld [vmem:[%s1942_s1 + $0x1c8] sm:$0xff]  ;;  %v1538_v8 = vld [vmem:[%s1942_s1 + $0x100] sm:$0xff] }
  0x23   : > { %920 = vmatpush.bf16.msra.mxu1 %v1516_v22  ;;  %v1554_v9 = vld [vmem:[%s1942_s1 + $0x180] sm:$0xff]  ;;  %v1577_v10 = vld [vmem:[%s1942_s1 + $0x238] sm:$0xff]  ;;  %v1189_v11 = vld [vmem:[%s1770_s8 + $0x10] sm:$0xf] }
  0x24   : > { %948 = vmatpush.bf16.msra.mxu3 %v1532_v23  ;;  %v1503_v12 = vld [vmem:[%s1770_s8 + $0x30] sm:$0xf0]  ;;  %v1197_v13 = vld [vmem:[%s1770_s8 + $0x18] sm:$0xf]  ;;  %v1504_v14 = vld [vmem:[%s1770_s8 + $0x38] sm:$0xf0] }
  0x25   : > { %907 = vmatpush.bf16.msra.mxu0 %v1507_v24  ;;  %v1546_v15 = vld [vmem:[%s1942_s1 + $0x140] sm:$0xff]  ;;  %v1499_v17 = vld [vmem:[%s1770_s8 + $0x14] sm:$0xf]  ;;  %v1191_v18 = vld [vmem:[%s1770_s8 + $0x34] sm:$0xf0]  ;;  %v1190_v21 = vor.u32 %v1503_v12, %v1189_v11  ;;  %v1198_v22 = vor.u32 %v1504_v14, %v1197_v13 }
  0x26   : > { %935 = vmatpush.bf16.msra.mxu2 %v1523_v25  ;;  %v1562_v16 = vld [vmem:[%s1942_s1 + $0x1c0] sm:$0xff]  ;;  %v1500_v19 = vld [vmem:[%s1770_s8 + $0x1c] sm:$0xf]  ;;  %v1194_v23 = vor.u32 %v1499_v17, %v1191_v18  ;;  %v1576_v25 = vld [vmem:[%s1942_s1 + $0x230] sm:$0xff] }
  0x27   : > { %921 = vmatpush.bf16.msra.mxu1 %v1515_v26  ;;  %v1199_v20 = vld [vmem:[%s1770_s8 + $0x3c] sm:$0xf0]  ;;  %v1575_v26 = vld [vmem:[%s1942_s1 + $0x228] sm:$0xff] }
  0x28   : > { %949 = vmatpush.bf16.msra.mxu3 %v1531_v27  ;;  %v1202_v24 = vor.u32 %v1500_v19, %v1199_v20  ;;  %v1574_v27 = vld [vmem:[%s1942_s1 + $0x220] sm:$0xff] }
  0x29   : > { %908 = vmatpush.bf16.msra.mxu0 %v1506_v28  ;;  %v1573_v28 = vld [vmem:[%s1942_s1 + $0x218] sm:$0xff] }
  0x2a   : > { %936 = vmatpush.bf16.msra.mxu2 %v1522_v29  ;;  %v1572_v29 = vld [vmem:[%s1942_s1 + $0x210] sm:$0xff] }
  0x2b   : > { %922 = vmatpush.bf16.msra.mxu1 %v1514_v32  ;;  %v1205_v32 = vld [vmem:[%s1770_s8 + $0x20] sm:$0xf] }
  0x2c   : > { %950 = vmatpush.bf16.msra.mxu3 %v1530_v33  ;;  %909 = vmatmul.bf16.vlgmr.msra.gmra.mxu0 %v1174_v44  ;;  %v1505_v33 = vld [vmem:[%s1770_s8 + $0x40] sm:$0xf0] }
  0x2d   : > { %957 = vmatpush.bf16.msrb.mxu0 %v1545_v30  ;;  %937 = vmatmul.bf16.vlgmr.msra.gmra.mxu2 %v1182_v45  ;;  %v1571_v30 = vld [vmem:[%s1942_s1 + $0x208] sm:$0xff]  ;;  %v1206_v34 = vor.u32 %v1505_v33, %v1205_v32 }
  0x2e   : > { %985 = vmatpush.bf16.msrb.mxu2 %v1561_v31  ;;  %923 = vmatmul.bf16.vlgmr.msra.gmra.mxu1 %v1178_v48  ;;  %v1570_v31 = vld [vmem:[%s1942_s1 + $0x200] sm:$0xff] }
  0x2f   : > { %971 = vmatpush.bf16.msrb.mxu1 %v1553_v38  ;;  %951 = vmatmul.bf16.vlgmr.msra.gmra.mxu3 %v1186_v49 }
  0x30   : > { %999 = vmatpush.bf16.msrb.mxu3 %v1569_v39 }
  0x31   : > { %958 = vmatpush.bf16.msrb.mxu0 %v1544_v46 }
  0x32   : > { %986 = vmatpush.bf16.msrb.mxu2 %v1560_v47 }
  0x33   : > { %972 = vmatpush.bf16.msrb.mxu1 %v1552_v50 }
  0x34   : > { %1000 = vmatpush.bf16.msrb.mxu3 %v1568_v51 }
  0x35   : > { %959 = vmatpush.bf16.msrb.mxu0 %v1543_v52 }
  0x36   : > { %987 = vmatpush.bf16.msrb.mxu2 %v1559_v53 }
  0x37   : > { %973 = vmatpush.bf16.msrb.mxu1 %v1551_v54 }
  0x38   : > { %1001 = vmatpush.bf16.msrb.mxu3 %v1567_v55 }
  0x39   : > { %960 = vmatpush.bf16.msrb.mxu0 %v1542_v56 }
  0x3a   : > { %988 = vmatpush.bf16.msrb.mxu2 %v1558_v57 }
  0x3b   : > { %974 = vmatpush.bf16.msrb.mxu1 %v1550_v58 }
  0x3c   : > { %1002 = vmatpush.bf16.msrb.mxu3 %v1566_v59 }
  0x3d   : > { %961 = vmatpush.bf16.msrb.mxu0 %v1541_v60 }
  0x3e   : > { %989 = vmatpush.bf16.msrb.mxu2 %v1557_v61 }
  0x3f   : > { %975 = vmatpush.bf16.msrb.mxu1 %v1549_v62 }
  0x40   : > { %1003 = vmatpush.bf16.msrb.mxu3 %v1565_v63 }
  0x41   : > { %962 = vmatpush.bf16.msrb.mxu0 %v1540_v0 }
  0x42   : > { %990 = vmatpush.bf16.msrb.mxu2 %v1556_v1  ;;  %v1608_v1 = vld [vmem:[%s1943_s2] ss:$0 sm:$0xff] }
  0x43   : > { %976 = vmatpush.bf16.msrb.mxu1 %v1548_v2 }
  0x44   : > { %1004 = vmatpush.bf16.msrb.mxu3 %v1564_v3 }
  0x45   : > { %963 = vmatpush.bf16.msrb.mxu0 %v1539_v4 }
  0x46   : > { %991 = vmatpush.bf16.msrb.mxu2 %v1555_v5  ;;  %v1609_v5 = vld [vmem:[%s1944_s3] ss:$0 sm:$0xff] }
  0x47   : > { %977 = vmatpush.bf16.msrb.mxu1 %v1547_v6 }
  0x48   : > { %1005 = vmatpush.bf16.msrb.mxu3 %v1563_v7 }
  0x49   : > { %964 = vmatpush.bf16.msrb.mxu0 %v1538_v8 }
  0x4a   : > { %992 = vmatpush.bf16.msrb.mxu2 %v1554_v9 }
  0x4b   : > { %978 = vmatpush.bf16.msrb.mxu1 %v1546_v15 }
  0x4c   : > { %1006 = vmatpush.bf16.msrb.mxu3 %v1562_v16  ;;  %965 = vmatmul.bf16.vlgmr.msrb.gmra.mxu0 %v1190_v21 }
  0x4d   : > { %1013 = vmatpush.bf16.msra.mxu0 %v1577_v10  ;;  %993 = vmatmul.bf16.vlgmr.msrb.gmra.mxu2 %v1198_v22 }
  0x4e   : > { %979 = vmatmul.bf16.vlgmr.msrb.gmra.mxu1 %v1194_v23 }
  0x4f   : > { %1007 = vmatmul.bf16.vlgmr.msrb.gmra.mxu3 %v1202_v24 }
  0x51   : > { %1014 = vmatpush.bf16.msra.mxu0 %v1576_v25 }
  0x55   : > { %1015 = vmatpush.bf16.msra.mxu0 %v1575_v26 }
  0x59   : > { %1016 = vmatpush.bf16.msra.mxu0 %v1574_v27 }
  0x5d   : > { %1017 = vmatpush.bf16.msra.mxu0 %v1573_v28 }
  0x61   : > { %1018 = vmatpush.bf16.msra.mxu0 %v1572_v29 }
  0x65   : > { %1019 = vmatpush.bf16.msra.mxu0 %v1571_v30 }
  0x69   : > { %1020 = vmatpush.bf16.msra.mxu0 %v1570_v31 }
  0x6c   : > { %1021 = vmatmul.bf16.vlgmr.msra.gmra.mxu0 %v1206_v34 }
  0xa9   : > { %v910_v35 = vpop.f32.mrf.mxu0 }
  0xab   : > { %v924_v36 = vpop.f32.mrf.mxu1 }
  0xac   : > { %v925_v40 = vadd.f32 %v924_v36, %v910_v35 }
  0xb0   : > { %v938_v37 = vpop.f32.mrf.mxu2 }
  0xb1   : > { %v912_v38 = vpop.f32.mrf.mxu0  ;;  %v939_v43 = vadd.f32 %v938_v37, %v925_v40 }
  0xb2   : > { %v952_v39 = vpop.f32.mrf.mxu3 }
  0xb3   : > { %v926_v41 = vpop.f32.mrf.mxu1  ;;  %v953_v46 = vadd.f32 %v952_v39, %v939_v43 }
  0xb4   : > { %v927_v47 = vadd.f32 %v926_v41, %v912_v38 }
  0xb8   : > { %v940_v42 = vpop.f32.mrf.mxu2 }
  0xb9   : > { %v941_v51 = vadd.f32 %v940_v42, %v927_v47 }
  0xba   : > { %v954_v45 = vpop.f32.mrf.mxu3 }
  0xbb   : > { %v955_v55 = vadd.f32 %v954_v45, %v941_v51 }
  0xc9   : > { %v966_v44 = vpop.f32.mrf.mxu0 }
  0xca   : > { %v967_v49 = vadd.f32 %v966_v44, %v953_v46 }
  0xcb   : > { %v980_v48 = vpop.f32.mrf.mxu1 }
  0xcc   : > { %v981_v53 = vadd.f32 %v980_v48, %v967_v49 }
  0xd0   : > { %v994_v50 = vpop.f32.mrf.mxu2 }
  0xd1   : > { %v968_v52 = vpop.f32.mrf.mxu0  ;;  %v995_v56 = vadd.f32 %v994_v50, %v981_v53 }
  0xd2   : > { %v1008_v54 = vpop.f32.mrf.mxu3  ;;  %v969_v57 = vadd.f32 %v968_v52, %v955_v55 }
  0xd3   : > { %v982_v58 = vpop.f32.mrf.mxu1  ;;  %v1009_v61 = vadd.f32 %v1008_v54, %v995_v56 }
  0xd4   : > { %v983_v62 = vadd.f32 %v982_v58, %v969_v57 }
  0xd8   : > { %v996_v59 = vpop.f32.mrf.mxu2 }
  0xd9   : > { %v997_v63 = vadd.f32 %v996_v59, %v983_v62 }
  0xda   : > { %v1010_v2 = vpop.f32.mrf.mxu3 }
  0xdb   : > { %v1011_v3 = vadd.f32 %v1010_v2, %v997_v63 }
  0xe9   : > { %v1022_v60 = vpop.f32.mrf.mxu0 }
  0xea   : > { %v1023_v0 = vadd.f32 %v1022_v60, %v1009_v61 }
  0xec   : > { %v1031_v4 = vmul.f32 %v1608_v1, %v1023_v0 }
  0xee   : > { %v1037_v8 = vadd.f32 %v1609_v5, %v1031_v4 }
  0xf0   : > { %v1039_v11 = vmax.f32 %v1037_v8, 0.0 }
  0xf1   : > { %v1024_v6 = vpop.f32.mrf.mxu0 }
  0xf2   : > { %v1025_v7 = vadd.f32 %v1024_v6, %v1011_v3 }
  0xf4   : > { %v1032_v9 = vmul.f32 %v1608_v1, %v1025_v7 }
  0xf6   : > { %v1038_v10 = vadd.f32 %v1609_v5, %v1032_v9 }
  0xf8   : > { %v1040_v12 = vmax.f32 %v1038_v10, 0.0 }
  0xfa   : > { %v1581_v13 = vpack.c.bf16 %v1040_v12, %v1039_v11 }
  0xfc   : > { %1582 = vst [vmem:[%s267_s24] sm:$0xff] %v1581_v13  }
  0xfd PF: > { %s14_s17 = sadd.s32 1, %s1632_s17   ;;  %s1946_s15 = smov %s1628_s16 }
  0xfe   : > { %p11_p5 = scmp.ge.s32.totalorder %s14_s17, 4   ;;  %s1947_s16 = smov %s1949_s18 }
 0x100   :  { %13 = sbr.rel (!%p11_p5) target bundleno = 2 (0x2), region = 75 }

// kernel: _lambda_.32
= control target key start
LH: loop header
LB: loop body
LE: loop exit
PB: predicated region body
PF: predicated region fallthrough
CT: control target
= control target key end

     0   :  { %s623_s15 = smov 0   ;;  %s625_s16 = smov 0   ;;  %s686_s0 = inlined_call_operand.vmem [shape: bf16[32,128], index: 0, kind: input, shape index: {}]   ;;  %s687_s1 = inlined_call_operand.vmem [shape: bf16[128,128], index: 1, kind: input, shape index: {}]   ;;  %s688_s2 = inlined_call_operand.vmem [shape: f32[1,128], index: 2, kind: input, shape index: {}]   ;;  %s689_s3 = inlined_call_operand.vmem [shape: f32[1,128], index: 3, kind: input, shape index: {}]   ;;  %s690_s4 = inlined_call_operand.vmem [shape: bf16[32,128], index: 4, kind: output, shape index: {}]  }
   0x1   :  { %s627_s17 = smov 0  }
   0x2 LB: > { %s26_s18 = sadd.s32 1, %s592_s16  ;;  %p491_p0 = scmp.ge.s32.totalorder %s596_s17, 1  ;;  %s596_s17 = sphi %s627_s17, %s14_s17   ;;  %s592_s16 = sphi %s625_s16, %s692_s16   ;;  %s588_s15 = sphi %s623_s15, %s691_s15  }
   0x3   : > { %p28_p1 = scmp.ge.s32.totalorder %s26_s18, 2  ;;  %p202_p2 = scmp.lt.s32.totalorder %s596_s17, 3 }
   0x5   : > { %s694_s18 = smov (%p28_p1, %s26_s18), 0  ;;  %p203_p3 = pnand %p491_p0, %p202_p2 }
   0x6   : > { %s492_s27 = sshll.u32 (!%p203_p3), %s588_s15, 1 }
   0x7   : > { %206 = sbr.rel (%p203_p3) target bundleno = 187 (0xbb), region = 36  ;;  %p242_p4 = scmp.lt.s32.totalorder (!%p203_p3), %s492_s27, 3 }
   0xc   : > { %v542_v0 = vld [vmem:[%s687_s1 + $0x38] sm:$0xff]  ;;  %v541_v1 = vld [vmem:[%s687_s1 + $0x30] sm:$0xff]  ;;  %v540_v2 = vld [vmem:[%s687_s1 + $0x28] sm:$0xff]  ;;  %s696_s27 = smov (!%p242_p4, %s492_s27), 3 }
   0xd   : > { %338 = vmatpush.bf16.msra.mxu0 %v542_v0  ;;  %v539_v3 = vld [vmem:[%s687_s1 + $0x20] sm:$0xff]  ;;  %v538_v4 = vld [vmem:[%s687_s1 + $0x18] sm:$0xff]  ;;  %v537_v5 = vld [vmem:[%s687_s1 + $0x10] sm:$0xff]  ;;  %s493_s8 = sshll.u32 %s696_s27, 2 }
   0xe   : > { %v536_v6 = vld [vmem:[%s687_s1 + $0x8] sm:$0xff]  ;;  %v535_v7 = vld [vmem:[%s687_s1] sm:$0xff]  ;;  %s245_s13 = scalar_lea.vmem %s686_s0, %s493_s8  ;;  %s264_s23 = scalar_lea.vmem %s690_s4, %s493_s8 }
   0xf   : > { %v534_v8 = vld [vmem:[%s245_s13] sm:$0xff] }
  0x10   : > { %v572_v10 = vld [vmem:[%s688_s2] ss:$0 sm:$0xff] }
  0x11   : > { %339 = vmatpush.bf16.msra.mxu0 %v541_v1  ;;  %v573_v12 = vld [vmem:[%s689_s3] ss:$0 sm:$0xff] }
  0x15   : > { %340 = vmatpush.bf16.msra.mxu0 %v540_v2 }
  0x19   : > { %341 = vmatpush.bf16.msra.mxu0 %v539_v3 }
  0x1d   : > { %342 = vmatpush.bf16.msra.mxu0 %v538_v4 }
  0x21   : > { %343 = vmatpush.bf16.msra.mxu0 %v537_v5 }
  0x25   : > { %344 = vmatpush.bf16.msra.mxu0 %v536_v6 }
  0x29   : > { %345 = vmatpush.bf16.msra.mxu0 %v535_v7 }
  0x2c   : > { %346 = vmatmul.bf16.vlgmr.msra.gmra.mxu0 %v534_v8 }
  0xa9   : > { %v347_v9 = vpop.f32.mrf.mxu0 }
  0xaa   : > { %v356_v11 = vmul.f32 %v572_v10, %v347_v9 }
  0xac   : > { %v362_v14 = vadd.f32 %v573_v12, %v356_v11 }
  0xae   : > { %v364_v17 = vmax.f32 %v362_v14, 0.0 }
  0xb1   : > { %v349_v13 = vpop.f32.mrf.mxu0 }
  0xb2   : > { %v357_v15 = vmul.f32 %v572_v10, %v349_v13 }
  0xb4   : > { %v363_v16 = vadd.f32 %v573_v12, %v357_v15 }
  0xb6   : > { %v365_v18 = vmax.f32 %v363_v16, 0.0 }
  0xb8   : > { %v546_v19 = vpack.c.bf16 %v365_v18, %v364_v17 }
  0xba   : > { %547 = vst [vmem:[%s264_s23] sm:$0xff] %v546_v19  }
  0xbb PF: > { %s14_s17 = sadd.s32 1, %s596_s17   ;;  %s691_s15 = smov %s592_s16 }
  0xbc   : > { %p11_p5 = scmp.ge.s32.totalorder %s14_s17, 4   ;;  %s692_s16 = smov %s694_s18 }
  0xbe   :  { %13 = sbr.rel (!%p11_p5) target bundleno = 2 (0x2), region = 75 }

// kernel: _lambda_.34
= control target key start
LH: loop header
LB: loop body
LE: loop exit
PB: predicated region body
PF: predicated region fallthrough
CT: control target
= control target key end

     0   :  { %s214_s1 = inlined_call_operand.vmem [shape: bf16[128,128], index: 1, kind: input, shape index: {}]   ;;  %s215_s2 = inlined_call_operand.vmem [shape: f32[1,128], index: 2, kind: input, shape index: {}]   ;;  %s216_s3 = inlined_call_operand.vmem [shape: f32[1,128], index: 3, kind: input, shape index: {}]   ;;  %s217_s0 = inlined_call_operand.vmem [shape: bf16[8,128], index: 0, kind: input, shape index: {}]   ;;  %s218_s4 = inlined_call_operand.vmem [shape: bf16[8,128], index: 4, kind: output, shape index: {}]  }
   0x1   :  { %v150_v0 = vld [vmem:[%s214_s1 + $0x38] sm:$0xff]  ;;  %v149_v1 = vld [vmem:[%s214_s1 + $0x30] sm:$0xff]  ;;  %v148_v2 = vld [vmem:[%s214_s1 + $0x28] sm:$0xff] }
   0x2   :  { %82 = vmatpush.bf16.msra.mxu0 %v150_v0  ;;  %v147_v3 = vld [vmem:[%s214_s1 + $0x20] sm:$0xff]  ;;  %v146_v4 = vld [vmem:[%s214_s1 + $0x18] sm:$0xff]  ;;  %v145_v5 = vld [vmem:[%s214_s1 + $0x10] sm:$0xff] }
   0x3   :  { %v144_v6 = vld [vmem:[%s214_s1 + $0x8] sm:$0xff]  ;;  %v143_v7 = vld [vmem:[%s214_s1] sm:$0xff] }
   0x4   :  { %v17_v8 = vld [vmem:[%s217_s0] sm:$0xf] }
   0x5   :  { %v151_v9 = vld [vmem:[%s215_s2] ss:$0 sm:$0xff] }
   0x6   :  { %83 = vmatpush.bf16.msra.mxu0 %v149_v1  ;;  %v152_v10 = vld [vmem:[%s216_s3] ss:$0 sm:$0xff] }
   0xa   :  { %84 = vmatpush.bf16.msra.mxu0 %v148_v2 }
   0xe   :  { %85 = vmatpush.bf16.msra.mxu0 %v147_v3 }
  0x12   :  { %86 = vmatpush.bf16.msra.mxu0 %v146_v4 }
  0x16   :  { %87 = vmatpush.bf16.msra.mxu0 %v145_v5 }
  0x1a   :  { %88 = vmatpush.bf16.msra.mxu0 %v144_v6 }
  0x1e   :  { %89 = vmatpush.bf16.msra.mxu0 %v143_v7 }
  0x21   :  { %90 = vmatmul.bf16.vlgmr.msra.gmra.mxu0 %v17_v8 }
  0x9e   :  { %v91_v11 = vpop.f32.mrf.mxu0 }
  0x9f   :  { %v99_v12 = vmul.f32 %v151_v9, %v91_v11 }
  0xa1   :  { %v104_v13 = vadd.f32 %v152_v10, %v99_v12 }
  0xa3   :  { %v105_v14 = vpack.c.bf16 %v104_v13, %v104_v13 }
  0xa5   :  { %106 = vst [vmem:[%s218_s4] sm:$0xf] %v105_v14 }
  0xa6   :  { %v93_v15 = vpop.f32.mrf.mxu0 }

// kernel: _lambda_.35
= control target key start
LH: loop header
LB: loop body
LE: loop exit
PB: predicated region body
PF: predicated region fallthrough
CT: control target
= control target key end

     0   :  { %s229_s1 = inlined_call_operand.vmem [shape: bf16[128,128], index: 1, kind: input, shape index: {}]   ;;  %s230_s2 = inlined_call_operand.vmem [shape: f32[1,128], index: 2, kind: input, shape index: {}]   ;;  %s231_s3 = inlined_call_operand.vmem [shape: f32[1,128], index: 3, kind: input, shape index: {}]   ;;  %s232_s0 = inlined_call_operand.vmem [shape: bf16[8,128], index: 0, kind: input, shape index: {}]   ;;  %s233_s4 = inlined_call_operand.vmem [shape: bf16[8,128], index: 4, kind: input, shape index: {}]   ;;  %s234_s5 = inlined_call_operand.vmem [shape: bf16[8,128], index: 5, kind: output, shape index: {}]  }
   0x1   :  { %v157_v0 = vld [vmem:[%s229_s1 + $0x38] sm:$0xff]  ;;  %v156_v1 = vld [vmem:[%s229_s1 + $0x30] sm:$0xff]  ;;  %v155_v2 = vld [vmem:[%s229_s1 + $0x28] sm:$0xff] }
   0x2   :  { %85 = vmatpush.bf16.msra.mxu0 %v157_v0  ;;  %v154_v3 = vld [vmem:[%s229_s1 + $0x20] sm:$0xff]  ;;  %v153_v4 = vld [vmem:[%s229_s1 + $0x18] sm:$0xff]  ;;  %v152_v5 = vld [vmem:[%s229_s1 + $0x10] sm:$0xff] }
   0x3   :  { %v151_v6 = vld [vmem:[%s229_s1 + $0x8] sm:$0xff]  ;;  %v150_v7 = vld [vmem:[%s229_s1] sm:$0xff] }
   0x4   :  { %v20_v8 = vld [vmem:[%s232_s0] sm:$0xf] }
   0x5   :  { %v158_v9 = vld [vmem:[%s230_s2] ss:$0 sm:$0xff] }
   0x6   :  { %86 = vmatpush.bf16.msra.mxu0 %v156_v1  ;;  %v108_v10 = vld [vmem:[%s233_s4] sm:$0xf] }
   0x7   :  { %v159_v11 = vld [vmem:[%s231_s3] ss:$0 sm:$0xff]  ;;  %v109_v14 = vunpack.c.l.bf16 %v108_v10 }
   0xa   :  { %87 = vmatpush.bf16.msra.mxu0 %v155_v2 }
   0xe   :  { %88 = vmatpush.bf16.msra.mxu0 %v154_v3 }
  0x12   :  { %89 = vmatpush.bf16.msra.mxu0 %v153_v4 }
  0x16   :  { %90 = vmatpush.bf16.msra.mxu0 %v152_v5 }
  0x1a   :  { %91 = vmatpush.bf16.msra.mxu0 %v151_v6 }
  0x1e   :  { %92 = vmatpush.bf16.msra.mxu0 %v150_v7 }
  0x21   :  { %93 = vmatmul.bf16.vlgmr.msra.gmra.mxu0 %v20_v8 }
  0x9e   :  { %v94_v12 = vpop.f32.mrf.mxu0 }
  0x9f   :  { %v102_v13 = vmul.f32 %v158_v9, %v94_v12 }
  0xa1   :  { %v107_v15 = vadd.f32 %v159_v11, %v102_v13 }
  0xa3   :  { %v110_v16 = vadd.f32 %v109_v14, %v107_v15 }
  0xa5   :  { %v111_v17 = vmax.f32 %v110_v16, 0.0 }
  0xa6   :  { %v96_v18 = vpop.f32.mrf.mxu0 }
  0xa7   :  { %v112_v19 = vpack.c.bf16 %v111_v17, %v111_v17 }
  0xa9   :  { %113 = vst [vmem:[%s234_s5] sm:$0xf] %v112_v19 }

// kernel: _lambda_.36
= control target key start
LH: loop header
LB: loop body
LE: loop exit
PB: predicated region body
PF: predicated region fallthrough
CT: control target
= control target key end

     0   :  { %s215_s1 = inlined_call_operand.vmem [shape: bf16[128,128], index: 1, kind: input, shape index: {}]   ;;  %s216_s2 = inlined_call_operand.vmem [shape: f32[1,128], index: 2, kind: input, shape index: {}]   ;;  %s217_s3 = inlined_call_operand.vmem [shape: f32[1,128], index: 3, kind: input, shape index: {}]   ;;  %s218_s0 = inlined_call_operand.vmem [shape: bf16[8,128], index: 0, kind: input, shape index: {}]   ;;  %s219_s4 = inlined_call_operand.vmem [shape: bf16[8,128], index: 4, kind: output, shape index: {}]  }
   0x1   :  { %v151_v0 = vld [vmem:[%s215_s1 + $0x38] sm:$0xff]  ;;  %v150_v1 = vld [vmem:[%s215_s1 + $0x30] sm:$0xff]  ;;  %v149_v2 = vld [vmem:[%s215_s1 + $0x28] sm:$0xff] }
   0x2   :  { %82 = vmatpush.bf16.msra.mxu0 %v151_v0  ;;  %v148_v3 = vld [vmem:[%s215_s1 + $0x20] sm:$0xff]  ;;  %v147_v4 = vld [vmem:[%s215_s1 + $0x18] sm:$0xff]  ;;  %v146_v5 = vld [vmem:[%s215_s1 + $0x10] sm:$0xff] }
   0x3   :  { %v145_v6 = vld [vmem:[%s215_s1 + $0x8] sm:$0xff]  ;;  %v144_v7 = vld [vmem:[%s215_s1] sm:$0xff] }
   0x4   :  { %v17_v8 = vld [vmem:[%s218_s0] sm:$0xf] }
   0x5   :  { %v152_v9 = vld [vmem:[%s216_s2] ss:$0 sm:$0xff] }
   0x6   :  { %83 = vmatpush.bf16.msra.mxu0 %v150_v1  ;;  %v153_v10 = vld [vmem:[%s217_s3] ss:$0 sm:$0xff] }
   0xa   :  { %84 = vmatpush.bf16.msra.mxu0 %v149_v2 }
   0xe   :  { %85 = vmatpush.bf16.msra.mxu0 %v148_v3 }
  0x12   :  { %86 = vmatpush.bf16.msra.mxu0 %v147_v4 }
  0x16   :  { %87 = vmatpush.bf16.msra.mxu0 %v146_v5 }
  0x1a   :  { %88 = vmatpush.bf16.msra.mxu0 %v145_v6 }
  0x1e   :  { %89 = vmatpush.bf16.msra.mxu0 %v144_v7 }
  0x21   :  { %90 = vmatmul.bf16.vlgmr.msra.gmra.mxu0 %v17_v8 }
  0x9e   :  { %v91_v11 = vpop.f32.mrf.mxu0 }
  0x9f   :  { %v99_v12 = vmul.f32 %v152_v9, %v91_v11 }
  0xa1   :  { %v104_v13 = vadd.f32 %v153_v10, %v99_v12 }
  0xa3   :  { %v105_v14 = vmax.f32 %v104_v13, 0.0 }
  0xa5   :  { %v106_v15 = vpack.c.bf16 %v105_v14, %v105_v14 }
  0xa6   :  { %v93_v16 = vpop.f32.mrf.mxu0 }
  0xa7   :  { %107 = vst [vmem:[%s219_s4] sm:$0xf] %v106_v15 }

// kernel: _lambda_.33
= control target key start
LH: loop header
LB: loop body
LE: loop exit
PB: predicated region body
PF: predicated region fallthrough
CT: control target
= control target key end

     0   :  { %s1391_s1 = inlined_call_operand.vmem [shape: bf16[1152,128], index: 1, kind: input, shape index: {}]   ;;  %s1392_s0 = inlined_call_operand.vmem [shape: bf16[8,1152], index: 0, kind: input, shape index: {}]   ;;  %s1393_s2 = inlined_call_operand.vmem [shape: f32[1,128], index: 2, kind: input, shape index: {}]   ;;  %s1394_s3 = inlined_call_operand.vmem [shape: f32[1,128], index: 3, kind: input, shape index: {}]   ;;  %s1395_s4 = inlined_call_operand.vmem [shape: bf16[8,128], index: 4, kind: output, shape index: {}]  }
   0x1   :  { %v1059_v0 = vld [vmem:[%s1391_s1 + $0x38] sm:$0xff]  ;;  %v1058_v4 = vld [vmem:[%s1391_s1 + $0x30] sm:$0xff]  ;;  %v1057_v8 = vld [vmem:[%s1391_s1 + $0x28] sm:$0xff] }
   0x2   :  { %v1075_v1 = vld [vmem:[%s1391_s1 + $0xb8] sm:$0xff]  ;;  %630 = vmatpush.bf16.msra.mxu0 %v1059_v0  ;;  %v1074_v5 = vld [vmem:[%s1391_s1 + $0xb0] sm:$0xff]  ;;  %v1073_v9 = vld [vmem:[%s1391_s1 + $0xa8] sm:$0xff] }
   0x3   :  { %v1083_v2 = vld [vmem:[%s1391_s1 + $0xf8] sm:$0xff]  ;;  %656 = vmatpush.bf16.msra.mxu2 %v1075_v1  ;;  %v1082_v6 = vld [vmem:[%s1391_s1 + $0xf0] sm:$0xff]  ;;  %v1081_v10 = vld [vmem:[%s1391_s1 + $0xe8] sm:$0xff] }
   0x4   :  { %v1067_v3 = vld [vmem:[%s1391_s1 + $0x78] sm:$0xff]  ;;  %669 = vmatpush.bf16.msra.mxu3 %v1083_v2  ;;  %v1066_v7 = vld [vmem:[%s1391_s1 + $0x70] sm:$0xff]  ;;  %v1065_v11 = vld [vmem:[%s1391_s1 + $0x68] sm:$0xff] }
   0x5   :  { %643 = vmatpush.bf16.msra.mxu1 %v1067_v3  ;;  %v1056_v12 = vld [vmem:[%s1391_s1 + $0x20] sm:$0xff]  ;;  %v1055_v16 = vld [vmem:[%s1391_s1 + $0x18] sm:$0xff]  ;;  %v1054_v20 = vld [vmem:[%s1391_s1 + $0x10] sm:$0xff] }
   0x6   :  { %631 = vmatpush.bf16.msra.mxu0 %v1058_v4  ;;  %v1072_v13 = vld [vmem:[%s1391_s1 + $0xa0] sm:$0xff]  ;;  %v1071_v17 = vld [vmem:[%s1391_s1 + $0x98] sm:$0xff]  ;;  %v1070_v21 = vld [vmem:[%s1391_s1 + $0x90] sm:$0xff] }
   0x7   :  { %657 = vmatpush.bf16.msra.mxu2 %v1074_v5  ;;  %v1080_v14 = vld [vmem:[%s1391_s1 + $0xe0] sm:$0xff]  ;;  %v1079_v18 = vld [vmem:[%s1391_s1 + $0xd8] sm:$0xff]  ;;  %v1078_v22 = vld [vmem:[%s1391_s1 + $0xd0] sm:$0xff] }
   0x8   :  { %670 = vmatpush.bf16.msra.mxu3 %v1082_v6  ;;  %v1064_v15 = vld [vmem:[%s1391_s1 + $0x60] sm:$0xff]  ;;  %v1063_v19 = vld [vmem:[%s1391_s1 + $0x58] sm:$0xff]  ;;  %v1062_v23 = vld [vmem:[%s1391_s1 + $0x50] sm:$0xff] }
   0x9   :  { %644 = vmatpush.bf16.msra.mxu1 %v1066_v7  ;;  %v1053_v24 = vld [vmem:[%s1391_s1 + $0x8] sm:$0xff]  ;;  %v17_v29 = vld [vmem:[%s1392_s0] sm:$0xff]  ;;  %v1091_v34 = vld [vmem:[%s1391_s1 + $0x138] sm:$0xff] }
   0xa   :  { %632 = vmatpush.bf16.msra.mxu0 %v1057_v8  ;;  %v1069_v25 = vld [vmem:[%s1391_s1 + $0x88] sm:$0xff]  ;;  %v1052_v30 = vld [vmem:[%s1391_s1] sm:$0xff]  ;;  %v171_v33 = vunpack.c.l.b16 %v17_v29  ;;  %v1107_v35 = vld [vmem:[%s1391_s1 + $0x1b8] sm:$0xff]  ;;  %v172_v39 = vunpack.c.h.b16 %v17_v29 }
   0xb   :  { %658 = vmatpush.bf16.msra.mxu2 %v1073_v9  ;;  %v1077_v26 = vld [vmem:[%s1391_s1 + $0xc8] sm:$0xff]  ;;  %v1068_v31 = vld [vmem:[%s1391_s1 + $0x80] sm:$0xff]  ;;  %v1115_v40 = vld [vmem:[%s1391_s1 + $0x1f8] sm:$0xff] }
   0xc   :  { %671 = vmatpush.bf16.msra.mxu3 %v1081_v10  ;;  %v1061_v27 = vld [vmem:[%s1391_s1 + $0x48] sm:$0xff]  ;;  %v1076_v36 = vld [vmem:[%s1391_s1 + $0xc0] sm:$0xff]  ;;  %v1099_v41 = vld [vmem:[%s1391_s1 + $0x178] sm:$0xff]  ;;  %v180_v43 = vpack.c.b16 %v171_v33, %v171_v33  ;;  %v181_v47 = vpack.c.b16 %v172_v39, %v172_v39 }
   0xd   :  { %645 = vmatpush.bf16.msra.mxu1 %v1065_v11  ;;  %v18_v28 = vld [vmem:[%s1392_s0 + $0x8] sm:$0xff]  ;;  %v1060_v37 = vld [vmem:[%s1391_s1 + $0x40] sm:$0xff]  ;;  %v1090_v44 = vld [vmem:[%s1391_s1 + $0x130] sm:$0xff] }
   0xe   :  { %633 = vmatpush.bf16.msra.mxu0 %v1056_v12  ;;  %v173_v32 = vunpack.c.l.b16 %v18_v28  ;;  %v174_v38 = vunpack.c.h.b16 %v18_v28  ;;  %v1106_v45 = vld [vmem:[%s1391_s1 + $0x1b0] sm:$0xff]  ;;  %v1089_v50 = vld [vmem:[%s1391_s1 + $0x128] sm:$0xff]  ;;  %v1088_v54 = vld [vmem:[%s1391_s1 + $0x120] sm:$0xff] }
   0xf   :  { %659 = vmatpush.bf16.msra.mxu2 %v1072_v13  ;;  %v1114_v48 = vld [vmem:[%s1391_s1 + $0x1f0] sm:$0xff]  ;;  %v1105_v51 = vld [vmem:[%s1391_s1 + $0x1a8] sm:$0xff]  ;;  %v1104_v55 = vld [vmem:[%s1391_s1 + $0x1a0] sm:$0xff] }
  0x10   :  { %672 = vmatpush.bf16.msra.mxu3 %v1080_v14  ;;  %v182_v42 = vpack.c.b16 %v173_v32, %v173_v32  ;;  %v183_v46 = vpack.c.b16 %v174_v38, %v174_v38  ;;  %v1098_v49 = vld [vmem:[%s1391_s1 + $0x170] sm:$0xff]  ;;  %v1113_v52 = vld [vmem:[%s1391_s1 + $0x1e8] sm:$0xff]  ;;  %v1112_v56 = vld [vmem:[%s1391_s1 + $0x1e0] sm:$0xff] }
  0x11   :  { %646 = vmatpush.bf16.msra.mxu1 %v1064_v15  ;;  %v1097_v53 = vld [vmem:[%s1391_s1 + $0x168] sm:$0xff]  ;;  %v1096_v57 = vld [vmem:[%s1391_s1 + $0x160] sm:$0xff]  ;;  %v1087_v58 = vld [vmem:[%s1391_s1 + $0x118] sm:$0xff] }
  0x12   :  { %634 = vmatpush.bf16.msra.mxu0 %v1055_v16  ;;  %v1103_v59 = vld [vmem:[%s1391_s1 + $0x198] sm:$0xff]  ;;  %v1086_v62 = vld [vmem:[%s1391_s1 + $0x110] sm:$0xff]  ;;  %v1085_v2 = vld [vmem:[%s1391_s1 + $0x108] sm:$0xff] }
  0x13   :  { %660 = vmatpush.bf16.msra.mxu2 %v1071_v17  ;;  %v1111_v60 = vld [vmem:[%s1391_s1 + $0x1d8] sm:$0xff]  ;;  %v1102_v63 = vld [vmem:[%s1391_s1 + $0x190] sm:$0xff]  ;;  %v1101_v3 = vld [vmem:[%s1391_s1 + $0x188] sm:$0xff] }
  0x14   :  { %673 = vmatpush.bf16.msra.mxu3 %v1079_v18  ;;  %v1095_v61 = vld [vmem:[%s1391_s1 + $0x158] sm:$0xff]  ;;  %v1110_v0 = vld [vmem:[%s1391_s1 + $0x1d0] sm:$0xff]  ;;  %v1109_v6 = vld [vmem:[%s1391_s1 + $0x1c8] sm:$0xff] }
  0x15   :  { %647 = vmatpush.bf16.msra.mxu1 %v1063_v19  ;;  %v1094_v1 = vld [vmem:[%s1391_s1 + $0x150] sm:$0xff]  ;;  %v20_v4 = vld [vmem:[%s1392_s0 + $0x18] sm:$0xff]  ;;  %v1093_v7 = vld [vmem:[%s1391_s1 + $0x148] sm:$0xff] }
  0x16   :  { %635 = vmatpush.bf16.msra.mxu0 %v1054_v20  ;;  %v19_v5 = vld [vmem:[%s1392_s0 + $0x10] sm:$0xff]  ;;  %v177_v8 = vunpack.c.l.b16 %v20_v4  ;;  %v1084_v10 = vld [vmem:[%s1391_s1 + $0x100] sm:$0xff]  ;;  %v1123_v12 = vld [vmem:[%s1391_s1 + $0x238] sm:$0xff]  ;;  %v178_v13 = vunpack.c.h.b16 %v20_v4 }
  0x17   :  { %661 = vmatpush.bf16.msra.mxu2 %v1070_v21  ;;  %v175_v9 = vunpack.c.l.b16 %v19_v5  ;;  %v1100_v11 = vld [vmem:[%s1391_s1 + $0x180] sm:$0xff]  ;;  %v176_v16 = vunpack.c.h.b16 %v19_v5  ;;  %v1122_v19 = vld [vmem:[%s1391_s1 + $0x230] sm:$0xff] }
  0x18   :  { %674 = vmatpush.bf16.msra.mxu3 %v1078_v22  ;;  %v1108_v14 = vld [vmem:[%s1391_s1 + $0x1c0] sm:$0xff]  ;;  %v186_v17 = vpack.c.b16 %v177_v8, %v177_v8  ;;  %v187_v20 = vpack.c.b16 %v178_v13, %v178_v13  ;;  %v1121_v22 = vld [vmem:[%s1391_s1 + $0x228] sm:$0xff] }
  0x19   :  { %648 = vmatpush.bf16.msra.mxu1 %v1062_v23  ;;  %v1092_v15 = vld [vmem:[%s1391_s1 + $0x140] sm:$0xff]  ;;  %v184_v18 = vpack.c.b16 %v175_v9, %v175_v9  ;;  %v185_v21 = vpack.c.b16 %v176_v16, %v176_v16 }
  0x1a   :  { %636 = vmatpush.bf16.msra.mxu0 %v1053_v24  ;;  %v1120_v23 = vld [vmem:[%s1391_s1 + $0x220] sm:$0xff]  ;;  %v1119_v24 = vld [vmem:[%s1391_s1 + $0x218] sm:$0xff] }
  0x1b   :  { %662 = vmatpush.bf16.msra.mxu2 %v1069_v25  ;;  %v1118_v25 = vld [vmem:[%s1391_s1 + $0x210] sm:$0xff]  ;;  %v1116_v29 = vld [vmem:[%s1391_s1 + $0x200] sm:$0xff] }
  0x1c   :  { %675 = vmatpush.bf16.msra.mxu3 %v1077_v26  ;;  %v1117_v26 = vld [vmem:[%s1391_s1 + $0x208] sm:$0xff] }
  0x1d   :  { %649 = vmatpush.bf16.msra.mxu1 %v1061_v27  ;;  %v21_v27 = vld [vmem:[%s1392_s0 + $0x20] sm:$0xf] }
  0x1e   :  { %637 = vmatpush.bf16.msra.mxu0 %v1052_v30  ;;  %v179_v28 = vunpack.c.l.b16 %v21_v27 }
  0x1f   :  { %663 = vmatpush.bf16.msra.mxu2 %v1068_v31 }
  0x20   :  { %676 = vmatpush.bf16.msra.mxu3 %v1076_v36  ;;  %v188_v30 = vpack.c.b16 %v179_v28, %v179_v28 }
  0x21   :  { %650 = vmatpush.bf16.msra.mxu1 %v1060_v37  ;;  %638 = vmatmul.bf16.vlgmr.msra.gmra.mxu0 %v180_v43 }
  0x22   :  { %682 = vmatpush.bf16.msrb.mxu0 %v1091_v34  ;;  %664 = vmatmul.bf16.vlgmr.msra.gmra.mxu2 %v182_v42 }
  0x23   :  { %708 = vmatpush.bf16.msrb.mxu2 %v1107_v35  ;;  %677 = vmatmul.bf16.vlgmr.msra.gmra.mxu3 %v183_v46 }
  0x24   :  { %721 = vmatpush.bf16.msrb.mxu3 %v1115_v40  ;;  %651 = vmatmul.bf16.vlgmr.msra.gmra.mxu1 %v181_v47 }
  0x25   :  { %695 = vmatpush.bf16.msrb.mxu1 %v1099_v41 }
  0x26   :  { %683 = vmatpush.bf16.msrb.mxu0 %v1090_v44 }
  0x27   :  { %709 = vmatpush.bf16.msrb.mxu2 %v1106_v45 }
  0x28   :  { %722 = vmatpush.bf16.msrb.mxu3 %v1114_v48 }
  0x29   :  { %696 = vmatpush.bf16.msrb.mxu1 %v1098_v49 }
  0x2a   :  { %684 = vmatpush.bf16.msrb.mxu0 %v1089_v50 }
  0x2b   :  { %710 = vmatpush.bf16.msrb.mxu2 %v1105_v51 }
  0x2c   :  { %723 = vmatpush.bf16.msrb.mxu3 %v1113_v52 }
  0x2d   :  { %697 = vmatpush.bf16.msrb.mxu1 %v1097_v53 }
  0x2e   :  { %685 = vmatpush.bf16.msrb.mxu0 %v1088_v54  ;;  %v1124_v54 = vld [vmem:[%s1393_s2] ss:$0 sm:$0xff] }
  0x2f   :  { %711 = vmatpush.bf16.msrb.mxu2 %v1104_v55 }
  0x30   :  { %724 = vmatpush.bf16.msrb.mxu3 %v1112_v56 }
  0x31   :  { %698 = vmatpush.bf16.msrb.mxu1 %v1096_v57  ;;  %v1125_v57 = vld [vmem:[%s1394_s3] ss:$0 sm:$0xff] }
  0x32   :  { %686 = vmatpush.bf16.msrb.mxu0 %v1087_v58 }
  0x33   :  { %712 = vmatpush.bf16.msrb.mxu2 %v1103_v59 }
  0x34   :  { %725 = vmatpush.bf16.msrb.mxu3 %v1111_v60 }
  0x35   :  { %699 = vmatpush.bf16.msrb.mxu1 %v1095_v61 }
  0x36   :  { %687 = vmatpush.bf16.msrb.mxu0 %v1086_v62 }
  0x37   :  { %713 = vmatpush.bf16.msrb.mxu2 %v1102_v63 }
  0x38   :  { %726 = vmatpush.bf16.msrb.mxu3 %v1110_v0 }
  0x39   :  { %700 = vmatpush.bf16.msrb.mxu1 %v1094_v1 }
  0x3a   :  { %688 = vmatpush.bf16.msrb.mxu0 %v1085_v2 }
  0x3b   :  { %714 = vmatpush.bf16.msrb.mxu2 %v1101_v3 }
  0x3c   :  { %727 = vmatpush.bf16.msrb.mxu3 %v1109_v6 }
  0x3d   :  { %701 = vmatpush.bf16.msrb.mxu1 %v1093_v7 }
  0x3e   :  { %689 = vmatpush.bf16.msrb.mxu0 %v1084_v10 }
  0x3f   :  { %715 = vmatpush.bf16.msrb.mxu2 %v1100_v11 }
  0x40   :  { %728 = vmatpush.bf16.msrb.mxu3 %v1108_v14 }
  0x41   :  { %702 = vmatpush.bf16.msrb.mxu1 %v1092_v15  ;;  %690 = vmatmul.bf16.vlgmr.msrb.gmra.mxu0 %v184_v18 }
  0x42   :  { %734 = vmatpush.bf16.msra.mxu0 %v1123_v12  ;;  %716 = vmatmul.bf16.vlgmr.msrb.gmra.mxu2 %v186_v17 }
  0x43   :  { %729 = vmatmul.bf16.vlgmr.msrb.gmra.mxu3 %v187_v20 }
  0x44   :  { %703 = vmatmul.bf16.vlgmr.msrb.gmra.mxu1 %v185_v21 }
  0x46   :  { %735 = vmatpush.bf16.msra.mxu0 %v1122_v19 }
  0x4a   :  { %736 = vmatpush.bf16.msra.mxu0 %v1121_v22 }
  0x4e   :  { %737 = vmatpush.bf16.msra.mxu0 %v1120_v23 }
  0x52   :  { %738 = vmatpush.bf16.msra.mxu0 %v1119_v24 }
  0x56   :  { %739 = vmatpush.bf16.msra.mxu0 %v1118_v25 }
  0x5a   :  { %740 = vmatpush.bf16.msra.mxu0 %v1117_v26 }
  0x5e   :  { %741 = vmatpush.bf16.msra.mxu0 %v1116_v29 }
  0x61   :  { %742 = vmatmul.bf16.vlgmr.msra.gmra.mxu0 %v188_v30 }
  0x9e   :  { %v639_v31 = vpop.f32.mrf.mxu0 }
  0xa1   :  { %v652_v32 = vpop.f32.mrf.mxu1 }
  0xa2   :  { %v653_v41 = vadd.f32 %v652_v32, %v639_v31 }
  0xa5   :  { %v665_v33 = vpop.f32.mrf.mxu2 }
  0xa6   :  { %v678_v34 = vpop.f32.mrf.mxu3  ;;  %v641_v35 = vpop.f32.mrf.mxu0  ;;  %v666_v43 = vadd.f32 %v665_v33, %v653_v41 }
  0xa8   :  { %v679_v47 = vadd.f32 %v678_v34, %v666_v43 }
  0xa9   :  { %v654_v36 = vpop.f32.mrf.mxu1 }
  0xad   :  { %v667_v37 = vpop.f32.mrf.mxu2 }
  0xae   :  { %v680_v38 = vpop.f32.mrf.mxu3 }
  0xbe   :  { %v691_v39 = vpop.f32.mrf.mxu0 }
  0xbf   :  { %v692_v49 = vadd.f32 %v691_v39, %v679_v47 }
  0xc1   :  { %v704_v40 = vpop.f32.mrf.mxu1 }
  0xc2   :  { %v705_v51 = vadd.f32 %v704_v40, %v692_v49 }
  0xc5   :  { %v717_v42 = vpop.f32.mrf.mxu2 }
  0xc6   :  { %v730_v44 = vpop.f32.mrf.mxu3  ;;  %v693_v45 = vpop.f32.mrf.mxu0  ;;  %v718_v52 = vadd.f32 %v717_v42, %v705_v51 }
  0xc8   :  { %v731_v53 = vadd.f32 %v730_v44, %v718_v52 }
  0xc9   :  { %v706_v46 = vpop.f32.mrf.mxu1 }
  0xcd   :  { %v719_v48 = vpop.f32.mrf.mxu2 }
  0xce   :  { %v732_v50 = vpop.f32.mrf.mxu3 }
  0xde   :  { %v743_v55 = vpop.f32.mrf.mxu0 }
  0xdf   :  { %v744_v56 = vadd.f32 %v743_v55, %v731_v53 }
  0xe1   :  { %v751_v58 = vmul.f32 %v1124_v54, %v744_v56 }
  0xe3   :  { %v756_v59 = vadd.f32 %v1125_v57, %v751_v58 }
  0xe5   :  { %v757_v60 = vmax.f32 %v756_v59, 0.0 }
  0xe6   :  { %v745_v61 = vpop.f32.mrf.mxu0 }
  0xe7   :  { %v758_v62 = vpack.c.bf16 %v757_v60, %v757_v60 }
  0xe9   :  { %759 = vst [vmem:[%s1395_s4] sm:$0xf] %v758_v62 }

// kernel: _lambda_.38
= control target key start
LH: loop header
LB: loop body
LE: loop exit
PB: predicated region body
PF: predicated region fallthrough
CT: control target
= control target key end

     0   :  { %s732_s15 = smov 0   ;;  %s734_s16 = smov 0   ;;  %s825_s0 = inlined_call_operand.vmem [shape: bf16[8,128], index: 0, kind: input, shape index: {}]   ;;  %s826_s1 = inlined_call_operand.vmem [shape: bf16[128,256], index: 1, kind: input, shape index: {}]   ;;  %s827_s2 = inlined_call_operand.vmem [shape: f32[1,256], index: 2, kind: input, shape index: {}]   ;;  %s828_s3 = inlined_call_operand.vmem [shape: f32[1,256], index: 3, kind: input, shape index: {}]   ;;  %s829_s4 = inlined_call_operand.vmem [shape: bf16[8,256], index: 4, kind: output, shape index: {}]  }
   0x1   :  { %s736_s17 = smov 0   ;;  %s738_s18 = smov 0  }
   0x2   :  { %s740_s19 = smov 0  }
   0x3 LB: > { %s23_s20 = sadd.s32 1, %s701_s18  ;;  %p66_p1 = scmp.ne.s32.totalorder %s693_s16, %s689_s15  ;;  %s705_s19 = sphi %s740_s19, %s14_s19   ;;  %s701_s18 = sphi %s738_s18, %s833_s18   ;;  %s697_s17 = sphi %s736_s17, %s832_s17   ;;  %s693_s16 = sphi %s734_s16, %s831_s16   ;;  %s689_s15 = sphi %s732_s15, %s830_s15  }
   0x4   : > { %p24_p0 = scmp.ge.s32.totalorder %s23_s20, 2  ;;  %p67_p2 = scmp.eq.s32.totalorder %s705_s19, 0 }
   0x5   : > { %s59_s22 = sadd.s32 1, %s693_s16  ;;  %p577_p5 = scmp.ge.s32.totalorder %s705_s19, 2 }
   0x6   : > { %s835_s20 = smov (%p24_p0, %s23_s20), 0  ;;  %p68_p3 = por %p67_p2, %p66_p1 }
   0x7   : > { %s56_s21 = ssub.s32 %s701_s18, %s835_s20  ;;  %179 = sbr.rel (%p577_p5) target bundleno = 32 (0x20), region = 20 }
   0x8   : > { %p57_p4 = scmp.eq.s32.totalorder %s56_s21, 0 }
   0xa   : > { %s767_s23 = scalar_select %p57_p4, %s693_s16, %s59_s22  }
   0xc   : > { %182 = sbr.rel (!%p68_p3) target bundleno = 32 (0x20), region = 24  ;;  %s184_s24 = sand.u32 (%p68_p3), 1, %s693_s16  }
   0xd   : > { %s579_s25 = sshll.u32 (%p68_p3), %s701_s18, 2  ;;  %s578_s26 = sshll.u32 (%p68_p3), %s184_s24, 6 }
   0xe   : > { %s775_s29 = scalar_lea.vmem (%p68_p3), %s826_s1, %s579_s25  ;;  %s186_s30 = scalar_lea.vmem (%p68_p3), [#allocation2], %s578_s26 }
   0xf   : > { %v205_v0 = vld [vmem:[%s775_s29] sm:$0xf] (%p68_p3)  ;;  %v207_v1 = vld [vmem:[%s775_s29 + $0x8] sm:$0xf] (%p68_p3)  ;;  %v209_v2 = vld [vmem:[%s775_s29 + $0x10] sm:$0xf] (%p68_p3) }
  0x10   : > { %206 = vst [vmem:[%s186_s30] sm:$0xf] (%p68_p3), %v205_v0  ;;  %v211_v3 = vld [vmem:[%s775_s29 + $0x18] sm:$0xf] (%p68_p3)  ;;  %v213_v4 = vld [vmem:[%s775_s29 + $0x20] sm:$0xf] (%p68_p3) }
  0x11   : > { %208 = vst [vmem:[%s186_s30 + $0x4] sm:$0xf] %v207_v1  ;;  %v215_v5 = vld [vmem:[%s775_s29 + $0x28] sm:$0xf]  ;;  %v217_v6 = vld [vmem:[%s775_s29 + $0x30] sm:$0xf] }
  0x12   : > { %210 = vst [vmem:[%s186_s30 + $0x8] sm:$0xf] %v209_v2  ;;  %v219_v7 = vld [vmem:[%s775_s29 + $0x38] sm:$0xf]  ;;  %v221_v8 = vld [vmem:[%s775_s29 + $0x40] sm:$0xf] }
  0x13   : > { %212 = vst [vmem:[%s186_s30 + $0xc] sm:$0xf] %v211_v3  ;;  %v223_v9 = vld [vmem:[%s775_s29 + $0x48] sm:$0xf]  ;;  %v225_v10 = vld [vmem:[%s775_s29 + $0x50] sm:$0xf] }
  0x14   : > { %214 = vst [vmem:[%s186_s30 + $0x10] sm:$0xf] %v213_v4  ;;  %v227_v11 = vld [vmem:[%s775_s29 + $0x58] sm:$0xf]  ;;  %v229_v12 = vld [vmem:[%s775_s29 + $0x60] sm:$0xf] }
  0x15   : > { %216 = vst [vmem:[%s186_s30 + $0x14] sm:$0xf] %v215_v5  ;;  %v231_v13 = vld [vmem:[%s775_s29 + $0x68] sm:$0xf]  ;;  %v233_v14 = vld [vmem:[%s775_s29 + $0x70] sm:$0xf] }
  0x16   : > { %218 = vst [vmem:[%s186_s30 + $0x18] sm:$0xf] %v217_v6  ;;  %v235_v15 = vld [vmem:[%s775_s29 + $0x78] sm:$0xf] }
  0x17   : > { %220 = vst [vmem:[%s186_s30 + $0x1c] sm:$0xf] %v219_v7 }
  0x18   : > { %222 = vst [vmem:[%s186_s30 + $0x20] sm:$0xf] %v221_v8 }
  0x19   : > { %224 = vst [vmem:[%s186_s30 + $0x24] sm:$0xf] %v223_v9 }
  0x1a   : > { %226 = vst [vmem:[%s186_s30 + $0x28] sm:$0xf] %v225_v10 }
  0x1b   : > { %228 = vst [vmem:[%s186_s30 + $0x2c] sm:$0xf] %v227_v11 }
  0x1c   : > { %230 = vst [vmem:[%s186_s30 + $0x30] sm:$0xf] %v229_v12 }
  0x1d   : > { %232 = vst [vmem:[%s186_s30 + $0x34] sm:$0xf] %v231_v13 }
  0x1e   : > { %234 = vst [vmem:[%s186_s30 + $0x38] sm:$0xf] %v233_v14 }
  0x1f   : > { %236 = vst [vmem:[%s186_s30 + $0x3c] sm:$0xf] %v235_v15 }
  0x20 PF: > { %p580_p6 = scmp.ge.s32.totalorder %s705_s19, 1  ;;  %p303_p7 = scmp.lt.s32.totalorder %s705_s19, 3 }
  0x22   : > { %p304_p8 = pnand %p580_p6, %p303_p7 }
  0x23   : > { %s310_s5 = sand.u32 (!%p304_p8), 1, %s689_s15   ;;  %p352_p9 = scmp.lt.s32.totalorder (!%p304_p8), %s697_s17, 1 }
  0x24   : > { %307 = sbr.rel (%p304_p8) target bundleno = 207 (0xcf), region = 73  ;;  %s581_s6 = sshll.u32 (!%p304_p8), %s310_s5, 6 }
  0x25   : > { %s312_s7 = scalar_lea.vmem (!%p304_p8), [#allocation2], %s581_s6 }
  0x29   : > { %v624_v16 = vld [vmem:[%s312_s7 + $0x38] sm:$0xff]  ;;  %s837_s17 = smov (!%p352_p9, %s697_s17), 1  ;;  %v623_v17 = vld [vmem:[%s312_s7 + $0x30] sm:$0xff]  ;;  %v622_v18 = vld [vmem:[%s312_s7 + $0x28] sm:$0xff] }
  0x2a   : > { %431 = vmatpush.bf16.msra.mxu0 %v624_v16  ;;  %s354_s10 = scalar_lea.vmem %s827_s2, %s837_s17  ;;  %s357_s13 = scalar_lea.vmem %s828_s3, %s837_s17  ;;  %v621_v19 = vld [vmem:[%s312_s7 + $0x20] sm:$0xff]  ;;  %v620_v20 = vld [vmem:[%s312_s7 + $0x18] sm:$0xff]  ;;  %v619_v21 = vld [vmem:[%s312_s7 + $0x10] sm:$0xff] }
  0x2b   : > { %v618_v22 = vld [vmem:[%s312_s7 + $0x8] sm:$0xff]  ;;  %v617_v23 = vld [vmem:[%s312_s7] sm:$0xff]  ;;  %s582_s21 = sshll.u32 %s837_s17, 2 }
  0x2c   : > { %v366_v24 = vld [vmem:[%s825_s0] sm:$0xf]  ;;  %s365_s25 = scalar_lea.vmem %s829_s4, %s582_s21 }
  0x2d   : > { %v665_v25 = vld [vmem:[%s354_s10] ss:$0 sm:$0xff] }
  0x2e   : > { %432 = vmatpush.bf16.msra.mxu0 %v623_v17  ;;  %v666_v26 = vld [vmem:[%s357_s13] ss:$0 sm:$0xff] }
  0x32   : > { %433 = vmatpush.bf16.msra.mxu0 %v622_v18 }
  0x36   : > { %434 = vmatpush.bf16.msra.mxu0 %v621_v19 }
  0x3a   : > { %435 = vmatpush.bf16.msra.mxu0 %v620_v20 }
  0x3e   : > { %436 = vmatpush.bf16.msra.mxu0 %v619_v21 }
  0x42   : > { %437 = vmatpush.bf16.msra.mxu0 %v618_v22 }
  0x46   : > { %438 = vmatpush.bf16.msra.mxu0 %v617_v23 }
  0x49   : > { %439 = vmatmul.bf16.vlgmr.msra.gmra.mxu0 %v366_v24 }
  0xc6   : > { %v440_v27 = vpop.f32.mrf.mxu0 }
  0xc7   : > { %v448_v28 = vmul.f32 %v665_v25, %v440_v27 }
  0xc9   : > { %v453_v29 = vadd.f32 %v666_v26, %v448_v28 }
  0xcb   : > { %v454_v30 = vpack.c.bf16 %v453_v29, %v453_v29 }
  0xcd   : > { %455 = vst [vmem:[%s365_s25] sm:$0xf] %v454_v30 }
  0xce   : > { %v442_v31 = vpop.f32.mrf.mxu0 }
  0xcf PF: > { %s14_s19 = sadd.s32 1, %s705_s19   ;;  %s830_s15 = smov %s693_s16 }
  0xd0   : > { %p11_p10 = scmp.ge.s32.totalorder %s14_s19, 4   ;;  %s831_s16 = smov %s767_s23 }
  0xd1   : > { %s832_s17 = smov %s701_s18  ;;  %s833_s18 = smov %s835_s20 }
  0xd2   :  { %13 = sbr.rel (!%p11_p10) target bundleno = 3 (0x3), region = 121 }

// kernel: _lambda_.39
= control target key start
LH: loop header
LB: loop body
LE: loop exit
PB: predicated region body
PF: predicated region fallthrough
CT: control target
= control target key end

     0   :  { %s818_s18 = smov 0   ;;  %s820_s19 = smov 0   ;;  %s919_s0 = inlined_call_operand.vmem [shape: bf16[8,128], index: 0, kind: input, shape index: {}]   ;;  %s920_s1 = inlined_call_operand.vmem [shape: bf16[128,256], index: 1, kind: input, shape index: {}]   ;;  %s921_s2 = inlined_call_operand.vmem [shape: f32[1,256], index: 2, kind: input, shape index: {}]   ;;  %s922_s3 = inlined_call_operand.vmem [shape: f32[1,256], index: 3, kind: input, shape index: {}]   ;;  %s923_s4 = inlined_call_operand.vmem [shape: bf16[8,256], index: 4, kind: input, shape index: {}]   ;;  %s924_s5 = inlined_call_operand.vmem [shape: bf16[8,256], index: 5, kind: output, shape index: {}]  }
   0x1   :  { %s822_s20 = smov 0   ;;  %s824_s21 = smov 0  }
   0x2   :  { %s826_s22 = smov 0  }
   0x3 LB: > { %s24_s23 = sadd.s32 1, %s782_s21  ;;  %p67_p1 = scmp.ne.s32.totalorder %s774_s19, %s770_s18  ;;  %s786_s22 = sphi %s826_s22, %s15_s22   ;;  %s782_s21 = sphi %s824_s21, %s928_s21   ;;  %s778_s20 = sphi %s822_s20, %s927_s20   ;;  %s774_s19 = sphi %s820_s19, %s926_s19   ;;  %s770_s18 = sphi %s818_s18, %s925_s18  }
   0x4   : > { %p25_p0 = scmp.ge.s32.totalorder %s24_s23, 2  ;;  %p68_p2 = scmp.eq.s32.totalorder %s786_s22, 0 }
   0x5   : > { %s60_s25 = sadd.s32 1, %s774_s19  ;;  %p657_p5 = scmp.ge.s32.totalorder %s786_s22, 2 }
   0x6   : > { %s930_s23 = smov (%p25_p0, %s24_s23), 0  ;;  %p69_p3 = por %p68_p2, %p67_p1 }
   0x7   : > { %s57_s24 = ssub.s32 %s782_s21, %s930_s23  ;;  %208 = sbr.rel (%p657_p5) target bundleno = 32 (0x20), region = 20 }
   0x8   : > { %p58_p4 = scmp.eq.s32.totalorder %s57_s24, 0 }
   0xa   : > { %s853_s26 = scalar_select %p58_p4, %s774_s19, %s60_s25  }
   0xc   : > { %211 = sbr.rel (!%p69_p3) target bundleno = 32 (0x20), region = 24  ;;  %s213_s27 = sand.u32 (%p69_p3), 1, %s774_s19  }
   0xd   : > { %s659_s28 = sshll.u32 (%p69_p3), %s782_s21, 2  ;;  %s658_s29 = sshll.u32 (%p69_p3), %s213_s27, 6 }
   0xe   : > { %s861_s7 = scalar_lea.vmem (%p69_p3), %s920_s1, %s659_s28  ;;  %s215_s8 = scalar_lea.vmem (%p69_p3), [#allocation2], %s658_s29 }
   0xf   : > { %v234_v0 = vld [vmem:[%s861_s7] sm:$0xf] (%p69_p3)  ;;  %v236_v1 = vld [vmem:[%s861_s7 + $0x8] sm:$0xf] (%p69_p3)  ;;  %v238_v2 = vld [vmem:[%s861_s7 + $0x10] sm:$0xf] (%p69_p3) }
  0x10   : > { %235 = vst [vmem:[%s215_s8] sm:$0xf] (%p69_p3), %v234_v0  ;;  %v240_v3 = vld [vmem:[%s861_s7 + $0x18] sm:$0xf] (%p69_p3)  ;;  %v242_v4 = vld [vmem:[%s861_s7 + $0x20] sm:$0xf] (%p69_p3) }
  0x11   : > { %237 = vst [vmem:[%s215_s8 + $0x4] sm:$0xf] %v236_v1  ;;  %v244_v5 = vld [vmem:[%s861_s7 + $0x28] sm:$0xf]  ;;  %v246_v6 = vld [vmem:[%s861_s7 + $0x30] sm:$0xf] }
  0x12   : > { %239 = vst [vmem:[%s215_s8 + $0x8] sm:$0xf] %v238_v2  ;;  %v248_v7 = vld [vmem:[%s861_s7 + $0x38] sm:$0xf]  ;;  %v250_v8 = vld [vmem:[%s861_s7 + $0x40] sm:$0xf] }
  0x13   : > { %241 = vst [vmem:[%s215_s8 + $0xc] sm:$0xf] %v240_v3  ;;  %v252_v9 = vld [vmem:[%s861_s7 + $0x48] sm:$0xf]  ;;  %v254_v10 = vld [vmem:[%s861_s7 + $0x50] sm:$0xf] }
  0x14   : > { %243 = vst [vmem:[%s215_s8 + $0x10] sm:$0xf] %v242_v4  ;;  %v256_v11 = vld [vmem:[%s861_s7 + $0x58] sm:$0xf]  ;;  %v258_v12 = vld [vmem:[%s861_s7 + $0x60] sm:$0xf] }
  0x15   : > { %245 = vst [vmem:[%s215_s8 + $0x14] sm:$0xf] %v244_v5  ;;  %v260_v13 = vld [vmem:[%s861_s7 + $0x68] sm:$0xf]  ;;  %v262_v14 = vld [vmem:[%s861_s7 + $0x70] sm:$0xf] }
  0x16   : > { %247 = vst [vmem:[%s215_s8 + $0x18] sm:$0xf] %v246_v6  ;;  %v264_v15 = vld [vmem:[%s861_s7 + $0x78] sm:$0xf] }
  0x17   : > { %249 = vst [vmem:[%s215_s8 + $0x1c] sm:$0xf] %v248_v7 }
  0x18   : > { %251 = vst [vmem:[%s215_s8 + $0x20] sm:$0xf] %v250_v8 }
  0x19   : > { %253 = vst [vmem:[%s215_s8 + $0x24] sm:$0xf] %v252_v9 }
  0x1a   : > { %255 = vst [vmem:[%s215_s8 + $0x28] sm:$0xf] %v254_v10 }
  0x1b   : > { %257 = vst [vmem:[%s215_s8 + $0x2c] sm:$0xf] %v256_v11 }
  0x1c   : > { %259 = vst [vmem:[%s215_s8 + $0x30] sm:$0xf] %v258_v12 }
  0x1d   : > { %261 = vst [vmem:[%s215_s8 + $0x34] sm:$0xf] %v260_v13 }
  0x1e   : > { %263 = vst [vmem:[%s215_s8 + $0x38] sm:$0xf] %v262_v14 }
  0x1f   : > { %265 = vst [vmem:[%s215_s8 + $0x3c] sm:$0xf] %v264_v15 }
  0x20 PF: > { %p660_p6 = scmp.ge.s32.totalorder %s786_s22, 1  ;;  %p343_p7 = scmp.lt.s32.totalorder %s786_s22, 3 }
  0x22   : > { %p344_p8 = pnand %p660_p6, %p343_p7 }
  0x23   : > { %s350_s9 = sand.u32 (!%p344_p8), 1, %s770_s18   ;;  %p402_p9 = scmp.lt.s32.totalorder (!%p344_p8), %s778_s20, 1 }
  0x24   : > { %347 = sbr.rel (%p344_p8) target bundleno = 210 (0xd2), region = 77  ;;  %s661_s10 = sshll.u32 (!%p344_p8), %s350_s9, 6 }
  0x25   : > { %s352_s11 = scalar_lea.vmem (!%p344_p8), [#allocation2], %s661_s10 }
  0x29   : > { %v705_v16 = vld [vmem:[%s352_s11 + $0x38] sm:$0xff]  ;;  %s932_s20 = smov (!%p402_p9, %s778_s20), 1  ;;  %v704_v17 = vld [vmem:[%s352_s11 + $0x30] sm:$0xff]  ;;  %v703_v18 = vld [vmem:[%s352_s11 + $0x28] sm:$0xff] }
  0x2a   : > { %489 = vmatpush.bf16.msra.mxu0 %v705_v16  ;;  %s404_s14 = scalar_lea.vmem %s921_s2, %s932_s20  ;;  %s407_s17 = scalar_lea.vmem %s922_s3, %s932_s20  ;;  %v702_v19 = vld [vmem:[%s352_s11 + $0x20] sm:$0xff]  ;;  %v701_v20 = vld [vmem:[%s352_s11 + $0x18] sm:$0xff]  ;;  %v700_v21 = vld [vmem:[%s352_s11 + $0x10] sm:$0xff] }
  0x2b   : > { %v699_v22 = vld [vmem:[%s352_s11 + $0x8] sm:$0xff]  ;;  %v698_v23 = vld [vmem:[%s352_s11] sm:$0xff]  ;;  %s662_s25 = sshll.u32 %s932_s20, 2 }
  0x2c   : > { %v424_v24 = vld [vmem:[%s919_s0] sm:$0xf]  ;;  %s415_s29 = scalar_lea.vmem %s923_s4, %s662_s25  ;;  %s423_s7 = scalar_lea.vmem %s924_s5, %s662_s25 }
  0x2d   : > { %v746_v25 = vld [vmem:[%s404_s14] ss:$0 sm:$0xff] }
  0x2e   : > { %490 = vmatpush.bf16.msra.mxu0 %v704_v17  ;;  %v512_v26 = vld [vmem:[%s415_s29] sm:$0xf] }
  0x2f   : > { %v747_v27 = vld [vmem:[%s407_s17] ss:$0 sm:$0xff]  ;;  %v513_v30 = vunpack.c.l.bf16 %v512_v26 }
  0x32   : > { %491 = vmatpush.bf16.msra.mxu0 %v703_v18 }
  0x36   : > { %492 = vmatpush.bf16.msra.mxu0 %v702_v19 }
  0x3a   : > { %493 = vmatpush.bf16.msra.mxu0 %v701_v20 }
  0x3e   : > { %494 = vmatpush.bf16.msra.mxu0 %v700_v21 }
  0x42   : > { %495 = vmatpush.bf16.msra.mxu0 %v699_v22 }
  0x46   : > { %496 = vmatpush.bf16.msra.mxu0 %v698_v23 }
  0x49   : > { %497 = vmatmul.bf16.vlgmr.msra.gmra.mxu0 %v424_v24 }
  0xc6   : > { %v498_v28 = vpop.f32.mrf.mxu0 }
  0xc7   : > { %v506_v29 = vmul.f32 %v746_v25, %v498_v28 }
  0xc9   : > { %v511_v31 = vadd.f32 %v747_v27, %v506_v29 }
  0xcb   : > { %v514_v32 = vadd.f32 %v513_v30, %v511_v31 }
  0xcd   : > { %v515_v33 = vmax.f32 %v514_v32, 0.0 }
  0xce   : > { %v500_v34 = vpop.f32.mrf.mxu0 }
  0xcf   : > { %v516_v35 = vpack.c.bf16 %v515_v33, %v515_v33 }
  0xd1   : > { %517 = vst [vmem:[%s423_s7] sm:$0xf] %v516_v35 }
  0xd2 PF: > { %s15_s22 = sadd.s32 1, %s786_s22   ;;  %s925_s18 = smov %s774_s19 }
  0xd3   : > { %p12_p10 = scmp.ge.s32.totalorder %s15_s22, 4   ;;  %s926_s19 = smov %s853_s26 }
  0xd4   : > { %s927_s20 = smov %s782_s21  ;;  %s928_s21 = smov %s930_s23 }
  0xd5   :  { %14 = sbr.rel (!%p12_p10) target bundleno = 3 (0x3), region = 128 }

// kernel: _lambda_.40
= control target key start
LH: loop header
LB: loop body
LE: loop exit
PB: predicated region body
PF: predicated region fallthrough
CT: control target
= control target key end

     0   :  { %s363_s1 = inlined_call_operand.vmem [shape: bf16[256,128], index: 1, kind: input, shape index: {}]   ;;  %s364_s0 = inlined_call_operand.vmem [shape: bf16[8,256], index: 0, kind: input, shape index: {}]   ;;  %s365_s2 = inlined_call_operand.vmem [shape: f32[1,128], index: 2, kind: input, shape index: {}]   ;;  %s366_s3 = inlined_call_operand.vmem [shape: f32[1,128], index: 3, kind: input, shape index: {}]   ;;  %s367_s4 = inlined_call_operand.vmem [shape: bf16[8,128], index: 4, kind: output, shape index: {}]  }
   0x1   :  { %v267_v0 = vld [vmem:[%s363_s1 + $0x38] sm:$0xff]  ;;  %v266_v2 = vld [vmem:[%s363_s1 + $0x30] sm:$0xff]  ;;  %v265_v4 = vld [vmem:[%s363_s1 + $0x28] sm:$0xff] }
   0x2   :  { %v275_v1 = vld [vmem:[%s363_s1 + $0x78] sm:$0xff]  ;;  %153 = vmatpush.bf16.msra.mxu0 %v267_v0  ;;  %v274_v3 = vld [vmem:[%s363_s1 + $0x70] sm:$0xff]  ;;  %v273_v5 = vld [vmem:[%s363_s1 + $0x68] sm:$0xff] }
   0x3   :  { %166 = vmatpush.bf16.msra.mxu1 %v275_v1  ;;  %v264_v6 = vld [vmem:[%s363_s1 + $0x20] sm:$0xff]  ;;  %v263_v8 = vld [vmem:[%s363_s1 + $0x18] sm:$0xff]  ;;  %v262_v10 = vld [vmem:[%s363_s1 + $0x10] sm:$0xff] }
   0x4   :  { %v272_v7 = vld [vmem:[%s363_s1 + $0x60] sm:$0xff]  ;;  %v271_v9 = vld [vmem:[%s363_s1 + $0x58] sm:$0xff]  ;;  %v270_v11 = vld [vmem:[%s363_s1 + $0x50] sm:$0xff] }
   0x5   :  { %v261_v12 = vld [vmem:[%s363_s1 + $0x8] sm:$0xff]  ;;  %v17_v14 = vld [vmem:[%s364_s0] sm:$0xff] }
   0x6   :  { %154 = vmatpush.bf16.msra.mxu0 %v266_v2  ;;  %v269_v13 = vld [vmem:[%s363_s1 + $0x48] sm:$0xff]  ;;  %v51_v15 = vunpack.c.l.b16 %v17_v14  ;;  %v52_v16 = vunpack.c.h.b16 %v17_v14  ;;  %v260_v17 = vld [vmem:[%s363_s1] sm:$0xff] }
   0x7   :  { %167 = vmatpush.bf16.msra.mxu1 %v274_v3  ;;  %v268_v18 = vld [vmem:[%s363_s1 + $0x40] sm:$0xff] }
   0x8   :  { %v53_v19 = vpack.c.b16 %v51_v15, %v51_v15  ;;  %v54_v20 = vpack.c.b16 %v52_v16, %v52_v16  ;;  %v276_v21 = vld [vmem:[%s365_s2] ss:$0 sm:$0xff] }
   0x9   :  { %v277_v25 = vld [vmem:[%s366_s3] ss:$0 sm:$0xff] }
   0xa   :  { %155 = vmatpush.bf16.msra.mxu0 %v265_v4 }
   0xb   :  { %168 = vmatpush.bf16.msra.mxu1 %v273_v5 }
   0xe   :  { %156 = vmatpush.bf16.msra.mxu0 %v264_v6 }
   0xf   :  { %169 = vmatpush.bf16.msra.mxu1 %v272_v7 }
  0x12   :  { %157 = vmatpush.bf16.msra.mxu0 %v263_v8 }
  0x13   :  { %170 = vmatpush.bf16.msra.mxu1 %v271_v9 }
  0x16   :  { %158 = vmatpush.bf16.msra.mxu0 %v262_v10 }
  0x17   :  { %171 = vmatpush.bf16.msra.mxu1 %v270_v11 }
  0x1a   :  { %159 = vmatpush.bf16.msra.mxu0 %v261_v12 }
  0x1b   :  { %172 = vmatpush.bf16.msra.mxu1 %v269_v13 }
  0x1e   :  { %160 = vmatpush.bf16.msra.mxu0 %v260_v17 }
  0x1f   :  { %173 = vmatpush.bf16.msra.mxu1 %v268_v18 }
  0x21   :  { %161 = vmatmul.bf16.vlgmr.msra.gmra.mxu0 %v53_v19 }
  0x22   :  { %174 = vmatmul.bf16.vlgmr.msra.gmra.mxu1 %v54_v20 }
  0x9e   :  { %v162_v22 = vpop.f32.mrf.mxu0 }
  0x9f   :  { %v175_v23 = vpop.f32.mrf.mxu1 }
  0xa0   :  { %v176_v24 = vadd.f32 %v175_v23, %v162_v22 }
  0xa2   :  { %v183_v26 = vmul.f32 %v276_v21, %v176_v24 }
  0xa4   :  { %v188_v27 = vadd.f32 %v277_v25, %v183_v26 }
  0xa6   :  { %v189_v28 = vmax.f32 %v188_v27, 0.0  ;;  %v164_v29 = vpop.f32.mrf.mxu0 }
  0xa7   :  { %v177_v30 = vpop.f32.mrf.mxu1 }
  0xa8   :  { %v190_v31 = vpack.c.bf16 %v189_v28, %v189_v28 }
  0xaa   :  { %191 = vst [vmem:[%s367_s4] sm:$0xf] %v190_v31 }

// kernel: _lambda_.37
= control target key start
LH: loop header
LB: loop body
LE: loop exit
PB: predicated region body
PF: predicated region fallthrough
CT: control target
= control target key end

     0   :  { %s1807_s15 = smov 0   ;;  %s1809_s16 = smov 0   ;;  %s2088_s0 = inlined_call_operand.vmem [shape: bf16[2,18,128], index: 0, kind: input, shape index: {}]   ;;  %s2089_s1 = inlined_call_operand.vmem [shape: bf16[9,128,128], index: 1, kind: input, shape index: {}]   ;;  %s2090_s2 = inlined_call_operand.vmem [shape: f32[1,128], index: 2, kind: input, shape index: {}]   ;;  %s2091_s3 = inlined_call_operand.vmem [shape: f32[1,128], index: 3, kind: input, shape index: {}]   ;;  %s2092_s4 = inlined_call_operand.vmem [shape: bf16[2,8,128], index: 4, kind: output, shape index: {}]  }
   0x1   :  { %s1811_s17 = smov 0  }
   0x2 LB: > { %s26_s18 = sadd.s32 1, %s1776_s16  ;;  %p1203_p0 = scmp.ge.s32.totalorder %s1780_s17, 1  ;;  %s1780_s17 = sphi %s1811_s17, %s14_s17   ;;  %s1776_s16 = sphi %s1809_s16, %s2094_s16   ;;  %s1772_s15 = sphi %s1807_s15, %s2093_s15  }
   0x3   : > { %p28_p1 = scmp.ge.s32.totalorder %s26_s18, 2  ;;  %p201_p2 = scmp.lt.s32.totalorder %s1780_s17, 3 }
   0x5   : > { %s2096_s18 = smov (%p28_p1, %s26_s18), 0  ;;  %p202_p3 = pnand %p1203_p0, %p201_p2 }
   0x6   : > { %p239_p4 = scmp.lt.s32.totalorder (!%p202_p3), %s1772_s15, 1 }
   0x7   : > { %205 = sbr.rel (%p202_p3) target bundleno = 245 (0xf5), region = 36 }
   0xc   : > { %v1659_v0 = vld [vmem:[%s2089_s1 + $0x38] sm:$0xff]  ;;  %v1658_v4 = vld [vmem:[%s2089_s1 + $0x30] sm:$0xff]  ;;  %v1657_v8 = vld [vmem:[%s2089_s1 + $0x28] sm:$0xff]  ;;  %s2098_s15 = smov (!%p239_p4, %s1772_s15), 1 }
   0xd   : > { %v1677_v1 = vld [vmem:[%s2089_s1 + $0xb8] sm:$0xff]  ;;  %326 = vmatpush.bf16.msra.mxu0 %v1659_v0  ;;  %v1676_v5 = vld [vmem:[%s2089_s1 + $0xb0] sm:$0xff]  ;;  %v1675_v9 = vld [vmem:[%s2089_s1 + $0xa8] sm:$0xff]  ;;  %s1731_s29 = smul.u32 12, %s2098_s15  ;;  %s1205_s21 = sshll.u32 %s2098_s15, 2 }
   0xe   : > { %v1686_v2 = vld [vmem:[%s2089_s1 + $0xf8] sm:$0xff]  ;;  %510 = vmatpush.bf16.msra.mxu2 %v1677_v1  ;;  %v1685_v6 = vld [vmem:[%s2089_s1 + $0xf0] sm:$0xff]  ;;  %v1684_v10 = vld [vmem:[%s2089_s1 + $0xe8] sm:$0xff]  ;;  %s260_s24 = scalar_lea.vmem %s2092_s4, %s1205_s21 }
   0xf   : > { %v1668_v3 = vld [vmem:[%s2089_s1 + $0x78] sm:$0xff]  ;;  %600 = vmatpush.bf16.msra.mxu3 %v1686_v2  ;;  %v1667_v7 = vld [vmem:[%s2089_s1 + $0x70] sm:$0xff]  ;;  %v1666_v11 = vld [vmem:[%s2089_s1 + $0x68] sm:$0xff]  ;;  %s1895_s14 = scalar_lea.vmem %s2088_s0, %s1731_s29 }
  0x10   : > { %420 = vmatpush.bf16.msra.mxu1 %v1668_v3  ;;  %v1656_v12 = vld [vmem:[%s2089_s1 + $0x20] sm:$0xff]  ;;  %v1655_v16 = vld [vmem:[%s2089_s1 + $0x18] sm:$0xff]  ;;  %v1654_v20 = vld [vmem:[%s2089_s1 + $0x10] sm:$0xff] }
  0x11   : > { %327 = vmatpush.bf16.msra.mxu0 %v1658_v4  ;;  %v1674_v13 = vld [vmem:[%s2089_s1 + $0xa0] sm:$0xff]  ;;  %v1673_v17 = vld [vmem:[%s2089_s1 + $0x98] sm:$0xff]  ;;  %v1672_v21 = vld [vmem:[%s2089_s1 + $0x90] sm:$0xff] }
  0x12   : > { %511 = vmatpush.bf16.msra.mxu2 %v1676_v5  ;;  %v1683_v14 = vld [vmem:[%s2089_s1 + $0xe0] sm:$0xff]  ;;  %v1682_v18 = vld [vmem:[%s2089_s1 + $0xd8] sm:$0xff]  ;;  %v1681_v23 = vld [vmem:[%s2089_s1 + $0xd0] sm:$0xff] }
  0x13   : > { %601 = vmatpush.bf16.msra.mxu3 %v1685_v6  ;;  %v1665_v15 = vld [vmem:[%s2089_s1 + $0x60] sm:$0xff]  ;;  %v1664_v19 = vld [vmem:[%s2089_s1 + $0x58] sm:$0xff]  ;;  %v1663_v24 = vld [vmem:[%s2089_s1 + $0x50] sm:$0xff] }
  0x14   : > { %421 = vmatpush.bf16.msra.mxu1 %v1667_v7  ;;  %v1256_v22 = vld [vmem:[%s1895_s14] sm:$0xf]  ;;  %v1660_v25 = vld [vmem:[%s1895_s14] sm:$0x10]  ;;  %v1653_v27 = vld [vmem:[%s2089_s1 + $0x8] sm:$0xff] }
  0x15   : > { %328 = vmatpush.bf16.msra.mxu0 %v1657_v8  ;;  %v1257_v26 = vor.u32 %v1660_v25, %v1256_v22  ;;  %v1671_v28 = vld [vmem:[%s2089_s1 + $0x88] sm:$0xff]  ;;  %v1308_v31 = vld [vmem:[%s1895_s14] sm:$0xe]  ;;  %v1669_v32 = vld [vmem:[%s1895_s14] sm:$0x10] }
  0x16   : > { %512 = vmatpush.bf16.msra.mxu2 %v1675_v9  ;;  %v1680_v29 = vld [vmem:[%s2089_s1 + $0xc8] sm:$0xff]  ;;  %v1360_v34 = vld [vmem:[%s1895_s14] sm:$0xc]  ;;  %v1678_v35 = vld [vmem:[%s1895_s14] sm:$0x30]  ;;  %v1309_v38 = vor.u32 %v1669_v32, %v1308_v31 }
  0x17   : > { %602 = vmatpush.bf16.msra.mxu3 %v1684_v10  ;;  %v1662_v30 = vld [vmem:[%s2089_s1 + $0x48] sm:$0xff]  ;;  %v367_v33 = vshll.u32 %v1257_v26, 16  ;;  %v1652_v36 = vld [vmem:[%s2089_s1] sm:$0xff]  ;;  %v1695_v39 = vld [vmem:[%s2089_s1 + $0x138] sm:$0xff]  ;;  %v1361_v43 = vor.u32 %v1678_v35, %v1360_v34  ;;  %v365_v44 = vshrl.u32 %v1257_v26, 16 }
  0x18   : > { %422 = vmatpush.bf16.msra.mxu1 %v1666_v11  ;;  %v1670_v37 = vld [vmem:[%s2089_s1 + $0x80] sm:$0xff]  ;;  %v1712_v40 = vld [vmem:[%s2089_s1 + $0x1b8] sm:$0xff]  ;;  %v460_v48 = vrot.slane %v1309_v38, 1  ;;  %v1694_v49 = vld [vmem:[%s2089_s1 + $0x130] sm:$0xff] }
  0x19   : > { %329 = vmatpush.bf16.msra.mxu0 %v1656_v12  ;;  %v1679_v41 = vld [vmem:[%s2089_s1 + $0xc0] sm:$0xff]  ;;  %v369_v45 = vrot.slane %v367_v33, 1  ;;  %v1721_v46 = vld [vmem:[%s2089_s1 + $0x1f8] sm:$0xff]  ;;  %v1711_v50 = vld [vmem:[%s2089_s1 + $0x1b0] sm:$0xff]  ;;  %v550_v52 = vrot.slane %v1361_v43, 2 }
  0x1a   : > { %513 = vmatpush.bf16.msra.mxu2 %v1674_v13  ;;  %v1661_v42 = vld [vmem:[%s2089_s1 + $0x40] sm:$0xff]  ;;  %v1704_v47 = vld [vmem:[%s2089_s1 + $0x178] sm:$0xff]  ;;  %v1720_v54 = vld [vmem:[%s2089_s1 + $0x1f0] sm:$0xff] }
  0x1b   : > { %603 = vmatpush.bf16.msra.mxu3 %v1683_v14  ;;  %v261_v51 = vld [vmem:[%s1895_s14] sm:$0xf]  ;;  %v370_v53 = vor.u32 %v369_v45, %v365_v44  ;;  %v1703_v55 = vld [vmem:[%s2089_s1 + $0x170] sm:$0xff]  ;;  %v1693_v56 = vld [vmem:[%s2089_s1 + $0x128] sm:$0xff] }
  0x1c   : > { %423 = vmatpush.bf16.msra.mxu1 %v1665_v15  ;;  %v1710_v57 = vld [vmem:[%s2089_s1 + $0x1a8] sm:$0xff]  ;;  %v1692_v60 = vld [vmem:[%s2089_s1 + $0x120] sm:$0xff]  ;;  %v1691_v0 = vld [vmem:[%s2089_s1 + $0x118] sm:$0xff] }
  0x1d   : > { %330 = vmatpush.bf16.msra.mxu0 %v1655_v16  ;;  %v1719_v58 = vld [vmem:[%s2089_s1 + $0x1e8] sm:$0xff]  ;;  %v1709_v61 = vld [vmem:[%s2089_s1 + $0x1a0] sm:$0xff]  ;;  %v1708_v1 = vld [vmem:[%s2089_s1 + $0x198] sm:$0xff] }
  0x1e   : > { %514 = vmatpush.bf16.msra.mxu2 %v1673_v17  ;;  %v1702_v59 = vld [vmem:[%s2089_s1 + $0x168] sm:$0xff]  ;;  %v1718_v62 = vld [vmem:[%s2089_s1 + $0x1e0] sm:$0xff]  ;;  %v1717_v4 = vld [vmem:[%s2089_s1 + $0x1d8] sm:$0xff] }
  0x1f   : > { %604 = vmatpush.bf16.msra.mxu3 %v1682_v18  ;;  %v1701_v63 = vld [vmem:[%s2089_s1 + $0x160] sm:$0xff]  ;;  %v1700_v5 = vld [vmem:[%s2089_s1 + $0x158] sm:$0xff]  ;;  %v1713_v7 = vld [vmem:[%s1895_s14 + $0x4] sm:$0x10] }
  0x20   : > { %424 = vmatpush.bf16.msra.mxu1 %v1664_v19  ;;  %v1412_v2 = vld [vmem:[%s1895_s14] sm:$0xc]  ;;  %v1687_v3 = vld [vmem:[%s1895_s14] sm:$0x70]  ;;  %v1690_v9 = vld [vmem:[%s2089_s1 + $0x110] sm:$0xff] }
  0x21   : > { %331 = vmatpush.bf16.msra.mxu0 %v1654_v20  ;;  %v1564_v6 = vld [vmem:[%s1895_s14 + $0x4] sm:$0xf]  ;;  %v1413_v8 = vor.u32 %v1687_v3, %v1412_v2  ;;  %v1707_v10 = vld [vmem:[%s2089_s1 + $0x190] sm:$0xff]  ;;  %v1689_v16 = vld [vmem:[%s2089_s1 + $0x108] sm:$0xff] }
  0x22   : > { %515 = vmatpush.bf16.msra.mxu2 %v1672_v21  ;;  %v1565_v11 = vor.u32 %v1713_v7, %v1564_v6  ;;  %v1716_v12 = vld [vmem:[%s2089_s1 + $0x1d0] sm:$0xff]  ;;  %v1706_v17 = vld [vmem:[%s2089_s1 + $0x188] sm:$0xff]  ;;  %v1688_v25 = vld [vmem:[%s2089_s1 + $0x100] sm:$0xff] }
  0x23   : > { %605 = vmatpush.bf16.msra.mxu3 %v1681_v23  ;;  %v1699_v13 = vld [vmem:[%s2089_s1 + $0x150] sm:$0xff]  ;;  %v641_v14 = vshrl.u32 %v1413_v8, 16  ;;  %v644_v15 = vshll.u32 %v1413_v8, 16  ;;  %v1715_v19 = vld [vmem:[%s2089_s1 + $0x1c8] sm:$0xff]  ;;  %v1464_v23 = vld [vmem:[%s1895_s14] sm:$0x8] }
  0x24   : > { %425 = vmatpush.bf16.msra.mxu1 %v1663_v24  ;;  %v912_v18 = vshll.u32 %v1565_v11, 16  ;;  %v1698_v20 = vld [vmem:[%s2089_s1 + $0x148] sm:$0xff]  ;;  %v1696_v24 = vld [vmem:[%s1895_s14] sm:$0x70]  ;;  %v1729_v35 = vld [vmem:[%s2089_s1 + $0x230] sm:$0xff] }
  0x25   : > { %332 = vmatpush.bf16.msra.mxu0 %v1653_v27  ;;  %v643_v21 = vrot.slane %v641_v14, 2  ;;  %v646_v22 = vrot.slane %v644_v15, 3  ;;  %v1705_v26 = vld [vmem:[%s2089_s1 + $0x180] sm:$0xff]  ;;  %v1730_v27 = vld [vmem:[%s2089_s1 + $0x238] sm:$0xff]  ;;  %v1465_v32 = vor.u32 %v1696_v24, %v1464_v23  ;;  %v1728_v38 = vld [vmem:[%s2089_s1 + $0x228] sm:$0xff] }
  0x26   : > { %516 = vmatpush.bf16.msra.mxu2 %v1671_v28  ;;  %v910_v28 = vshrl.u32 %v1565_v11, 16  ;;  %v1697_v31 = vld [vmem:[%s2089_s1 + $0x140] sm:$0xff]  ;;  %v1722_v44 = vld [vmem:[%s1895_s14 + $0x4] sm:$0x10] }
  0x27   : > { %606 = vmatpush.bf16.msra.mxu3 %v1680_v29  ;;  %v914_v29 = vrot.slane %v912_v18, 1  ;;  %v647_v33 = vor.u32 %v646_v22, %v643_v21  ;;  %v803_v34 = vld [vmem:[%s1895_s14 + $0x4] sm:$0xf]  ;;  %v1756_v7 = vld [vmem:[%s2090_s2] ss:$0 sm:$0xff] }
  0x28   : > { %426 = vmatpush.bf16.msra.mxu1 %v1662_v30  ;;  %v1714_v30 = vld [vmem:[%s2089_s1 + $0x1c0] sm:$0xff] }
  0x29   : > { %333 = vmatpush.bf16.msra.mxu0 %v1652_v36  ;;  %v915_v36 = vor.u32 %v914_v29, %v910_v28  ;;  %v1616_v43 = vld [vmem:[%s1895_s14 + $0x4] sm:$0xe] }
  0x2a   : > { %517 = vmatpush.bf16.msra.mxu2 %v1670_v37  ;;  %v737_v37 = vrot.slane %v1465_v32, 3  ;;  %v1617_v45 = vor.u32 %v1722_v44, %v1616_v43 }
  0x2b   : > { %607 = vmatpush.bf16.msra.mxu3 %v1679_v41  ;;  %v1725_v41 = vld [vmem:[%s2089_s1 + $0x210] sm:$0xff] }
  0x2c   : > { %427 = vmatpush.bf16.msra.mxu1 %v1661_v42  ;;  %334 = vmatmul.bf16.vlgmr.msra.gmra.mxu0 %v261_v51  ;;  %v1724_v42 = vld [vmem:[%s2089_s1 + $0x208] sm:$0xff] }
  0x2d   : > { %697 = vmatpush.bf16.msrb.mxu0 %v1695_v39  ;;  %518 = vmatmul.bf16.vlgmr.msra.gmra.mxu2 %v460_v48  ;;  %v1727_v39 = vld [vmem:[%s2089_s1 + $0x220] sm:$0xff] }
  0x2e   : > { %869 = vmatpush.bf16.msrb.mxu2 %v1712_v40  ;;  %608 = vmatmul.bf16.vlgmr.msra.gmra.mxu3 %v550_v52  ;;  %v1726_v40 = vld [vmem:[%s2089_s1 + $0x218] sm:$0xff] }
  0x2f   : > { %965 = vmatpush.bf16.msrb.mxu3 %v1721_v46  ;;  %428 = vmatmul.bf16.vlgmr.msra.gmra.mxu1 %v370_v53  ;;  %v1723_v46 = vld [vmem:[%s2089_s1 + $0x200] sm:$0xff] }
  0x30   : > { %787 = vmatpush.bf16.msrb.mxu1 %v1704_v47  ;;  %v1005_v47 = vrot.slane %v1617_v45, 1 }
  0x31   : > { %698 = vmatpush.bf16.msrb.mxu0 %v1694_v49 }
  0x32   : > { %870 = vmatpush.bf16.msrb.mxu2 %v1711_v50 }
  0x33   : > { %966 = vmatpush.bf16.msrb.mxu3 %v1720_v54 }
  0x34   : > { %788 = vmatpush.bf16.msrb.mxu1 %v1703_v55 }
  0x35   : > { %699 = vmatpush.bf16.msrb.mxu0 %v1693_v56 }
  0x36   : > { %871 = vmatpush.bf16.msrb.mxu2 %v1710_v57 }
  0x37   : > { %967 = vmatpush.bf16.msrb.mxu3 %v1719_v58 }
  0x38   : > { %789 = vmatpush.bf16.msrb.mxu1 %v1702_v59 }
  0x39   : > { %700 = vmatpush.bf16.msrb.mxu0 %v1692_v60 }
  0x3a   : > { %872 = vmatpush.bf16.msrb.mxu2 %v1709_v61 }
  0x3b   : > { %968 = vmatpush.bf16.msrb.mxu3 %v1718_v62 }
  0x3c   : > { %790 = vmatpush.bf16.msrb.mxu1 %v1701_v63 }
  0x3d   : > { %701 = vmatpush.bf16.msrb.mxu0 %v1691_v0 }
  0x3e   : > { %873 = vmatpush.bf16.msrb.mxu2 %v1708_v1 }
  0x3f   : > { %969 = vmatpush.bf16.msrb.mxu3 %v1717_v4 }
  0x40   : > { %791 = vmatpush.bf16.msrb.mxu1 %v1700_v5 }
  0x41   : > { %702 = vmatpush.bf16.msrb.mxu0 %v1690_v9 }
  0x42   : > { %874 = vmatpush.bf16.msrb.mxu2 %v1707_v10  ;;  %v1757_v10 = vld [vmem:[%s2091_s3] ss:$0 sm:$0xff] }
  0x43   : > { %970 = vmatpush.bf16.msrb.mxu3 %v1716_v12 }
  0x44   : > { %792 = vmatpush.bf16.msrb.mxu1 %v1699_v13 }
  0x45   : > { %703 = vmatpush.bf16.msrb.mxu0 %v1689_v16 }
  0x46   : > { %875 = vmatpush.bf16.msrb.mxu2 %v1706_v17 }
  0x47   : > { %971 = vmatpush.bf16.msrb.mxu3 %v1715_v19 }
  0x48   : > { %793 = vmatpush.bf16.msrb.mxu1 %v1698_v20 }
  0x49   : > { %704 = vmatpush.bf16.msrb.mxu0 %v1688_v25 }
  0x4a   : > { %876 = vmatpush.bf16.msrb.mxu2 %v1705_v26 }
  0x4b   : > { %972 = vmatpush.bf16.msrb.mxu3 %v1714_v30 }
  0x4c   : > { %794 = vmatpush.bf16.msrb.mxu1 %v1697_v31  ;;  %705 = vmatmul.bf16.vlgmr.msrb.gmra.mxu0 %v647_v33 }
  0x4d   : > { %1055 = vmatpush.bf16.msra.mxu0 %v1730_v27  ;;  %877 = vmatmul.bf16.vlgmr.msrb.gmra.mxu2 %v803_v34 }
  0x4e   : > { %973 = vmatmul.bf16.vlgmr.msrb.gmra.mxu3 %v915_v36 }
  0x4f   : > { %795 = vmatmul.bf16.vlgmr.msrb.gmra.mxu1 %v737_v37 }
  0x51   : > { %1056 = vmatpush.bf16.msra.mxu0 %v1729_v35 }
  0x55   : > { %1057 = vmatpush.bf16.msra.mxu0 %v1728_v38 }
  0x59   : > { %1058 = vmatpush.bf16.msra.mxu0 %v1727_v39 }
  0x5d   : > { %1059 = vmatpush.bf16.msra.mxu0 %v1726_v40 }
  0x61   : > { %1060 = vmatpush.bf16.msra.mxu0 %v1725_v41 }
  0x65   : > { %1061 = vmatpush.bf16.msra.mxu0 %v1724_v42 }
  0x69   : > { %1062 = vmatpush.bf16.msra.mxu0 %v1723_v46 }
  0x6c   : > { %1063 = vmatmul.bf16.vlgmr.msra.gmra.mxu0 %v1005_v47 }
  0xa9   : > { %v335_v48 = vpop.f32.mrf.mxu0 }
  0xac   : > { %v429_v49 = vpop.f32.mrf.mxu1 }
  0xad   : > { %v434_v58 = vadd.f32 %v429_v49, %v335_v48 }
  0xb0   : > { %v519_v50 = vpop.f32.mrf.mxu2 }
  0xb1   : > { %v609_v51 = vpop.f32.mrf.mxu3  ;;  %v337_v52 = vpop.f32.mrf.mxu0  ;;  %v524_v60 = vadd.f32 %v519_v50, %v434_v58 }
  0xb3   : > { %v614_v0 = vadd.f32 %v609_v51, %v524_v60 }
  0xb4   : > { %v431_v53 = vpop.f32.mrf.mxu1 }
  0xb8   : > { %v521_v54 = vpop.f32.mrf.mxu2 }
  0xb9   : > { %v611_v55 = vpop.f32.mrf.mxu3 }
  0xc9   : > { %v706_v56 = vpop.f32.mrf.mxu0 }
  0xca   : > { %v711_v2 = vadd.f32 %v706_v56, %v614_v0 }
  0xcc   : > { %v796_v57 = vpop.f32.mrf.mxu1 }
  0xcd   : > { %v801_v4 = vadd.f32 %v796_v57, %v711_v2 }
  0xd0   : > { %v878_v59 = vpop.f32.mrf.mxu2 }
  0xd1   : > { %v974_v61 = vpop.f32.mrf.mxu3  ;;  %v708_v62 = vpop.f32.mrf.mxu0  ;;  %v883_v5 = vadd.f32 %v878_v59, %v801_v4 }
  0xd3   : > { %v979_v6 = vadd.f32 %v974_v61, %v883_v5 }
  0xd4   : > { %v798_v63 = vpop.f32.mrf.mxu1 }
  0xd8   : > { %v880_v1 = vpop.f32.mrf.mxu2 }
  0xd9   : > { %v976_v3 = vpop.f32.mrf.mxu3 }
  0xe9   : > { %v1064_v8 = vpop.f32.mrf.mxu0 }
  0xea   : > { %v1069_v9 = vadd.f32 %v1064_v8, %v979_v6 }
  0xec   : > { %v1076_v11 = vmul.f32 %v1756_v7, %v1069_v9 }
  0xee   : > { %v1081_v12 = vadd.f32 %v1757_v10, %v1076_v11 }
  0xf0   : > { %v1082_v13 = vmax.f32 %v1081_v12, 0.0 }
  0xf1   : > { %v1066_v14 = vpop.f32.mrf.mxu0 }
  0xf2   : > { %v1083_v15 = vpack.c.bf16 %v1082_v13, %v1082_v13 }
  0xf4   : > { %1084 = vst [vmem:[%s260_s24] sm:$0xf] %v1083_v15 }
  0xf5 PF: > { %s14_s17 = sadd.s32 1, %s1780_s17   ;;  %s2093_s15 = smov %s1776_s16 }
  0xf6   : > { %p11_p5 = scmp.ge.s32.totalorder %s14_s17, 4   ;;  %s2094_s16 = smov %s2096_s18 }
  0xf8   :  { %13 = sbr.rel (!%p11_p5) target bundleno = 2 (0x2), region = 83 }

// kernel: _lambda_.44
= control target key start
LH: loop header
LB: loop body
LE: loop exit
PB: predicated region body
PF: predicated region fallthrough
CT: control target
= control target key end

     0   :  { %s307_s6 = smov 0   ;;  %s309_s7 = smov 0   ;;  %s361_s0 = inlined_call_operand.vmem [shape: bf16[2,4,256], index: 0, kind: input, shape index: {}]   ;;  %s362_s1 = inlined_call_operand.vmem [shape: f32[2,256], index: 1, kind: output, shape index: {}]  }
   0x1   :  { %s311_s8 = smov 0  }
   0x2 LB: > { %s238_s9 = sadd.s32 4294967295, %s295_s8   ;;  %s324_s10 = sadd.s32 1, %s295_s8   ;;  %s295_s8 = sphi %s311_s8, %s365_s8   ;;  %s291_s7 = sphi %s309_s7, %s364_s7   ;;  %s287_s6 = sphi %s307_s6, %s363_s6  }
   0x3   : > { %s15_s11 = ssub.s32 %s295_s8, %s324_s10  ;;  %s18_s12 = sadd.s32 1, %s291_s7 }
   0x4   : > { %p16_p0 = scmp.eq.s32.totalorder %s15_s11, 0  ;;  %p25_p1 = scmp.ne.s32.totalorder %s291_s7, %s287_s6 }
   0x5   : > { %p26_p2 = scmp.eq.s32.totalorder %s295_s8, 0  ;;  %p241_p4 = scmp.ge.s32.totalorder %s295_s8, 2 }
   0x6   : > { %s333_s13 = scalar_select %p16_p0, %s291_s7, %s18_s12  }
   0x7   : > { %p27_p3 = por %p26_p2, %p25_p1  ;;  %77 = sbr.rel (%p241_p4) target bundleno = 18 (0x12), region = 16 }
   0xc   : > { %80 = sbr.rel (!%p27_p3) target bundleno = 18 (0x12), region = 20  ;;  %s82_s14 = sand.u32 (%p27_p3), 1, %s291_s7  }
   0xd   : > { %s243_s15 = sshll.u32 (%p27_p3), %s295_s8, 1  ;;  %s242_s16 = sshll.u32 (%p27_p3), %s82_s14, 2 }
   0xe   : > { %s86_s19 = scalar_lea.vmem (%p27_p3), %s361_s0, %s243_s15  ;;  %s84_s20 = scalar_lea.vmem (%p27_p3), [#allocation2], %s242_s16 }
   0xf   : > { %v103_v0 = vld [vmem:[%s86_s19] sm:$0x3] (%p27_p3)  ;;  %v105_v1 = vld [vmem:[%s86_s19 + $0x4] sm:$0x3] (%p27_p3) }
  0x10   : > { %104 = vst [vmem:[%s84_s20] sm:$0x3] (%p27_p3), %v103_v0 }
  0x11   : > { %106 = vst [vmem:[%s84_s20 + $0x2] sm:$0x3] %v105_v1 }
  0x12 PF: > { %p244_p5 = scmp.ge.s32.totalorder %s295_s8, 1  ;;  %p125_p6 = scmp.lt.s32.totalorder %s295_s8, 3 }
  0x14   : > { %p126_p7 = pnand %p244_p5, %p125_p6 }
  0x15   : > { %s132_s21 = sand.u32 (!%p126_p7), 1, %s287_s6   ;;  %p150_p8 = scmp.lt.s32.totalorder (!%p126_p7), %s238_s9, 1 }
  0x16   : > { %129 = sbr.rel (%p126_p7) target bundleno = 45 (0x2d), region = 54  ;;  %s245_s22 = sshll.u32 (!%p126_p7), %s132_s21, 2 }
  0x17   : > { %s134_s23 = scalar_lea.vmem (!%p126_p7), [#allocation2], %s245_s22 }
  0x1b   : > { %v154_v2 = vld [vmem:[%s134_s23] sm:$0x3]  ;;  %v155_v3 = vld [vmem:[%s134_s23 + $0x2] sm:$0x3]  ;;  %vm158_vm0 = vcmask 1043456   ;;  %s367_s9 = smov (!%p150_p8, %s238_s9), 1 }
  0x1c   : > { %v156_v4 = vunpack.c.l.bf16 %v154_v2  ;;  %v157_v5 = vunpack.c.l.bf16 %v155_v3  ;;  %s246_s24 = sshll.u32 %s367_s9, 1  ;;  %vm175_vm1 = vcmask 1041409  }
  0x1d   : > { %s153_s27 = scalar_lea.vmem %s362_s1, %s246_s24 }
  0x1e   : > { %v159_v6 = vsel %vm158_vm0, %v156_v4, -inf  ;;  %v166_v7 = vsel %vm158_vm0, %v157_v5, -inf }
  0x1f   : > { %v160_v8 = vrot.slane %v159_v6, 4  ;;  %v167_v9 = vrot.slane %v166_v7, 4 }
  0x21   : > { %v161_v10 = vmax.f32 %v159_v6, %v160_v8  ;;  %v168_v11 = vmax.f32 %v166_v7, %v167_v9 }
  0x23   : > { %v162_v12 = vrot.slane %v161_v10, 2  ;;  %v169_v13 = vrot.slane %v168_v11, 2 }
  0x25   : > { %v163_v14 = vmax.f32 %v161_v10, %v162_v12  ;;  %v170_v15 = vmax.f32 %v168_v11, %v169_v13 }
  0x27   : > { %v164_v16 = vrot.slane %v163_v14, 1  ;;  %v171_v17 = vrot.slane %v170_v15, 1 }
  0x29   : > { %v165_v18 = vmax.f32 %v163_v14, %v164_v16  ;;  %v172_v19 = vmax.f32 %v170_v15, %v171_v17 }
  0x2b   : > { %v176_v20 = vsel %vm175_vm1, %v172_v19, %v165_v18 }
  0x2c   : > { %178 = vst [vmem:[%s153_s27] sm:$0x3] %v176_v20 }
  0x2d PF: > { %p8_p9 = scmp.ge.s32.totalorder %s324_s10, 4   ;;  %s363_s6 = smov %s291_s7 }
  0x2e   : > { %s364_s7 = smov %s333_s13  ;;  %s365_s8 = smov %s324_s10 }
  0x2f   :  { %10 = sbr.rel (!%p8_p9) target bundleno = 2 (0x2), region = 93 }

// kernel: _lambda_.43
= control target key start
LH: loop header
LB: loop body
LE: loop exit
PB: predicated region body
PF: predicated region fallthrough
CT: control target
= control target key end

     0   :  { %s320_s6 = smov 0   ;;  %s322_s7 = smov 0   ;;  %s374_s0 = inlined_call_operand.vmem [shape: bf16[2,4,256], index: 0, kind: input, shape index: {}]   ;;  %s375_s1 = inlined_call_operand.vmem [shape: f32[2,256], index: 1, kind: output, shape index: {}]  }
   0x1   :  { %s324_s8 = smov 0  }
   0x2 LB: > { %s247_s9 = sadd.s32 4294967295, %s307_s8   ;;  %s337_s10 = sadd.s32 1, %s307_s8   ;;  %s307_s8 = sphi %s324_s8, %s378_s8   ;;  %s303_s7 = sphi %s322_s7, %s377_s7   ;;  %s299_s6 = sphi %s320_s6, %s376_s6  }
   0x3   : > { %s15_s11 = ssub.s32 %s307_s8, %s337_s10  ;;  %s18_s12 = sadd.s32 1, %s303_s7 }
   0x4   : > { %p16_p0 = scmp.eq.s32.totalorder %s15_s11, 0  ;;  %p25_p1 = scmp.ne.s32.totalorder %s303_s7, %s299_s6 }
   0x5   : > { %p26_p2 = scmp.eq.s32.totalorder %s307_s8, 0  ;;  %p250_p4 = scmp.ge.s32.totalorder %s307_s8, 2 }
   0x6   : > { %s346_s13 = scalar_select %p16_p0, %s303_s7, %s18_s12  }
   0x7   : > { %p27_p3 = por %p26_p2, %p25_p1  ;;  %77 = sbr.rel (%p250_p4) target bundleno = 18 (0x12), region = 16 }
   0xc   : > { %80 = sbr.rel (!%p27_p3) target bundleno = 18 (0x12), region = 20  ;;  %s82_s14 = sand.u32 (%p27_p3), 1, %s303_s7  }
   0xd   : > { %s252_s15 = sshll.u32 (%p27_p3), %s307_s8, 1  ;;  %s251_s16 = sshll.u32 (%p27_p3), %s82_s14, 2 }
   0xe   : > { %s86_s19 = scalar_lea.vmem (%p27_p3), %s374_s0, %s252_s15  ;;  %s84_s20 = scalar_lea.vmem (%p27_p3), [#allocation2], %s251_s16 }
   0xf   : > { %v103_v0 = vld [vmem:[%s86_s19] sm:$0x3] (%p27_p3)  ;;  %v105_v1 = vld [vmem:[%s86_s19 + $0x4] sm:$0x3] (%p27_p3) }
  0x10   : > { %104 = vst [vmem:[%s84_s20] sm:$0x3] (%p27_p3), %v103_v0 }
  0x11   : > { %106 = vst [vmem:[%s84_s20 + $0x2] sm:$0x3] %v105_v1 }
  0x12 PF: > { %p253_p5 = scmp.ge.s32.totalorder %s307_s8, 1  ;;  %p125_p6 = scmp.lt.s32.totalorder %s307_s8, 3 }
  0x14   : > { %p126_p7 = pnand %p253_p5, %p125_p6 }
  0x15   : > { %s132_s21 = sand.u32 (!%p126_p7), 1, %s299_s6   ;;  %p150_p8 = scmp.lt.s32.totalorder (!%p126_p7), %s247_s9, 1 }
  0x16   : > { %129 = sbr.rel (%p126_p7) target bundleno = 48 (0x30), region = 54  ;;  %s254_s22 = sshll.u32 (!%p126_p7), %s132_s21, 2 }
  0x17   : > { %s134_s23 = scalar_lea.vmem (!%p126_p7), [#allocation2], %s254_s22 }
  0x1b   : > { %v309_v2 = vmov 4.0   ;;  %v154_v3 = vld [vmem:[%s134_s23] sm:$0x3]  ;;  %v155_v4 = vld [vmem:[%s134_s23 + $0x2] sm:$0x3]  ;;  %vm158_vm0 = vcmask 1043456  }
  0x1c   : > { %283 = vrcp.f32 %v309_v2  ;;  %v156_v5 = vunpack.c.l.bf16 %v154_v3  ;;  %v157_v6 = vunpack.c.l.bf16 %v155_v4  ;;  %s380_s9 = smov (!%p150_p8, %s247_s9), 1  ;;  %vm184_vm2 = vcmask 1041409  }
  0x1d   : > { %s255_s24 = sshll.u32 %s380_s9, 1 }
  0x1e   : > { %v159_v7 = vsel %vm158_vm0, %v156_v5, 0.0  ;;  %v166_v8 = vsel %vm158_vm0, %v157_v6, 0.0  ;;  %s153_s27 = scalar_lea.vmem %s375_s1, %s255_s24 }
  0x1f   : > { %v160_v10 = vrot.slane %v159_v7, 4  ;;  %v167_v11 = vrot.slane %v166_v8, 4 }
  0x21   : > { %v161_v13 = vadd.f32 %v160_v10, %v159_v7  ;;  %v168_v14 = vadd.f32 %v167_v11, %v166_v8 }
  0x22   : > { %v284_v9 = vpop.eup %283 }
  0x23   : > { %v174_v12 = vmul.f32 4.0, %v284_v9  ;;  %v162_v16 = vrot.slane %v161_v13, 2  ;;  %v169_v17 = vrot.slane %v168_v14, 2  ;;  %vm178_vm1 = vweird.f32 %v284_v9 }
  0x25   : > { %v175_v15 = vsub.f32 1.0, %v174_v12  ;;  %v163_v19 = vadd.f32 %v162_v16, %v161_v13  ;;  %v170_v20 = vadd.f32 %v169_v17, %v168_v14 }
  0x27   : > { %v176_v18 = vmul.f32 %v284_v9, %v175_v15  ;;  %v164_v22 = vrot.slane %v163_v19, 1  ;;  %v171_v23 = vrot.slane %v170_v20, 1 }
  0x29   : > { %v177_v21 = vadd.f32 %v284_v9, %v176_v18  ;;  %v165_v25 = vadd.f32 %v164_v22, %v163_v19  ;;  %v172_v26 = vadd.f32 %v171_v23, %v170_v20 }
  0x2b   : > { %v179_v24 = vsel %vm178_vm1, %v284_v9, %v177_v21 }
  0x2c   : > { %v180_v27 = vmul.f32 %v179_v24, %v165_v25  ;;  %v181_v28 = vmul.f32 %v179_v24, %v172_v26 }
  0x2e   : > { %v185_v29 = vsel %vm184_vm2, %v181_v28, %v180_v27 }
  0x2f   : > { %187 = vst [vmem:[%s153_s27] sm:$0x3] %v185_v29 }
  0x30 PF: > { %p8_p9 = scmp.ge.s32.totalorder %s337_s10, 4   ;;  %s376_s6 = smov %s303_s7 }
  0x31   : > { %s377_s7 = smov %s346_s13  ;;  %s378_s8 = smov %s337_s10 }
  0x32   :  { %10 = sbr.rel (!%p8_p9) target bundleno = 2 (0x2), region = 93 }

// kernel: _lambda_.45
= control target key start
LH: loop header
LB: loop body
LE: loop exit
PB: predicated region body
PF: predicated region fallthrough
CT: control target
= control target key end

     0   :  { %vm30_vm0 = vcmask 1041408   ;;  %s236_s0 = inlined_call_operand.vmem [shape: f32[2,256], index: 0, kind: input, shape index: {}]   ;;  %s237_s1 = inlined_call_operand.vmem [shape: f32[2,256], index: 1, kind: input, shape index: {}]   ;;  %s238_s2 = inlined_call_operand.vmem [shape: f32[1,256], index: 2, kind: input, shape index: {}, may-alias: {2,4}]   ;;  %s239_s3 = inlined_call_operand.vmem [shape: f32[1,256], index: 3, kind: input, shape index: {}, may-alias: {3,5}]   ;;  %s240_s4 = inlined_call_operand.vmem [shape: f32[1,256], index: 4, kind: input, shape index: {}, may-alias: {2,4}]   ;;  %s241_s5 = inlined_call_operand.vmem [shape: f32[1,256], index: 5, kind: input, shape index: {}, may-alias: {3,5}]   ;;  %s242_s6 = inlined_call_operand.hbm [shape: f32[2,512], index: 6, kind: output, shape index: {}]  }
   0x1   :  { %v25_v0 = vld [vmem:[%s238_s2] sm:$0x3] }
   0x2   :  { %v24_v1 = vld [vmem:[%s236_s0] sm:$0xf]  ;;  %v27_v2 = vperm.slane %v25_v0, 0  ;;  %v28_v3 = vperm.slane %v25_v0, 1 }
   0x3   :  { %v34_v4 = vld [vmem:[%s239_s3] sm:$0x3] }
   0x4   :  { %v36_v5 = vperm.slane %v34_v4, 0  ;;  %v37_v6 = vperm.slane %v34_v4, 1  ;;  %v43_v7 = vld [vmem:[%s240_s4] sm:$0x3]  ;;  %v29_v9 = vrot.slane %v28_v3, 6 }
   0x5   :  { %v51_v8 = vld [vmem:[%s241_s5] sm:$0x3]  ;;  %v45_v10 = vperm.slane %v43_v7, 0  ;;  %v46_v11 = vperm.slane %v43_v7, 1 }
   0x6   :  { %11 = vsyncpa [#allocation3], 0  ;;  %v38_v12 = vrot.slane %v37_v6, 6  ;;  %v54_v13 = vperm.slane %v51_v8, 1  ;;  %v31_v14 = vsel %vm30_vm0, %v27_v2, %v29_v9  ;;  %v42_v15 = vld [vmem:[%s237_s1] sm:$0xf] }
   0x7   :  { %v47_v16 = vrot.slane %v46_v11, 6  ;;  %v53_v17 = vperm.slane %v51_v8, 0  ;;  %v33_v18 = vmul.f32 %v31_v14, %v24_v1  ;;  %v170_v55 = vmov 269488144   ;;  %s171_s1 = smov [#allocation2]   ;;  %s129_s7 = sshll.u32 %s242_s6, 4  ;;  %s130_s7 = int_to_ptr.hbm [resolvable:$true] %s129_s7 }
   0x8   :  { %v39_v19 = vsel %vm30_vm0, %v36_v5, %v38_v12  ;;  %v55_v20 = vrot.slane %v54_v13, 6  ;;  %v114_v56 = vunpack.c.l.s4 %v170_v55  ;;  %s127_s3 = sshll.u32 %s171_s1, 4  ;;  %s128_s3 = int_to_ptr.vmem [resolvable:$true] %s127_s3 }
   0x9   :  { %v48_v21 = vsel %vm30_vm0, %v45_v10, %v47_v16  ;;  %v41_v22 = vadd.f32 %v39_v19, %v33_v18 }
   0xa   :  { %v50_v23 = vmul.f32 %v48_v21, %v42_v15  ;;  %v56_v24 = vsel %vm30_vm0, %v53_v17, %v55_v20  ;;  %v115_v61 = vunpack.c.0.s8 %v114_v56 }
   0xb   :  { %v59_v25 = vmul.f32 %v41_v22, %v41_v22 }
   0xc   :  { %v58_v26 = vadd.f32 %v56_v24, %v50_v23 }
   0xd   :  { %61 = vst [vmem:[#allocation1] ss:$4 sm:$0xff] %v59_v25 }
   0xe   :  { %v71_v27 = vmul.f32 %v58_v26, %v58_v26 }
  0x14   :  { %v62_v28 = vld.sshfl [vmem:[#allocation1] sm:$0xff pattern:$0x73625140]  ;;  %v63_v29 = vld.sshfl [vmem:[#allocation1 + $0x8] sm:$0xff pattern:$0x73625140] }
  0x15   :  { %v66_v30 = vsel %vm30_vm0, %v62_v28, 0.0  ;;  %v67_v31 = vsel %vm30_vm0, %v63_v29, 0.0  ;;  %73 = vst [vmem:[#allocation1] ss:$4 sm:$0xff] %v71_v27 }
  0x16   :  { %v68_v32 = vadd.f32 %v67_v31, %v66_v30 }
  0x18   :  { %69 = vadd.xlane.f32.xlu0 %v68_v32 }
  0x1c   :  { %v74_v33 = vld.sshfl [vmem:[#allocation1] sm:$0xff pattern:$0x73625140]  ;;  %v75_v34 = vld.sshfl [vmem:[#allocation1 + $0x8] sm:$0xff pattern:$0x73625140] }
  0x1d   :  { %v78_v35 = vsel %vm30_vm0, %v74_v33, 0.0  ;;  %v79_v36 = vsel %vm30_vm0, %v75_v34, 0.0 }
  0x1e   :  { %v80_v37 = vadd.f32 %v79_v36, %v78_v35 }
  0x20   :  { %81 = vadd.xlane.f32.xlu0 %v80_v37 }
  0x8b   :  { %v70_v38 = vpop.xlane.xlu0 %69 }
  0x93   :  { %v82_v39 = vpop.xlane.xlu0 %81 }
  0x94   :  { %v83_v40 = vadd.f32 %v82_v39, %v70_v38 }
  0x96   :  { %140 = vrsqrt.f32 %v83_v40  ;;  %vm91_vm1 = vcmp.eq.f32.partialorder %v83_v40, inf  ;;  %v94_v48 = vand.u32 2147483648, %v83_v40  ;;  %vm93_vm2 = vcmp.eq.f32.partialorder %v83_v40, 0.0 }
  0x9c   :  { %v141_v41 = vpop.eup %140 }
  0x9d   :  { %v85_v42 = vmul.f32 %v141_v41, %v83_v40 }
  0x9f   :  { %v86_v43 = vmul.f32 %v141_v41, %v85_v42 }
  0xa1   :  { %v87_v44 = vmul.f32 0.5, %v86_v43 }
  0xa3   :  { %v88_v45 = vsub.f32 1.5, %v87_v44 }
  0xa5   :  { %v89_v46 = vmul.f32 %v141_v41, %v88_v45 }
  0xa7   :  { %v90_v47 = vmul.f32 %v89_v46, %v83_v40 }
  0xa9   :  { %v92_v49 = vsel %vm91_vm1, %v83_v40, %v90_v47 }
  0xaa   :  { %v95_v50 = vsel %vm93_vm2, %v94_v48, %v92_v49 }
  0xab   :  { %v96_v51 = vmax.f32 %v95_v50, 1e-12 }
  0xad   :  { %142 = vrcp.f32 %v96_v51  ;;  %v108_v57 = vand.u32 2147483648, %v96_v51  ;;  %v106_v59 = vand.u32 2147483647, %v96_v51  ;;  %vm102_vm4 = vweird.f32 %v96_v51 }
  0xaf   :  { %v109_v62 = vor.u32 1.1754944e-38, %v108_v57  ;;  %vm107_vm6 = vcmp.eq.f32.partialorder %v106_v59, 8.507059e+37 }
  0xb3   :  { %v143_v52 = vpop.eup %142 }
  0xb4   :  { %v98_v53 = vmul.f32 %v143_v52, %v96_v51  ;;  %vm103_vm3 = vweird.f32 %v143_v52 }
  0xb5   :  { %vm104_vm5 = vmor %vm102_vm4, %vm103_vm3 }
  0xb6   :  { %v99_v54 = vsub.f32 1.0, %v98_v53 }
  0xb8   :  { %v100_v58 = vmul.f32 %v143_v52, %v99_v54 }
  0xba   :  { %v101_v60 = vadd.f32 %v143_v52, %v100_v58 }
  0xbc   :  { %v105_v63 = vsel %vm104_vm5, %v143_v52, %v101_v60 }
  0xbd   :  { %v110_v0 = vsel %vm107_vm6, %v109_v62, %v105_v63 }
  0xbe   :  { %v116_v1 = vperm.slane %v110_v0, %v115_v61 }
  0xc0   :  { %v118_v2 = vmul.f32 %v116_v1, %v41_v22  ;;  %v120_v3 = vmul.f32 %v116_v1, %v58_v26 }
  0xc2   :  { %119 = vst [vmem:[#allocation2] sm:$0xf] %v118_v2 }
  0xc3   :  { %121 = vst [vmem:[#allocation2 + $0x4] sm:$0xf] %v120_v3 }
  0xc4   :  { %132 = dma.vmem_to_hbm [thread:$0]  %s128_s3, 128, %s130_s7, [#allocation3]  }
  0xc5   :  { %168 = dma.done.wait [#allocation3], 128  }
  0xc6   :  { %169 = vsyncadd [#allocation3], 4294967168 }
  0xc7   :  { %137 = vsyncpa [#allocation3], 1 }

</bundles_post_ra>
